<compile_context>
chip_gen: v6e
topology: v6e:2x2x1
jax: 0.10.0
libtpu: 0.0.40
codegen_flags: <defaults>
</compile_context>

<pallas_src>
import jax
import jax.numpy as jnp
from jax import lax
from jax.experimental import pallas as pl
from jax.experimental.pallas import tpu as pltpu

C_OUT = 256
EPS = 1e-5  # nn.BatchNorm2d default


def _bn_scale_shift(acc, gamma, beta, inv_cnt):
    """Training-mode BN folded to a per-channel scale/shift (one stats sweep)."""
    s1 = jnp.sum(acc, axis=0, keepdims=True)
    s2 = jnp.sum(acc * acc, axis=0, keepdims=True)
    mean = s1 * inv_cnt
    var = s2 * inv_cnt - mean * mean          # biased variance, E[x^2]-E[x]^2
    scale = gamma * lax.rsqrt(var + EPS)
    shift = beta - mean * scale
    return scale, shift


def residual_block_kernel(xpad_ref, res_ref, w1_ref, g1_ref, be1_ref,
                          w2_ref, g2_ref, be2_ref, out_ref,
                          im2col_ref, pad2_ref):
    HP, N, WP, C = xpad_ref.shape             # (H+2, N, W+2, C_in)
    H, W = HP - 2, WP - 2
    NW = N * W
    rows = N * H * W                          # row order: (h, n, w)
    inv_cnt = 1.0 / rows

    def build_im2col(src):
        """src: (HP, N, WP, c) f32 padded activations -> im2col_ref (rows, 9c) bf16."""
        c = src.shape[-1]
        for dx in range(3):
            # one sublane-offset slice per dx; the reshape is layout-free
            # because W % 8 == 0 (f32 sublane tile).
            slab = src[:, :, dx:dx + W, :].reshape(HP * NW, c)
            for dy in range(3):
                tap = dy * 3 + dx
                # row offset dy*NW is sublane-aligned -> free view; cast fuses
                # into the lane-aligned column store.
                im2col_ref[:, tap * c:(tap + 1) * c] = (
                    slab[dy * NW:dy * NW + rows, :].astype(jnp.bfloat16))

    # ---- conv1: im2col + single bf16 MXU dot (f32 accumulate) ----
    build_im2col(xpad_ref[...])
    acc1 = jnp.dot(im2col_ref[...], w1_ref[...],
                   preferred_element_type=jnp.float32)

    # ---- bn1 (training-mode batch stats) + ReLU ----
    scale1, shift1 = _bn_scale_shift(acc1, g1_ref[...], be1_ref[...], inv_cnt)
    h = jnp.maximum(acc1 * scale1 + shift1, 0.0)

    # ---- conv2 input: write interior once, zero only the 1-px halo ----
    zrow = jnp.zeros((1, N, WP, C), jnp.float32)
    pad2_ref[0:1, :, :, :] = zrow
    pad2_ref[HP - 1:HP, :, :, :] = zrow
    zcol = jnp.zeros((HP, N, 1, C), jnp.float32)
    pad2_ref[:, :, 0:1, :] = zcol
    pad2_ref[:, :, WP - 1:WP, :] = zcol
    pad2_ref[1:1 + H, :, 1:1 + W, :] = h.reshape(H, N, W, C)

    # ---- conv2: im2col (scratch reused) + single bf16 MXU dot ----
    build_im2col(pad2_ref[...])
    acc2 = jnp.dot(im2col_ref[...], w2_ref[...],
                   preferred_element_type=jnp.float32)

    # ---- bn2 + residual add + ReLU ----
    scale2, shift2 = _bn_scale_shift(acc2, g2_ref[...], be2_ref[...], inv_cnt)
    out_ref[...] = jnp.maximum(acc2 * scale2 + shift2 + res_ref[...], 0.0)


def residual_block_forward(x_nchw, params):
    """x_nchw: (N, C_in, H, W) float32; C_in must equal 256 (residual add)."""
    w1, b1, g1, be1, w2, b2, g2, be2 = params
    # b1/b2 (conv biases) intentionally unused: they cancel exactly under
    # training-mode BatchNorm (batch mean absorbs the constant shift).
    del b1, b2
    N, C_in, H, W = x_nchw.shape
    assert C_in == C_OUT, "out += residual requires in_channels == 256"
    rows = N * H * W

    # (H, N, W, C): W(+2) on the sublane axis, C on lanes.  With W % 8 == 0 and
    # (N*W) % 8 == 0 the in-kernel reshapes / per-dy row views are layout-free.
    x_hnwc = jnp.transpose(x_nchw, (2, 0, 3, 1)).astype(jnp.float32)
    xpad = jnp.pad(x_hnwc, ((1, 1), (0, 0), (1, 1), (0, 0)))
    res2d = x_hnwc.reshape(rows, C_in)            # residual, pre-flattened

    # Conv weights OIHW -> HWIO -> (9*C_in, C_OUT) bf16 matrices for one dot.
    def as_mat(w):
        return jnp.transpose(w, (2, 3, 1, 0)).reshape(
            9 * w.shape[1], w.shape[0]).astype(jnp.bfloat16)
    w1_k, w2_k = as_mat(w1), as_mat(w2)
    vec = lambda v: v.reshape(1, C_OUT).astype(jnp.float32)

    flops = 2 * rows * (9 * C_in) * C_OUT + 2 * rows * (9 * C_OUT) * C_OUT
    bytes_accessed = (4 * (xpad.size + res2d.size + rows * C_OUT + 4 * C_OUT)
                      + 2 * (w1_k.size + w2_k.size))

    vmem = pl.BlockSpec(memory_space=pltpu.MemorySpace.VMEM)
    out2d = pl.pallas_call(
        residual_block_kernel,
        out_shape=jax.ShapeDtypeStruct((rows, C_OUT), jnp.float32),
        in_specs=[vmem] * 8,
        out_specs=vmem,
        scratch_shapes=[
            pltpu.VMEM((rows, 9 * C_in), jnp.bfloat16),         # im2col (reused)
            pltpu.VMEM((H + 2, N, W + 2, C_OUT), jnp.float32),  # conv2 halo pad
        ],
        compiler_params=pltpu.CompilerParams(vmem_limit_bytes=32 * 1024 * 1024),
        cost_estimate=pl.CostEstimate(flops=flops, transcendentals=2 * C_OUT,
                                      bytes_accessed=bytes_accessed),
    )(xpad, res2d, w1_k, vec(g1), vec(be1), w2_k, vec(g2), vec(be2))

    # (rows, C) in (h, n, w) order -> NCHW
    return jnp.transpose(out2d.reshape(H, N, W, C_OUT), (1, 3, 0, 2))


def ref_forward(x, w1, b1, g1, be1, w2, b2, g2, be2, mm_dtype=jnp.float32):
    """Plain-JAX reference mirroring the PyTorch forward (training-mode BN).
    mm_dtype=bfloat16 emulates the kernel's bf16 MXU operands (f32 accumulate)."""
    def conv(inp, w, b):
        y = lax.conv_general_dilated(
            inp.astype(mm_dtype), w.astype(mm_dtype), (1, 1), ((1, 1), (1, 1)),
            dimension_numbers=('NCHW', 'OIHW', 'NCHW'),
            preferred_element_type=jnp.float32)
        return y + b[None, :, None, None]

    def bn(inp, g, be):
        mean = jnp.mean(inp, axis=(0, 2, 3), keepdims=True)
        var = jnp.mean((inp - mean) ** 2, axis=(0, 2, 3), keepdims=True)
        return (inp - mean) * lax.rsqrt(var + EPS) \
            * g[None, :, None, None] + be[None, :, None, None]

    out = jax.nn.relu(bn(conv(x, w1, b1), g1, be1))
    out = bn(conv(out, w2, b2), g2, be2)
    return jax.nn.relu(out + x)


if __name__ == "__main__":
    key = jax.random.PRNGKey(0)
    ks = jax.random.split(key, 8)

    N, H, W = 2, 8, 8
    in_channels = 256   # `out += residual` requires in_channels == 256

    x = jax.random.normal(ks[0], (N, in_channels, H, W), jnp.float32)
    w1 = jax.random.normal(ks[1], (C_OUT, in_channels, 3, 3), jnp.float32) * 0.05
    b1 = jax.random.normal(ks[2], (C_OUT,), jnp.float32) * 0.05
    g1 = 1.0 + 0.1 * jax.random.normal(ks[3], (C_OUT,), jnp.float32)
    be1 = 0.1 * jax.random.normal(ks[4], (C_OUT,), jnp.float32)
    w2 = jax.random.normal(ks[5], (C_OUT, C_OUT, 3, 3), jnp.float32) * 0.05
    b2 = jax.random.normal(ks[6], (C_OUT,), jnp.float32) * 0.05
    g2 = jnp.ones((C_OUT,), jnp.float32)
    be2 = jnp.zeros((C_OUT,), jnp.float32)
    params = (w1, b1, g1, be1, w2, b2, g2, be2)

    y = residual_block_forward(x, params)
    jax.block_until_ready(y)
    assert y.shape == (N, C_OUT, H, W), y.shape

    # (1) structural check vs a reference that emulates the kernel's bf16
    #     matmul operands (tight tolerance: catches any wiring/BN/residual bug).
    err_bf16 = float(jnp.max(jnp.abs(y - ref_forward(x, *params,
                                                     mm_dtype=jnp.bfloat16))))
    # (2) end-to-end check vs the pure-f32 reference (bf16 operand rounding
    #     through two K=2304 convs stays far below this bound).
    err_f32 = float(jnp.max(jnp.abs(y - ref_forward(x, *params))))

    if err_bf16 < 1e-2 and err_f32 < 8e-2:
        print("KERNEL_OK")
    else:
        raise SystemExit(f"MISMATCH bf16_ref_err={err_bf16} f32_ref_err={err_f32}")
</pallas_src>

<mosaic_0001>
module attributes {stable_mosaic.version = 11 : i64} {
  func.func @residual_block_kernel(%arg0: memref<10x2x10x256xf32, #tpu.memory_space<vmem>>, %arg1: memref<128x256xf32, #tpu.memory_space<vmem>>, %arg2: memref<2304x256xbf16, #tpu.memory_space<vmem>>, %arg3: memref<1x256xf32, #tpu.memory_space<vmem>>, %arg4: memref<1x256xf32, #tpu.memory_space<vmem>>, %arg5: memref<2304x256xbf16, #tpu.memory_space<vmem>>, %arg6: memref<1x256xf32, #tpu.memory_space<vmem>>, %arg7: memref<1x256xf32, #tpu.memory_space<vmem>>, %arg8: memref<128x256xf32, #tpu.memory_space<vmem>>, %arg9: memref<128x2304xbf16, #tpu.memory_space<vmem>>, %arg10: memref<10x2x10x256xf32, #tpu.memory_space<vmem>>) attributes {dimension_semantics = [], scalar_prefetch = 0 : i64, scratch_operands = 2 : i64, tpu.core_type = #tpu.core_type<tc>} {
    %c0 = arith.constant 0 : index
    %c0_0 = arith.constant 0 : index
    %c0_1 = arith.constant 0 : index
    %c0_2 = arith.constant 0 : index
    %0 = vector.load %arg0[%c0, %c0_0, %c0_1, %c0_2] : memref<10x2x10x256xf32, #tpu.memory_space<vmem>>, vector<10x2x10x256xf32>
    %1 = vector.extract_strided_slice %0 {offsets = [0, 0, 0, 0], sizes = [10, 2, 8, 256], strides = [1, 1, 1, 1]} : vector<10x2x10x256xf32> to vector<10x2x8x256xf32>
    %2 = vector.shape_cast %1 : vector<10x2x8x256xf32> to vector<160x256xf32>
    %3 = vector.extract_strided_slice %2 {offsets = [0, 0], sizes = [128, 256], strides = [1, 1]} : vector<160x256xf32> to vector<128x256xf32>
    %4 = arith.truncf %3 : vector<128x256xf32> to vector<128x256xbf16>
    %c0_3 = arith.constant 0 : index
    %c0_4 = arith.constant 0 : index
    %5 = vector.load %arg9[%c0_3, %c0_4] : memref<128x2304xbf16, #tpu.memory_space<vmem>>, vector<128x256xbf16>
    tpu.vector_store %arg9[%c0_3, %c0_4], %4 {strides = array<i32>} : memref<128x2304xbf16, #tpu.memory_space<vmem>>, vector<128x256xbf16>,
    %6 = vector.extract_strided_slice %2 {offsets = [16, 0], sizes = [128, 256], strides = [1, 1]} : vector<160x256xf32> to vector<128x256xf32>
    %7 = arith.truncf %6 : vector<128x256xf32> to vector<128x256xbf16>
    %c0_5 = arith.constant 0 : index
    %c768 = arith.constant 768 : index
    %8 = vector.load %arg9[%c0_5, %c768] : memref<128x2304xbf16, #tpu.memory_space<vmem>>, vector<128x256xbf16>
    tpu.vector_store %arg9[%c0_5, %c768], %7 {strides = array<i32>} : memref<128x2304xbf16, #tpu.memory_space<vmem>>, vector<128x256xbf16>,
    %9 = vector.extract_strided_slice %2 {offsets = [32, 0], sizes = [128, 256], strides = [1, 1]} : vector<160x256xf32> to vector<128x256xf32>
    %10 = arith.truncf %9 : vector<128x256xf32> to vector<128x256xbf16>
    %c0_6 = arith.constant 0 : index
    %c1536 = arith.constant 1536 : index
    %11 = vector.load %arg9[%c0_6, %c1536] : memref<128x2304xbf16, #tpu.memory_space<vmem>>, vector<128x256xbf16>
    tpu.vector_store %arg9[%c0_6, %c1536], %10 {strides = array<i32>} : memref<128x2304xbf16, #tpu.memory_space<vmem>>, vector<128x256xbf16>,
    %12 = vector.extract_strided_slice %0 {offsets = [0, 0, 1, 0], sizes = [10, 2, 8, 256], strides = [1, 1, 1, 1]} : vector<10x2x10x256xf32> to vector<10x2x8x256xf32>
    %13 = vector.shape_cast %12 : vector<10x2x8x256xf32> to vector<160x256xf32>
    %14 = vector.extract_strided_slice %13 {offsets = [0, 0], sizes = [128, 256], strides = [1, 1]} : vector<160x256xf32> to vector<128x256xf32>
    %15 = arith.truncf %14 : vector<128x256xf32> to vector<128x256xbf16>
    %c0_7 = arith.constant 0 : index
    %c256 = arith.constant 256 : index
    %16 = vector.load %arg9[%c0_7, %c256] : memref<128x2304xbf16, #tpu.memory_space<vmem>>, vector<128x256xbf16>
    tpu.vector_store %arg9[%c0_7, %c256], %15 {strides = array<i32>} : memref<128x2304xbf16, #tpu.memory_space<vmem>>, vector<128x256xbf16>,
    %17 = vector.extract_strided_slice %13 {offsets = [16, 0], sizes = [128, 256], strides = [1, 1]} : vector<160x256xf32> to vector<128x256xf32>
    %18 = arith.truncf %17 : vector<128x256xf32> to vector<128x256xbf16>
    %c0_8 = arith.constant 0 : index
    %c1024 = arith.constant 1024 : index
    %19 = vector.load %arg9[%c0_8, %c1024] : memref<128x2304xbf16, #tpu.memory_space<vmem>>, vector<128x256xbf16>
    tpu.vector_store %arg9[%c0_8, %c1024], %18 {strides = array<i32>} : memref<128x2304xbf16, #tpu.memory_space<vmem>>, vector<128x256xbf16>,
    %20 = vector.extract_strided_slice %13 {offsets = [32, 0], sizes = [128, 256], strides = [1, 1]} : vector<160x256xf32> to vector<128x256xf32>
    %21 = arith.truncf %20 : vector<128x256xf32> to vector<128x256xbf16>
    %c0_9 = arith.constant 0 : index
    %c1792 = arith.constant 1792 : index
    %22 = vector.load %arg9[%c0_9, %c1792] : memref<128x2304xbf16, #tpu.memory_space<vmem>>, vector<128x256xbf16>
    tpu.vector_store %arg9[%c0_9, %c1792], %21 {strides = array<i32>} : memref<128x2304xbf16, #tpu.memory_space<vmem>>, vector<128x256xbf16>,
    %23 = vector.extract_strided_slice %0 {offsets = [0, 0, 2, 0], sizes = [10, 2, 8, 256], strides = [1, 1, 1, 1]} : vector<10x2x10x256xf32> to vector<10x2x8x256xf32>
    %24 = vector.shape_cast %23 : vector<10x2x8x256xf32> to vector<160x256xf32>
    %25 = vector.extract_strided_slice %24 {offsets = [0, 0], sizes = [128, 256], strides = [1, 1]} : vector<160x256xf32> to vector<128x256xf32>
    %26 = arith.truncf %25 : vector<128x256xf32> to vector<128x256xbf16>
    %c0_10 = arith.constant 0 : index
    %c512 = arith.constant 512 : index
    %27 = vector.load %arg9[%c0_10, %c512] : memref<128x2304xbf16, #tpu.memory_space<vmem>>, vector<128x256xbf16>
    tpu.vector_store %arg9[%c0_10, %c512], %26 {strides = array<i32>} : memref<128x2304xbf16, #tpu.memory_space<vmem>>, vector<128x256xbf16>,
    %28 = vector.extract_strided_slice %24 {offsets = [16, 0], sizes = [128, 256], strides = [1, 1]} : vector<160x256xf32> to vector<128x256xf32>
    %29 = arith.truncf %28 : vector<128x256xf32> to vector<128x256xbf16>
    %c0_11 = arith.constant 0 : index
    %c1280 = arith.constant 1280 : index
    %30 = vector.load %arg9[%c0_11, %c1280] : memref<128x2304xbf16, #tpu.memory_space<vmem>>, vector<128x256xbf16>
    tpu.vector_store %arg9[%c0_11, %c1280], %29 {strides = array<i32>} : memref<128x2304xbf16, #tpu.memory_space<vmem>>, vector<128x256xbf16>,
    %31 = vector.extract_strided_slice %24 {offsets = [32, 0], sizes = [128, 256], strides = [1, 1]} : vector<160x256xf32> to vector<128x256xf32>
    %32 = arith.truncf %31 : vector<128x256xf32> to vector<128x256xbf16>
    %c0_12 = arith.constant 0 : index
    %c2048 = arith.constant 2048 : index
    %33 = vector.load %arg9[%c0_12, %c2048] : memref<128x2304xbf16, #tpu.memory_space<vmem>>, vector<128x256xbf16>
    tpu.vector_store %arg9[%c0_12, %c2048], %32 {strides = array<i32>} : memref<128x2304xbf16, #tpu.memory_space<vmem>>, vector<128x256xbf16>,
    %c0_13 = arith.constant 0 : index
    %c0_14 = arith.constant 0 : index
    %34 = vector.load %arg9[%c0_13, %c0_14] : memref<128x2304xbf16, #tpu.memory_space<vmem>>, vector<128x2304xbf16>
    %c0_15 = arith.constant 0 : index
    %c0_16 = arith.constant 0 : index
    %35 = vector.load %arg2[%c0_15, %c0_16] : memref<2304x256xbf16, #tpu.memory_space<vmem>>, vector<2304x256xbf16>
    %cst = arith.constant dense<0.000000e+00> : vector<128x256xf32>
    %36 = tpu.matmul %34, %35, %cst {dimension_numbers = #tpu.dot_dimension_numbers<[1], [0], [0], [1], [0, 0, 1, 1], [], []>} : vector<128x2304xbf16>, vector<2304x256xbf16>, vector<128x256xf32> -> vector<128x256xf32>
    %c0_17 = arith.constant 0 : index
    %c0_18 = arith.constant 0 : index
    %37 = vector.load %arg3[%c0_17, %c0_18] : memref<1x256xf32, #tpu.memory_space<vmem>>, vector<1x256xf32>
    %c0_19 = arith.constant 0 : index
    %c0_20 = arith.constant 0 : index
    %38 = vector.load %arg4[%c0_19, %c0_20] : memref<1x256xf32, #tpu.memory_space<vmem>>, vector<1x256xf32>
    %cst_21 = arith.constant dense<0.000000e+00> : vector<256xf32>
    %39 = vector.multi_reduction <add>, %36, %cst_21 [0] : vector<128x256xf32> to vector<256xf32>
    %40 = vector.shape_cast %39 : vector<256xf32> to vector<1x256xf32>
    %41 = arith.mulf %36, %36 : vector<128x256xf32>
    %cst_22 = arith.constant dense<0.000000e+00> : vector<256xf32>
    %42 = vector.multi_reduction <add>, %41, %cst_22 [0] : vector<128x256xf32> to vector<256xf32>
    %43 = vector.shape_cast %42 : vector<256xf32> to vector<1x256xf32>
    %cst_23 = arith.constant 7.812500e-03 : f32
    %44 = vector.broadcast %cst_23 : f32 to vector<1x256xf32>
    %45 = arith.mulf %40, %44 : vector<1x256xf32>
    %cst_24 = arith.constant 7.812500e-03 : f32
    %46 = vector.broadcast %cst_24 : f32 to vector<1x256xf32>
    %47 = arith.mulf %43, %46 : vector<1x256xf32>
    %48 = arith.mulf %45, %45 : vector<1x256xf32>
    %49 = arith.subf %47, %48 : vector<1x256xf32>
    %cst_25 = arith.constant 9.99999974E-6 : f32
    %50 = vector.broadcast %cst_25 : f32 to vector<1x256xf32>
    %51 = arith.addf %49, %50 : vector<1x256xf32>
    %52 = math.rsqrt %51 : vector<1x256xf32>
    %53 = arith.mulf %37, %52 : vector<1x256xf32>
    %54 = arith.mulf %45, %53 : vector<1x256xf32>
    %55 = arith.subf %38, %54 : vector<1x256xf32>
    %56 = vector.broadcast %53 : vector<1x256xf32> to vector<128x256xf32>
    %57 = arith.mulf %36, %56 : vector<128x256xf32>
    %58 = vector.broadcast %55 : vector<1x256xf32> to vector<128x256xf32>
    %59 = arith.addf %57, %58 : vector<128x256xf32>
    %cst_26 = arith.constant 0.000000e+00 : f32
    %60 = vector.broadcast %cst_26 : f32 to vector<128x256xf32>
    %61 = arith.maximumf %59, %60 : vector<128x256xf32>
    %cst_27 = arith.constant 0.000000e+00 : f32
    %62 = vector.broadcast %cst_27 : f32 to vector<1x2x10x256xf32>
    %c0_28 = arith.constant 0 : index
    %c0_29 = arith.constant 0 : index
    %c0_30 = arith.constant 0 : index
    %c0_31 = arith.constant 0 : index
    %63 = vector.load %arg10[%c0_28, %c0_29, %c0_30, %c0_31] : memref<10x2x10x256xf32, #tpu.memory_space<vmem>>, vector<1x2x10x256xf32>
    tpu.vector_store %arg10[%c0_28, %c0_29, %c0_30, %c0_31], %62 {strides = array<i32>} : memref<10x2x10x256xf32, #tpu.memory_space<vmem>>, vector<1x2x10x256xf32>,
    %c9 = arith.constant 9 : index
    %c0_32 = arith.constant 0 : index
    %c0_33 = arith.constant 0 : index
    %c0_34 = arith.constant 0 : index
    %64 = vector.load %arg10[%c9, %c0_32, %c0_33, %c0_34] : memref<10x2x10x256xf32, #tpu.memory_space<vmem>>, vector<1x2x10x256xf32>
    tpu.vector_store %arg10[%c9, %c0_32, %c0_33, %c0_34], %62 {strides = array<i32>} : memref<10x2x10x256xf32, #tpu.memory_space<vmem>>, vector<1x2x10x256xf32>,
    %cst_35 = arith.constant 0.000000e+00 : f32
    %65 = vector.broadcast %cst_35 : f32 to vector<10x2x1x256xf32>
    %c0_36 = arith.constant 0 : index
    %c0_37 = arith.constant 0 : index
    %c0_38 = arith.constant 0 : index
    %c0_39 = arith.constant 0 : index
    %66 = vector.load %arg10[%c0_36, %c0_37, %c0_38, %c0_39] : memref<10x2x10x256xf32, #tpu.memory_space<vmem>>, vector<10x2x1x256xf32>
    tpu.vector_store %arg10[%c0_36, %c0_37, %c0_38, %c0_39], %65 {strides = array<i32>} : memref<10x2x10x256xf32, #tpu.memory_space<vmem>>, vector<10x2x1x256xf32>,
    %c0_40 = arith.constant 0 : index
    %c0_41 = arith.constant 0 : index
    %c9_42 = arith.constant 9 : index
    %c0_43 = arith.constant 0 : index
    %67 = vector.load %arg10[%c0_40, %c0_41, %c9_42, %c0_43] : memref<10x2x10x256xf32, #tpu.memory_space<vmem>>, vector<10x2x1x256xf32>
    tpu.vector_store %arg10[%c0_40, %c0_41, %c9_42, %c0_43], %65 {strides = array<i32>} : memref<10x2x10x256xf32, #tpu.memory_space<vmem>>, vector<10x2x1x256xf32>,
    %68 = vector.shape_cast %61 : vector<128x256xf32> to vector<8x2x8x256xf32>
    %c1 = arith.constant 1 : index
    %c0_44 = arith.constant 0 : index
    %c1_45 = arith.constant 1 : index
    %c0_46 = arith.constant 0 : index
    %69 = vector.load %arg10[%c1, %c0_44, %c1_45, %c0_46] : memref<10x2x10x256xf32, #tpu.memory_space<vmem>>, vector<8x2x8x256xf32>
    tpu.vector_store %arg10[%c1, %c0_44, %c1_45, %c0_46], %68 {strides = array<i32>} : memref<10x2x10x256xf32, #tpu.memory_space<vmem>>, vector<8x2x8x256xf32>,
    %c0_47 = arith.constant 0 : index
    %c0_48 = arith.constant 0 : index
    %c0_49 = arith.constant 0 : index
    %c0_50 = arith.constant 0 : index
    %70 = vector.load %arg10[%c0_47, %c0_48, %c0_49, %c0_50] : memref<10x2x10x256xf32, #tpu.memory_space<vmem>>, vector<10x2x10x256xf32>
    %71 = vector.extract_strided_slice %70 {offsets = [0, 0, 0, 0], sizes = [10, 2, 8, 256], strides = [1, 1, 1, 1]} : vector<10x2x10x256xf32> to vector<10x2x8x256xf32>
    %72 = vector.shape_cast %71 : vector<10x2x8x256xf32> to vector<160x256xf32>
    %73 = vector.extract_strided_slice %72 {offsets = [0, 0], sizes = [128, 256], strides = [1, 1]} : vector<160x256xf32> to vector<128x256xf32>
    %74 = arith.truncf %73 : vector<128x256xf32> to vector<128x256xbf16>
    %c0_51 = arith.constant 0 : index
    %c0_52 = arith.constant 0 : index
    %75 = vector.load %arg9[%c0_51, %c0_52] : memref<128x2304xbf16, #tpu.memory_space<vmem>>, vector<128x256xbf16>
    tpu.vector_store %arg9[%c0_51, %c0_52], %74 {strides = array<i32>} : memref<128x2304xbf16, #tpu.memory_space<vmem>>, vector<128x256xbf16>,
    %76 = vector.extract_strided_slice %72 {offsets = [16, 0], sizes = [128, 256], strides = [1, 1]} : vector<160x256xf32> to vector<128x256xf32>
    %77 = arith.truncf %76 : vector<128x256xf32> to vector<128x256xbf16>
    %c0_53 = arith.constant 0 : index
    %c768_54 = arith.constant 768 : index
    %78 = vector.load %arg9[%c0_53, %c768_54] : memref<128x2304xbf16, #tpu.memory_space<vmem>>, vector<128x256xbf16>
    tpu.vector_store %arg9[%c0_53, %c768_54], %77 {strides = array<i32>} : memref<128x2304xbf16, #tpu.memory_space<vmem>>, vector<128x256xbf16>,
    %79 = vector.extract_strided_slice %72 {offsets = [32, 0], sizes = [128, 256], strides = [1, 1]} : vector<160x256xf32> to vector<128x256xf32>
    %80 = arith.truncf %79 : vector<128x256xf32> to vector<128x256xbf16>
    %c0_55 = arith.constant 0 : index
    %c1536_56 = arith.constant 1536 : index
    %81 = vector.load %arg9[%c0_55, %c1536_56] : memref<128x2304xbf16, #tpu.memory_space<vmem>>, vector<128x256xbf16>
    tpu.vector_store %arg9[%c0_55, %c1536_56], %80 {strides = array<i32>} : memref<128x2304xbf16, #tpu.memory_space<vmem>>, vector<128x256xbf16>,
    %82 = vector.extract_strided_slice %70 {offsets = [0, 0, 1, 0], sizes = [10, 2, 8, 256], strides = [1, 1, 1, 1]} : vector<10x2x10x256xf32> to vector<10x2x8x256xf32>
    %83 = vector.shape_cast %82 : vector<10x2x8x256xf32> to vector<160x256xf32>
    %84 = vector.extract_strided_slice %83 {offsets = [0, 0], sizes = [128, 256], strides = [1, 1]} : vector<160x256xf32> to vector<128x256xf32>
    %85 = arith.truncf %84 : vector<128x256xf32> to vector<128x256xbf16>
    %c0_57 = arith.constant 0 : index
    %c256_58 = arith.constant 256 : index
    %86 = vector.load %arg9[%c0_57, %c256_58] : memref<128x2304xbf16, #tpu.memory_space<vmem>>, vector<128x256xbf16>
    tpu.vector_store %arg9[%c0_57, %c256_58], %85 {strides = array<i32>} : memref<128x2304xbf16, #tpu.memory_space<vmem>>, vector<128x256xbf16>,
    %87 = vector.extract_strided_slice %83 {offsets = [16, 0], sizes = [128, 256], strides = [1, 1]} : vector<160x256xf32> to vector<128x256xf32>
    %88 = arith.truncf %87 : vector<128x256xf32> to vector<128x256xbf16>
    %c0_59 = arith.constant 0 : index
    %c1024_60 = arith.constant 1024 : index
    %89 = vector.load %arg9[%c0_59, %c1024_60] : memref<128x2304xbf16, #tpu.memory_space<vmem>>, vector<128x256xbf16>
    tpu.vector_store %arg9[%c0_59, %c1024_60], %88 {strides = array<i32>} : memref<128x2304xbf16, #tpu.memory_space<vmem>>, vector<128x256xbf16>,
    %90 = vector.extract_strided_slice %83 {offsets = [32, 0], sizes = [128, 256], strides = [1, 1]} : vector<160x256xf32> to vector<128x256xf32>
    %91 = arith.truncf %90 : vector<128x256xf32> to vector<128x256xbf16>
    %c0_61 = arith.constant 0 : index
    %c1792_62 = arith.constant 1792 : index
    %92 = vector.load %arg9[%c0_61, %c1792_62] : memref<128x2304xbf16, #tpu.memory_space<vmem>>, vector<128x256xbf16>
    tpu.vector_store %arg9[%c0_61, %c1792_62], %91 {strides = array<i32>} : memref<128x2304xbf16, #tpu.memory_space<vmem>>, vector<128x256xbf16>,
    %93 = vector.extract_strided_slice %70 {offsets = [0, 0, 2, 0], sizes = [10, 2, 8, 256], strides = [1, 1, 1, 1]} : vector<10x2x10x256xf32> to vector<10x2x8x256xf32>
    %94 = vector.shape_cast %93 : vector<10x2x8x256xf32> to vector<160x256xf32>
    %95 = vector.extract_strided_slice %94 {offsets = [0, 0], sizes = [128, 256], strides = [1, 1]} : vector<160x256xf32> to vector<128x256xf32>
    %96 = arith.truncf %95 : vector<128x256xf32> to vector<128x256xbf16>
    %c0_63 = arith.constant 0 : index
    %c512_64 = arith.constant 512 : index
    %97 = vector.load %arg9[%c0_63, %c512_64] : memref<128x2304xbf16, #tpu.memory_space<vmem>>, vector<128x256xbf16>
    tpu.vector_store %arg9[%c0_63, %c512_64], %96 {strides = array<i32>} : memref<128x2304xbf16, #tpu.memory_space<vmem>>, vector<128x256xbf16>,
    %98 = vector.extract_strided_slice %94 {offsets = [16, 0], sizes = [128, 256], strides = [1, 1]} : vector<160x256xf32> to vector<128x256xf32>
    %99 = arith.truncf %98 : vector<128x256xf32> to vector<128x256xbf16>
    %c0_65 = arith.constant 0 : index
    %c1280_66 = arith.constant 1280 : index
    %100 = vector.load %arg9[%c0_65, %c1280_66] : memref<128x2304xbf16, #tpu.memory_space<vmem>>, vector<128x256xbf16>
    tpu.vector_store %arg9[%c0_65, %c1280_66], %99 {strides = array<i32>} : memref<128x2304xbf16, #tpu.memory_space<vmem>>, vector<128x256xbf16>,
    %101 = vector.extract_strided_slice %94 {offsets = [32, 0], sizes = [128, 256], strides = [1, 1]} : vector<160x256xf32> to vector<128x256xf32>
    %102 = arith.truncf %101 : vector<128x256xf32> to vector<128x256xbf16>
    %c0_67 = arith.constant 0 : index
    %c2048_68 = arith.constant 2048 : index
    %103 = vector.load %arg9[%c0_67, %c2048_68] : memref<128x2304xbf16, #tpu.memory_space<vmem>>, vector<128x256xbf16>
    tpu.vector_store %arg9[%c0_67, %c2048_68], %102 {strides = array<i32>} : memref<128x2304xbf16, #tpu.memory_space<vmem>>, vector<128x256xbf16>,
    %c0_69 = arith.constant 0 : index
    %c0_70 = arith.constant 0 : index
    %104 = vector.load %arg9[%c0_69, %c0_70] : memref<128x2304xbf16, #tpu.memory_space<vmem>>, vector<128x2304xbf16>
    %c0_71 = arith.constant 0 : index
    %c0_72 = arith.constant 0 : index
    %105 = vector.load %arg5[%c0_71, %c0_72] : memref<2304x256xbf16, #tpu.memory_space<vmem>>, vector<2304x256xbf16>
    %cst_73 = arith.constant dense<0.000000e+00> : vector<128x256xf32>
    %106 = tpu.matmul %104, %105, %cst_73 {dimension_numbers = #tpu.dot_dimension_numbers<[1], [0], [0], [1], [0, 0, 1, 1], [], []>} : vector<128x2304xbf16>, vector<2304x256xbf16>, vector<128x256xf32> -> vector<128x256xf32>
    %c0_74 = arith.constant 0 : index
    %c0_75 = arith.constant 0 : index
    %107 = vector.load %arg6[%c0_74, %c0_75] : memref<1x256xf32, #tpu.memory_space<vmem>>, vector<1x256xf32>
    %c0_76 = arith.constant 0 : index
    %c0_77 = arith.constant 0 : index
    %108 = vector.load %arg7[%c0_76, %c0_77] : memref<1x256xf32, #tpu.memory_space<vmem>>, vector<1x256xf32>
    %cst_78 = arith.constant dense<0.000000e+00> : vector<256xf32>
    %109 = vector.multi_reduction <add>, %106, %cst_78 [0] : vector<128x256xf32> to vector<256xf32>
    %110 = vector.shape_cast %109 : vector<256xf32> to vector<1x256xf32>
    %111 = arith.mulf %106, %106 : vector<128x256xf32>
    %cst_79 = arith.constant dense<0.000000e+00> : vector<256xf32>
    %112 = vector.multi_reduction <add>, %111, %cst_79 [0] : vector<128x256xf32> to vector<256xf32>
    %113 = vector.shape_cast %112 : vector<256xf32> to vector<1x256xf32>
    %cst_80 = arith.constant 7.812500e-03 : f32
    %114 = vector.broadcast %cst_80 : f32 to vector<1x256xf32>
    %115 = arith.mulf %110, %114 : vector<1x256xf32>
    %cst_81 = arith.constant 7.812500e-03 : f32
    %116 = vector.broadcast %cst_81 : f32 to vector<1x256xf32>
    %117 = arith.mulf %113, %116 : vector<1x256xf32>
    %118 = arith.mulf %115, %115 : vector<1x256xf32>
    %119 = arith.subf %117, %118 : vector<1x256xf32>
    %cst_82 = arith.constant 9.99999974E-6 : f32
    %120 = vector.broadcast %cst_82 : f32 to vector<1x256xf32>
    %121 = arith.addf %119, %120 : vector<1x256xf32>
    %122 = math.rsqrt %121 : vector<1x256xf32>
    %123 = arith.mulf %107, %122 : vector<1x256xf32>
    %124 = arith.mulf %115, %123 : vector<1x256xf32>
    %125 = arith.subf %108, %124 : vector<1x256xf32>
    %126 = vector.broadcast %123 : vector<1x256xf32> to vector<128x256xf32>
    %127 = arith.mulf %106, %126 : vector<128x256xf32>
    %128 = vector.broadcast %125 : vector<1x256xf32> to vector<128x256xf32>
    %129 = arith.addf %127, %128 : vector<128x256xf32>
    %c0_83 = arith.constant 0 : index
    %c0_84 = arith.constant 0 : index
    %130 = vector.load %arg1[%c0_83, %c0_84] : memref<128x256xf32, #tpu.memory_space<vmem>>, vector<128x256xf32>
    %131 = arith.addf %129, %130 : vector<128x256xf32>
    %cst_85 = arith.constant 0.000000e+00 : f32
    %132 = vector.broadcast %cst_85 : f32 to vector<128x256xf32>
    %133 = arith.maximumf %131, %132 : vector<128x256xf32>
    %c0_86 = arith.constant 0 : index
    %c0_87 = arith.constant 0 : index
    %134 = vector.load %arg8[%c0_86, %c0_87] : memref<128x256xf32, #tpu.memory_space<vmem>>, vector<128x256xf32>
    tpu.vector_store %arg8[%c0_86, %c0_87], %133 {strides = array<i32>} : memref<128x256xf32, #tpu.memory_space<vmem>>, vector<128x256xf32>,
    return
  }
}

</mosaic_0001>

<bundles_post_ra>
// kernel: tpu_custom_call.1
= control target key start
LH: loop header
LB: loop body
LE: loop exit
PB: predicated region body
PF: predicated region fallthrough
CT: control target
= control target key end

     0   :  { %13 = vsyncpa [#allocation5], 0  ;;  %s15818_s0 = inlined_call_operand.vmem [shape: f32[10,2,10,256], index: 0, kind: input, shape index: {}]   ;;  %s15819_s1 = inlined_call_operand.hbm [shape: f32[128,256], index: 1, kind: input, shape index: {}]   ;;  %s15820_s2 = inlined_call_operand.hbm [shape: bf16[2304,256], index: 2, kind: input, shape index: {}]   ;;  %s15821_s3 = inlined_call_operand.hbm [shape: f32[1,256], index: 3, kind: input, shape index: {}]   ;;  %s15822_s4 = inlined_call_operand.hbm [shape: f32[1,256], index: 4, kind: input, shape index: {}]   ;;  %s15823_s5 = inlined_call_operand.hbm [shape: bf16[2304,256], index: 5, kind: input, shape index: {}]   ;;  %s15824_s6 = inlined_call_operand.hbm [shape: f32[1,256], index: 6, kind: input, shape index: {}]   ;;  %s15825_s7 = inlined_call_operand.hbm [shape: f32[1,256], index: 7, kind: input, shape index: {}]   ;;  %s15826_s8 = inlined_call_operand.hbm [shape: f32[128,256], index: 8, kind: output, shape index: {}]  }
   0x1   :  { %14 = vsyncpa [#allocation8], 0 }
   0x2   :  { %15 = vsyncpa [#allocation11], 0 }
   0x3   :  { %16 = vsyncpa [#allocation14], 0 }
   0x4   :  { %17 = vsyncpa [#allocation6], 0  ;;  %s12578_s27 = smov [#allocation7]  }
   0x5   :  { %s37_s28 = sshll.u32 %s12578_s27, 4  ;;  %s38_s28 = int_to_ptr.vmem [resolvable:$true] %s37_s28 }
   0x6   :  { %s12416_s29 = scalar_lea.vmem %s38_s28, 36864  ;;  %p12421_p1 = scmp.lt.s32.totalorder %s38_s28, %s38_s28 }
   0x7   :  { %p12417_p0 = scmp.ne.s32.totalorder %s38_s28, %s12416_s29  ;;  %p12422_p2 = scmp.lt.s32.totalorder %s12416_s29, %s12416_s29 }
   0x9   :  { %p12423_p3 = por %p12422_p2, %p12421_p1 }
   0xb   :  { %p12424_p4 = pnand %p12423_p3, %p12417_p0 }
   0xd   :  { %12427 = shalt.err (!%p12424_p4)
}
   0xe   :  { %s12579_s30 = smov 128   ;;  %s12580_s9 = smov 8  }
   0xf   :  { %43 = dma.hbm_to_vmem [thread:$0]  %s15820_s2, 36864, %s38_s28, [#allocation8], %s12579_s30, %s12579_s30, %s12580_s9  }
  0x10   :  { %s12581_s12 = smov [#allocation10]   ;;  %s12582_s14 = smov [#allocation13]  }
  0x11   :  { %s60_s13 = sshll.u32 %s12581_s12, 4  ;;  %s82_s15 = sshll.u32 %s12582_s14, 4  ;;  %s61_s13 = int_to_ptr.vmem [resolvable:$true] %s60_s13  ;;  %s83_s15 = int_to_ptr.vmem [resolvable:$true] %s82_s15 }
  0x12   :  { %s12436_s16 = scalar_lea.vmem %s61_s13, 32  ;;  %p12441_p6 = scmp.lt.s32.totalorder %s61_s13, %s61_s13 }
  0x13   :  { %p12437_p5 = scmp.ne.s32.totalorder %s61_s13, %s12436_s16  ;;  %p12442_p7 = scmp.lt.s32.totalorder %s12436_s16, %s12436_s16 }
  0x15   :  { %p12443_p8 = por %p12442_p7, %p12441_p6 }
  0x17   :  { %p12444_p9 = pnand %p12443_p8, %p12437_p5 }
  0x19   :  { %12447 = shalt.err (!%p12444_p9)
}
  0x1a   :  { %63 = dma.hbm_to_vmem [thread:$0]  %s15822_s4, 32, %s61_s13, [#allocation11]  }
  0x1b   :  { %s12456_s19 = scalar_lea.vmem %s83_s15, 32  ;;  %p12461_p11 = scmp.lt.s32.totalorder %s83_s15, %s83_s15 }
  0x1c   :  { %p12457_p10 = scmp.ne.s32.totalorder %s83_s15, %s12456_s19  ;;  %p12462_p12 = scmp.lt.s32.totalorder %s12456_s19, %s12456_s19 }
  0x1e   :  { %p12463_p13 = por %p12462_p12, %p12461_p11 }
  0x20   :  { %p12464_p0 = pnand %p12463_p13, %p12457_p10 }
  0x22   :  { %12467 = shalt.err (!%p12464_p0)
}
  0x23   :  { %85 = dma.hbm_to_vmem [thread:$0]  %s15824_s6, 32, %s83_s15, [#allocation14]  }
  0x24   :  { %s12583_s21 = smov [#allocation4]  }
  0x25   :  { %s25_s22 = sshll.u32 %s12583_s21, 4  ;;  %s26_s22 = int_to_ptr.vmem [resolvable:$true] %s25_s22 }
  0x26   :  { %s12476_s23 = scalar_lea.vmem %s26_s22, 4096  ;;  %p12481_p2 = scmp.lt.s32.totalorder %s26_s22, %s26_s22 }
  0x27   :  { %p12477_p1 = scmp.ne.s32.totalorder %s26_s22, %s12476_s23  ;;  %p12482_p3 = scmp.lt.s32.totalorder %s12476_s23, %s12476_s23 }
  0x29   :  { %p12483_p4 = por %p12482_p3, %p12481_p2 }
  0x2b   :  { %p12484_p5 = pnand %p12483_p4, %p12477_p1 }
  0x2d   :  { %12487 = shalt.err (!%p12484_p5)
}
  0x2e   :  { %s12584_s4 = smov 256   ;;  %s12585_s24 = smov 16  }
  0x2f   :  { %31 = dma.hbm_to_vmem [thread:$0]  %s15819_s1, 4096, %s26_s22, [#allocation5], %s12584_s4, %s12584_s4, %s12585_s24  }
  0x30   :  { %s12586_s6 = smov [#allocation9]   ;;  %s12587_s28 = smov [#allocation12]  }
  0x31   :  { %s50_s27 = sshll.u32 %s12586_s6, 4  ;;  %s69_s29 = sshll.u32 %s12587_s28, 4  ;;  %s51_s27 = int_to_ptr.vmem [resolvable:$true] %s50_s27  ;;  %s70_s29 = int_to_ptr.vmem [resolvable:$true] %s69_s29 }
  0x32   :  { %s12496_s10 = scalar_lea.vmem %s51_s27, 32  ;;  %p12501_p7 = scmp.lt.s32.totalorder %s51_s27, %s51_s27 }
  0x33   :  { %p12497_p6 = scmp.ne.s32.totalorder %s51_s27, %s12496_s10  ;;  %p12502_p8 = scmp.lt.s32.totalorder %s12496_s10, %s12496_s10 }
  0x35   :  { %p12503_p9 = por %p12502_p8, %p12501_p7 }
  0x37   :  { %p12504_p10 = pnand %p12503_p9, %p12497_p6 }
  0x39   :  { %12507 = shalt.err (!%p12504_p10)
}
  0x3a   :  { %53 = dma.hbm_to_vmem [thread:$0]  %s15821_s3, 32, %s51_s27, [#allocation8]  }
  0x3b   :  { %s12516_s13 = scalar_lea.vmem %s70_s29, 36864  ;;  %p12521_p12 = scmp.lt.s32.totalorder %s70_s29, %s70_s29 }
  0x3c   :  { %p12517_p11 = scmp.ne.s32.totalorder %s70_s29, %s12516_s13  ;;  %p12522_p13 = scmp.lt.s32.totalorder %s12516_s13, %s12516_s13 }
  0x3e   :  { %p12523_p0 = por %p12522_p13, %p12521_p12 }
  0x40   :  { %p12524_p1 = pnand %p12523_p0, %p12517_p11 }
  0x42   :  { %12527 = shalt.err (!%p12524_p1)
}
  0x43   :  { %75 = dma.hbm_to_vmem [thread:$0]  %s15823_s5, 36864, %s70_s29, [#allocation11], %s12579_s30, %s12579_s30, %s12580_s9  }
  0x44   :  { %s12588_s15 = smov [#allocation15]  }
  0x45   :  { %s92_s16 = sshll.u32 %s12588_s15, 4  ;;  %s93_s16 = int_to_ptr.vmem [resolvable:$true] %s92_s16 }
  0x46   :  { %s12536_s17 = scalar_lea.vmem %s93_s16, 32  ;;  %p12541_p3 = scmp.lt.s32.totalorder %s93_s16, %s93_s16 }
  0x47   :  { %p12537_p2 = scmp.ne.s32.totalorder %s93_s16, %s12536_s17  ;;  %p12542_p4 = scmp.lt.s32.totalorder %s12536_s17, %s12536_s17 }
  0x49   :  { %p12543_p5 = por %p12542_p4, %p12541_p3 }
  0x4b   :  { %p12544_p6 = pnand %p12543_p5, %p12537_p2 }
  0x4d   :  { %12547 = shalt.err (!%p12544_p6)
}
  0x4e   :  { %95 = dma.hbm_to_vmem [thread:$0]  %s15825_s7, 32, %s93_s16, [#allocation14]  }
  0x4f   :  { %12568 = dma.done.wait [#allocation5], 4096  }
  0x50   :  { %12569 = vsyncadd [#allocation5], 4294963200 }
  0x51   :  { %12570 = dma.done.wait [#allocation8], 36896  }
  0x52   :  { %12571 = vsyncadd [#allocation8], 4294930400 }
  0x53   :  { %12572 = dma.done.wait [#allocation11], 36896  }
  0x54   :  { %12573 = vsyncadd [#allocation11], 4294930400 }
  0x55   :  { %12574 = dma.done.wait [#allocation14], 64  }
  0x56   :  { %12575 = vsyncadd [#allocation14], 4294967232  ;;  %v11536_v0 = vld [vmem:[#allocation7 + $0x74] ss:$8 sps:$4 sm:$0xff]   ;;  %v11540_v2 = vld [vmem:[#allocation7 + $0x70] ss:$8 sps:$4 sm:$0xff]  }
  0x57   :  { %v11538_v1 = vld [vmem:[#allocation7 + $0x174] ss:$8 sps:$4 sm:$0xff]   ;;  %3695 = vmatprep.subr.bf16.mxu0 %v11536_v0  ;;  %v11541_v3 = vld [vmem:[#allocation7 + $0x170] ss:$8 sps:$4 sm:$0xff]   ;;  %v11542_v4 = vld [vmem:[#allocation7 + $0x64] ss:$8 sps:$4 sm:$0xff]  }
  0x58   :  { %3808 = vmatprep.subr.bf16.mxu1 %v11538_v1  ;;  %3696 = vmatpush1.bf16.msra.mxu0 %v11540_v2  ;;  %v11544_v5 = vld [vmem:[#allocation7 + $0x164] ss:$8 sps:$4 sm:$0xff]   ;;  %v11546_v6 = vld [vmem:[#allocation7 + $0x60] ss:$8 sps:$4 sm:$0xff]   ;;  %v11548_v8 = vld [vmem:[#allocation7 + $0x54] ss:$8 sps:$4 sm:$0xff]  }
  0x59   :  { %3809 = vmatpush1.bf16.msra.mxu1 %v11541_v3  ;;  %3697 = vmatprep.subr.bf16.mxu0 %v11542_v4  ;;  %v11547_v7 = vld [vmem:[#allocation7 + $0x160] ss:$8 sps:$4 sm:$0xff]   ;;  %v11550_v9 = vld [vmem:[#allocation7 + $0x154] ss:$8 sps:$4 sm:$0xff]   ;;  %v11552_v10 = vld [vmem:[#allocation7 + $0x50] ss:$8 sps:$4 sm:$0xff]  }
  0x5a   :  { %3810 = vmatprep.subr.bf16.mxu1 %v11544_v5  ;;  %v11553_v11 = vld [vmem:[#allocation7 + $0x150] ss:$8 sps:$4 sm:$0xff]   ;;  %v11554_v12 = vld [vmem:[#allocation7 + $0x44] ss:$8 sps:$4 sm:$0xff]   ;;  %v11558_v14 = vld [vmem:[#allocation7 + $0x40] ss:$8 sps:$4 sm:$0xff]  }
  0x5b   :  { %v11556_v13 = vld [vmem:[#allocation7 + $0x144] ss:$8 sps:$4 sm:$0xff]   ;;  %v11559_v15 = vld [vmem:[#allocation7 + $0x140] ss:$8 sps:$4 sm:$0xff]   ;;  %v11560_v16 = vld [vmem:[#allocation7 + $0x34] ss:$8 sps:$4 sm:$0xff]  }
  0x5c   :  { %3698 = vmatpush1.bf16.msra.mxu0 %v11546_v6  ;;  %v11562_v17 = vld [vmem:[#allocation7 + $0x134] ss:$8 sps:$4 sm:$0xff]   ;;  %v11564_v18 = vld [vmem:[#allocation7 + $0x30] ss:$8 sps:$4 sm:$0xff]   ;;  %v11566_v20 = vld [vmem:[#allocation7 + $0x24] ss:$8 sps:$4 sm:$0xff]  }
  0x5d   :  { %3811 = vmatpush1.bf16.msra.mxu1 %v11547_v7  ;;  %3699 = vmatprep.subr.bf16.mxu0 %v11548_v8  ;;  %v11565_v19 = vld [vmem:[#allocation7 + $0x130] ss:$8 sps:$4 sm:$0xff]   ;;  %v11568_v21 = vld [vmem:[#allocation7 + $0x124] ss:$8 sps:$4 sm:$0xff]   ;;  %v11570_v22 = vld [vmem:[#allocation7 + $0x20] ss:$8 sps:$4 sm:$0xff]  }
  0x5e   :  { %3812 = vmatprep.subr.bf16.mxu1 %v11550_v9  ;;  %v11571_v23 = vld [vmem:[#allocation7 + $0x120] ss:$8 sps:$4 sm:$0xff]   ;;  %v11572_v24 = vld [vmem:[#allocation7 + $0x14] ss:$8 sps:$4 sm:$0xff]   ;;  %v11576_v26 = vld [vmem:[#allocation7 + $0x10] ss:$8 sps:$4 sm:$0xff]  }
  0x5f   :  { %v11574_v25 = vld [vmem:[#allocation7 + $0x114] ss:$8 sps:$4 sm:$0xff]   ;;  %v11577_v27 = vld [vmem:[#allocation7 + $0x110] ss:$8 sps:$4 sm:$0xff]   ;;  %v11578_v28 = vld [vmem:[#allocation7 + $0x4] ss:$8 sps:$4 sm:$0xff]  }
  0x60   :  { %3700 = vmatpush1.bf16.msra.mxu0 %v11552_v10  ;;  %v11580_v29 = vld [vmem:[#allocation7 + $0x104] ss:$8 sps:$4 sm:$0xff]   ;;  %v11582_v30 = vld [vmem:[#allocation7] ss:$8 sps:$4 sm:$0xff]   ;;  %v11584_v32 = vld [vmem:[#allocation7 + $0xf4] ss:$8 sps:$4 sm:$0xff]  }
  0x61   :  { %3813 = vmatpush1.bf16.msra.mxu1 %v11553_v11  ;;  %3701 = vmatprep.subr.bf16.mxu0 %v11554_v12  ;;  %v11583_v31 = vld [vmem:[#allocation7 + $0x100] ss:$8 sps:$4 sm:$0xff]   ;;  %v11586_v33 = vld [vmem:[#allocation7 + $0x1f4] ss:$8 sps:$4 sm:$0xff]   ;;  %v11588_v34 = vld [vmem:[#allocation7 + $0xf0] ss:$8 sps:$4 sm:$0xff]  }
  0x62   :  { %3814 = vmatprep.subr.bf16.mxu1 %v11556_v13  ;;  %v11589_v35 = vld [vmem:[#allocation7 + $0x1f0] ss:$8 sps:$4 sm:$0xff]   ;;  %v11590_v36 = vld [vmem:[#allocation7 + $0xe4] ss:$8 sps:$4 sm:$0xff]   ;;  %v11594_v38 = vld [vmem:[#allocation7 + $0xe0] ss:$8 sps:$4 sm:$0xff]  }
  0x63   :  { %v11592_v37 = vld [vmem:[#allocation7 + $0x1e4] ss:$8 sps:$4 sm:$0xff]   ;;  %v11595_v39 = vld [vmem:[#allocation7 + $0x1e0] ss:$8 sps:$4 sm:$0xff]   ;;  %v11596_v40 = vld [vmem:[#allocation7 + $0xd4] ss:$8 sps:$4 sm:$0xff]  }
  0x64   :  { %3702 = vmatpush1.bf16.msra.mxu0 %v11558_v14  ;;  %v11598_v41 = vld [vmem:[#allocation7 + $0x1d4] ss:$8 sps:$4 sm:$0xff]   ;;  %v11600_v42 = vld [vmem:[#allocation7 + $0xd0] ss:$8 sps:$4 sm:$0xff]   ;;  %v11602_v44 = vld [vmem:[#allocation7 + $0xc4] ss:$8 sps:$4 sm:$0xff]  }
  0x65   :  { %3815 = vmatpush1.bf16.msra.mxu1 %v11559_v15  ;;  %3703 = vmatprep.subr.bf16.mxu0 %v11560_v16  ;;  %v11601_v43 = vld [vmem:[#allocation7 + $0x1d0] ss:$8 sps:$4 sm:$0xff]   ;;  %v11604_v45 = vld [vmem:[#allocation7 + $0x1c4] ss:$8 sps:$4 sm:$0xff]   ;;  %vm445_vm0 = vcmask 1046528   ;;  %vm774_vm1 = vcmask 1045504  }
  0x66   :  { %3816 = vmatprep.subr.bf16.mxu1 %v11562_v17  ;;  %v11606_v46 = vld [vmem:[#allocation7 + $0xc0] ss:$8 sps:$4 sm:$0xff]   ;;  %v11608_v49 = vld [vmem:[#allocation7 + $0xb4] ss:$8 sps:$4 sm:$0xff]   ;;  %v120_v53 = vld [vmem:[%s15818_s0 + $0x18] sm:$0x3] }
  0x67   :  { %v11607_v47 = vld [vmem:[#allocation7 + $0x1c0] ss:$8 sps:$4 sm:$0xff]   ;;  %v11610_v50 = vld [vmem:[#allocation7 + $0x1b4] ss:$8 sps:$4 sm:$0xff]   ;;  %v124_v57 = vld [vmem:[%s15818_s0 + $0x38] sm:$0x3] }
  0x68   :  { %3704 = vmatpush1.bf16.msra.mxu0 %v11564_v18  ;;  %v118_v48 = vld [vmem:[%s15818_s0 + $0x8] sm:$0xff]  ;;  %v450_v58 = vrot.slane %v120_v53, 1  ;;  %v456_v60 = vrot.slane %v124_v57, 1  ;;  %v779_v61 = vrot.slane %v120_v53, 2  ;;  %v785_v62 = vrot.slane %v124_v57, 2  ;;  %v12682_v63 = vld [vmem:[%s15818_s0] sm:$0xff] }
  0x69   :  { %3817 = vmatpush1.bf16.msra.mxu1 %v11565_v19  ;;  %3705 = vmatprep.subr.bf16.mxu0 %v11566_v20  ;;  %v122_v51 = vld [vmem:[%s15818_s0 + $0x28] sm:$0xff]  ;;  %v449_v52 = vrot.slane %v118_v48, 1  ;;  %v778_v55 = vrot.slane %v118_v48, 2  ;;  %v12687_v0 = vld [vmem:[%s15818_s0 + $0x20] sm:$0xff]  ;;  %v11612_v1 = vld [vmem:[#allocation7 + $0xb0] ss:$8 sps:$4 sm:$0xff]  }
  0x6a   :  { %3818 = vmatprep.subr.bf16.mxu1 %v11568_v21  ;;  %v455_v54 = vrot.slane %v122_v51, 1  ;;  %v11403_v56 = vpack.c.bf16 %v122_v51, %v118_v48  ;;  %v784_v59 = vrot.slane %v122_v51, 2  ;;  %v775_v3 = vrot.slane %v12682_v63, 2  ;;  %v119_v5 = vld [vmem:[%s15818_s0 + $0x10] sm:$0x3] }
  0x6b   :  { %v451_v2 = vsel %vm445_vm0, %v449_v52, %v450_v58  ;;  %v781_v4 = vrot.slane %v12687_v0, 2  ;;  %v123_v7 = vld [vmem:[%s15818_s0 + $0x30] sm:$0x3]  ;;  %v776_v10 = vrot.slane %v119_v5, 2  ;;  %v12700_v12 = vsel %vm774_vm1, %v778_v55, %v779_v61  ;;  %v11614_v13 = vld [vmem:[#allocation7 + $0xa4] ss:$8 sps:$4 sm:$0xff]  }
  0x6c   :  { %3706 = vmatpush1.bf16.msra.mxu0 %v11570_v22  ;;  %3727 = vmatprep.mubr.bf16.mxu0 %v11403_v56  ;;  %v457_v6 = vsel %vm445_vm0, %v455_v54, %v456_v60  ;;  %v11613_v8 = vld [vmem:[#allocation7 + $0x1b0] ss:$8 sps:$4 sm:$0xff]   ;;  %v782_v11 = vrot.slane %v123_v7, 2  ;;  %v11616_v14 = vld [vmem:[#allocation7 + $0x1a4] ss:$8 sps:$4 sm:$0xff]   ;;  %v12703_v15 = vsel %vm774_vm1, %v784_v59, %v785_v62 }
  0x6d   :  { %3819 = vmatpush1.bf16.msra.mxu1 %v11571_v23  ;;  %3707 = vmatprep.subr.bf16.mxu0 %v11572_v24  ;;  %v11405_v9 = vpack.c.bf16 %v457_v6, %v451_v2  ;;  %v12708_v17 = vsel %vm774_vm1, %v775_v3, %v776_v10  ;;  %v11618_v19 = vld [vmem:[#allocation7 + $0xa0] ss:$8 sps:$4 sm:$0xff]   ;;  %v11620_v22 = vld [vmem:[#allocation7 + $0x94] ss:$8 sps:$4 sm:$0xff]   ;;  %v131_v51 = vld [vmem:[%s15818_s0 + $0x70] sm:$0x3] }
  0x6e   :  { %3820 = vmatprep.subr.bf16.mxu1 %v11574_v25  ;;  %v12711_v18 = vsel %vm774_vm1, %v781_v4, %v782_v11  ;;  %v11619_v20 = vld [vmem:[#allocation7 + $0x1a0] ss:$8 sps:$4 sm:$0xff]   ;;  %v11622_v25 = vld [vmem:[#allocation7 + $0x194] ss:$8 sps:$4 sm:$0xff]   ;;  %v794_v62 = vrot.slane %v131_v51, 2  ;;  %v465_v3 = vrot.slane %v131_v51, 1 }
  0x6f   :  { %3840 = vmatprep.mubr.bf16.mxu1 %v11405_v9  ;;  %v12718_v23 = vld [vmem:[%s15818_s0 + $0x48] sm:$0xff]  ;;  %v11634_v58 = vld [vmem:[#allocation7 + $0x274] ss:$8 sps:$4 sm:$0xff]   ;;  %v11632_v9 = vld [vmem:[#allocation7 + $0x270] ss:$8 sps:$4 sm:$0xff]  }
  0x70   :  { %3708 = vmatpush1.bf16.msra.mxu0 %v11576_v26  ;;  %v12723_v24 = vld [vmem:[%s15818_s0 + $0x68] sm:$0xff]  ;;  %v128_v26 = vld [vmem:[%s15818_s0 + $0x58] sm:$0x3] }
  0x71   :  { %3821 = vmatpush1.bf16.msra.mxu1 %v11577_v27  ;;  %3709 = vmatprep.subr.bf16.mxu0 %v11578_v28  ;;  %v132_v27 = vld [vmem:[%s15818_s0 + $0x78] sm:$0x3]  ;;  %v11631_v53 = vld [vmem:[#allocation7 + $0x180] ss:$8 sps:$4 sm:$0xff]  }
  0x72   :  { %3822 = vmatprep.subr.bf16.mxu1 %v11580_v29  ;;  %v11624_v28 = vld [vmem:[#allocation7 + $0x90] ss:$8 sps:$4 sm:$0xff]   ;;  %v797_v52 = vrot.slane %v132_v27, 2  ;;  %v12766_v4 = vld [vmem:[%s15818_s0 + $0x88] sm:$0xff] }
  0x73   :  { %v11625_v29 = vld [vmem:[#allocation7 + $0x190] ss:$8 sps:$4 sm:$0xff]   ;;  %v802_v11 = vrot.slane %v12766_v4, 2 }
  0x74   :  { %3710 = vmatpush1.bf16.msra.mxu0 %v11582_v30  ;;  %v446_v30 = vrot.slane %v12682_v63, 1  ;;  %v11635_v10 = vld [vmem:[#allocation7 + $0x370] ss:$8 sps:$4 sm:$0xff]  }
  0x75   :  { %3823 = vmatpush1.bf16.msra.mxu1 %v11583_v31  ;;  %3711 = vmatprep.subr.bf16.mxu0 %v11584_v32  ;;  %v452_v31 = vrot.slane %v12687_v0, 1  ;;  %v447_v32 = vrot.slane %v119_v5, 1  ;;  %v12771_v5 = vld [vmem:[%s15818_s0 + $0xa8] sm:$0xff] }
  0x76   :  { %3824 = vmatprep.subr.bf16.mxu1 %v11586_v33  ;;  %v453_v33 = vrot.slane %v123_v7, 1 }
  0x77   :  { %v448_v48 = vsel %vm445_vm0, %v446_v30, %v447_v32  ;;  %v808_v30 = vrot.slane %v12771_v5, 2 }
  0x78   :  { %3712 = vmatpush2.bf16.msra.mxu0 %v11588_v34  ;;  %v11626_v34 = vld [vmem:[#allocation7 + $0x84] ss:$8 sps:$4 sm:$0xff]  }
  0x79   :  { %3825 = vmatpush2.bf16.msra.mxu1 %v11589_v35  ;;  %3713 = vmatprep.subr.bf16.mxu0 %v11590_v36  ;;  %v11628_v35 = vld [vmem:[#allocation7 + $0x184] ss:$8 sps:$4 sm:$0xff]   ;;  %v461_v36 = vrot.slane %v12718_v23, 1 }
  0x7a   :  { %3826 = vmatprep.subr.bf16.mxu1 %v11592_v37  ;;  %v467_v37 = vrot.slane %v12723_v24, 1 }
  0x7c   :  { %3714 = vmatpush2.bf16.msra.mxu0 %v11594_v38  ;;  %v790_v38 = vrot.slane %v12718_v23, 2 }
  0x7d   :  { %3827 = vmatpush2.bf16.msra.mxu1 %v11595_v39  ;;  %3715 = vmatprep.subr.bf16.mxu0 %v11596_v40  ;;  %v12739_v39 = vld [vmem:[%s15818_s0 + $0x40] sm:$0xff]  ;;  %v796_v40 = vrot.slane %v12723_v24, 2 }
  0x7e   :  { %3828 = vmatprep.subr.bf16.mxu1 %v11598_v41  ;;  %v462_v41 = vrot.slane %v128_v26, 1 }
  0x7f   :  { %v798_v61 = vsel %vm774_vm1, %v796_v40, %v797_v52 }
  0x80   :  { %3716 = vmatpush2.bf16.msra.mxu0 %v11600_v42  ;;  %v468_v42 = vrot.slane %v132_v27, 1  ;;  %v463_v59 = vsel %vm445_vm0, %v461_v36, %v462_v41  ;;  %v135_v41 = vld [vmem:[%s15818_s0 + $0x90] sm:$0x3] }
  0x81   :  { %3829 = vmatpush2.bf16.msra.mxu1 %v11601_v43  ;;  %3717 = vmatprep.subr.bf16.mxu0 %v11602_v44  ;;  %v12745_v43 = vld [vmem:[%s15818_s0 + $0x60] sm:$0xff]  ;;  %v787_v44 = vrot.slane %v12739_v39, 2 }
  0x82   :  { %3830 = vmatprep.subr.bf16.mxu1 %v11604_v45  ;;  %v127_v45 = vld [vmem:[%s15818_s0 + $0x50] sm:$0x3]  ;;  %v464_v54 = vrot.slane %v12745_v43, 1  ;;  %v793_v55 = vrot.slane %v12745_v43, 2  ;;  %v469_v2 = vsel %vm445_vm0, %v467_v37, %v468_v42 }
  0x83   :  { %v788_v57 = vrot.slane %v127_v45, 2  ;;  %v459_v60 = vrot.slane %v127_v45, 1  ;;  %v139_v42 = vld [vmem:[%s15818_s0 + $0xb0] sm:$0x3]  ;;  %v12820_v45 = vpack.c.bf16 %v12745_v43, %v12739_v39 }
  0x84   :  { %3718 = vmatpush2.bf16.msra.mxu0 %v11606_v46  ;;  %v791_v46 = vrot.slane %v128_v26, 2  ;;  %v12790_v26 = vpack.c.bf16 %v469_v2, %v463_v59  ;;  %v11647_v43 = vld [vmem:[#allocation7 + $0x350] ss:$8 sps:$4 sm:$0xff]  }
  0x85   :  { %3831 = vmatpush2.bf16.msra.mxu1 %v11607_v47  ;;  %3719 = vmatprep.subr.bf16.mxu0 %v11608_v49  ;;  %v11630_v47 = vld [vmem:[#allocation7 + $0x80] ss:$8 sps:$4 sm:$0xff]   ;;  %v454_v49 = vsel %vm445_vm0, %v452_v31, %v453_v33  ;;  %v789_v7 = vsel %vm774_vm1, %v787_v44, %v788_v57 }
  0x86   :  { %3832 = vmatprep.subr.bf16.mxu1 %v11610_v50  ;;  %v458_v50 = vrot.slane %v12739_v39, 1  ;;  %v792_v56 = vsel %vm774_vm1, %v790_v38, %v791_v46  ;;  %15935 = vst [vmem:[#allocation22_spill] sm:$0xff] %v12790_v26  ;;  %v12805_v33 = vld [vmem:[%s15818_s0 + $0xa0] sm:$0xff]  ;;  %v11646_v46 = vld [vmem:[#allocation7 + $0x254] ss:$8 sps:$4 sm:$0xff]  }
  0x87   :  { %v12773_v6 = vpack.c.bf16 %v798_v61, %v792_v56  ;;  %v805_v37 = vrot.slane %v12805_v33, 2  ;;  %v11644_v39 = vld [vmem:[#allocation7 + $0x250] ss:$8 sps:$4 sm:$0xff]   ;;  %v477_v61 = vrot.slane %v139_v42, 1 }
  0x88   :  { %3720 = vmatpush2.bf16.msra.mxu0 %v11612_v1  ;;  %v11637_v1 = vld [vmem:[#allocation7 + $0x374] ss:$8 sps:$4 sm:$0xff]   ;;  %v460_v27 = vsel %vm445_vm0, %v458_v50, %v459_v60  ;;  %v471_v60 = vrot.slane %v135_v41, 1 }
  0x89   :  { %3833 = vmatpush2.bf16.msra.mxu1 %v11613_v8  ;;  %3721 = vmatprep.subr.bf16.mxu0 %v11614_v13  ;;  %v11402_v8 = vpack.c.bf16 %v12687_v0, %v12682_v63  ;;  %v136_v13 = vld [vmem:[%s15818_s0 + $0x98] sm:$0x3]  ;;  %v795_v63 = vsel %vm774_vm1, %v793_v55, %v794_v62  ;;  %v11649_v50 = vld [vmem:[#allocation7 + $0x354] ss:$8 sps:$4 sm:$0xff]   ;;  %v12833_v55 = vld [vmem:[%s15818_s0 + $0xc8] sm:$0xff] }
  0x8a   :  { %3834 = vmatprep.subr.bf16.mxu1 %v11616_v14  ;;  %v11404_v14 = vpack.c.bf16 %v454_v49, %v448_v48  ;;  %v803_v0 = vrot.slane %v136_v13, 2  ;;  %v474_v31 = vrot.slane %v136_v13, 1  ;;  %v12809_v38 = vpack.c.bf16 %v795_v63, %v789_v7  ;;  %v12843_v62 = vld [vmem:[%s15818_s0 + $0xe8] sm:$0xff]  ;;  %v12858_v13 = vld [vmem:[%s15818_s0 + $0xc0] sm:$0xff] }
  0x8b   :  { %v806_v48 = vrot.slane %v139_v42, 2  ;;  %v11655_v7 = vld [vmem:[#allocation7 + $0x344] ss:$8 sps:$4 sm:$0xff]   ;;  %v12867_v63 = vpack.c.bf16 %v12771_v5, %v12766_v4 }
  0x8c   :  { %3722 = vmatpush2.bf16.msra.mxu0 %v11618_v19  ;;  %v11640_v19 = vld [vmem:[#allocation7 + $0x264] ss:$8 sps:$4 sm:$0xff]   ;;  %v804_v40 = vsel %vm774_vm1, %v802_v11, %v803_v0 }
  0x8d   :  { %3835 = vmatpush2.bf16.msra.mxu1 %v11619_v20  ;;  %3723 = vmatprep.subr.bf16.mxu0 %v11620_v22  ;;  %v12784_v20 = vpack.c.bf16 %v12723_v24, %v12718_v23  ;;  %v140_v22 = vld [vmem:[%s15818_s0 + $0xb8] sm:$0x3]  ;;  %v12798_v23 = vld [vmem:[%s15818_s0 + $0x80] sm:$0xff]  ;;  %v466_v24 = vsel %vm445_vm0, %v464_v54, %v465_v3  ;;  %v476_v54 = vrot.slane %v12805_v33, 1 }
  0x8e   :  { %3836 = vmatprep.subr.bf16.mxu1 %v11622_v25  ;;  %v11643_v25 = vld [vmem:[#allocation7 + $0x364] ss:$8 sps:$4 sm:$0xff]   ;;  %v480_v32 = vrot.slane %v140_v22, 1  ;;  %v799_v36 = vrot.slane %v12798_v23, 2  ;;  %v809_v44 = vrot.slane %v140_v22, 2  ;;  %v12822_v49 = vpack.c.bf16 %v466_v24, %v460_v27 }
  0x8f   :  { %v470_v52 = vrot.slane %v12798_v23, 1  ;;  %v11652_v3 = vld [vmem:[#allocation7 + $0x244] ss:$8 sps:$4 sm:$0xff]   ;;  %v11653_v22 = vld [vmem:[#allocation7 + $0x340] ss:$8 sps:$4 sm:$0xff]   ;;  %v478_v24 = vsel %vm445_vm0, %v476_v54, %v477_v61 }
  0x90   :  { %3724 = vmatpush2.bf16.msra.mxu0 %v11624_v28  ;;  %v473_v28 = vrot.slane %v12766_v4, 1  ;;  %15936 = vst [vmem:[#allocation23_spill] sm:$0xff] %v12822_v49  ;;  %v11661_v4 = vld [vmem:[#allocation7 + $0x334] ss:$8 sps:$4 sm:$0xff]   ;;  %v11667_v61 = vld [vmem:[#allocation7 + $0x324] ss:$8 sps:$4 sm:$0xff]  }
  0x91   :  { %3837 = vmatpush2.bf16.msra.mxu1 %v11625_v29  ;;  %3725 = vmatprep.subr.bf16.mxu0 %v11626_v34  ;;  %v479_v29 = vrot.slane %v12771_v5, 1  ;;  %v11638_v34 = vld [vmem:[#allocation7 + $0x260] ss:$8 sps:$4 sm:$0xff]   ;;  %v820_v5 = vrot.slane %v12843_v62, 2 }
  0x92   :  { %3838 = vmatprep.subr.bf16.mxu1 %v11628_v35  ;;  %v11641_v35 = vld [vmem:[#allocation7 + $0x360] ss:$8 sps:$4 sm:$0xff]   ;;  %v475_v51 = vsel %vm445_vm0, %v473_v28, %v474_v31  ;;  %v143_v28 = vld [vmem:[%s15818_s0 + $0xd0] sm:$0x3]  ;;  %v811_v31 = vrot.slane %v12858_v13, 2 }
  0x93   :  { %v481_v59 = vsel %vm445_vm0, %v479_v29, %v480_v32  ;;  %v472_v29 = vsel %vm445_vm0, %v470_v52, %v471_v60  ;;  %v147_v32 = vld [vmem:[%s15818_s0 + $0xf0] sm:$0x3]  ;;  %v11664_v60 = vld [vmem:[#allocation7 + $0x224] ss:$8 sps:$4 sm:$0xff]  }
  0x94   :  { %3726 = vmatpush2.bf16.msra.mxu0 %v11630_v47  ;;  %v800_v47 = vrot.slane %v135_v41, 2  ;;  %v12869_v0 = vpack.c.bf16 %v481_v59, %v475_v51  ;;  %v483_v41 = vrot.slane %v143_v28, 1  ;;  %v12894_v51 = vpack.c.bf16 %v12805_v33, %v12798_v23  ;;  %v12908_v23 = vld [vmem:[%s15818_s0 + $0x128] sm:$0xff]  ;;  %v152_v33 = vld [vmem:[%s15818_s0 + $0x118] sm:$0x3] }
  0x95   :  { %3839 = vmatpush2.bf16.msra.mxu1 %v11631_v53  ;;  %3921 = vmatprep.subr.bf16.mxu0 %v11634_v58  ;;  %v810_v53 = vsel %vm774_vm1, %v808_v30, %v809_v44  ;;  %v807_v58 = vsel %vm774_vm1, %v805_v37, %v806_v48  ;;  %v11658_v30 = vld [vmem:[#allocation7 + $0x234] ss:$8 sps:$4 sm:$0xff]   ;;  %v812_v44 = vrot.slane %v143_v28, 2  ;;  %v12896_v52 = vpack.c.bf16 %v478_v24, %v472_v29  ;;  %v12940_v24 = vld [vmem:[%s15818_s0 + $0x120] sm:$0xff] }
  0x96   :  { %4034 = vmatprep.subr.bf16.mxu1 %v11637_v1  ;;  %v12835_v56 = vpack.c.bf16 %v810_v53, %v804_v40  ;;  %v801_v57 = vsel %vm774_vm1, %v799_v36, %v800_v47  ;;  %v144_v1 = vld [vmem:[%s15818_s0 + $0xd8] sm:$0x3]  ;;  %15937 = vst [vmem:[#allocation24_spill] sm:$0xff] %v12869_v0  ;;  %v489_v47 = vrot.slane %v147_v32, 1  ;;  %v498_v28 = vrot.slane %v152_v33, 1 }
  0x97   :  { %3728 = vmatmul.mubr.bf16.vlgmr.msra.gmra.mxu0 %v11402_v8  ;;  %v12848_v2 = vpack.c.bf16 %v807_v58, %v801_v57  ;;  %v148_v8 = vld [vmem:[%s15818_s0 + $0xf8] sm:$0x3]  ;;  %v486_v11 = vrot.slane %v144_v1, 1  ;;  %v815_v37 = vrot.slane %v144_v1, 2  ;;  %15938 = vst [vmem:[#allocation25_spill] sm:$0xff] %v12896_v52  ;;  %v813_v54 = vsel %vm774_vm1, %v811_v31, %v812_v44 }
  0x98   :  { %3841 = vmatmul.mubr.bf16.vlgmr.msra.gmra.mxu1 %v11404_v14  ;;  %3922 = vmatpush1.bf16.msra.mxu0 %v11632_v9  ;;  %v485_v9 = vrot.slane %v12833_v55, 1  ;;  %v12863_v14 = vld [vmem:[%s15818_s0 + $0xe0] sm:$0xff]  ;;  %v492_v27 = vrot.slane %v148_v8, 1  ;;  %v821_v42 = vrot.slane %v148_v8, 2  ;;  %v11656_v53 = vld [vmem:[#allocation7 + $0x230] ss:$8 sps:$4 sm:$0xff]   ;;  %v12918_v1 = vpack.c.bf16 %v12843_v62, %v12833_v55 }
  0x99   :  { %4035 = vmatpush1.bf16.msra.mxu1 %v11635_v10  ;;  %3923 = vmatprep.subr.bf16.mxu0 %v11640_v19  ;;  %v814_v10 = vrot.slane %v12833_v55, 2  ;;  %v11650_v19 = vld [vmem:[#allocation7 + $0x240] ss:$8 sps:$4 sm:$0xff]   ;;  %v817_v36 = vrot.slane %v12863_v14, 2  ;;  %v11659_v57 = vld [vmem:[#allocation7 + $0x330] ss:$8 sps:$4 sm:$0xff]  }
  0x9a   :  { %4036 = vmatprep.subr.bf16.mxu1 %v11643_v25  ;;  %3737 = vmatprep.mubr.bf16.mxu0 %v12784_v20  ;;  %v491_v25 = vrot.slane %v12843_v62, 1  ;;  %v487_v40 = vsel %vm445_vm0, %v485_v9, %v486_v11  ;;  %v11662_v8 = vld [vmem:[#allocation7 + $0x220] ss:$8 sps:$4 sm:$0xff]   ;;  %v11670_v62 = vld [vmem:[#allocation7 + $0x214] ss:$8 sps:$4 sm:$0xff]  }
  0x9b   :  { %3850 = vmatprep.mubr.bf16.mxu1 %v12790_v26  ;;  %v816_v48 = vsel %vm774_vm1, %v814_v10, %v815_v37  ;;  %v11665_v9 = vld [vmem:[#allocation7 + $0x320] ss:$8 sps:$4 sm:$0xff]   ;;  %v827_v37 = vrot.slane %v152_v33, 2 }
  0x9c   :  { %3924 = vmatpush1.bf16.msra.mxu0 %v11638_v34  ;;  %v482_v34 = vrot.slane %v12858_v13, 1  ;;  %v12932_v55 = vld [vmem:[%s15818_s0 + $0x100] sm:$0xff]  ;;  %v158_v33 = vld [vmem:[%s15818_s0 + $0x148] sm:$0xff] }
  0x9d   :  { %4037 = vmatpush1.bf16.msra.mxu1 %v11641_v35  ;;  %3925 = vmatprep.subr.bf16.mxu0 %v11646_v46  ;;  %v488_v35 = vrot.slane %v12863_v14, 1  ;;  %v493_v46 = vsel %vm445_vm0, %v491_v25, %v492_v27  ;;  %v11673_v25 = vld [vmem:[#allocation7 + $0x314] ss:$8 sps:$4 sm:$0xff]   ;;  %v503_v27 = vrot.slane %v12908_v23, 1 }
  0x9e   :  { %4038 = vmatprep.subr.bf16.mxu1 %v11649_v50  ;;  %v818_v50 = vrot.slane %v147_v32, 2  ;;  %v484_v10 = vsel %vm445_vm0, %v482_v34, %v483_v41  ;;  %v12951_v32 = vpack.c.bf16 %v12863_v14, %v12858_v13  ;;  %v11671_v41 = vld [vmem:[#allocation7 + $0x310] ss:$8 sps:$4 sm:$0xff]   ;;  %v500_v13 = vrot.slane %v12940_v24, 1 }
  0x9f   :  { %3738 = vmatmul.mubr.bf16.gmra.mxu0 %v12820_v45  ;;  %v490_v11 = vsel %vm445_vm0, %v488_v35, %v489_v47  ;;  %v829_v35 = vrot.slane %v12940_v24, 2 }
  0xa0   :  { %3851 = vmatmul.mubr.bf16.gmra.mxu1 %v12822_v49  ;;  %3926 = vmatpush1.bf16.msra.mxu0 %v11644_v39  ;;  %v12901_v39 = vld [vmem:[%s15818_s0 + $0x108] sm:$0xff]  ;;  %v819_v59 = vsel %vm774_vm1, %v817_v36, %v818_v50  ;;  %v12953_v34 = vpack.c.bf16 %v490_v11, %v484_v10  ;;  %v155_v36 = vld [vmem:[%s15818_s0 + $0x130] sm:$0x3] }
  0xa1   :  { %4039 = vmatpush1.bf16.msra.mxu1 %v11647_v43  ;;  %3927 = vmatprep.subr.bf16.mxu0 %v11652_v3  ;;  %v822_v43 = vsel %vm774_vm1, %v820_v5, %v821_v42  ;;  %v12920_v3 = vpack.c.bf16 %v493_v46, %v487_v40  ;;  %v151_v5 = vld [vmem:[%s15818_s0 + $0x110] sm:$0x3]  ;;  %v12947_v31 = vpack.c.bf16 %v819_v59, %v813_v54  ;;  %v494_v42 = vrot.slane %v12932_v55, 1  ;;  %v11676_v46 = vld [vmem:[#allocation7 + $0x204] ss:$8 sps:$4 sm:$0xff]  }
  0xa2   :  { %4040 = vmatprep.subr.bf16.mxu1 %v11655_v7  ;;  %3747 = vmatprep.mubr.bf16.mxu0 %v12867_v63  ;;  %v12913_v58 = vpack.c.bf16 %v822_v43, %v816_v48  ;;  %v156_v7 = vld [vmem:[%s15818_s0 + $0x138] sm:$0x3]  ;;  %15940 = vst [vmem:[#allocation27_spill] sm:$0xff] %v12953_v34  ;;  %v824_v44 = vrot.slane %v151_v5, 2  ;;  %v11679_v43 = vld [vmem:[#allocation7 + $0x304] ss:$8 sps:$4 sm:$0xff]  }
  0xa3   :  { %3860 = vmatprep.mubr.bf16.mxu1 %v12869_v0  ;;  %15939 = vst [vmem:[#allocation26_spill] sm:$0xff] %v12920_v3  ;;  %v504_v29 = vrot.slane %v156_v7, 1  ;;  %v11668_v40 = vld [vmem:[#allocation7 + $0x210] ss:$8 sps:$4 sm:$0xff]   ;;  %v833_v14 = vrot.slane %v156_v7, 2  ;;  %v495_v54 = vrot.slane %v151_v5, 1 }
  0xa4   :  { %3928 = vmatpush1.bf16.msra.mxu0 %v11650_v19  ;;  %v497_v19 = vrot.slane %v12901_v39, 1  ;;  %v509_v7 = vrot.slane %v158_v33, 1  ;;  %v11715_v0 = vld [vmem:[#allocation7 + $0x3a4] ss:$8 sps:$4 sm:$0xff]  }
  0xa5   :  { %4041 = vmatpush1.bf16.msra.mxu1 %v11653_v22  ;;  %3929 = vmatprep.subr.bf16.mxu0 %v11658_v30  ;;  %v826_v22 = vrot.slane %v12901_v39, 2  ;;  %v832_v30 = vrot.slane %v12908_v23, 2  ;;  %v505_v48 = vsel %vm445_vm0, %v503_v27, %v504_v29 }
  0xa6   :  { %4042 = vmatprep.subr.bf16.mxu1 %v11661_v4  ;;  %v823_v4 = vrot.slane %v12932_v55, 2  ;;  %v499_v47 = vsel %vm445_vm0, %v497_v19, %v498_v28  ;;  %v11674_v19 = vld [vmem:[#allocation7 + $0x200] ss:$8 sps:$4 sm:$0xff]   ;;  %v164_v28 = vld [vmem:[%s15818_s0 + $0x178] sm:$0x3] }
  0xa7   :  { %3748 = vmatmul.mubr.bf16.gmra.mxu0 %v12894_v51  ;;  %v828_v50 = vsel %vm774_vm1, %v826_v22, %v827_v37  ;;  %v834_v59 = vsel %vm774_vm1, %v832_v30, %v833_v14  ;;  %v11677_v22 = vld [vmem:[#allocation7 + $0x300] ss:$8 sps:$4 sm:$0xff]   ;;  %v838_v30 = vrot.slane %v158_v33, 2  ;;  %v516_v5 = vrot.slane %v164_v28, 1 }
  0xa8   :  { %3861 = vmatmul.mubr.bf16.gmra.mxu1 %v12896_v52  ;;  %3930 = vmatpush1.bf16.msra.mxu0 %v11656_v53  ;;  %v830_v53 = vrot.slane %v155_v36, 2  ;;  %v12982_v10 = vpack.c.bf16 %v834_v59, %v828_v50  ;;  %v11680_v59 = vld [vmem:[#allocation7 + $0x2f0] ss:$8 sps:$4 sm:$0xff]   ;;  %v11701_v52 = vld [vmem:[#allocation7 + $0x3c0] ss:$8 sps:$4 sm:$0xff]  }
  0xa9   :  { %4043 = vmatpush1.bf16.msra.mxu1 %v11659_v57  ;;  %3931 = vmatprep.subr.bf16.mxu0 %v11664_v60  ;;  %v501_v57 = vrot.slane %v155_v36, 1  ;;  %v825_v60 = vsel %vm774_vm1, %v823_v4, %v824_v44  ;;  %v163_v44 = vld [vmem:[%s15818_s0 + $0x170] sm:$0x3] }
  0xaa   :  { %4044 = vmatprep.subr.bf16.mxu1 %v11667_v61  ;;  %3757 = vmatprep.mubr.bf16.mxu0 %v12918_v1  ;;  %v162_v61 = vld [vmem:[%s15818_s0 + $0x168] sm:$0xff]  ;;  %v831_v11 = vsel %vm774_vm1, %v829_v35, %v830_v53  ;;  %v496_v35 = vsel %vm445_vm0, %v494_v42, %v495_v54  ;;  %v513_v54 = vrot.slane %v163_v44, 1  ;;  %v842_v21 = vrot.slane %v163_v44, 2  ;;  %v11694_v44 = vld [vmem:[#allocation7 + $0x2d4] ss:$8 sps:$4 sm:$0xff]  }
  0xab   :  { %3870 = vmatprep.mubr.bf16.mxu1 %v12920_v3  ;;  %v515_v27 = vrot.slane %v162_v61, 1  ;;  %v844_v4 = vrot.slane %v162_v61, 2  ;;  %v502_v36 = vsel %vm445_vm0, %v500_v13, %v501_v57  ;;  %v13013_v42 = vpack.c.bf16 %v831_v11, %v825_v60  ;;  %v11683_v11 = vld [vmem:[#allocation7 + $0x3f0] ss:$8 sps:$4 sm:$0xff]   ;;  %v11698_v3 = vld [vmem:[#allocation7 + $0x2c0] ss:$8 sps:$4 sm:$0xff]  }
  0xac   :  { %3932 = vmatpush1.bf16.msra.mxu0 %v11662_v8  ;;  %v160_v8 = vld [vmem:[%s15818_s0 + $0x158] sm:$0x3]  ;;  %v13023_v57 = vpack.c.bf16 %v502_v36, %v496_v35 }
  0xad   :  { %4045 = vmatpush1.bf16.msra.mxu1 %v11665_v9  ;;  %3933 = vmatprep.subr.bf16.mxu0 %v11670_v62  ;;  %v12980_v9 = vld [vmem:[%s15818_s0 + $0x140] sm:$0xff]  ;;  %v12987_v62 = vpack.c.bf16 %v12908_v23, %v12901_v39  ;;  %v510_v29 = vrot.slane %v160_v8, 1  ;;  %v159_v23 = vld [vmem:[%s15818_s0 + $0x150] sm:$0x3]  ;;  %15942 = vst [vmem:[#allocation29_spill] sm:$0xff] %v13013_v42 }
  0xae   :  { %4046 = vmatprep.subr.bf16.mxu1 %v11673_v25  ;;  %v12989_v25 = vpack.c.bf16 %v505_v48, %v499_v47  ;;  %v12999_v39 = vld [vmem:[%s15818_s0 + $0x160] sm:$0xff]  ;;  %v506_v37 = vrot.slane %v12980_v9, 1  ;;  %v835_v14 = vrot.slane %v12980_v9, 2  ;;  %v11682_v47 = vld [vmem:[#allocation7 + $0x2f4] ss:$8 sps:$4 sm:$0xff]   ;;  %15943 = vst [vmem:[#allocation30_spill] sm:$0xff] %v13023_v57 }
  0xaf   :  { %3758 = vmatmul.mubr.bf16.gmra.mxu0 %v12951_v32  ;;  %v11685_v48 = vld [vmem:[#allocation7 + $0x3f4] ss:$8 sps:$4 sm:$0xff]   ;;  %v511_v50 = vsel %vm445_vm0, %v509_v7, %v510_v29  ;;  %v512_v13 = vrot.slane %v12999_v39, 1  ;;  %v841_v53 = vrot.slane %v12999_v39, 2  ;;  %v845_v7 = vrot.slane %v164_v28, 2  ;;  %v166_v28 = vld [vmem:[%s15818_s0 + $0x188] sm:$0xff] }
  0xb0   :  { %15941 = vst [vmem:[#allocation28_spill] sm:$0xff] %v12989_v25  ;;  %3871 = vmatmul.mubr.bf16.gmra.mxu1 %v12953_v34  ;;  %3934 = vmatpush1.bf16.msra.mxu0 %v11668_v40  ;;  %v517_v40 = vsel %vm445_vm0, %v515_v27, %v516_v5  ;;  %v836_v60 = vrot.slane %v159_v23, 2  ;;  %v13025_v27 = vpack.c.bf16 %v162_v61, %v158_v33  ;;  %v11686_v61 = vld [vmem:[#allocation7 + $0x2e0] ss:$8 sps:$4 sm:$0xff]   ;;  %v521_v35 = vrot.slane %v166_v28, 1 }
  0xb1   :  { %4047 = vmatpush1.bf16.msra.mxu1 %v11671_v41  ;;  %3935 = vmatprep.subr.bf16.mxu0 %v11676_v46  ;;  %v507_v41 = vrot.slane %v159_v23, 1  ;;  %v839_v46 = vrot.slane %v160_v8, 2  ;;  %v13027_v29 = vpack.c.bf16 %v517_v40, %v511_v50  ;;  %v11688_v8 = vld [vmem:[#allocation7 + $0x2e4] ss:$8 sps:$4 sm:$0xff]   ;;  %v514_v23 = vsel %vm445_vm0, %v512_v13, %v513_v54  ;;  %v168_v36 = vld [vmem:[%s15818_s0 + $0x198] sm:$0x3] }
  0xb2   :  { %4048 = vmatprep.subr.bf16.mxu1 %v11679_v43  ;;  %3767 = vmatprep.mubr.bf16.mxu0 %v12987_v62  ;;  %v13021_v43 = vpack.c.bf16 %v12940_v24, %v12932_v55  ;;  %v11691_v55 = vld [vmem:[#allocation7 + $0x3e4] ss:$8 sps:$4 sm:$0xff]   ;;  %v837_v33 = vsel %vm774_vm1, %v835_v14, %v836_v60  ;;  %v843_v14 = vsel %vm774_vm1, %v841_v53, %v842_v21  ;;  %v172_v50 = vld [vmem:[%s15818_s0 + $0x1b8] sm:$0x3]  ;;  %v522_v40 = vrot.slane %v168_v36, 1 }
  0xb3   :  { %3880 = vmatprep.mubr.bf16.mxu1 %v12989_v25  ;;  %15944 = vst [vmem:[#allocation31_spill] sm:$0xff] %v13027_v29  ;;  %v840_v5 = vsel %vm774_vm1, %v838_v30, %v839_v46  ;;  %v508_v24 = vsel %vm445_vm0, %v506_v37, %v507_v41  ;;  %v170_v30 = vld [vmem:[%s15818_s0 + $0x1a8] sm:$0xff]  ;;  %v13046_v37 = vld [vmem:[%s15818_s0 + $0x180] sm:$0xff]  ;;  %v850_v21 = vrot.slane %v166_v28, 2  ;;  %v528_v53 = vrot.slane %v172_v50, 1 }
  0xb4   :  { %3936 = vmatpush1.bf16.msra.mxu0 %v11674_v19  ;;  %v846_v19 = vsel %vm774_vm1, %v844_v4, %v845_v7  ;;  %v13059_v41 = vld [vmem:[%s15818_s0 + $0x1a0] sm:$0xff]  ;;  %v856_v13 = vrot.slane %v170_v30, 2  ;;  %v167_v54 = vld [vmem:[%s15818_s0 + $0x190] sm:$0x3]  ;;  %v13066_v46 = vpack.c.bf16 %v12999_v39, %v12980_v9  ;;  %v13068_v7 = vpack.c.bf16 %v514_v23, %v508_v24 }
  0xb5   :  { %4049 = vmatpush1.bf16.msra.mxu1 %v11677_v22  ;;  %3937 = vmatprep.subr.bf16.mxu0 %v11682_v47  ;;  %v11689_v22 = vld [vmem:[#allocation7 + $0x3e0] ss:$8 sps:$4 sm:$0xff]   ;;  %v13048_v4 = vpack.c.bf16 %v846_v19, %v840_v5  ;;  %v11697_v47 = vld [vmem:[#allocation7 + $0x3d4] ss:$8 sps:$4 sm:$0xff]   ;;  %v518_v60 = vrot.slane %v13046_v37, 1  ;;  %v847_v9 = vrot.slane %v13046_v37, 2 }
  0xb6   :  { %4050 = vmatprep.subr.bf16.mxu1 %v11685_v48  ;;  %v527_v48 = vrot.slane %v170_v30, 1  ;;  %15946 = vst [vmem:[#allocation33_spill] sm:$0xff] %v13068_v7  ;;  %v11692_v5 = vld [vmem:[#allocation7 + $0x2d0] ss:$8 sps:$4 sm:$0xff]   ;;  %v519_v39 = vrot.slane %v167_v54, 1  ;;  %v853_v23 = vrot.slane %v13059_v41, 2 }
  0xb7   :  { %15945 = vst [vmem:[#allocation32_spill] sm:$0xff] %v13048_v4  ;;  %3768 = vmatmul.mubr.bf16.gmra.mxu0 %v13021_v43  ;;  %v11695_v24 = vld [vmem:[#allocation7 + $0x3d0] ss:$8 sps:$4 sm:$0xff]   ;;  %v11700_v25 = vld [vmem:[#allocation7 + $0x2c4] ss:$8 sps:$4 sm:$0xff]   ;;  %v857_v34 = vrot.slane %v172_v50, 2 }
  0xb8   :  { %3881 = vmatmul.mubr.bf16.gmra.mxu1 %v13023_v57  ;;  %3938 = vmatpush2.bf16.msra.mxu0 %v11680_v59  ;;  %v524_v59 = vrot.slane %v13059_v41, 1  ;;  %v529_v19 = vsel %vm445_vm0, %v527_v48, %v528_v53  ;;  %v851_v57 = vrot.slane %v168_v36, 2  ;;  %v520_v53 = vsel %vm445_vm0, %v518_v60, %v519_v39  ;;  %v11704_v39 = vld [vmem:[#allocation7 + $0x2b0] ss:$8 sps:$4 sm:$0xff]  }
  0xb9   :  { %4051 = vmatpush2.bf16.msra.mxu1 %v11683_v11  ;;  %3939 = vmatprep.subr.bf16.mxu0 %v11688_v8  ;;  %v171_v11 = vld [vmem:[%s15818_s0 + $0x1b0] sm:$0x3]  ;;  %v523_v8 = vsel %vm445_vm0, %v521_v35, %v522_v40  ;;  %v11703_v35 = vld [vmem:[#allocation7 + $0x3c4] ss:$8 sps:$4 sm:$0xff]   ;;  %v13083_v40 = vpack.c.bf16 %v170_v30, %v166_v28  ;;  %v11706_v28 = vld [vmem:[#allocation7 + $0x2b4] ss:$8 sps:$4 sm:$0xff]  }
  0xba   :  { %4052 = vmatprep.subr.bf16.mxu1 %v11691_v55  ;;  %3777 = vmatprep.mubr.bf16.mxu0 %v13025_v27  ;;  %v13079_v55 = vpack.c.bf16 %v843_v14, %v837_v33  ;;  %v525_v16 = vrot.slane %v171_v11, 1  ;;  %v852_v33 = vsel %vm774_vm1, %v850_v21, %v851_v57  ;;  %v854_v14 = vrot.slane %v171_v11, 2  ;;  %v178_v30 = vld [vmem:[%s15818_s0 + $0x1e8] sm:$0xff] }
  0xbb   :  { %3890 = vmatprep.mubr.bf16.mxu1 %v13027_v29  ;;  %v848_v29 = vrot.slane %v167_v54, 2  ;;  %v13086_v48 = vpack.c.bf16 %v529_v19, %v523_v8  ;;  %v539_v21 = vrot.slane %v178_v30, 1  ;;  %v177_v8 = vld [vmem:[%s15818_s0 + $0x1e0] sm:$0xff] }
  0xbc   :  { %15947 = vst [vmem:[#allocation34_spill] sm:$0xff] %v13079_v55  ;;  %3940 = vmatpush2.bf16.msra.mxu0 %v11686_v61  ;;  %v174_v61 = vld [vmem:[%s15818_s0 + $0x1c8] sm:$0xff]  ;;  %v526_v57 = vsel %vm445_vm0, %v524_v59, %v525_v16  ;;  %v855_v50 = vsel %vm774_vm1, %v853_v23, %v854_v14  ;;  %v11709_v16 = vld [vmem:[#allocation7 + $0x3b4] ss:$8 sps:$4 sm:$0xff]   ;;  %v868_v59 = vrot.slane %v178_v30, 2 }
  0xbd   :  { %4053 = vmatpush2.bf16.msra.mxu1 %v11689_v22  ;;  %3941 = vmatprep.subr.bf16.mxu0 %v11694_v44  ;;  %15948 = vst [vmem:[#allocation35_spill] sm:$0xff] %v13086_v48  ;;  %v858_v22 = vsel %vm774_vm1, %v856_v13, %v857_v34  ;;  %v849_v36 = vsel %vm774_vm1, %v847_v9, %v848_v29  ;;  %v533_v44 = vrot.slane %v174_v61, 1  ;;  %v13106_v34 = vld [vmem:[%s15818_s0 + $0x1c0] sm:$0xff]  ;;  %v180_v13 = vld [vmem:[%s15818_s0 + $0x1f8] sm:$0x3]  ;;  %v862_v60 = vrot.slane %v174_v61, 2 }
  0xbe   :  { %4054 = vmatprep.subr.bf16.mxu1 %v11697_v47  ;;  %v176_v47 = vld [vmem:[%s15818_s0 + $0x1d8] sm:$0x3]  ;;  %v13108_v29 = vpack.c.bf16 %v858_v22, %v852_v33  ;;  %v540_v11 = vrot.slane %v180_v13, 1  ;;  %v13124_v9 = vpack.c.bf16 %v13059_v41, %v13046_v37  ;;  %v859_v19 = vrot.slane %v13106_v34, 2  ;;  %v179_v23 = vld [vmem:[%s15818_s0 + $0x1f0] sm:$0x3] }
  0xbf   :  { %3778 = vmatmul.mubr.bf16.gmra.mxu0 %v13066_v46  ;;  %v534_v54 = vrot.slane %v176_v47, 1  ;;  %v11712_v33 = vld [vmem:[#allocation7 + $0x2a4] ss:$8 sps:$4 sm:$0xff]   ;;  %v13135_v37 = vpack.c.bf16 %v855_v50, %v849_v36  ;;  %v536_v41 = vrot.slane %v177_v8, 1  ;;  %v869_v49 = vrot.slane %v180_v13, 2 }
  0xc0   :  { %3891 = vmatmul.mubr.bf16.gmra.mxu1 %v13068_v7  ;;  %15949 = vst [vmem:[#allocation36_spill] sm:$0xff] %v13108_v29  ;;  %3942 = vmatpush2.bf16.msra.mxu0 %v11692_v5  ;;  %v175_v5 = vld [vmem:[%s15818_s0 + $0x1d0] sm:$0x3]  ;;  %v541_v22 = vsel %vm445_vm0, %v539_v21, %v540_v11  ;;  %v863_v7 = vrot.slane %v176_v47, 2  ;;  %v13137_v29 = vpack.c.bf16 %v178_v30, %v174_v61  ;;  %v866_v21 = vrot.slane %v179_v23, 2 }
  0xc1   :  { %4055 = vmatpush2.bf16.msra.mxu1 %v11695_v24  ;;  %3943 = vmatprep.subr.bf16.mxu0 %v11700_v25  ;;  %v13126_v25 = vpack.c.bf16 %v526_v57, %v520_v53  ;;  %v530_v24 = vrot.slane %v13106_v34, 1  ;;  %v535_v14 = vsel %vm445_vm0, %v533_v44, %v534_v54  ;;  %15950 = vst [vmem:[#allocation37_spill] sm:$0xff] %v13135_v37  ;;  %v865_v53 = vrot.slane %v177_v8, 2  ;;  %v11713_v61 = vld [vmem:[#allocation7 + $0x3a0] ss:$8 sps:$4 sm:$0xff]  }
  0xc2   :  { %4056 = vmatprep.subr.bf16.mxu1 %v11703_v35  ;;  %3787 = vmatprep.mubr.bf16.mxu0 %v13083_v40  ;;  %v11707_v35 = vld [vmem:[#allocation7 + $0x3b0] ss:$8 sps:$4 sm:$0xff]   ;;  %v537_v57 = vrot.slane %v179_v23, 1  ;;  %v860_v26 = vrot.slane %v175_v5, 2  ;;  %v13139_v55 = vpack.c.bf16 %v541_v22, %v535_v14  ;;  %v864_v44 = vsel %vm774_vm1, %v862_v60, %v863_v7  ;;  %v11718_v47 = vld [vmem:[#allocation7 + $0x294] ss:$8 sps:$4 sm:$0xff]  }
  0xc3   :  { %3900 = vmatprep.mubr.bf16.mxu1 %v13086_v48  ;;  %v531_v48 = vrot.slane %v175_v5, 1  ;;  %v870_v36 = vsel %vm774_vm1, %v868_v59, %v869_v49  ;;  %v867_v7 = vsel %vm774_vm1, %v865_v53, %v866_v21  ;;  %v11719_v54 = vld [vmem:[#allocation7 + $0x390] ss:$8 sps:$4 sm:$0xff]   ;;  %v11724_v60 = vld [vmem:[#allocation7 + $0x284] ss:$8 sps:$4 sm:$0xff]   ;;  %v15952_v5 = vpack.c.bf16 %v12703_v15, %v12700_v12 }
  0xc4   :  { %3944 = vmatpush2.bf16.msra.mxu0 %v11698_v3  ;;  %v538_v30 = vsel %vm445_vm0, %v536_v41, %v537_v57  ;;  %v13148_v50 = vpack.c.bf16 %v870_v36, %v864_v44  ;;  %v11722_v59 = vld [vmem:[#allocation7 + $0x280] ss:$8 sps:$4 sm:$0xff]   ;;  %v11739_v23 = vld [vmem:[#allocation7 + $0x564] ss:$8 sps:$4 sm:$0xff]   ;;  %v11742_v15 = vld [vmem:[#allocation7 + $0x454] ss:$8 sps:$4 sm:$0xff]  }
  0xc5   :  { %4057 = vmatpush2.bf16.msra.mxu1 %v11701_v52  ;;  %3945 = vmatprep.subr.bf16.mxu0 %v11706_v28  ;;  %v11710_v52 = vld [vmem:[#allocation7 + $0x2a0] ss:$8 sps:$4 sm:$0xff]   ;;  %v532_v3 = vsel %vm445_vm0, %v530_v24, %v531_v48  ;;  %v861_v28 = vsel %vm774_vm1, %v859_v19, %v860_v26  ;;  %v13156_v26 = vpack.c.bf16 %v177_v8, %v13106_v34  ;;  %v11716_v48 = vld [vmem:[#allocation7 + $0x290] ss:$8 sps:$4 sm:$0xff]   ;;  %v11730_v34 = vld [vmem:[#allocation7 + $0x474] ss:$8 sps:$4 sm:$0xff]  }
  0xc6   :  { %4058 = vmatprep.subr.bf16.mxu1 %v11709_v16  ;;  %15951 = vst [vmem:[#allocation38_spill] sm:$0xff] %v13148_v50  ;;  %v11721_v16 = vld [vmem:[#allocation7 + $0x394] ss:$8 sps:$4 sm:$0xff]   ;;  %v13151_v13 = vpack.c.bf16 %v867_v7, %v861_v28  ;;  %v13158_v49 = vpack.c.bf16 %v538_v30, %v532_v3  ;;  %v11725_v11 = vld [vmem:[#allocation7 + $0x380] ss:$8 sps:$4 sm:$0xff]  }
  0xc7   :  { %3788 = vmatmul.mubr.bf16.gmra.mxu0 %v13124_v9  ;;  %v11733_v8 = vld [vmem:[#allocation7 + $0x574] ss:$8 sps:$4 sm:$0xff]   ;;  %v11731_v24 = vld [vmem:[#allocation7 + $0x570] ss:$8 sps:$4 sm:$0xff]   ;;  %v11736_v19 = vld [vmem:[#allocation7 + $0x464] ss:$8 sps:$4 sm:$0xff]  }
  0xc8   :  { %3901 = vmatmul.mubr.bf16.gmra.mxu1 %v13126_v25  ;;  %3946 = vmatpush2.bf16.msra.mxu0 %v11704_v39  ;;  %v11728_v39 = vld [vmem:[#allocation7 + $0x470] ss:$8 sps:$4 sm:$0xff]   ;;  %v11737_v12 = vld [vmem:[#allocation7 + $0x560] ss:$8 sps:$4 sm:$0xff]   ;;  %v11754_v53 = vld [vmem:[#allocation7 + $0x434] ss:$8 sps:$4 sm:$0xff]  }
  0xc9   :  { %4059 = vmatpush2.bf16.msra.mxu1 %v11707_v35  ;;  %3947 = vmatprep.subr.bf16.mxu0 %v11712_v33  ;;  %v15953_v35 = vpack.c.bf16 %v12711_v18, %v12708_v17  ;;  %v11734_v33 = vld [vmem:[#allocation7 + $0x460] ss:$8 sps:$4 sm:$0xff]   ;;  %v11740_v14 = vld [vmem:[#allocation7 + $0x450] ss:$8 sps:$4 sm:$0xff]   ;;  %v11748_v17 = vld [vmem:[#allocation7 + $0x444] ss:$8 sps:$4 sm:$0xff]  }
  0xca   :  { %4060 = vmatprep.subr.bf16.mxu1 %v11715_v0  ;;  %3797 = vmatprep.mubr.bf16.mxu0 %v13137_v29  ;;  %v11727_v0 = vld [vmem:[#allocation7 + $0x384] ss:$8 sps:$4 sm:$0xff]   ;;  %v11743_v22 = vld [vmem:[#allocation7 + $0x550] ss:$8 sps:$4 sm:$0xff]   ;;  %v11749_v41 = vld [vmem:[#allocation7 + $0x540] ss:$8 sps:$4 sm:$0xff]  }
  0xcb   :  { %3910 = vmatprep.mubr.bf16.mxu1 %v13139_v55  ;;  %v11751_v18 = vld [vmem:[#allocation7 + $0x544] ss:$8 sps:$4 sm:$0xff]   ;;  %v11757_v57 = vld [vmem:[#allocation7 + $0x534] ss:$8 sps:$4 sm:$0xff]   ;;  %v11752_v44 = vld [vmem:[#allocation7 + $0x430] ss:$8 sps:$4 sm:$0xff]  }
  0xcc   :  { %3948 = vmatpush2.bf16.msra.mxu0 %v11710_v52  ;;  %v11755_v21 = vld [vmem:[#allocation7 + $0x530] ss:$8 sps:$4 sm:$0xff]   ;;  %v11760_v52 = vld [vmem:[#allocation7 + $0x424] ss:$8 sps:$4 sm:$0xff]   ;;  %v11758_v36 = vld [vmem:[#allocation7 + $0x420] ss:$8 sps:$4 sm:$0xff]  }
  0xcd   :  { %4061 = vmatpush2.bf16.msra.mxu1 %v11713_v61  ;;  %3949 = vmatprep.subr.bf16.mxu0 %v11718_v47  ;;  %v11763_v3 = vld [vmem:[#allocation7 + $0x524] ss:$8 sps:$4 sm:$0xff]   ;;  %v11761_v28 = vld [vmem:[#allocation7 + $0x520] ss:$8 sps:$4 sm:$0xff]   ;;  %v11766_v61 = vld [vmem:[#allocation7 + $0x414] ss:$8 sps:$4 sm:$0xff]  }
  0xce   :  { %4062 = vmatprep.subr.bf16.mxu1 %v11721_v16  ;;  %v11769_v30 = vld [vmem:[#allocation7 + $0x514] ss:$8 sps:$4 sm:$0xff]   ;;  %v11764_v47 = vld [vmem:[#allocation7 + $0x410] ss:$8 sps:$4 sm:$0xff]   ;;  %v11772_v16 = vld [vmem:[#allocation7 + $0x404] ss:$8 sps:$4 sm:$0xff]  }
  0xcf   :  { %3798 = vmatmul.mubr.bf16.gmra.mxu0 %v13156_v26  ;;  %v11767_v7 = vld [vmem:[#allocation7 + $0x510] ss:$8 sps:$4 sm:$0xff]  }
  0xd0   :  { %3911 = vmatmul.mubr.bf16.gmra.mxu1 %v13158_v49  ;;  %3950 = vmatpush2.bf16.msra.mxu0 %v11716_v48  ;;  %v11775_v48 = vld [vmem:[#allocation7 + $0x504] ss:$8 sps:$4 sm:$0xff]  }
  0xd1   :  { %4063 = vmatpush2.bf16.msra.mxu1 %v11719_v54  ;;  %3951 = vmatprep.subr.bf16.mxu0 %v11724_v60  ;;  %v11770_v54 = vld [vmem:[#allocation7 + $0x400] ss:$8 sps:$4 sm:$0xff]  }
  0xd2   :  { %4064 = vmatprep.subr.bf16.mxu1 %v11727_v0  ;;  %3953 = vmatprep.mubr.bf16.mxu0 %v15952_v5  ;;  %v11773_v60 = vld [vmem:[#allocation7 + $0x500] ss:$8 sps:$4 sm:$0xff]   ;;  %v11778_v0 = vld [vmem:[#allocation7 + $0x4f4] ss:$8 sps:$4 sm:$0xff]   ;;  %v11787_v5 = vld [vmem:[#allocation7 + $0x5e4] ss:$8 sps:$4 sm:$0xff]  }
  0xd3   :  { %4066 = vmatprep.mubr.bf16.mxu1 %v12784_v20  ;;  %v11745_v20 = vld [vmem:[#allocation7 + $0x554] ss:$8 sps:$4 sm:$0xff]  }
  0xd4   :  { %3952 = vmatpush2.bf16.msra.mxu0 %v11722_v59  ;;  %v11781_v59 = vld [vmem:[#allocation7 + $0x5f4] ss:$8 sps:$4 sm:$0xff]  }
  0xd5   :  { %4065 = vmatpush2.bf16.msra.mxu1 %v11725_v11  ;;  %4147 = vmatprep.subr.bf16.mxu0 %v11730_v34  ;;  %v11776_v11 = vld [vmem:[#allocation7 + $0x4f0] ss:$8 sps:$4 sm:$0xff]  }
  0xd6   :  { %4260 = vmatprep.subr.bf16.mxu1 %v11733_v8  ;;  %v11779_v34 = vld [vmem:[#allocation7 + $0x5f0] ss:$8 sps:$4 sm:$0xff]   ;;  %v11784_v8 = vld [vmem:[#allocation7 + $0x4e4] ss:$8 sps:$4 sm:$0xff]  }
  0xd7   :  { %3954 = vmatmul.mubr.bf16.vlgmr.msra.gmra.mxu0 %v15953_v35  ;;  %v11788_v35 = vld [vmem:[#allocation7 + $0x4d0] ss:$8 sps:$4 sm:$0xff]  }
  0xd8   :  { %4067 = vmatmul.mubr.bf16.vlgmr.msra.gmra.mxu1 %v12820_v45  ;;  %4148 = vmatpush1.bf16.msra.mxu0 %v11728_v39  ;;  %v11746_v45 = vld [vmem:[#allocation7 + $0x440] ss:$8 sps:$4 sm:$0xff]  }
  0xd9   :  { %4261 = vmatpush1.bf16.msra.mxu1 %v11731_v24  ;;  %4149 = vmatprep.subr.bf16.mxu0 %v11736_v19  ;;  %v11782_v39 = vld [vmem:[#allocation7 + $0x4e0] ss:$8 sps:$4 sm:$0xff]   ;;  %v11790_v19 = vld [vmem:[#allocation7 + $0x4d4] ss:$8 sps:$4 sm:$0xff]  }
  0xda   :  { %4262 = vmatprep.subr.bf16.mxu1 %v11739_v23  ;;  %3963 = vmatprep.mubr.bf16.mxu0 %v12773_v6  ;;  %v11785_v24 = vld [vmem:[#allocation7 + $0x5e0] ss:$8 sps:$4 sm:$0xff]   ;;  %v11793_v23 = vld [vmem:[#allocation7 + $0x5d4] ss:$8 sps:$4 sm:$0xff]  }
  0xdb   :  { %4076 = vmatprep.mubr.bf16.mxu1 %v12867_v63 }
  0xdc   :  { %4150 = vmatpush1.bf16.msra.mxu0 %v11734_v33  ;;  %v11791_v33 = vld [vmem:[#allocation7 + $0x5d0] ss:$8 sps:$4 sm:$0xff]  }
  0xdd   :  { %4263 = vmatpush1.bf16.msra.mxu1 %v11737_v12  ;;  %4151 = vmatprep.subr.bf16.mxu0 %v11742_v15  ;;  %v11796_v12 = vld [vmem:[#allocation7 + $0x4c4] ss:$8 sps:$4 sm:$0xff]  }
  0xde   :  { %4264 = vmatprep.subr.bf16.mxu1 %v11745_v20  ;;  %v11799_v15 = vld [vmem:[#allocation7 + $0x5c4] ss:$8 sps:$4 sm:$0xff]  }
  0xdf   :  { %3964 = vmatmul.mubr.bf16.gmra.mxu0 %v12809_v38  ;;  %v15954_v20 = vld [vmem:[#allocation34_spill] sm:$0xff] }
  0xe0   :  { %4077 = vmatmul.mubr.bf16.gmra.mxu1 %v12894_v51  ;;  %4152 = vmatpush1.bf16.msra.mxu0 %v11740_v14  ;;  %v11794_v14 = vld [vmem:[#allocation7 + $0x4c0] ss:$8 sps:$4 sm:$0xff]  }
  0xe1   :  { %4265 = vmatpush1.bf16.msra.mxu1 %v11743_v22  ;;  %4153 = vmatprep.subr.bf16.mxu0 %v11748_v17  ;;  %v11797_v22 = vld [vmem:[#allocation7 + $0x5c0] ss:$8 sps:$4 sm:$0xff]   ;;  %v11802_v17 = vld [vmem:[#allocation7 + $0x4b4] ss:$8 sps:$4 sm:$0xff]  }
  0xe2   :  { %4266 = vmatprep.subr.bf16.mxu1 %v11751_v18  ;;  %3973 = vmatprep.mubr.bf16.mxu0 %v12835_v56  ;;  %v11805_v18 = vld [vmem:[#allocation7 + $0x5b4] ss:$8 sps:$4 sm:$0xff]  }
  0xe3   :  { %4086 = vmatprep.mubr.bf16.mxu1 %v12918_v1 }
  0xe4   :  { %4154 = vmatpush1.bf16.msra.mxu0 %v11746_v45  ;;  %v15955_v45 = vld [vmem:[#allocation36_spill] sm:$0xff] }
  0xe5   :  { %4267 = vmatpush1.bf16.msra.mxu1 %v11749_v41  ;;  %4155 = vmatprep.subr.bf16.mxu0 %v11754_v53  ;;  %v11800_v41 = vld [vmem:[#allocation7 + $0x4b0] ss:$8 sps:$4 sm:$0xff]  }
  0xe6   :  { %4268 = vmatprep.subr.bf16.mxu1 %v11757_v57  ;;  %v11803_v53 = vld [vmem:[#allocation7 + $0x5b0] ss:$8 sps:$4 sm:$0xff]   ;;  %v13195_v57 = vld [vmem:[%s15818_s0 + $0x208] sm:$0xff] }
  0xe7   :  { %3974 = vmatmul.mubr.bf16.gmra.mxu0 %v12848_v2 }
  0xe8   :  { %4087 = vmatmul.mubr.bf16.gmra.mxu1 %v12951_v32  ;;  %4156 = vmatpush1.bf16.msra.mxu0 %v11752_v44  ;;  %v13200_v44 = vld [vmem:[%s15818_s0 + $0x228] sm:$0xff] }
  0xe9   :  { %4269 = vmatpush1.bf16.msra.mxu1 %v11755_v21  ;;  %4157 = vmatprep.subr.bf16.mxu0 %v11760_v52  ;;  %v11808_v21 = vld [vmem:[#allocation7 + $0x4a4] ss:$8 sps:$4 sm:$0xff]  }
  0xea   :  { %4270 = vmatprep.subr.bf16.mxu1 %v11763_v3  ;;  %3983 = vmatprep.mubr.bf16.mxu0 %v12913_v58  ;;  %v11811_v52 = vld [vmem:[#allocation7 + $0x5a4] ss:$8 sps:$4 sm:$0xff]   ;;  %v11806_v3 = vld [vmem:[#allocation7 + $0x4a0] ss:$8 sps:$4 sm:$0xff]  }
  0xeb   :  { %4096 = vmatprep.mubr.bf16.mxu1 %v12987_v62 }
  0xec   :  { %4158 = vmatpush1.bf16.msra.mxu0 %v11758_v36  ;;  %v11809_v36 = vld [vmem:[#allocation7 + $0x5a0] ss:$8 sps:$4 sm:$0xff]  }
  0xed   :  { %4271 = vmatpush1.bf16.msra.mxu1 %v11761_v28  ;;  %4159 = vmatprep.subr.bf16.mxu0 %v11766_v61  ;;  %v13204_v28 = vpack.c.bf16 %v13200_v44, %v13195_v57  ;;  %v11814_v61 = vld [vmem:[#allocation7 + $0x494] ss:$8 sps:$4 sm:$0xff]  }
  0xee   :  { %4272 = vmatprep.subr.bf16.mxu1 %v11769_v30  ;;  %v13211_v30 = vld [vmem:[%s15818_s0 + $0x200] sm:$0xff] }
  0xef   :  { %3984 = vmatmul.mubr.bf16.gmra.mxu0 %v12947_v31 }
  0xf0   :  { %4097 = vmatmul.mubr.bf16.gmra.mxu1 %v13021_v43  ;;  %4160 = vmatpush1.bf16.msra.mxu0 %v11764_v47  ;;  %v13216_v47 = vld [vmem:[%s15818_s0 + $0x220] sm:$0xff] }
  0xf1   :  { %4273 = vmatpush1.bf16.msra.mxu1 %v11767_v7  ;;  %4161 = vmatprep.subr.bf16.mxu0 %v11772_v16  ;;  %v11817_v7 = vld [vmem:[#allocation7 + $0x594] ss:$8 sps:$4 sm:$0xff]   ;;  %v11812_v16 = vld [vmem:[#allocation7 + $0x490] ss:$8 sps:$4 sm:$0xff]  }
  0xf2   :  { %4274 = vmatprep.subr.bf16.mxu1 %v11775_v48  ;;  %3993 = vmatprep.mubr.bf16.mxu0 %v12982_v10  ;;  %v13222_v48 = vpack.c.bf16 %v13216_v47, %v13211_v30 }
  0xf3   :  { %4106 = vmatprep.mubr.bf16.mxu1 %v13025_v27 }
  0xf4   :  { %4162 = vmatpush1.bf16.msra.mxu0 %v11770_v54  ;;  %v11815_v54 = vld [vmem:[#allocation7 + $0x590] ss:$8 sps:$4 sm:$0xff]  }
  0xf5   :  { %4275 = vmatpush1.bf16.msra.mxu1 %v11773_v60  ;;  %4163 = vmatprep.subr.bf16.mxu0 %v11778_v0  ;;  %v11820_v60 = vld [vmem:[#allocation7 + $0x484] ss:$8 sps:$4 sm:$0xff]  }
  0xf6   :  { %4276 = vmatprep.subr.bf16.mxu1 %v11781_v59  ;;  %v11823_v0 = vld [vmem:[#allocation7 + $0x584] ss:$8 sps:$4 sm:$0xff]   ;;  %v11818_v59 = vld [vmem:[#allocation7 + $0x480] ss:$8 sps:$4 sm:$0xff]  }
  0xf7   :  { %3994 = vmatmul.mubr.bf16.gmra.mxu0 %v13013_v42 }
  0xf8   :  { %4107 = vmatmul.mubr.bf16.gmra.mxu1 %v13066_v46  ;;  %4164 = vmatpush2.bf16.msra.mxu0 %v11776_v11  ;;  %v11821_v11 = vld [vmem:[#allocation7 + $0x580] ss:$8 sps:$4 sm:$0xff]  }
  0xf9   :  { %4277 = vmatpush2.bf16.msra.mxu1 %v11779_v34  ;;  %4165 = vmatprep.subr.bf16.mxu0 %v11784_v8  ;;  %v11826_v34 = vld [vmem:[#allocation7 + $0x674] ss:$8 sps:$4 sm:$0xff]  }
  0xfa   :  { %4278 = vmatprep.subr.bf16.mxu1 %v11787_v5  ;;  %4003 = vmatprep.mubr.bf16.mxu0 %v13048_v4  ;;  %v11829_v8 = vld [vmem:[#allocation7 + $0x774] ss:$8 sps:$4 sm:$0xff]   ;;  %v15956_v5 = vld [vmem:[#allocation22_spill] sm:$0xff] }
  0xfb   :  { %4116 = vmatprep.mubr.bf16.mxu1 %v13083_v40 }
  0xfc   :  { %4166 = vmatpush2.bf16.msra.mxu0 %v11782_v39  ;;  %v11824_v39 = vld [vmem:[#allocation7 + $0x670] ss:$8 sps:$4 sm:$0xff]  }
  0xfd   :  { %4279 = vmatpush2.bf16.msra.mxu1 %v11785_v24  ;;  %4167 = vmatprep.subr.bf16.mxu0 %v11790_v19  ;;  %v11827_v24 = vld [vmem:[#allocation7 + $0x770] ss:$8 sps:$4 sm:$0xff]   ;;  %v11832_v19 = vld [vmem:[#allocation7 + $0x664] ss:$8 sps:$4 sm:$0xff]  }
  0xfe   :  { %4280 = vmatprep.subr.bf16.mxu1 %v11793_v23  ;;  %v11835_v23 = vld [vmem:[#allocation7 + $0x764] ss:$8 sps:$4 sm:$0xff]  }
  0xff   :  { %4004 = vmatmul.mubr.bf16.gmra.mxu0 %v15954_v20 }
 0x100   :  { %4117 = vmatmul.mubr.bf16.gmra.mxu1 %v13124_v9  ;;  %4168 = vmatpush2.bf16.msra.mxu0 %v11788_v35  ;;  %v15957_v35 = vld [vmem:[#allocation23_spill] sm:$0xff] }
 0x101   :  { %4281 = vmatpush2.bf16.msra.mxu1 %v11791_v33  ;;  %4169 = vmatprep.subr.bf16.mxu0 %v11796_v12  ;;  %v11830_v33 = vld [vmem:[#allocation7 + $0x660] ss:$8 sps:$4 sm:$0xff]  }
 0x102   :  { %4282 = vmatprep.subr.bf16.mxu1 %v11799_v15  ;;  %4013 = vmatprep.mubr.bf16.mxu0 %v15955_v45  ;;  %v11833_v12 = vld [vmem:[#allocation7 + $0x760] ss:$8 sps:$4 sm:$0xff]   ;;  %v11838_v15 = vld [vmem:[#allocation7 + $0x654] ss:$8 sps:$4 sm:$0xff]  }
 0x103   :  { %4126 = vmatprep.mubr.bf16.mxu1 %v13137_v29 }
 0x104   :  { %4170 = vmatpush2.bf16.msra.mxu0 %v11794_v14  ;;  %v15958_v14 = vld [vmem:[#allocation24_spill] sm:$0xff] }
 0x105   :  { %4283 = vmatpush2.bf16.msra.mxu1 %v11797_v22  ;;  %4171 = vmatprep.subr.bf16.mxu0 %v11802_v17  ;;  %v11836_v22 = vld [vmem:[#allocation7 + $0x650] ss:$8 sps:$4 sm:$0xff]  }
 0x106   :  { %4284 = vmatprep.subr.bf16.mxu1 %v11805_v18  ;;  %v11839_v17 = vld [vmem:[#allocation7 + $0x750] ss:$8 sps:$4 sm:$0xff]   ;;  %v11844_v18 = vld [vmem:[#allocation7 + $0x644] ss:$8 sps:$4 sm:$0xff]  }
 0x107   :  { %4014 = vmatmul.mubr.bf16.gmra.mxu0 %v13135_v37 }
 0x108   :  { %4127 = vmatmul.mubr.bf16.gmra.mxu1 %v13156_v26  ;;  %4172 = vmatpush2.bf16.msra.mxu0 %v11800_v41  ;;  %v15959_v41 = vld [vmem:[#allocation25_spill] sm:$0xff] }
 0x109   :  { %4285 = vmatpush2.bf16.msra.mxu1 %v11803_v53  ;;  %4173 = vmatprep.subr.bf16.mxu0 %v11808_v21  ;;  %v11842_v53 = vld [vmem:[#allocation7 + $0x640] ss:$8 sps:$4 sm:$0xff]  }
 0x10a   :  { %4286 = vmatprep.subr.bf16.mxu1 %v11811_v52  ;;  %4023 = vmatprep.mubr.bf16.mxu0 %v13148_v50  ;;  %v11845_v21 = vld [vmem:[#allocation7 + $0x740] ss:$8 sps:$4 sm:$0xff]   ;;  %v11850_v52 = vld [vmem:[#allocation7 + $0x634] ss:$8 sps:$4 sm:$0xff]  }
 0x10b   :  { %4136 = vmatprep.mubr.bf16.mxu1 %v13204_v28 }
 0x10c   :  { %4174 = vmatpush2.bf16.msra.mxu0 %v11806_v3  ;;  %v11853_v3 = vld [vmem:[#allocation7 + $0x734] ss:$8 sps:$4 sm:$0xff]  }
 0x10d   :  { %4287 = vmatpush2.bf16.msra.mxu1 %v11809_v36  ;;  %4175 = vmatprep.subr.bf16.mxu0 %v11814_v61  ;;  %v15960_v36 = vld [vmem:[#allocation26_spill] sm:$0xff]  ;;  %v11848_v61 = vld [vmem:[#allocation7 + $0x630] ss:$8 sps:$4 sm:$0xff]  }
 0x10e   :  { %4288 = vmatprep.subr.bf16.mxu1 %v11817_v7  ;;  %v11851_v7 = vld [vmem:[#allocation7 + $0x730] ss:$8 sps:$4 sm:$0xff]  }
 0x10f   :  { %4024 = vmatmul.mubr.bf16.gmra.mxu0 %v13151_v13 }
 0x110   :  { %4137 = vmatmul.mubr.bf16.gmra.mxu1 %v13222_v48  ;;  %4176 = vmatpush2.bf16.msra.mxu0 %v11812_v16  ;;  %v11856_v16 = vld [vmem:[#allocation7 + $0x624] ss:$8 sps:$4 sm:$0xff]  }
 0x111   :  { %4289 = vmatpush2.bf16.msra.mxu1 %v11815_v54  ;;  %4177 = vmatprep.subr.bf16.mxu0 %v11820_v60  ;;  %v11859_v54 = vld [vmem:[#allocation7 + $0x724] ss:$8 sps:$4 sm:$0xff]   ;;  %v15961_v60 = vld [vmem:[#allocation27_spill] sm:$0xff] }
 0x112   :  { %4290 = vmatprep.subr.bf16.mxu1 %v11823_v0  ;;  %4179 = vmatprep.mubr.bf16.mxu0 %v15956_v5  ;;  %v11854_v0 = vld [vmem:[#allocation7 + $0x620] ss:$8 sps:$4 sm:$0xff]   ;;  %v11860_v5 = vld [vmem:[#allocation7 + $0x610] ss:$8 sps:$4 sm:$0xff]  }
 0x113   :  { %4292 = vmatprep.mubr.bf16.mxu1 %v12773_v6  ;;  %v11841_v6 = vld [vmem:[#allocation7 + $0x754] ss:$8 sps:$4 sm:$0xff]  }
 0x114   :  { %4178 = vmatpush2.bf16.msra.mxu0 %v11818_v59  ;;  %v11857_v59 = vld [vmem:[#allocation7 + $0x720] ss:$8 sps:$4 sm:$0xff]  }
 0x115   :  { %4291 = vmatpush2.bf16.msra.mxu1 %v11821_v11  ;;  %4373 = vmatprep.subr.bf16.mxu0 %v11826_v34  ;;  %v11862_v11 = vld [vmem:[#allocation7 + $0x614] ss:$8 sps:$4 sm:$0xff]  }
 0x116   :  { %4486 = vmatprep.subr.bf16.mxu1 %v11829_v8  ;;  %v11865_v34 = vld [vmem:[#allocation7 + $0x714] ss:$8 sps:$4 sm:$0xff]  }
 0x117   :  { %4180 = vmatmul.mubr.bf16.vlgmr.msra.gmra.mxu0 %v15957_v35  ;;  %v15962_v8 = vld [vmem:[#allocation28_spill] sm:$0xff]  ;;  %v11866_v35 = vld [vmem:[#allocation7 + $0x600] ss:$8 sps:$4 sm:$0xff]  }
 0x118   :  { %4293 = vmatmul.mubr.bf16.vlgmr.msra.gmra.mxu1 %v12809_v38  ;;  %4374 = vmatpush1.bf16.msra.mxu0 %v11824_v39  ;;  %v11847_v38 = vld [vmem:[#allocation7 + $0x744] ss:$8 sps:$4 sm:$0xff]   ;;  %v11863_v39 = vld [vmem:[#allocation7 + $0x710] ss:$8 sps:$4 sm:$0xff]  }
 0x119   :  { %4487 = vmatpush1.bf16.msra.mxu1 %v11827_v24  ;;  %4375 = vmatprep.subr.bf16.mxu0 %v11832_v19  ;;  %v11868_v24 = vld [vmem:[#allocation7 + $0x604] ss:$8 sps:$4 sm:$0xff]  }
 0x11a   :  { %4488 = vmatprep.subr.bf16.mxu1 %v11835_v23  ;;  %4189 = vmatprep.mubr.bf16.mxu0 %v15958_v14  ;;  %v11871_v19 = vld [vmem:[#allocation7 + $0x704] ss:$8 sps:$4 sm:$0xff]  }
 0x11b   :  { %4302 = vmatprep.mubr.bf16.mxu1 %v12835_v56  ;;  %v15963_v23 = vld [vmem:[#allocation30_spill] sm:$0xff] }
 0x11c   :  { %4376 = vmatpush1.bf16.msra.mxu0 %v11830_v33  ;;  %v11869_v33 = vld [vmem:[#allocation7 + $0x700] ss:$8 sps:$4 sm:$0xff]  }
 0x11d   :  { %4489 = vmatpush1.bf16.msra.mxu1 %v11833_v12  ;;  %4377 = vmatprep.subr.bf16.mxu0 %v11838_v15  ;;  %v11874_v12 = vld [vmem:[#allocation7 + $0x6f4] ss:$8 sps:$4 sm:$0xff]  }
 0x11e   :  { %4490 = vmatprep.subr.bf16.mxu1 %v11841_v6  ;;  %v11877_v15 = vld [vmem:[#allocation7 + $0x7f4] ss:$8 sps:$4 sm:$0xff]  }
 0x11f   :  { %4190 = vmatmul.mubr.bf16.gmra.mxu0 %v15959_v41  ;;  %v15964_v6 = vld [vmem:[#allocation31_spill] sm:$0xff] }
 0x120   :  { %4303 = vmatmul.mubr.bf16.gmra.mxu1 %v12848_v2  ;;  %4378 = vmatpush1.bf16.msra.mxu0 %v11836_v22  ;;  %v11872_v22 = vld [vmem:[#allocation7 + $0x6f0] ss:$8 sps:$4 sm:$0xff]  }
 0x121   :  { %4491 = vmatpush1.bf16.msra.mxu1 %v11839_v17  ;;  %4379 = vmatprep.subr.bf16.mxu0 %v11844_v18  ;;  %v11875_v17 = vld [vmem:[#allocation7 + $0x7f0] ss:$8 sps:$4 sm:$0xff]   ;;  %v11880_v18 = vld [vmem:[#allocation7 + $0x6e4] ss:$8 sps:$4 sm:$0xff]  }
 0x122   :  { %4492 = vmatprep.subr.bf16.mxu1 %v11847_v38  ;;  %4199 = vmatprep.mubr.bf16.mxu0 %v15960_v36  ;;  %v11883_v38 = vld [vmem:[#allocation7 + $0x7e4] ss:$8 sps:$4 sm:$0xff]  }
 0x123   :  { %4312 = vmatprep.mubr.bf16.mxu1 %v12913_v58 }
 0x124   :  { %4380 = vmatpush1.bf16.msra.mxu0 %v11842_v53  ;;  %v15965_v53 = vld [vmem:[#allocation33_spill] sm:$0xff] }
 0x125   :  { %4493 = vmatpush1.bf16.msra.mxu1 %v11845_v21  ;;  %4381 = vmatprep.subr.bf16.mxu0 %v11850_v52  ;;  %v11878_v21 = vld [vmem:[#allocation7 + $0x6e0] ss:$8 sps:$4 sm:$0xff]  }
 0x126   :  { %4494 = vmatprep.subr.bf16.mxu1 %v11853_v3  ;;  %v11881_v52 = vld [vmem:[#allocation7 + $0x7e0] ss:$8 sps:$4 sm:$0xff]   ;;  %v11886_v3 = vld [vmem:[#allocation7 + $0x6d4] ss:$8 sps:$4 sm:$0xff]  }
 0x127   :  { %4200 = vmatmul.mubr.bf16.gmra.mxu0 %v15961_v60 }
 0x128   :  { %4313 = vmatmul.mubr.bf16.gmra.mxu1 %v12947_v31  ;;  %4382 = vmatpush1.bf16.msra.mxu0 %v11848_v61  ;;  %v11889_v61 = vld [vmem:[#allocation7 + $0x7d4] ss:$8 sps:$4 sm:$0xff]  }
 0x129   :  { %4495 = vmatpush1.bf16.msra.mxu1 %v11851_v7  ;;  %4383 = vmatprep.subr.bf16.mxu0 %v11856_v16  ;;  %v184_v7 = vld [vmem:[%s15818_s0 + $0x218] sm:$0x3]  ;;  %v15966_v16 = vld [vmem:[#allocation35_spill] sm:$0xff] }
 0x12a   :  { %4496 = vmatprep.subr.bf16.mxu1 %v11859_v54  ;;  %4209 = vmatprep.mubr.bf16.mxu0 %v15962_v8  ;;  %v11884_v54 = vld [vmem:[#allocation7 + $0x6d0] ss:$8 sps:$4 sm:$0xff]  }
 0x12b   :  { %4322 = vmatprep.mubr.bf16.mxu1 %v12982_v10 }
 0x12c   :  { %4384 = vmatpush1.bf16.msra.mxu0 %v11854_v0  ;;  %v11887_v0 = vld [vmem:[#allocation7 + $0x7d0] ss:$8 sps:$4 sm:$0xff]  }
 0x12d   :  { %4497 = vmatpush1.bf16.msra.mxu1 %v11857_v59  ;;  %4385 = vmatprep.subr.bf16.mxu0 %v11862_v11  ;;  %v188_v59 = vld [vmem:[%s15818_s0 + $0x238] sm:$0x3]  ;;  %v11892_v11 = vld [vmem:[#allocation7 + $0x6c4] ss:$8 sps:$4 sm:$0xff]  }
 0x12e   :  { %4498 = vmatprep.subr.bf16.mxu1 %v11865_v34  ;;  %v11895_v34 = vld [vmem:[#allocation7 + $0x7c4] ss:$8 sps:$4 sm:$0xff]  }
 0x12f   :  { %4210 = vmatmul.mubr.bf16.gmra.mxu0 %v15963_v23 }
 0x130   :  { %4323 = vmatmul.mubr.bf16.gmra.mxu1 %v13013_v42  ;;  %4386 = vmatpush1.bf16.msra.mxu0 %v11860_v5  ;;  %v545_v5 = vrot.slane %v13195_v57, 1 }
 0x131   :  { %4499 = vmatpush1.bf16.msra.mxu1 %v11863_v39  ;;  %4387 = vmatprep.subr.bf16.mxu0 %v11868_v24  ;;  %v551_v39 = vrot.slane %v13200_v44, 1  ;;  %v183_v24 = vld [vmem:[%s15818_s0 + $0x210] sm:$0x3] }
 0x132   :  { %4500 = vmatprep.subr.bf16.mxu1 %v11871_v19  ;;  %4219 = vmatprep.mubr.bf16.mxu0 %v15964_v6  ;;  %v187_v19 = vld [vmem:[%s15818_s0 + $0x230] sm:$0x3] }
 0x133   :  { %4332 = vmatprep.mubr.bf16.mxu1 %v13048_v4  ;;  %v878_v42 = vrot.slane %v187_v19, 2 }
 0x134   :  { %4388 = vmatpush1.bf16.msra.mxu0 %v11866_v35  ;;  %v874_v35 = vrot.slane %v13195_v57, 2  ;;  %v548_v57 = vrot.slane %v13216_v47, 1 }
 0x135   :  { %4501 = vmatpush1.bf16.msra.mxu1 %v11869_v33  ;;  %4389 = vmatprep.subr.bf16.mxu0 %v11874_v12  ;;  %v880_v33 = vrot.slane %v13200_v44, 2  ;;  %v11890_v12 = vld [vmem:[#allocation7 + $0x6c0] ss:$8 sps:$4 sm:$0xff]   ;;  %v871_v44 = vrot.slane %v13211_v30, 2 }
 0x136   :  { %4502 = vmatprep.subr.bf16.mxu1 %v11877_v15  ;;  %v11893_v15 = vld [vmem:[#allocation7 + $0x7c0] ss:$8 sps:$4 sm:$0xff]  }
 0x137   :  { %4220 = vmatmul.mubr.bf16.gmra.mxu0 %v15965_v53 }
 0x138   :  { %4333 = vmatmul.mubr.bf16.gmra.mxu1 %v15954_v20  ;;  %4390 = vmatpush2.bf16.msra.mxu0 %v11872_v22  ;;  %v546_v22 = vrot.slane %v184_v7, 1  ;;  %v549_v20 = vrot.slane %v187_v19, 1 }
 0x139   :  { %4503 = vmatpush2.bf16.msra.mxu1 %v11875_v17  ;;  %4391 = vmatprep.subr.bf16.mxu0 %v11880_v18  ;;  %v11898_v17 = vld [vmem:[#allocation7 + $0x6b4] ss:$8 sps:$4 sm:$0xff]  }
 0x13a   :  { %4504 = vmatprep.subr.bf16.mxu1 %v11883_v38  ;;  %4229 = vmatprep.mubr.bf16.mxu0 %v15966_v16  ;;  %v11901_v18 = vld [vmem:[#allocation7 + $0x7b4] ss:$8 sps:$4 sm:$0xff]   ;;  %v552_v38 = vrot.slane %v188_v59, 1  ;;  %v550_v19 = vsel %vm445_vm0, %v548_v57, %v549_v20 }
 0x13b   :  { %4342 = vmatprep.mubr.bf16.mxu1 %v15955_v45  ;;  %v543_v45 = vrot.slane %v183_v24, 1 }
 0x13c   :  { %4392 = vmatpush2.bf16.msra.mxu0 %v11878_v21  ;;  %v875_v21 = vrot.slane %v184_v7, 2  ;;  %v11904_v7 = vld [vmem:[#allocation7 + $0x6a4] ss:$8 sps:$4 sm:$0xff]  }
 0x13d   :  { %4505 = vmatpush2.bf16.msra.mxu1 %v11881_v52  ;;  %4393 = vmatprep.subr.bf16.mxu0 %v11886_v3  ;;  %v881_v52 = vrot.slane %v188_v59, 2  ;;  %v542_v3 = vrot.slane %v13211_v30, 1  ;;  %v11907_v59 = vld [vmem:[#allocation7 + $0x7a4] ss:$8 sps:$4 sm:$0xff]   ;;  %v877_v30 = vrot.slane %v13216_v47, 2 }
 0x13e   :  { %4506 = vmatprep.subr.bf16.mxu1 %v11889_v61  ;;  %v11896_v61 = vld [vmem:[#allocation7 + $0x6b0] ss:$8 sps:$4 sm:$0xff]   ;;  %v876_v4 = vsel %vm774_vm1, %v874_v35, %v875_v21  ;;  %v11905_v35 = vld [vmem:[#allocation7 + $0x7a0] ss:$8 sps:$4 sm:$0xff]  }
 0x13f   :  { %4230 = vmatmul.mubr.bf16.gmra.mxu0 %v13126_v25  ;;  %v11911_v21 = vld [vmem:[#allocation7 + $0x790] ss:$8 sps:$4 sm:$0xff]  }
 0x140   :  { %4343 = vmatmul.mubr.bf16.gmra.mxu1 %v13135_v37  ;;  %4394 = vmatpush2.bf16.msra.mxu0 %v11884_v54  ;;  %v11899_v37 = vld [vmem:[#allocation7 + $0x7b0] ss:$8 sps:$4 sm:$0xff]   ;;  %v547_v54 = vsel %vm445_vm0, %v545_v5, %v546_v22  ;;  %v13284_v5 = vld [vmem:[%s15818_s0 + $0x260] sm:$0xff] }
 0x141   :  { %4507 = vmatpush2.bf16.msra.mxu1 %v11887_v0  ;;  %4395 = vmatprep.subr.bf16.mxu0 %v11892_v11  ;;  %v553_v0 = vsel %vm445_vm0, %v551_v39, %v552_v38  ;;  %v882_v11 = vsel %vm774_vm1, %v880_v33, %v881_v52  ;;  %v11902_v39 = vld [vmem:[#allocation7 + $0x6a0] ss:$8 sps:$4 sm:$0xff]   ;;  %v13297_v22 = vld [vmem:[%s15818_s0 + $0x250] sm:$0x3] }
 0x142   :  { %4508 = vmatprep.subr.bf16.mxu1 %v11895_v34  ;;  %4239 = vmatprep.mubr.bf16.mxu0 %v13139_v55  ;;  %v872_v34 = vrot.slane %v183_v24, 2  ;;  %v13286_v33 = vpack.c.bf16 %v553_v0, %v547_v54  ;;  %v13288_v47 = vpack.c.bf16 %v882_v11, %v876_v4  ;;  %v544_v24 = vsel %vm445_vm0, %v542_v3, %v543_v45  ;;  %v13302_v4 = vld [vmem:[%s15818_s0 + $0x270] sm:$0x3]  ;;  %v11914_v54 = vld [vmem:[#allocation7 + $0x680] ss:$8 sps:$4 sm:$0xff]  }
 0x143   :  { %4352 = vmatprep.mubr.bf16.mxu1 %v13148_v50  ;;  %v13279_v50 = vld [vmem:[%s15818_s0 + $0x240] sm:$0xff]  ;;  %v879_v45 = vsel %vm774_vm1, %v877_v30, %v878_v42  ;;  %v11908_v38 = vld [vmem:[#allocation7 + $0x690] ss:$8 sps:$4 sm:$0xff]   ;;  %v884_v52 = vrot.slane %v13297_v22, 2  ;;  %v13312_v3 = vpack.c.bf16 %v550_v19, %v544_v24  ;;  %v11922_v11 = vld [vmem:[#allocation7 + $0x874] ss:$8 sps:$4 sm:$0xff]  }
 0x144   :  { %4396 = vmatpush2.bf16.msra.mxu0 %v11890_v12  ;;  %v11910_v12 = vld [vmem:[#allocation7 + $0x694] ss:$8 sps:$4 sm:$0xff]   ;;  %v883_v20 = vrot.slane %v13279_v50, 2  ;;  %v11916_v42 = vld [vmem:[#allocation7 + $0x684] ss:$8 sps:$4 sm:$0xff]  }
 0x145   :  { %4509 = vmatpush2.bf16.msra.mxu1 %v11893_v15  ;;  %4397 = vmatprep.subr.bf16.mxu0 %v11898_v17  ;;  %v11913_v15 = vld [vmem:[#allocation7 + $0x794] ss:$8 sps:$4 sm:$0xff]   ;;  %v873_v17 = vsel %vm774_vm1, %v871_v44, %v872_v34  ;;  %v11919_v44 = vld [vmem:[#allocation7 + $0x784] ss:$8 sps:$4 sm:$0xff]   ;;  %v11917_v0 = vld [vmem:[#allocation7 + $0x780] ss:$8 sps:$4 sm:$0xff]  }
 0x146   :  { %4510 = vmatprep.subr.bf16.mxu1 %v11901_v18  ;;  %v889_v18 = vrot.slane %v13284_v5, 2  ;;  %v13314_v57 = vpack.c.bf16 %v879_v45, %v873_v17  ;;  %v11920_v30 = vld [vmem:[#allocation7 + $0x870] ss:$8 sps:$4 sm:$0xff]   ;;  %v11925_v34 = vld [vmem:[#allocation7 + $0x864] ss:$8 sps:$4 sm:$0xff]  }
 0x147   :  { %4240 = vmatmul.mubr.bf16.gmra.mxu0 %v13158_v49  ;;  %v11928_v19 = vld [vmem:[#allocation7 + $0x854] ss:$8 sps:$4 sm:$0xff]   ;;  %v11926_v17 = vld [vmem:[#allocation7 + $0x850] ss:$8 sps:$4 sm:$0xff]  }
 0x148   :  { %4353 = vmatmul.mubr.bf16.gmra.mxu1 %v13151_v13  ;;  %4398 = vmatpush2.bf16.msra.mxu0 %v11896_v61  ;;  %v13317_v61 = vsel %vm774_vm1, %v883_v20, %v884_v52 }
 0x149   :  { %4511 = vmatpush2.bf16.msra.mxu1 %v11899_v37  ;;  %4399 = vmatprep.subr.bf16.mxu0 %v11904_v7  ;;  %v890_v37 = vrot.slane %v13302_v4, 2 }
 0x14a   :  { %4512 = vmatprep.subr.bf16.mxu1 %v11907_v59  ;;  %4249 = vmatprep.mubr.bf16.mxu0 %v13286_v33 }
 0x14b   :  { %4362 = vmatprep.mubr.bf16.mxu1 %v13288_v47  ;;  %v13320_v7 = vsel %vm774_vm1, %v889_v18, %v890_v37  ;;  %v11931_v18 = vld [vmem:[#allocation7 + $0x844] ss:$8 sps:$4 sm:$0xff]  }
 0x14c   :  { %4400 = vmatpush2.bf16.msra.mxu0 %v11902_v39  ;;  %v11923_v39 = vld [vmem:[#allocation7 + $0x860] ss:$8 sps:$4 sm:$0xff]  }
 0x14d   :  { %4513 = vmatpush2.bf16.msra.mxu1 %v11905_v35  ;;  %4401 = vmatprep.subr.bf16.mxu0 %v11910_v12 }
 0x14e   :  { %4514 = vmatprep.subr.bf16.mxu1 %v11913_v15 }
 0x14f   :  { %4250 = vmatmul.mubr.bf16.gmra.mxu0 %v13312_v3 }
 0x150   :  { %4363 = vmatmul.mubr.bf16.gmra.mxu1 %v13314_v57  ;;  %4402 = vmatpush2.bf16.msra.mxu0 %v11908_v38 }
 0x151   :  { %4515 = vmatpush2.bf16.msra.mxu1 %v11911_v21  ;;  %4403 = vmatprep.subr.bf16.mxu0 %v11916_v42 }
 0x152   :  { %4516 = vmatprep.subr.bf16.mxu1 %v11919_v44  ;;  %4405 = vmatprep.mubr.bf16.mxu0 %v12867_v63 }
 0x153   :  { %4518 = vmatprep.mubr.bf16.mxu1 %v15958_v14 }
 0x154   :  { %4404 = vmatpush2.bf16.msra.mxu0 %v11914_v54 }
 0x155   :  { %4517 = vmatpush2.bf16.msra.mxu1 %v11917_v0  ;;  %4599 = vmatprep.subr.bf16.mxu0 %v11922_v11  ;;  %v11932_v11 = vld [vmem:[#allocation7 + $0x830] ss:$8 sps:$4 sm:$0xff]  }
 0x157   :  { %v3729_v35 = vpop.f32.mrf.mxu0  ;;  %4406 = vmatmul.mubr.bf16.vlgmr.msra.gmra.mxu0 %v12894_v51 }
 0x158   :  { %v3842_v24 = vpop.f32.mrf.mxu1  ;;  %4519 = vmatmul.mubr.bf16.vlgmr.msra.gmra.mxu1 %v15959_v41  ;;  %4600 = vmatpush1.bf16.msra.mxu0 %v11920_v30 }
 0x159   :  { %v13330_v12 = vadd.f32 %v3842_v24, %v3729_v35  ;;  %4415 = vmatprep.mubr.bf16.mxu0 %v12918_v1  ;;  %v3731_v63 = vpop.f32.mrf.mxu0  ;;  %4601 = vmatprep.subr.bf16.mxu0 %v11925_v34  ;;  %v11929_v1 = vld [vmem:[#allocation7 + $0x840] ss:$8 sps:$4 sm:$0xff]  }
 0x15a   :  { %v3844_v15 = vpop.f32.mrf.mxu1  ;;  %4528 = vmatprep.mubr.bf16.mxu1 %v15960_v36  ;;  %v11934_v36 = vld [vmem:[#allocation7 + $0x834] ss:$8 sps:$4 sm:$0xff]  }
 0x15b   :  { %v13334_v14 = vadd.f32 %v3844_v15, %v3731_v63  ;;  %v3733_v45 = vpop.f32.mrf.mxu0 }
 0x15c   :  { %v3846_v20 = vpop.f32.mrf.mxu1  ;;  %4602 = vmatpush1.bf16.msra.mxu0 %v11923_v39  ;;  %v11937_v39 = vld [vmem:[#allocation7 + $0x824] ss:$8 sps:$4 sm:$0xff]  }
 0x15d   :  { %v13336_v51 = vadd.f32 %v3846_v20, %v3733_v45  ;;  %v3735_v41 = vpop.f32.mrf.mxu0  ;;  %4603 = vmatprep.subr.bf16.mxu0 %v11928_v19 }
 0x15e   :  { %v3848_v38 = vpop.f32.mrf.mxu1 }
 0x15f   :  { %v13338_v21 = vadd.f32 %v3848_v38, %v3735_v41  ;;  %v3739_v52 = vpop.f32.mrf.mxu0  ;;  %4416 = vmatmul.mubr.bf16.gmra.mxu0 %v12951_v32 }
 0x160   :  { %v3852_v37 = vpop.f32.mrf.mxu1  ;;  %4529 = vmatmul.mubr.bf16.gmra.mxu1 %v15961_v60  ;;  %4604 = vmatpush1.bf16.msra.mxu0 %v11926_v17 }
 0x161   :  { %v13342_v42 = vadd.f32 %v3852_v37, %v3739_v52  ;;  %4425 = vmatprep.mubr.bf16.mxu0 %v12987_v62  ;;  %v3741_v44 = vpop.f32.mrf.mxu0  ;;  %4605 = vmatprep.subr.bf16.mxu0 %v11931_v18  ;;  %v11935_v62 = vld [vmem:[#allocation7 + $0x820] ss:$8 sps:$4 sm:$0xff]   ;;  %v11938_v18 = vld [vmem:[#allocation7 + $0x810] ss:$8 sps:$4 sm:$0xff]  }
 0x162   :  { %v3854_v54 = vpop.f32.mrf.mxu1  ;;  %4538 = vmatprep.mubr.bf16.mxu1 %v15962_v8  ;;  %v11940_v8 = vld [vmem:[#allocation7 + $0x814] ss:$8 sps:$4 sm:$0xff]  }
 0x163   :  { %v13346_v0 = vadd.f32 %v3854_v54, %v3741_v44  ;;  %v3743_v30 = vpop.f32.mrf.mxu0 }
 0x164   :  { %v3856_v34 = vpop.f32.mrf.mxu1  ;;  %4606 = vmatpush1.bf16.msra.mxu0 %v11929_v1  ;;  %v11943_v1 = vld [vmem:[#allocation7 + $0x804] ss:$8 sps:$4 sm:$0xff]  }
 0x165   :  { %v13348_v32 = vadd.f32 %v3856_v34, %v3743_v30  ;;  %v3745_v60 = vpop.f32.mrf.mxu0  ;;  %4607 = vmatprep.subr.bf16.mxu0 %v11934_v36 }
 0x166   :  { %v3858_v35 = vpop.f32.mrf.mxu1 }
 0x167   :  { %v13350_v24 = vadd.f32 %v3858_v35, %v3745_v60  ;;  %v3749_v19 = vpop.f32.mrf.mxu0  ;;  %4426 = vmatmul.mubr.bf16.gmra.mxu0 %v13021_v43 }
 0x168   :  { %v3862_v63 = vpop.f32.mrf.mxu1  ;;  %4539 = vmatmul.mubr.bf16.gmra.mxu1 %v15963_v23  ;;  %4608 = vmatpush1.bf16.msra.mxu0 %v11932_v11 }
 0x169   :  { %v13354_v15 = vadd.f32 %v3862_v63, %v3749_v19  ;;  %4435 = vmatprep.mubr.bf16.mxu0 %v13025_v27  ;;  %v3751_v17 = vpop.f32.mrf.mxu0  ;;  %4609 = vmatprep.subr.bf16.mxu0 %v11937_v39  ;;  %v11941_v27 = vld [vmem:[#allocation7 + $0x800] ss:$8 sps:$4 sm:$0xff]   ;;  %v11944_v39 = vld [vmem:[#allocation7 + $0x8f0] ss:$8 sps:$4 sm:$0xff]  }
 0x16a   :  { %v3864_v45 = vpop.f32.mrf.mxu1  ;;  %4548 = vmatprep.mubr.bf16.mxu1 %v15964_v6  ;;  %v11946_v6 = vld [vmem:[#allocation7 + $0x8f4] ss:$8 sps:$4 sm:$0xff]  }
 0x16b   :  { %v13358_v20 = vadd.f32 %v3864_v45, %v3751_v17  ;;  %v3753_v41 = vpop.f32.mrf.mxu0 }
 0x16c   :  { %v3866_v38 = vpop.f32.mrf.mxu1  ;;  %4610 = vmatpush1.bf16.msra.mxu0 %v11935_v62  ;;  %v11949_v62 = vld [vmem:[#allocation7 + $0x8e4] ss:$8 sps:$4 sm:$0xff]  }
 0x16d   :  { %v13360_v43 = vadd.f32 %v3866_v38, %v3753_v41  ;;  %v3755_v23 = vpop.f32.mrf.mxu0  ;;  %4611 = vmatprep.subr.bf16.mxu0 %v11940_v8 }
 0x16e   :  { %v3868_v52 = vpop.f32.mrf.mxu1 }
 0x16f   :  { %v13362_v37 = vadd.f32 %v3868_v52, %v3755_v23  ;;  %v3759_v36 = vpop.f32.mrf.mxu0  ;;  %4436 = vmatmul.mubr.bf16.gmra.mxu0 %v13066_v46  ;;  %v11950_v23 = vld [vmem:[#allocation7 + $0x8d0] ss:$8 sps:$4 sm:$0xff]  }
 0x170   :  { %v3872_v44 = vpop.f32.mrf.mxu1  ;;  %4549 = vmatmul.mubr.bf16.gmra.mxu1 %v15965_v53  ;;  %4612 = vmatpush1.bf16.msra.mxu0 %v11938_v18  ;;  %v13384_v18 = vld [vmem:[%s15818_s0 + $0x248] sm:$0xff] }
 0x171   :  { %v13366_v54 = vadd.f32 %v3872_v44, %v3759_v36  ;;  %4445 = vmatprep.mubr.bf16.mxu0 %v13083_v40  ;;  %v3761_v11 = vpop.f32.mrf.mxu0  ;;  %4613 = vmatprep.subr.bf16.mxu0 %v11943_v1  ;;  %v11947_v40 = vld [vmem:[#allocation7 + $0x8e0] ss:$8 sps:$4 sm:$0xff]  }
 0x172   :  { %v3874_v30 = vpop.f32.mrf.mxu1  ;;  %4558 = vmatprep.mubr.bf16.mxu1 %v15966_v16  ;;  %v11952_v16 = vld [vmem:[#allocation7 + $0x8d4] ss:$8 sps:$4 sm:$0xff]  }
 0x173   :  { %v13370_v34 = vadd.f32 %v3874_v30, %v3761_v11  ;;  %v3763_v60 = vpop.f32.mrf.mxu0  ;;  %v557_v11 = vrot.slane %v13384_v18, 1  ;;  %v11953_v30 = vld [vmem:[#allocation7 + $0x8c0] ss:$8 sps:$4 sm:$0xff]  }
 0x174   :  { %v3876_v35 = vpop.f32.mrf.mxu1  ;;  %4614 = vmatpush1.bf16.msra.mxu0 %v11941_v27  ;;  %v11955_v27 = vld [vmem:[#allocation7 + $0x8c4] ss:$8 sps:$4 sm:$0xff]  }
 0x175   :  { %v13372_v46 = vadd.f32 %v3876_v35, %v3763_v60  ;;  %v3765_v53 = vpop.f32.mrf.mxu0  ;;  %4615 = vmatprep.subr.bf16.mxu0 %v11946_v6 }
 0x176   :  { %v3878_v19 = vpop.f32.mrf.mxu1 }
 0x177   :  { %v13374_v63 = vadd.f32 %v3878_v19, %v3765_v53  ;;  %v3769_v8 = vpop.f32.mrf.mxu0  ;;  %4446 = vmatmul.mubr.bf16.gmra.mxu0 %v13124_v9  ;;  %v13390_v9 = vld [vmem:[%s15818_s0 + $0x268] sm:$0xff]  ;;  %v11958_v19 = vld [vmem:[#allocation7 + $0x8b4] ss:$8 sps:$4 sm:$0xff]  }
 0x178   :  { %v3882_v17 = vpop.f32.mrf.mxu1  ;;  %4559 = vmatmul.mubr.bf16.gmra.mxu1 %v13126_v25  ;;  %4616 = vmatpush2.bf16.msra.mxu0 %v11944_v39  ;;  %v13395_v25 = vld [vmem:[%s15818_s0 + $0x258] sm:$0x3]  ;;  %v563_v39 = vrot.slane %v13390_v9, 1 }
 0x179   :  { %v13378_v45 = vadd.f32 %v3882_v17, %v3769_v8  ;;  %4455 = vmatprep.mubr.bf16.mxu0 %v13137_v29  ;;  %v3771_v41 = vpop.f32.mrf.mxu0  ;;  %4617 = vmatprep.subr.bf16.mxu0 %v11949_v62  ;;  %v13400_v29 = vld [vmem:[%s15818_s0 + $0x278] sm:$0x3]  ;;  %v558_v60 = vrot.slane %v13395_v25, 1  ;;  %s12591_s0 = smov [#allocation16]  }
 0x17a   :  { %v3884_v38 = vpop.f32.mrf.mxu1  ;;  %4568 = vmatprep.mubr.bf16.mxu1 %v13139_v55  ;;  %v564_v35 = vrot.slane %v13400_v29, 1  ;;  %s10283_s3 = sshll.u32 %s12591_s0, 4  ;;  %s10284_s3 = int_to_ptr.vmem [resolvable:$true] %s10283_s3 }
 0x17b   :  { %v13402_v1 = vadd.f32 %v3884_v38, %v3771_v41  ;;  %v3773_v52 = vpop.f32.mrf.mxu0  ;;  %v11956_v41 = vld [vmem:[#allocation7 + $0x8b0] ss:$8 sps:$4 sm:$0xff]   ;;  %v559_v38 = vsel %vm445_vm0, %v557_v11, %v558_v60  ;;  %s12548_s18 = scalar_lea.vmem %s10284_s3, 4096  ;;  %p12553_p8 = scmp.lt.s32.totalorder %s10284_s3, %s10284_s3 }
 0x17c   :  { %v3886_v55 = vpop.f32.mrf.mxu1  ;;  %4618 = vmatpush2.bf16.msra.mxu0 %v11947_v40  ;;  %p12549_p7 = scmp.ne.s32.totalorder %s10284_s3, %s12548_s18  ;;  %p12554_p9 = scmp.lt.s32.totalorder %s12548_s18, %s12548_s18 }
 0x17d   :  { %v13404_v36 = vadd.f32 %v3886_v55, %v3773_v52  ;;  %v13406_v44 = vpop.f32.mrf.mxu0  ;;  %4619 = vmatprep.subr.bf16.mxu0 %v11952_v16  ;;  %v11961_v55 = vld [vmem:[#allocation7 + $0x8a4] ss:$8 sps:$4 sm:$0xff]  }
 0x17e   :  { %v13408_v6 = vpop.f32.mrf.mxu1  ;;  %p12555_p10 = por %p12554_p9, %p12553_p8 }
 0x17f   :  { %v3779_v62 = vpop.f32.mrf.mxu0  ;;  %4456 = vmatmul.mubr.bf16.gmra.mxu0 %v13156_v26  ;;  %v565_v26 = vsel %vm445_vm0, %v563_v39, %v564_v35  ;;  %v11959_v35 = vld [vmem:[#allocation7 + $0x8a0] ss:$8 sps:$4 sm:$0xff]  }
 0x180   :  { %v3892_v53 = vpop.f32.mrf.mxu1  ;;  %4569 = vmatmul.mubr.bf16.gmra.mxu1 %v13158_v49  ;;  %4620 = vmatpush2.bf16.msra.mxu0 %v11950_v23  ;;  %v11457_v23 = vpack.c.bf16 %v13390_v9, %v13384_v18  ;;  %v11459_v60 = vpack.c.bf16 %v565_v26, %v559_v38  ;;  %v11962_v38 = vld [vmem:[#allocation7 + $0x890] ss:$8 sps:$4 sm:$0xff]   ;;  %p12556_p11 = pnand %p12555_p10, %p12549_p7 }
 0x181   :  { %v13416_v40 = vadd.f32 %v3892_v53, %v3779_v62  ;;  %4465 = vmatprep.mubr.bf16.mxu0 %v13204_v28  ;;  %v3781_v8 = vpop.f32.mrf.mxu0  ;;  %4621 = vmatprep.subr.bf16.mxu0 %v11955_v27  ;;  %v554_v28 = vrot.slane %v13279_v50, 1  ;;  %v555_v27 = vrot.slane %v13297_v22, 1  ;;  %v561_v53 = vrot.slane %v13302_v4, 1 }
 0x182   :  { %v3894_v17 = vpop.f32.mrf.mxu1  ;;  %4578 = vmatprep.mubr.bf16.mxu1 %v13286_v33  ;;  %v560_v33 = vrot.slane %v13284_v5, 1 }
 0x183   :  { %v13420_v16 = vadd.f32 %v3894_v17, %v3781_v8  ;;  %v3783_v52 = vpop.f32.mrf.mxu0  ;;  %v556_v22 = vsel %vm445_vm0, %v554_v28, %v555_v27 }
 0x184   :  { %v3896_v49 = vpop.f32.mrf.mxu1  ;;  %4622 = vmatpush2.bf16.msra.mxu0 %v11953_v30  ;;  %v11964_v30 = vld [vmem:[#allocation7 + $0x894] ss:$8 sps:$4 sm:$0xff]   ;;  %v562_v4 = vsel %vm445_vm0, %v560_v33, %v561_v53 }
 0x185   :  { %v13427_v62 = vadd.f32 %v3896_v49, %v3783_v52  ;;  %v13432_v11 = vpop.f32.mrf.mxu0  ;;  %4623 = vmatprep.subr.bf16.mxu0 %v11958_v19 }
 0x186   :  { %v13434_v39 = vpop.f32.mrf.mxu1 }
 0x187   :  { %v3789_v8 = vpop.f32.mrf.mxu0  ;;  %4466 = vmatmul.mubr.bf16.gmra.mxu0 %v13222_v48 }
 0x188   :  { %v3902_v17 = vpop.f32.mrf.mxu1  ;;  %4579 = vmatmul.mubr.bf16.gmra.mxu1 %v13312_v3  ;;  %4624 = vmatpush2.bf16.msra.mxu0 %v11956_v41  ;;  %v11456_v3 = vpack.c.bf16 %v13284_v5, %v13279_v50 }
 0x189   :  { %v13438_v52 = vadd.f32 %v3902_v17, %v3789_v8  ;;  %4475 = vmatprep.mubr.bf16.mxu0 %v11457_v23  ;;  %v3791_v49 = vpop.f32.mrf.mxu0  ;;  %4625 = vmatprep.subr.bf16.mxu0 %v11961_v55  ;;  %v11458_v8 = vpack.c.bf16 %v562_v4, %v556_v22  ;;  %v11967_v17 = vld [vmem:[#allocation7 + $0x884] ss:$8 sps:$4 sm:$0xff]   ;;  %v11965_v55 = vld [vmem:[#allocation7 + $0x880] ss:$8 sps:$4 sm:$0xff]  }
 0x18a   :  { %v3904_v59 = vpop.f32.mrf.mxu1  ;;  %4588 = vmatprep.mubr.bf16.mxu1 %v11459_v60 }
 0x18b   :  { %v13442_v19 = vadd.f32 %v3904_v59, %v3791_v49  ;;  %v3793_v26 = vpop.f32.mrf.mxu0 }
 0x18c   :  { %v3906_v48 = vpop.f32.mrf.mxu1  ;;  %4626 = vmatpush2.bf16.msra.mxu0 %v11959_v35 }
 0x18d   :  { %v13446_v41 = vadd.f32 %v3906_v48, %v3793_v26  ;;  %v13448_v23 = vpop.f32.mrf.mxu0  ;;  %4627 = vmatprep.subr.bf16.mxu0 %v11964_v30 }
 0x18e   :  { %v13450_v28 = vpop.f32.mrf.mxu1 }
 0x18f   :  { %v3799_v33 = vpop.f32.mrf.mxu0  ;;  %4476 = vmatmul.mubr.bf16.gmra.mxu0 %v11456_v3 }
 0x190   :  { %v3912_v59 = vpop.f32.mrf.mxu1  ;;  %4589 = vmatmul.mubr.bf16.gmra.mxu1 %v11458_v8  ;;  %4628 = vmatpush2.bf16.msra.mxu0 %v11962_v38 }
 0x191   :  { %v13452_v27 = vadd.f32 %v3912_v59, %v3799_v33  ;;  %4631 = vmatprep.mubr.bf16.mxu0 %v12835_v56  ;;  %v3801_v50 = vpop.f32.mrf.mxu0  ;;  %4629 = vmatprep.subr.bf16.mxu0 %v11967_v17 }
 0x192   :  { %v3914_v5 = vpop.f32.mrf.mxu1 }
 0x193   :  { %v13455_v53 = vadd.f32 %v3914_v5, %v3801_v50  ;;  %v3803_v60 = vpop.f32.mrf.mxu0 }
 0x194   :  { %v3916_v35 = vpop.f32.mrf.mxu1  ;;  %4630 = vmatpush2.bf16.msra.mxu0 %v11965_v55 }
 0x195   :  { %v13457_v22 = vadd.f32 %v3916_v35, %v3803_v60  ;;  %v13459_v30 = vpop.f32.mrf.mxu0 }
 0x196   :  { %v13461_v4 = vpop.f32.mrf.mxu1 }
 0x197   :  { %v3955_v49 = vpop.f32.mrf.mxu0  ;;  %4632 = vmatmul.mubr.bf16.vlgmr.msra.gmra.mxu0 %v12848_v2 }
 0x198   :  { %v4068_v38 = vpop.f32.mrf.mxu1  ;;  %v3956_v56 = vadd.f32 %v3955_v49, %v13330_v12  ;;  %4641 = vmatprep.mubr.bf16.mxu0 %v12913_v58 }
 0x199   :  { %v3957_v26 = vpop.f32.mrf.mxu0 }
 0x19a   :  { %v4070_v48 = vpop.f32.mrf.mxu1  ;;  %v3958_v3 = vadd.f32 %v3957_v26, %v13334_v14  ;;  %v13467_v8 = vadd.f32 %v4068_v38, %v3956_v56 }
 0x19b   :  { %v3959_v17 = vpop.f32.mrf.mxu0 }
 0x19c   :  { %v4072_v55 = vpop.f32.mrf.mxu1  ;;  %v3960_v33 = vadd.f32 %v3959_v17, %v13336_v51  ;;  %v13470_v59 = vadd.f32 %v4070_v48, %v3958_v3 }
 0x19d   :  { %v3961_v50 = vpop.f32.mrf.mxu0 }
 0x19e   :  { %v13472_v5 = vpop.f32.mrf.mxu1  ;;  %v13475_v2 = vadd.f32 %v3961_v50, %v13338_v21  ;;  %v13477_v12 = vadd.f32 %v4072_v55, %v3960_v33  ;;  %v15967_v55 = vld [vmem:[#allocation29_spill] sm:$0xff]  ;;  %v15968_v50 = vld [vmem:[#allocation32_spill] sm:$0xff] }
 0x19f   :  { %v3965_v58 = vpop.f32.mrf.mxu0  ;;  %4642 = vmatmul.mubr.bf16.gmra.mxu0 %v12947_v31 }
 0x1a0   :  { %v4078_v14 = vpop.f32.mrf.mxu1  ;;  %v3966_v60 = vadd.f32 %v3965_v58, %v13342_v42  ;;  %4651 = vmatprep.mubr.bf16.mxu0 %v12982_v10 }
 0x1a1   :  { %v3967_v35 = vpop.f32.mrf.mxu0 }
 0x1a2   :  { %v4080_v51 = vpop.f32.mrf.mxu1  ;;  %v3968_v49 = vadd.f32 %v3967_v35, %v13346_v0  ;;  %v13483_v38 = vadd.f32 %v4078_v14, %v3966_v60 }
 0x1a3   :  { %v3969_v56 = vpop.f32.mrf.mxu0 }
 0x1a4   :  { %v4082_v26 = vpop.f32.mrf.mxu1  ;;  %v3970_v21 = vadd.f32 %v3969_v56, %v13348_v32  ;;  %v13486_v48 = vadd.f32 %v4080_v51, %v3968_v49 }
 0x1a5   :  { %v3971_v3 = vpop.f32.mrf.mxu0 }
 0x1a6   :  { %v13488_v17 = vpop.f32.mrf.mxu1  ;;  %v13491_v31 = vadd.f32 %v3971_v3, %v13350_v24  ;;  %v13493_v42 = vadd.f32 %v4082_v26, %v3970_v21 }
 0x1a7   :  { %v3975_v10 = vpop.f32.mrf.mxu0  ;;  %4652 = vmatmul.mubr.bf16.gmra.mxu0 %v15967_v55 }
 0x1a8   :  { %v4088_v0 = vpop.f32.mrf.mxu1  ;;  %v3976_v33 = vadd.f32 %v3975_v10, %v13354_v15  ;;  %4661 = vmatprep.mubr.bf16.mxu0 %v15968_v50  ;;  %v15969_v10 = vld [vmem:[#allocation34_spill] sm:$0xff] }
 0x1a9   :  { %v3977_v58 = vpop.f32.mrf.mxu0 }
 0x1aa   :  { %v4090_v32 = vpop.f32.mrf.mxu1  ;;  %v3978_v14 = vadd.f32 %v3977_v58, %v13358_v20  ;;  %v13499_v60 = vadd.f32 %v4088_v0, %v3976_v33  ;;  %v15970_v0 = vld [vmem:[#allocation36_spill] sm:$0xff] }
 0x1ab   :  { %v3979_v35 = vpop.f32.mrf.mxu0 }
 0x1ac   :  { %v4092_v51 = vpop.f32.mrf.mxu1  ;;  %v3980_v24 = vadd.f32 %v3979_v35, %v13360_v43  ;;  %v13502_v49 = vadd.f32 %v4090_v32, %v3978_v14 }
 0x1ad   :  { %v3981_v56 = vpop.f32.mrf.mxu0 }
 0x1ae   :  { %v13504_v26 = vpop.f32.mrf.mxu1  ;;  %v13507_v21 = vadd.f32 %v3981_v56, %v13362_v37  ;;  %v13509_v15 = vadd.f32 %v4092_v51, %v3980_v24 }
 0x1af   :  { %v3985_v3 = vpop.f32.mrf.mxu0  ;;  %4662 = vmatmul.mubr.bf16.gmra.mxu0 %v15969_v10  ;;  %v15971_v10 = vld [vmem:[#allocation37_spill] sm:$0xff] }
 0x1b0   :  { %v4098_v20 = vpop.f32.mrf.mxu1  ;;  %v3986_v55 = vadd.f32 %v3985_v3, %v13366_v54  ;;  %4671 = vmatprep.mubr.bf16.mxu0 %v15970_v0 }
 0x1b1   :  { %v3987_v33 = vpop.f32.mrf.mxu0 }
 0x1b2   :  { %v4100_v43 = vpop.f32.mrf.mxu1  ;;  %v3988_v50 = vadd.f32 %v3987_v33, %v13370_v34  ;;  %v13515_v58 = vadd.f32 %v4098_v20, %v3986_v55  ;;  %v15972_v55 = vld [vmem:[#allocation38_spill] sm:$0xff] }
 0x1b3   :  { %v3989_v32 = vpop.f32.mrf.mxu0 }
 0x1b4   :  { %v4102_v14 = vpop.f32.mrf.mxu1  ;;  %v3990_v37 = vadd.f32 %v3989_v32, %v13372_v46  ;;  %v13518_v35 = vadd.f32 %v4100_v43, %v3988_v50 }
 0x1b5   :  { %v3991_v51 = vpop.f32.mrf.mxu0 }
 0x1b6   :  { %v13520_v24 = vpop.f32.mrf.mxu1  ;;  %v13523_v56 = vadd.f32 %v3991_v51, %v13374_v63  ;;  %v13525_v54 = vadd.f32 %v4102_v14, %v3990_v37  ;;  %v886_v37 = vrot.slane %v13384_v18, 2  ;;  %v892_v51 = vrot.slane %v13390_v9, 2 }
 0x1b7   :  { %v3995_v3 = vpop.f32.mrf.mxu0  ;;  %4672 = vmatmul.mubr.bf16.gmra.mxu0 %v15971_v10 }
 0x1b8   :  { %v4108_v34 = vpop.f32.mrf.mxu1  ;;  %v3996_v20 = vadd.f32 %v3995_v3, %v13378_v45  ;;  %4681 = vmatprep.mubr.bf16.mxu0 %v15972_v55  ;;  %v887_v3 = vrot.slane %v13395_v25, 2 }
 0x1b9   :  { %v3997_v0 = vpop.f32.mrf.mxu0 }
 0x1ba   :  { %v4110_v46 = vpop.f32.mrf.mxu1  ;;  %v3998_v33 = vadd.f32 %v3997_v0, %v13402_v1  ;;  %v13531_v43 = vadd.f32 %v4108_v34, %v3996_v20  ;;  %v893_v1 = vrot.slane %v13400_v29, 2  ;;  %v888_v0 = vsel %vm774_vm1, %v886_v37, %v887_v3 }
 0x1bb   :  { %v3999_v50 = vpop.f32.mrf.mxu0 }
 0x1bc   :  { %v4112_v32 = vpop.f32.mrf.mxu1  ;;  %v4000_v63 = vadd.f32 %v3999_v50, %v13404_v36  ;;  %v13534_v14 = vadd.f32 %v4110_v46, %v3998_v33  ;;  %v894_v46 = vsel %vm774_vm1, %v892_v51, %v893_v1 }
 0x1bd   :  { %v13538_v10 = vpop.f32.mrf.mxu0 }
 0x1be   :  { %v13540_v45 = vpop.f32.mrf.mxu1  ;;  %v13544_v34 = vadd.f32 %v4112_v32, %v4000_v63  ;;  %v11461_v63 = vpack.c.bf16 %v894_v46, %v888_v0 }
 0x1bf   :  { %v4005_v20 = vpop.f32.mrf.mxu0  ;;  %4682 = vmatmul.mubr.bf16.gmra.mxu0 %v13151_v13 }
 0x1c0   :  { %v4118_v36 = vpop.f32.mrf.mxu1  ;;  %v4006_v55 = vadd.f32 %v4005_v20, %v13416_v40  ;;  %4691 = vmatprep.mubr.bf16.mxu0 %v13288_v47 }
 0x1c1   :  { %v4007_v18 = vpop.f32.mrf.mxu0 }
 0x1c2   :  { %v4120_v9 = vpop.f32.mrf.mxu1  ;;  %v4008_v25 = vadd.f32 %v4007_v18, %v13420_v16  ;;  %v13552_v33 = vadd.f32 %v4118_v36, %v4006_v55 }
 0x1c3   :  { %v4009_v29 = vpop.f32.mrf.mxu0 }
 0x1c4   :  { %v4122_v50 = vpop.f32.mrf.mxu1  ;;  %v4010_v32 = vadd.f32 %v4009_v29, %v13427_v62  ;;  %v13555_v13 = vadd.f32 %v4120_v9, %v4008_v25  ;;  %v15974_v29 = vpack.c.bf16 %v13320_v7, %v13317_v61 }
 0x1c5   :  { %v13557_v40 = vpop.f32.mrf.mxu0 }
 0x1c6   :  { %v13559_v47 = vpop.f32.mrf.mxu1  ;;  %v13561_v20 = vadd.f32 %v4122_v50, %v4010_v32 }
 0x1c7   :  { %v4015_v37 = vpop.f32.mrf.mxu0  ;;  %4692 = vmatmul.mubr.bf16.gmra.mxu0 %v13314_v57 }
 0x1c8   :  { %v4128_v51 = vpop.f32.mrf.mxu1  ;;  %v4016_v16 = vadd.f32 %v4015_v37, %v13438_v52  ;;  %4701 = vmatprep.mubr.bf16.mxu0 %v11461_v63 }
 0x1c9   :  { %v4017_v3 = vpop.f32.mrf.mxu0 }
 0x1ca   :  { %v4130_v1 = vpop.f32.mrf.mxu1  ;;  %v4018_v62 = vadd.f32 %v4017_v3, %v13442_v19  ;;  %v13566_v36 = vadd.f32 %v4128_v51, %v4016_v16 }
 0x1cb   :  { %v4019_v55 = vpop.f32.mrf.mxu0 }
 0x1cc   :  { %v4132_v18 = vpop.f32.mrf.mxu1  ;;  %v4020_v9 = vadd.f32 %v4019_v55, %v13446_v41  ;;  %v13569_v0 = vadd.f32 %v4130_v1, %v4018_v62 }
 0x1cd   :  { %v13571_v46 = vpop.f32.mrf.mxu0 }
 0x1ce   :  { %v13573_v25 = vpop.f32.mrf.mxu1  ;;  %v13575_v57 = vadd.f32 %v4132_v18, %v4020_v9 }
 0x1cf   :  { %15973 = vst [vmem:[#allocation22_spill] sm:$0xff] %v13573_v25  ;;  %v4025_v52 = vpop.f32.mrf.mxu0  ;;  %4702 = vmatmul.mubr.bf16.gmra.mxu0 %v15974_v29 }
 0x1d0   :  { %v4138_v19 = vpop.f32.mrf.mxu1  ;;  %v4026_v50 = vadd.f32 %v4025_v52, %v13452_v27 }
 0x1d1   :  { %v4027_v32 = vpop.f32.mrf.mxu0 }
 0x1d2   :  { %v4140_v63 = vpop.f32.mrf.mxu1  ;;  %v4028_v41 = vadd.f32 %v4027_v32, %v13455_v53  ;;  %v13582_v37 = vadd.f32 %v4138_v19, %v4026_v50 }
 0x1d3   :  { %v4029_v51 = vpop.f32.mrf.mxu0 }
 0x1d4   :  { %v4142_v16 = vpop.f32.mrf.mxu1  ;;  %v4030_v3 = vadd.f32 %v4029_v51, %v13457_v22  ;;  %v13585_v1 = vadd.f32 %v4140_v63, %v4028_v41 }
 0x1d5   :  { %v13587_v62 = vpop.f32.mrf.mxu0 }
 0x1d6   :  { %v13589_v55 = vpop.f32.mrf.mxu1  ;;  %v13591_v61 = vadd.f32 %v4142_v16, %v4030_v3 }
 0x1d7   :  { %15975 = vst [vmem:[#allocation23_spill] sm:$0xff] %v13589_v55  ;;  %v4181_v7 = vpop.f32.mrf.mxu0 }
 0x1d8   :  { %v4294_v27 = vpop.f32.mrf.mxu1  ;;  %v4182_v18 = vadd.f32 %v4181_v7, %v13467_v8 }
 0x1d9   :  { %v4183_v9 = vpop.f32.mrf.mxu0 }
 0x1da   :  { %v4296_v53 = vpop.f32.mrf.mxu1  ;;  %v4184_v52 = vadd.f32 %v4183_v9, %v13470_v59  ;;  %v13595_v29 = vadd.f32 %v4294_v27, %v4182_v18 }
 0x1db   :  { %v4185_v19 = vpop.f32.mrf.mxu0 }
 0x1dc   :  { %v4298_v22 = vpop.f32.mrf.mxu1  ;;  %v4186_v50 = vadd.f32 %v4185_v19, %v13477_v12  ;;  %v13598_v32 = vadd.f32 %v4296_v53, %v4184_v52 }
 0x1dd   :  { %v13600_v63 = vpop.f32.mrf.mxu0 }
 0x1de   :  { %v13602_v41 = vpop.f32.mrf.mxu1  ;;  %v13604_v51 = vadd.f32 %v4298_v22, %v4186_v50 }
 0x1df   :  { %15976 = vst [vmem:[#allocation24_spill] sm:$0xff] %v13602_v41  ;;  %v4191_v16 = vpop.f32.mrf.mxu0 }
 0x1e0   :  { %v4304_v8 = vpop.f32.mrf.mxu1  ;;  %v4192_v3 = vadd.f32 %v4191_v16, %v13483_v38 }
 0x1e1   :  { %v4193_v7 = vpop.f32.mrf.mxu0 }
 0x1e2   :  { %v4306_v59 = vpop.f32.mrf.mxu1  ;;  %v4194_v27 = vadd.f32 %v4193_v7, %v13486_v48  ;;  %v13608_v18 = vadd.f32 %v4304_v8, %v4192_v3 }
 0x1e3   :  { %v4195_v9 = vpop.f32.mrf.mxu0 }
 0x1e4   :  { %v4308_v12 = vpop.f32.mrf.mxu1  ;;  %v4196_v53 = vadd.f32 %v4195_v9, %v13493_v42  ;;  %v13611_v52 = vadd.f32 %v4306_v59, %v4194_v27 }
 0x1e5   :  { %v13613_v19 = vpop.f32.mrf.mxu0 }
 0x1e6   :  { %v13615_v22 = vpop.f32.mrf.mxu1  ;;  %v13617_v50 = vadd.f32 %v4308_v12, %v4196_v53 }
 0x1e7   :  { %15977 = vst [vmem:[#allocation25_spill] sm:$0xff] %v13615_v22  ;;  %v4201_v41 = vpop.f32.mrf.mxu0 }
 0x1e8   :  { %v4314_v38 = vpop.f32.mrf.mxu1  ;;  %v4202_v16 = vadd.f32 %v4201_v41, %v13499_v60 }
 0x1e9   :  { %v4203_v55 = vpop.f32.mrf.mxu0 }
 0x1ea   :  { %v4316_v48 = vpop.f32.mrf.mxu1  ;;  %v4204_v8 = vadd.f32 %v4203_v55, %v13502_v49  ;;  %v13621_v3 = vadd.f32 %v4314_v38, %v4202_v16 }
 0x1eb   :  { %v4205_v7 = vpop.f32.mrf.mxu0 }
 0x1ec   :  { %v4318_v42 = vpop.f32.mrf.mxu1  ;;  %v4206_v59 = vadd.f32 %v4205_v7, %v13509_v15  ;;  %v13624_v27 = vadd.f32 %v4316_v48, %v4204_v8 }
 0x1ed   :  { %v13626_v9 = vpop.f32.mrf.mxu0 }
 0x1ee   :  { %15978 = vst [vmem:[#allocation26_spill] sm:$0xff] %v13626_v9  ;;  %v13628_v12 = vpop.f32.mrf.mxu1  ;;  %v13630_v53 = vadd.f32 %v4318_v42, %v4206_v59 }
 0x1ef   :  { %15979 = vst [vmem:[#allocation27_spill] sm:$0xff] %v13628_v12  ;;  %v4211_v22 = vpop.f32.mrf.mxu0 }
 0x1f0   :  { %v4324_v60 = vpop.f32.mrf.mxu1  ;;  %v4212_v41 = vadd.f32 %v4211_v22, %v13515_v58 }
 0x1f1   :  { %v4213_v25 = vpop.f32.mrf.mxu0 }
 0x1f2   :  { %v4326_v49 = vpop.f32.mrf.mxu1  ;;  %v4214_v55 = vadd.f32 %v4213_v25, %v13518_v35  ;;  %v13634_v38 = vadd.f32 %v4324_v60, %v4212_v41 }
 0x1f3   :  { %v4215_v16 = vpop.f32.mrf.mxu0 }
 0x1f4   :  { %v4328_v15 = vpop.f32.mrf.mxu1  ;;  %v4216_v48 = vadd.f32 %v4215_v16, %v13525_v54  ;;  %v13637_v8 = vadd.f32 %v4326_v49, %v4214_v55 }
 0x1f5   :  { %v13639_v7 = vpop.f32.mrf.mxu0 }
 0x1f6   :  { %15980 = vst [vmem:[#allocation28_spill] sm:$0xff] %v13639_v7  ;;  %v13641_v42 = vpop.f32.mrf.mxu1  ;;  %v13643_v59 = vadd.f32 %v4328_v15, %v4216_v48 }
 0x1f7   :  { %15981 = vst [vmem:[#allocation30_spill] sm:$0xff] %v13641_v42  ;;  %v4221_v12 = vpop.f32.mrf.mxu0 }
 0x1f8   :  { %v4334_v58 = vpop.f32.mrf.mxu1  ;;  %v4222_v22 = vadd.f32 %v4221_v12, %v13531_v43 }
 0x1f9   :  { %v4223_v9 = vpop.f32.mrf.mxu0 }
 0x1fa   :  { %v4336_v35 = vpop.f32.mrf.mxu1  ;;  %v4224_v25 = vadd.f32 %v4223_v9, %v13534_v14  ;;  %v13647_v60 = vadd.f32 %v4334_v58, %v4222_v22 }
 0x1fb   :  { %v4225_v41 = vpop.f32.mrf.mxu0 }
 0x1fc   :  { %v4338_v54 = vpop.f32.mrf.mxu1  ;;  %v4226_v49 = vadd.f32 %v4225_v41, %v13544_v34  ;;  %v13650_v55 = vadd.f32 %v4336_v35, %v4224_v25 }
 0x1fd   :  { %v13652_v16 = vpop.f32.mrf.mxu0 }
 0x1fe   :  { %15982 = vst [vmem:[#allocation31_spill] sm:$0xff] %v13652_v16  ;;  %v13654_v15 = vpop.f32.mrf.mxu1  ;;  %v13656_v48 = vadd.f32 %v4338_v54, %v4226_v49 }
 0x1ff   :  { %15983 = vst [vmem:[#allocation33_spill] sm:$0xff] %v13654_v15  ;;  %v4231_v42 = vpop.f32.mrf.mxu0 }
 0x200   :  { %v4344_v43 = vpop.f32.mrf.mxu1  ;;  %v4232_v12 = vadd.f32 %v4231_v42, %v13552_v33 }
 0x201   :  { %v4233_v7 = vpop.f32.mrf.mxu0 }
 0x202   :  { %v4346_v14 = vpop.f32.mrf.mxu1  ;;  %v4234_v9 = vadd.f32 %v4233_v7, %v13555_v13  ;;  %v13660_v58 = vadd.f32 %v4344_v43, %v4232_v12 }
 0x203   :  { %v4235_v22 = vpop.f32.mrf.mxu0 }
 0x204   :  { %v4348_v34 = vpop.f32.mrf.mxu1  ;;  %v4236_v35 = vadd.f32 %v4235_v22, %v13561_v20  ;;  %v13663_v25 = vadd.f32 %v4346_v14, %v4234_v9 }
 0x205   :  { %v13665_v41 = vpop.f32.mrf.mxu0 }
 0x206   :  { %15984 = vst [vmem:[#allocation35_spill] sm:$0xff] %v13665_v41  ;;  %v13667_v54 = vpop.f32.mrf.mxu1  ;;  %v13669_v49 = vadd.f32 %v4348_v34, %v4236_v35 }
 0x207   :  { %15985 = vst [vmem:[#allocation29_spill] sm:$0xff] %v13667_v54  ;;  %v4241_v15 = vpop.f32.mrf.mxu0 }
 0x208   :  { %v4354_v33 = vpop.f32.mrf.mxu1  ;;  %v4242_v42 = vadd.f32 %v4241_v15, %v13566_v36 }
 0x209   :  { %v4243_v16 = vpop.f32.mrf.mxu0 }
 0x20a   :  { %v4356_v13 = vpop.f32.mrf.mxu1  ;;  %v4244_v7 = vadd.f32 %v4243_v16, %v13569_v0  ;;  %v13673_v43 = vadd.f32 %v4354_v33, %v4242_v42 }
 0x20b   :  { %v4245_v12 = vpop.f32.mrf.mxu0 }
 0x20c   :  { %v4358_v20 = vpop.f32.mrf.mxu1  ;;  %v4246_v14 = vadd.f32 %v4245_v12, %v13575_v57  ;;  %v13676_v9 = vadd.f32 %v4356_v13, %v4244_v7  ;;  %v11970_v13 = vld [vmem:[#allocation12 + $0x74] ss:$8 sps:$4 sm:$0xff]  }
 0x20d   :  { %v13678_v22 = vpop.f32.mrf.mxu0  ;;  %v11973_v7 = vld [vmem:[#allocation12 + $0x174] ss:$8 sps:$4 sm:$0xff]   ;;  %8877 = vmatprep.subr.bf16.mxu1 %v11970_v13 }
 0x20e   :  { %v13680_v34 = vpop.f32.mrf.mxu1  ;;  %v13682_v35 = vadd.f32 %v4358_v20, %v4246_v14  ;;  %v11968_v20 = vld [vmem:[#allocation12 + $0x70] ss:$8 sps:$4 sm:$0xff]   ;;  %8990 = vmatprep.subr.bf16.mxu0 %v11973_v7 }
 0x20f   :  { %15986 = vst [vmem:[#allocation32_spill] sm:$0xff] %v13680_v34  ;;  %v4251_v54 = vpop.f32.mrf.mxu0  ;;  %v11971_v14 = vld [vmem:[#allocation12 + $0x170] ss:$8 sps:$4 sm:$0xff]   ;;  %8878 = vmatpush1.bf16.msra.mxu1 %v11968_v20 }
 0x210   :  { %v4364_v36 = vpop.f32.mrf.mxu1  ;;  %v4252_v15 = vadd.f32 %v4251_v54, %v13582_v37  ;;  %8991 = vmatpush1.bf16.msra.mxu0 %v11971_v14  ;;  %v11976_v54 = vld [vmem:[#allocation12 + $0x64] ss:$8 sps:$4 sm:$0xff]   ;;  %v11982_v14 = vld [vmem:[#allocation12 + $0x54] ss:$8 sps:$4 sm:$0xff]  }
 0x211   :  { %v4253_v41 = vpop.f32.mrf.mxu0  ;;  %8879 = vmatprep.subr.bf16.mxu1 %v11976_v54  ;;  %v11988_v54 = vld [vmem:[#allocation12 + $0x44] ss:$8 sps:$4 sm:$0xff]  }
 0x212   :  { %v13685_v0 = vpop.f32.mrf.mxu1  ;;  %v13688_v16 = vadd.f32 %v4253_v41, %v13585_v1  ;;  %v13690_v33 = vadd.f32 %v4364_v36, %v4252_v15  ;;  %v11979_v36 = vld [vmem:[#allocation12 + $0x164] ss:$8 sps:$4 sm:$0xff]  }
 0x213   :  { %v4255_v57 = vpop.f32.mrf.mxu0  ;;  %8992 = vmatprep.subr.bf16.mxu0 %v11979_v36  ;;  %v11991_v36 = vld [vmem:[#allocation12 + $0x144] ss:$8 sps:$4 sm:$0xff]  }
 0x214   :  { %v13692_v42 = vpop.f32.mrf.mxu1  ;;  %v13695_v12 = vadd.f32 %v4255_v57, %v13591_v61  ;;  %v11974_v61 = vld [vmem:[#allocation12 + $0x60] ss:$8 sps:$4 sm:$0xff]  }
 0x215   :  { %15987 = vst [vmem:[#allocation34_spill] sm:$0xff] %v13692_v42  ;;  %v13697_v34 = vpop.f32.mrf.mxu0  ;;  %v11977_v57 = vld [vmem:[#allocation12 + $0x160] ss:$8 sps:$4 sm:$0xff]   ;;  %8880 = vmatpush1.bf16.msra.mxu1 %v11974_v61 }
 0x216   :  { %15988 = vst [vmem:[#allocation36_spill] sm:$0xff] %v13695_v12  ;;  %v13699_v37 = vpop.f32.mrf.mxu1  ;;  %8993 = vmatpush1.bf16.msra.mxu0 %v11977_v57  ;;  %8881 = vmatprep.subr.bf16.mxu1 %v11982_v14  ;;  %v11989_v57 = vld [vmem:[#allocation12 + $0x140] ss:$8 sps:$4 sm:$0xff]  }
 0x217   :  { %15989 = vst [vmem:[#allocation37_spill] sm:$0xff] %v13699_v37  ;;  %v4407_v1 = vpop.f32.mrf.mxu0 }
 0x218   :  { %v13701_v41 = vpop.f32.mrf.mxu1  ;;  %v13704_v15 = vadd.f32 %v4407_v1, %v13595_v29  ;;  %v11980_v1 = vld [vmem:[#allocation12 + $0x50] ss:$8 sps:$4 sm:$0xff]  }
 0x219   :  { %15990 = vst [vmem:[#allocation38_spill] sm:$0xff] %v13701_v41  ;;  %v4409_v42 = vpop.f32.mrf.mxu0  ;;  %v11985_v41 = vld [vmem:[#allocation12 + $0x154] ss:$8 sps:$4 sm:$0xff]   ;;  %8882 = vmatpush1.bf16.msra.mxu1 %v11980_v1 }
 0x21a   :  { %15991 = vst [vmem:[#allocation39_spill] sm:$0xff] %v13704_v15  ;;  %v13706_v12 = vpop.f32.mrf.mxu1  ;;  %v13709_v13 = vadd.f32 %v4409_v42, %v13598_v32  ;;  %v11983_v15 = vld [vmem:[#allocation12 + $0x150] ss:$8 sps:$4 sm:$0xff]   ;;  %8994 = vmatprep.subr.bf16.mxu0 %v11985_v41  ;;  %8883 = vmatprep.subr.bf16.mxu1 %v11988_v54  ;;  %v11997_v1 = vld [vmem:[#allocation12 + $0x134] ss:$8 sps:$4 sm:$0xff]  }
 0x21b   :  { %15992 = vst [vmem:[#allocation40_spill] sm:$0xff] %v13706_v12  ;;  %v4411_v7 = vpop.f32.mrf.mxu0  ;;  %8995 = vmatpush1.bf16.msra.mxu0 %v11983_v15  ;;  %v11994_v15 = vld [vmem:[#allocation12 + $0x34] ss:$8 sps:$4 sm:$0xff]  }
 0x21c   :  { %v13711_v20 = vpop.f32.mrf.mxu1  ;;  %v13714_v29 = vadd.f32 %v4411_v7, %v13604_v51  ;;  %v11986_v51 = vld [vmem:[#allocation12 + $0x40] ss:$8 sps:$4 sm:$0xff]   ;;  %8996 = vmatprep.subr.bf16.mxu0 %v11991_v36  ;;  %v12000_v36 = vld [vmem:[#allocation12 + $0x24] ss:$8 sps:$4 sm:$0xff]  }
 0x21d   :  { %15993 = vst [vmem:[#allocation41_spill] sm:$0xff] %v13711_v20  ;;  %v13716_v37 = vpop.f32.mrf.mxu0  ;;  %8884 = vmatpush1.bf16.msra.mxu1 %v11986_v51  ;;  %v12003_v51 = vld [vmem:[#allocation12 + $0x124] ss:$8 sps:$4 sm:$0xff]  }
 0x21e   :  { %v13718_v12 = vpop.f32.mrf.mxu1  ;;  %8885 = vmatprep.subr.bf16.mxu1 %v11994_v15 }
 0x21f   :  { %v4417_v32 = vpop.f32.mrf.mxu0  ;;  %8997 = vmatpush1.bf16.msra.mxu0 %v11989_v57 }
 0x220   :  { %v13720_v42 = vpop.f32.mrf.mxu1  ;;  %v13723_v61 = vadd.f32 %v4417_v32, %v13608_v18  ;;  %v11992_v18 = vld [vmem:[#allocation12 + $0x30] ss:$8 sps:$4 sm:$0xff]   ;;  %8998 = vmatprep.subr.bf16.mxu0 %v11997_v1 }
 0x221   :  { %15994 = vst [vmem:[#allocation42_spill] sm:$0xff] %v13720_v42  ;;  %v4419_v7 = vpop.f32.mrf.mxu0  ;;  %v11995_v32 = vld [vmem:[#allocation12 + $0x130] ss:$8 sps:$4 sm:$0xff]   ;;  %8886 = vmatpush1.bf16.msra.mxu1 %v11992_v18  ;;  %v12006_v18 = vld [vmem:[#allocation12 + $0x14] ss:$8 sps:$4 sm:$0xff]  }
 0x222   :  { %15995 = vst [vmem:[#allocation43_spill] sm:$0xff] %v13723_v61  ;;  %v13726_v20 = vadd.f32 %v4419_v7, %v13611_v52  ;;  %v13728_v14 = vpop.f32.mrf.mxu1  ;;  %v11998_v7 = vld [vmem:[#allocation12 + $0x20] ss:$8 sps:$4 sm:$0xff]   ;;  %8887 = vmatprep.subr.bf16.mxu1 %v12000_v36 }
 0x223   :  { %15996 = vst [vmem:[#allocation44_spill] sm:$0xff] %v13728_v14  ;;  %v4421_v41 = vpop.f32.mrf.mxu0  ;;  %8999 = vmatpush1.bf16.msra.mxu0 %v11995_v32  ;;  %v12001_v14 = vld [vmem:[#allocation12 + $0x120] ss:$8 sps:$4 sm:$0xff]   ;;  %v12009_v32 = vld [vmem:[#allocation12 + $0x114] ss:$8 sps:$4 sm:$0xff]  }
 0x224   :  { %v13731_v42 = vadd.f32 %v4421_v41, %v13617_v50  ;;  %v13735_v54 = vpop.f32.mrf.mxu1  ;;  %9000 = vmatprep.subr.bf16.mxu0 %v12003_v51 }
 0x225   :  { %v13733_v61 = vpop.f32.mrf.mxu0  ;;  %15997 = vst [vmem:[#allocation45_spill] sm:$0xff] %v13735_v54  ;;  %8888 = vmatpush1.bf16.msra.mxu1 %v11998_v7  ;;  %v12015_v7 = vld [vmem:[#allocation12 + $0x104] ss:$8 sps:$4 sm:$0xff]  }
 0x226   :  { %v13740_v41 = vpop.f32.mrf.mxu1  ;;  %8889 = vmatprep.subr.bf16.mxu1 %v12006_v18 }
 0x227   :  { %v4427_v52 = vpop.f32.mrf.mxu0  ;;  %9001 = vmatpush1.bf16.msra.mxu0 %v12001_v14 }
 0x228   :  { %v13738_v57 = vadd.f32 %v4427_v52, %v13621_v3  ;;  %v12004_v3 = vld [vmem:[#allocation12 + $0x10] ss:$8 sps:$4 sm:$0xff]   ;;  %9002 = vmatprep.subr.bf16.mxu0 %v12009_v32  ;;  %v13750_v36 = vpop.f32.mrf.mxu1 }
 0x229   :  { %v4429_v50 = vpop.f32.mrf.mxu0  ;;  %8890 = vmatpush1.bf16.msra.mxu1 %v12004_v3  ;;  %v12018_v3 = vld [vmem:[#allocation12 + $0xf4] ss:$8 sps:$4 sm:$0xff]  }
 0x22a   :  { %15998 = vst [vmem:[#allocation46_spill] sm:$0xff] %v13738_v57  ;;  %v13743_v15 = vadd.f32 %v4429_v50, %v13624_v27  ;;  %v12007_v57 = vld [vmem:[#allocation12 + $0x110] ss:$8 sps:$4 sm:$0xff]   ;;  %v12012_v27 = vld [vmem:[#allocation12 + $0x4] ss:$8 sps:$4 sm:$0xff]  }
 0x22b   :  { %v4431_v1 = vpop.f32.mrf.mxu0  ;;  %9003 = vmatpush1.bf16.msra.mxu0 %v12007_v57  ;;  %v12010_v50 = vld [vmem:[#allocation12] ss:$8 sps:$4 sm:$0xff]   ;;  %8891 = vmatprep.subr.bf16.mxu1 %v12012_v27  ;;  %v12021_v57 = vld [vmem:[#allocation12 + $0x1f4] ss:$8 sps:$4 sm:$0xff]  }
 0x22c   :  { %15999 = vst [vmem:[#allocation47_spill] sm:$0xff] %v13743_v15  ;;  %v13746_v54 = vadd.f32 %v4431_v1, %v13630_v53  ;;  %v12013_v15 = vld [vmem:[#allocation12 + $0x100] ss:$8 sps:$4 sm:$0xff]   ;;  %9004 = vmatprep.subr.bf16.mxu0 %v12015_v7  ;;  %v13755_v1 = vpop.f32.mrf.mxu1 }
 0x22d   :  { %v13748_v52 = vpop.f32.mrf.mxu0  ;;  %8892 = vmatpush1.bf16.msra.mxu1 %v12010_v50  ;;  %v12027_v50 = vld [vmem:[#allocation12 + $0x1e4] ss:$8 sps:$4 sm:$0xff]  }
 0x22e   :  { %16000 = vst [vmem:[#allocation48_spill] sm:$0xff] %v13746_v54  ;;  %8893 = vmatprep.subr.bf16.mxu1 %v12018_v3  ;;  %v13765_v27 = vpop.f32.mrf.mxu1 }
 0x22f   :  { %v4437_v51 = vpop.f32.mrf.mxu0  ;;  %9005 = vmatpush1.bf16.msra.mxu0 %v12013_v15 }
 0x230   :  { %v13753_v14 = vadd.f32 %v4437_v51, %v13634_v38  ;;  %v12016_v38 = vld [vmem:[#allocation12 + $0xf0] ss:$8 sps:$4 sm:$0xff]   ;;  %9006 = vmatprep.subr.bf16.mxu0 %v12021_v57 }
 0x231   :  { %v4439_v53 = vpop.f32.mrf.mxu0  ;;  %v12019_v51 = vld [vmem:[#allocation12 + $0x1f0] ss:$8 sps:$4 sm:$0xff]   ;;  %8894 = vmatpush2.bf16.msra.mxu1 %v12016_v38  ;;  %v12030_v38 = vld [vmem:[#allocation12 + $0xd4] ss:$8 sps:$4 sm:$0xff]  }
 0x232   :  { %16001 = vst [vmem:[#allocation49_spill] sm:$0xff] %v13753_v14  ;;  %v13758_v18 = vadd.f32 %v4439_v53, %v13637_v8  ;;  %v12024_v8 = vld [vmem:[#allocation12 + $0xe4] ss:$8 sps:$4 sm:$0xff]   ;;  %v12022_v53 = vld [vmem:[#allocation12 + $0xe0] ss:$8 sps:$4 sm:$0xff]  }
 0x233   :  { %v4441_v32 = vpop.f32.mrf.mxu0  ;;  %9007 = vmatpush2.bf16.msra.mxu0 %v12019_v51  ;;  %8895 = vmatprep.subr.bf16.mxu1 %v12024_v8  ;;  %v12033_v51 = vld [vmem:[#allocation12 + $0x1d4] ss:$8 sps:$4 sm:$0xff]  }
 0x234   :  { %16002 = vst [vmem:[#allocation50_spill] sm:$0xff] %v13758_v18  ;;  %v13761_v54 = vadd.f32 %v4441_v32, %v13643_v59  ;;  %v12025_v18 = vld [vmem:[#allocation12 + $0x1e0] ss:$8 sps:$4 sm:$0xff]   ;;  %9008 = vmatprep.subr.bf16.mxu0 %v12027_v50  ;;  %v13770_v32 = vpop.f32.mrf.mxu1 }
 0x235   :  { %v13763_v14 = vpop.f32.mrf.mxu0  ;;  %8896 = vmatpush2.bf16.msra.mxu1 %v12022_v53  ;;  %v12039_v53 = vld [vmem:[#allocation12 + $0x1c4] ss:$8 sps:$4 sm:$0xff]  }
 0x236   :  { %16003 = vst [vmem:[#allocation51_spill] sm:$0xff] %v13761_v54  ;;  %8897 = vmatprep.subr.bf16.mxu1 %v12030_v38  ;;  %v13780_v8 = vpop.f32.mrf.mxu1 }
 0x237   :  { %v4447_v7 = vpop.f32.mrf.mxu0  ;;  %9009 = vmatpush2.bf16.msra.mxu0 %v12025_v18  ;;  %16007 = vst [vmem:[#allocation55_spill] sm:$0xff] %v13780_v8 }
 0x238   :  { %v13768_v15 = vadd.f32 %v4447_v7, %v13647_v60  ;;  %v12028_v60 = vld [vmem:[#allocation12 + $0xd0] ss:$8 sps:$4 sm:$0xff]   ;;  %9010 = vmatprep.subr.bf16.mxu0 %v12033_v51 }
 0x239   :  { %v4449_v59 = vpop.f32.mrf.mxu0  ;;  %v12031_v7 = vld [vmem:[#allocation12 + $0x1d0] ss:$8 sps:$4 sm:$0xff]   ;;  %8898 = vmatpush2.bf16.msra.mxu1 %v12028_v60  ;;  %v12042_v60 = vld [vmem:[#allocation12 + $0xb4] ss:$8 sps:$4 sm:$0xff]  }
 0x23a   :  { %16004 = vst [vmem:[#allocation52_spill] sm:$0xff] %v13768_v15  ;;  %v13773_v3 = vadd.f32 %v4449_v59, %v13650_v55  ;;  %v12036_v55 = vld [vmem:[#allocation12 + $0xc4] ss:$8 sps:$4 sm:$0xff]   ;;  %v12034_v59 = vld [vmem:[#allocation12 + $0xc0] ss:$8 sps:$4 sm:$0xff]  }
 0x23b   :  { %v4451_v57 = vpop.f32.mrf.mxu0  ;;  %9011 = vmatpush2.bf16.msra.mxu0 %v12031_v7  ;;  %8899 = vmatprep.subr.bf16.mxu1 %v12036_v55  ;;  %v12045_v7 = vld [vmem:[#allocation12 + $0x1b4] ss:$8 sps:$4 sm:$0xff]  }
 0x23c   :  { %16005 = vst [vmem:[#allocation53_spill] sm:$0xff] %v13773_v3  ;;  %v13776_v54 = vadd.f32 %v4451_v57, %v13656_v48  ;;  %v12037_v3 = vld [vmem:[#allocation12 + $0x1c0] ss:$8 sps:$4 sm:$0xff]   ;;  %9012 = vmatprep.subr.bf16.mxu0 %v12039_v53  ;;  %v13785_v57 = vpop.f32.mrf.mxu1  ;;  %v12048_v53 = vld [vmem:[#allocation12 + $0xa4] ss:$8 sps:$4 sm:$0xff]  }
 0x23d   :  { %v13778_v15 = vpop.f32.mrf.mxu0  ;;  %8900 = vmatpush2.bf16.msra.mxu1 %v12034_v59  ;;  %v12051_v59 = vld [vmem:[#allocation12 + $0x1a4] ss:$8 sps:$4 sm:$0xff]  }
 0x23e   :  { %16006 = vst [vmem:[#allocation54_spill] sm:$0xff] %v13776_v54  ;;  %8901 = vmatprep.subr.bf16.mxu1 %v12042_v60  ;;  %v13795_v55 = vpop.f32.mrf.mxu1 }
 0x23f   :  { %v4457_v50 = vpop.f32.mrf.mxu0  ;;  %9013 = vmatpush2.bf16.msra.mxu0 %v12037_v3  ;;  %16012 = vst [vmem:[#allocation60_spill] sm:$0xff] %v13795_v55  ;;  %v12589_v3 = vmov 0.0  }
 0x240   :  { %v13783_v18 = vadd.f32 %v4457_v50, %v13660_v58  ;;  %v15855_v58 = vlaneseq  ;;  %v12040_v50 = vld [vmem:[#allocation12 + $0xb0] ss:$8 sps:$4 sm:$0xff]   ;;  %9014 = vmatprep.subr.bf16.mxu0 %v12045_v7  ;;  %5000 = vst [vmem:[#allocation3] sm:$0xff] %v12589_v3  ;;  %5001 = vst [vmem:[#allocation3 + $0x8] sm:$0xff] %v12589_v3  ;;  %v13885_v7 = vpop.f32.mrf.mxu1 }
 0x241   :  { %v4459_v48 = vpop.f32.mrf.mxu0  ;;  %8902 = vmatpush2.bf16.msra.mxu1 %v12040_v50  ;;  %5004 = vst [vmem:[#allocation3 + $0x20] sm:$0xff] %v12589_v3  ;;  %5005 = vst [vmem:[#allocation3 + $0x28] sm:$0xff] %v12589_v3 }
 0x242   :  { %16008 = vst [vmem:[#allocation56_spill] sm:$0xff] %v13783_v18  ;;  %v13788_v38 = vadd.f32 %v4459_v48, %v13663_v25  ;;  %v12043_v18 = vld [vmem:[#allocation12 + $0x1b0] ss:$8 sps:$4 sm:$0xff]   ;;  %vm13798_vm2 = vcmp.lt.s32.totalorder %v15855_v58, 256  ;;  %5002 = vst [vmem:[#allocation3 + $0x10] sm:$0x3] %v12589_v3  ;;  %8903 = vmatprep.subr.bf16.mxu1 %v12048_v53  ;;  %v13895_v53 = vpop.f32.mrf.mxu1 }
 0x243   :  { %v4461_v51 = vpop.f32.mrf.mxu0  ;;  %5003 = vst [vmem:[#allocation3 + $0x18] sm:$0x3] %v12589_v3  ;;  %5006 = vst [vmem:[#allocation3 + $0x30] sm:$0x3] %v12589_v3  ;;  %9015 = vmatpush2.bf16.msra.mxu0 %v12043_v18  ;;  %v12046_v48 = vld [vmem:[#allocation12 + $0xa0] ss:$8 sps:$4 sm:$0xff]  }
 0x244   :  { %16009 = vst [vmem:[#allocation57_spill] sm:$0xff] %v13788_v38  ;;  %v13791_v54 = vadd.f32 %v4461_v51, %v13669_v49  ;;  %5007 = vst [vmem:[#allocation3 + $0x38] sm:$0x3] %v12589_v3  ;;  %v12049_v51 = vld [vmem:[#allocation12 + $0x1a0] ss:$8 sps:$4 sm:$0xff]   ;;  %9016 = vmatprep.subr.bf16.mxu0 %v12051_v59 }
 0x245   :  { %v13793_v8 = vpop.f32.mrf.mxu0  ;;  %5009 = vst [vmem:[#allocation3 + $0x240] sm:$0xff] %v12589_v3  ;;  %5010 = vst [vmem:[#allocation3 + $0x248] sm:$0xff] %v12589_v3  ;;  %8904 = vmatpush2.bf16.msra.mxu1 %v12046_v48  ;;  %v12057_v38 = vld [vmem:[#allocation12 + $0x194] ss:$8 sps:$4 sm:$0xff]  }
 0x246   :  { %16010 = vst [vmem:[#allocation58_spill] sm:$0xff] %v13791_v54  ;;  %16011 = vst [vmem:[#allocation59_spill] sm:$0xff] %v13793_v8  ;;  %v12054_v54 = vld [vmem:[#allocation12 + $0x94] ss:$8 sps:$4 sm:$0xff]  }
 0x247   :  { %5011 = vst [vmem:[#allocation3 + $0x250] sm:$0x3] %v12589_v3  ;;  %5012 = vst [vmem:[#allocation3 + $0x258] sm:$0x3] %v12589_v3  ;;  %v4467_v49 = vpop.f32.mrf.mxu0  ;;  %9017 = vmatpush2.bf16.msra.mxu0 %v12049_v51  ;;  %8905 = vmatprep.subr.bf16.mxu1 %v12054_v54 }
 0x248   :  { %5013 = vst [vmem:[#allocation3 + $0x260] sm:$0xff] %v12589_v3  ;;  %5014 = vst [vmem:[#allocation3 + $0x268] sm:$0xff] %v12589_v3  ;;  %v13883_v18 = vadd.f32 %v4467_v49, %v13673_v43  ;;  %v12052_v43 = vld [vmem:[#allocation12 + $0x90] ss:$8 sps:$4 sm:$0xff]   ;;  %9018 = vmatprep.subr.bf16.mxu0 %v12057_v38  ;;  %v12058_v38 = vld [vmem:[#allocation12 + $0x80] ss:$8 sps:$4 sm:$0xff]  }
 0x249   :  { %5015 = vst [vmem:[#allocation3 + $0x270] sm:$0x3] %v12589_v3  ;;  %5016 = vst [vmem:[#allocation3 + $0x278] sm:$0x3] %v12589_v3  ;;  %v4469_v60 = vpop.f32.mrf.mxu0  ;;  %8906 = vmatpush2.bf16.msra.mxu1 %v12052_v43 }
 0x24a   :  { %5021 = vst.msk [vmem:[#allocation3] ss:$8 sm:$0x3] %vm13798_vm2, %v12589_v3  ;;  %5024 = vst.msk [vmem:[#allocation3 + $0x20] ss:$8 sm:$0x3] %vm13798_vm2, %v12589_v3  ;;  %v13888_v50 = vadd.f32 %v4469_v60, %v13676_v9 }
 0x24b   :  { %5027 = vst.msk [vmem:[#allocation3 + $0x40] ss:$8 sm:$0x3] %vm13798_vm2, %v12589_v3  ;;  %5030 = vst.msk [vmem:[#allocation3 + $0x60] ss:$8 sm:$0x3] %vm13798_vm2, %v12589_v3  ;;  %v4471_v58 = vpop.f32.mrf.mxu0 }
 0x24c   :  { %5033 = vst.msk [vmem:[#allocation3 + $0x80] ss:$8 sm:$0x3] %vm13798_vm2, %v12589_v3  ;;  %5036 = vst.msk [vmem:[#allocation3 + $0xa0] ss:$8 sm:$0x3] %vm13798_vm2, %v12589_v3  ;;  %v13891_v25 = vadd.f32 %v4471_v58, %v13682_v35 }
 0x24d   :  { %5039 = vst.msk [vmem:[#allocation3 + $0xc0] ss:$8 sm:$0x3] %vm13798_vm2, %v12589_v3  ;;  %5042 = vst.msk [vmem:[#allocation3 + $0xe0] ss:$8 sm:$0x3] %vm13798_vm2, %v12589_v3  ;;  %v13893_v49 = vpop.f32.mrf.mxu0 }
 0x24e   :  { %5045 = vst.msk [vmem:[#allocation3 + $0x100] ss:$8 sm:$0x3] %vm13798_vm2, %v12589_v3  ;;  %5048 = vst.msk [vmem:[#allocation3 + $0x120] ss:$8 sm:$0x3] %vm13798_vm2, %v12589_v3 }
 0x24f   :  { %5051 = vst.msk [vmem:[#allocation3 + $0x140] ss:$8 sm:$0x3] %vm13798_vm2, %v12589_v3  ;;  %5054 = vst.msk [vmem:[#allocation3 + $0x160] ss:$8 sm:$0x3] %vm13798_vm2, %v12589_v3  ;;  %v4477_v51 = vpop.f32.mrf.mxu0 }
 0x250   :  { %5057 = vst.msk [vmem:[#allocation3 + $0x180] ss:$8 sm:$0x3] %vm13798_vm2, %v12589_v3  ;;  %5060 = vst.msk [vmem:[#allocation3 + $0x1a0] ss:$8 sm:$0x3] %vm13798_vm2, %v12589_v3  ;;  %v13906_v54 = vadd.f32 %v4477_v51, %v13690_v33  ;;  %v13920_v33 = vpop.f32.mrf.mxu1 }
 0x251   :  { %5063 = vst.msk [vmem:[#allocation3 + $0x1c0] ss:$8 sm:$0x3] %vm13798_vm2, %v12589_v3  ;;  %5066 = vst.msk [vmem:[#allocation3 + $0x1e0] ss:$8 sm:$0x3] %vm13798_vm2, %v12589_v3 }
 0x252   :  { %5069 = vst.msk [vmem:[#allocation3 + $0x200] ss:$8 sm:$0x3] %vm13798_vm2, %v12589_v3  ;;  %5072 = vst.msk [vmem:[#allocation3 + $0x220] ss:$8 sm:$0x3] %vm13798_vm2, %v12589_v3 }
 0x253   :  { %5087 = vst.msk [vmem:[#allocation3 + $0x51] ss:$8 sm:$0x3] %vm13798_vm2, %v12589_v3  ;;  %5090 = vst.msk [vmem:[#allocation3 + $0x71] ss:$8 sm:$0x3] %vm13798_vm2, %v12589_v3 }
 0x254   :  { %5093 = vst.msk [vmem:[#allocation3 + $0x91] ss:$8 sm:$0x3] %vm13798_vm2, %v12589_v3  ;;  %5096 = vst.msk [vmem:[#allocation3 + $0xb1] ss:$8 sm:$0x3] %vm13798_vm2, %v12589_v3 }
 0x255   :  { %5099 = vst.msk [vmem:[#allocation3 + $0xd1] ss:$8 sm:$0x3] %vm13798_vm2, %v12589_v3  ;;  %5102 = vst.msk [vmem:[#allocation3 + $0xf1] ss:$8 sm:$0x3] %vm13798_vm2, %v12589_v3 }
 0x256   :  { %5105 = vst.msk [vmem:[#allocation3 + $0x111] ss:$8 sm:$0x3] %vm13798_vm2, %v12589_v3  ;;  %5108 = vst.msk [vmem:[#allocation3 + $0x131] ss:$8 sm:$0x3] %vm13798_vm2, %v12589_v3 }
 0x257   :  { %5111 = vst.msk [vmem:[#allocation3 + $0x151] ss:$8 sm:$0x3] %vm13798_vm2, %v12589_v3  ;;  %5114 = vst.msk [vmem:[#allocation3 + $0x171] ss:$8 sm:$0x3] %vm13798_vm2, %v12589_v3 }
 0x258   :  { %5117 = vst.msk [vmem:[#allocation3 + $0x191] ss:$8 sm:$0x3] %vm13798_vm2, %v12589_v3  ;;  %5120 = vst.msk [vmem:[#allocation3 + $0x1b1] ss:$8 sm:$0x3] %vm13798_vm2, %v12589_v3 }
 0x259   :  { %5123 = vst.msk [vmem:[#allocation3 + $0x1d1] ss:$8 sm:$0x3] %vm13798_vm2, %v12589_v3  ;;  %5126 = vst.msk [vmem:[#allocation3 + $0x1f1] ss:$8 sm:$0x3] %vm13798_vm2, %v12589_v3 }
 0x25a   :  { %5129 = vst.msk [vmem:[#allocation3 + $0x211] ss:$8 sm:$0x3] %vm13798_vm2, %v12589_v3  ;;  %5132 = vst.msk [vmem:[#allocation3 + $0x231] ss:$8 sm:$0x3] %vm13798_vm2, %v12589_v3 }
 0x25b   :  { %5081 = vst.msk [vmem:[#allocation3 + $0x11] ss:$8 sm:$0x3] %vm13798_vm2, %v12589_v3  ;;  %5084 = vst.msk [vmem:[#allocation3 + $0x31] ss:$8 sm:$0x3] %vm13798_vm2, %v12589_v3 }
 0x25c   :  { %5075 = vst.msk [vmem:[#allocation3 + $0x240] ss:$8 sm:$0x3] %vm13798_vm2, %v12589_v3  ;;  %5078 = vst.msk [vmem:[#allocation3 + $0x260] ss:$8 sm:$0x3] %vm13798_vm2, %v12589_v3 }
 0x25d   :  { %5135 = vst.msk [vmem:[#allocation3 + $0x251] ss:$8 sm:$0x3] %vm13798_vm2, %v12589_v3  ;;  %5138 = vst.msk [vmem:[#allocation3 + $0x271] ss:$8 sm:$0x3] %vm13798_vm2, %v12589_v3 }
 0x25e   :  { %16015 = vst [vmem:[#allocation61_spill] sm:$0xff] %v13883_v18  ;;  %16016 = vst [vmem:[#allocation62_spill] sm:$0xff] %v13885_v7  ;;  %v12055_v3 = vld [vmem:[#allocation12 + $0x190] ss:$8 sps:$4 sm:$0xff]   ;;  %v13897_v59 = vld [vmem:[#allocation3 + $0x8] sm:$0xff] }
 0x25f   :  { %16017 = vst [vmem:[#allocation63_spill] sm:$0xff] %v13888_v50  ;;  %16018 = vst [vmem:[#allocation64_spill] sm:$0xff] %v13891_v25  ;;  %v13899_v9 = vld [vmem:[#allocation3 + $0x28] sm:$0xff]  ;;  %9019 = vmatpush2.bf16.msra.mxu0 %v12055_v3  ;;  %v5632_v58 = vrot.slane %v13897_v59, 1  ;;  %v13910_v50 = vpop.f32.mrf.mxu0  ;;  %v13916_v8 = vld [vmem:[#allocation3 + $0x20] sm:$0xff] }
 0x260   :  { %16019 = vst [vmem:[#allocation65_spill] sm:$0xff] %v13893_v49  ;;  %16020 = vst [vmem:[#allocation66_spill] sm:$0xff] %v13895_v53  ;;  %v12060_v60 = vld [vmem:[#allocation12 + $0x84] ss:$8 sps:$4 sm:$0xff]   ;;  %v5638_v25 = vrot.slane %v13899_v9, 1  ;;  %v13914_v53 = vld [vmem:[#allocation3] sm:$0xff]  ;;  %v11463_v51 = vpack.c.bf16 %v13899_v9, %v13897_v59 }
 0x261   :  { %16021 = vst [vmem:[#allocation67_spill] sm:$0xff] %v13897_v59  ;;  %16022 = vst [vmem:[#allocation68_spill] sm:$0xff] %v13899_v9  ;;  %v12063_v35 = vld [vmem:[#allocation12 + $0x184] ss:$8 sps:$4 sm:$0xff]   ;;  %v12061_v49 = vld [vmem:[#allocation12 + $0x180] ss:$8 sps:$4 sm:$0xff]   ;;  %8907 = vmatprep.subr.bf16.mxu1 %v12060_v60 }
 0x262   :  { %v13901_v48 = vld [vmem:[#allocation3 + $0x18] sm:$0x3]  ;;  %16024 = vst [vmem:[#allocation70_spill] sm:$0xff] %v13906_v54  ;;  %16026 = vst [vmem:[#allocation72_spill] sm:$0xff] %v13910_v50  ;;  %9020 = vmatprep.subr.bf16.mxu0 %v12063_v35  ;;  %v13918_v7 = vld [vmem:[#allocation3 + $0x10] sm:$0x3]  ;;  %8908 = vmatpush2.bf16.msra.mxu1 %v12058_v38  ;;  %v13927_v35 = vpop.f32.mrf.mxu0 }
 0x263   :  { %16023 = vst [vmem:[#allocation69_spill] sm:$0xff] %v13901_v48  ;;  %v13908_v43 = vld [vmem:[#allocation3 + $0x38] sm:$0x3]  ;;  %v5633_v18 = vrot.slane %v13901_v48, 1  ;;  %16027 = vst [vmem:[#allocation73_spill] sm:$0xff] %v13916_v8  ;;  %v5629_v54 = vrot.slane %v13914_v53, 1  ;;  %9021 = vmatpush2.bf16.msra.mxu0 %v12061_v49  ;;  %8909 = vmatprep.mubr.bf16.mxu1 %v11463_v51 }
 0x264   :  { %16025 = vst [vmem:[#allocation71_spill] sm:$0xff] %v13908_v43  ;;  %v5639_v3 = vrot.slane %v13908_v43, 1  ;;  %16028 = vst [vmem:[#allocation74_spill] sm:$0xff] %v13918_v7  ;;  %v13925_v60 = vld [vmem:[#allocation3 + $0x30] sm:$0x3]  ;;  %v5635_v50 = vrot.slane %v13916_v8, 1  ;;  %v13935_v59 = vpop.f32.mrf.mxu0 }
 0x265   :  { %16029 = vst [vmem:[#allocation75_spill] sm:$0xff] %v13920_v33  ;;  %16030 = vst [vmem:[#allocation76_spill] sm:$0xff] %v13925_v60  ;;  %v5634_v43 = vsel %vm445_vm0, %v5632_v58, %v5633_v18  ;;  %v11462_v33 = vpack.c.bf16 %v13916_v8, %v13914_v53  ;;  %v5630_v9 = vrot.slane %v13918_v7, 1  ;;  %v5636_v55 = vrot.slane %v13925_v60, 1  ;;  %v12064_v58 = vld [vmem:[#allocation12 + $0x270] ss:$8 sps:$4 sm:$0xff]  }
 0x266   :  { %16031 = vst [vmem:[#allocation77_spill] sm:$0xff] %v13927_v35  ;;  %v5640_v48 = vsel %vm445_vm0, %v5638_v25, %v5639_v3  ;;  %v13938_v35 = vpop.f32.mrf.mxu1  ;;  %v13941_v25 = vpop.f32.mrf.mxu0  ;;  %v12066_v3 = vld [vmem:[#allocation12 + $0x274] ss:$8 sps:$4 sm:$0xff]  }
 0x267   :  { %v11465_v38 = vpack.c.bf16 %v5640_v48, %v5634_v43  ;;  %8910 = vmatmul.mubr.bf16.vlgmr.msra.gmra.mxu1 %v11462_v33  ;;  %v5631_v18 = vsel %vm445_vm0, %v5629_v54, %v5630_v9  ;;  %v5637_v49 = vsel %vm445_vm0, %v5635_v50, %v5636_v55  ;;  %v12067_v43 = vld [vmem:[#allocation12 + $0x370] ss:$8 sps:$4 sm:$0xff]   ;;  %v12069_v7 = vld [vmem:[#allocation12 + $0x374] ss:$8 sps:$4 sm:$0xff]   ;;  %9103 = vmatprep.subr.bf16.mxu1 %v12066_v3  ;;  %v12072_v33 = vld [vmem:[#allocation12 + $0x264] ss:$8 sps:$4 sm:$0xff]  }
 0x268   :  { %v13944_v51 = vpop.f32.mrf.mxu0  ;;  %v11464_v48 = vpack.c.bf16 %v5637_v49, %v5631_v18  ;;  %v13946_v8 = vpop.f32.mrf.mxu1  ;;  %9104 = vmatpush1.bf16.msra.mxu1 %v12064_v58  ;;  %v12070_v9 = vld [vmem:[#allocation12 + $0x260] ss:$8 sps:$4 sm:$0xff]   ;;  %9216 = vmatprep.subr.bf16.mxu0 %v12069_v7  ;;  %v3889_v55 = vadd.f32 %v13408_v6, %v13406_v44  ;;  %v3899_v50 = vadd.f32 %v13434_v39, %v13432_v11 }
 0x269   :  { %9022 = vmatprep.mubr.bf16.mxu0 %v11465_v38  ;;  %9105 = vmatprep.subr.bf16.mxu1 %v12072_v33  ;;  %v3909_v38 = vadd.f32 %v13450_v28, %v13448_v23  ;;  %v3919_v49 = vadd.f32 %v13461_v4, %v13459_v30  ;;  %v4075_v44 = vadd.f32 %v13472_v5, %v13475_v2  ;;  %v12075_v28 = vld [vmem:[#allocation12 + $0x364] ss:$8 sps:$4 sm:$0xff]  }
 0x26a   :  { %v13948_v60 = vpop.f32.mrf.mxu0  ;;  %9023 = vmatmul.mubr.bf16.vlgmr.msra.gmra.mxu0 %v11464_v48  ;;  %v13958_v18 = vpop.f32.mrf.mxu1  ;;  %v4002_v7 = vadd.f32 %v13538_v10, %v3889_v55  ;;  %v4012_v58 = vadd.f32 %v13557_v40, %v3899_v50  ;;  %v4085_v11 = vadd.f32 %v13488_v17, %v13491_v31  ;;  %v4095_v30 = vadd.f32 %v13504_v26, %v13507_v21  ;;  %v12073_v40 = vld [vmem:[#allocation12 + $0x360] ss:$8 sps:$4 sm:$0xff]   ;;  %v16034_v33 = vld [vmem:[#allocation23_spill] sm:$0xff]  ;;  %v16035_v55 = vld [vmem:[#allocation28_spill] sm:$0xff] }
 0x26b   :  { %9217 = vmatpush1.bf16.msra.mxu0 %v12067_v43  ;;  %v4022_v6 = vadd.f32 %v13571_v46, %v3909_v38  ;;  %v4032_v39 = vadd.f32 %v13587_v62, %v3919_v49  ;;  %v4188_v4 = vadd.f32 %v13600_v63, %v4075_v44  ;;  %v4105_v5 = vadd.f32 %v13520_v24, %v13523_v56  ;;  %v12078_v62 = vld [vmem:[#allocation12 + $0x254] ss:$8 sps:$4 sm:$0xff]   ;;  %v16032_v48 = vld [vmem:[#allocation22_spill] sm:$0xff]  ;;  %v12076_v43 = vld [vmem:[#allocation12 + $0x250] ss:$8 sps:$4 sm:$0xff]  }
 0x26c   :  { %v13954_v54 = vpop.f32.mrf.mxu0  ;;  %9106 = vmatpush1.bf16.msra.mxu1 %v12070_v9  ;;  %v13977_v10 = vpop.f32.mrf.mxu1  ;;  %v4115_v2 = vadd.f32 %v13540_v45, %v4002_v7  ;;  %v4125_v17 = vadd.f32 %v13559_v47, %v4012_v58  ;;  %v4198_v31 = vadd.f32 %v13613_v19, %v4085_v11  ;;  %9218 = vmatprep.subr.bf16.mxu0 %v12075_v28  ;;  %v16033_v21 = vld [vmem:[#allocation26_spill] sm:$0xff]  ;;  %v16036_v56 = vld [vmem:[#allocation31_spill] sm:$0xff]  ;;  %v16038_v19 = vld [vmem:[#allocation24_spill] sm:$0xff] }
 0x26d   :  { %v4135_v26 = vadd.f32 %v16032_v48, %v4022_v6  ;;  %v4208_v63 = vadd.f32 %v16033_v21, %v4095_v30  ;;  %v4145_v9 = vadd.f32 %v16034_v33, %v4032_v39  ;;  %v4218_v24 = vadd.f32 %v16035_v55, %v4105_v5  ;;  %v16037_v50 = vld [vmem:[#allocation35_spill] sm:$0xff]  ;;  %9107 = vmatprep.subr.bf16.mxu1 %v12078_v62  ;;  %v16039_v44 = vld [vmem:[#allocation25_spill] sm:$0xff]  ;;  %v16041_v5 = vld [vmem:[#allocation30_spill] sm:$0xff] }
 0x26e   :  { %v13964_v3 = vpop.f32.mrf.mxu0  ;;  %v4228_v45 = vadd.f32 %v16036_v56, %v4115_v2  ;;  %v4238_v47 = vadd.f32 %v16037_v50, %v4125_v17  ;;  %v4301_v49 = vadd.f32 %v16038_v19, %v4188_v4  ;;  %v13996_v58 = vpop.f32.mrf.mxu1  ;;  %v4311_v6 = vadd.f32 %v16039_v44, %v4198_v31  ;;  %v16040_v28 = vld [vmem:[#allocation27_spill] sm:$0xff]  ;;  %v16042_v17 = vld [vmem:[#allocation33_spill] sm:$0xff]  ;;  %v16044_v31 = vld [vmem:[#allocation32_spill] sm:$0xff] }
 0x26f   :  { %9219 = vmatpush1.bf16.msra.mxu0 %v12073_v40  ;;  %v4248_v7 = vadd.f32 %v13678_v22, %v4135_v26  ;;  %v4258_v11 = vadd.f32 %v13697_v34, %v4145_v9  ;;  %v4321_v30 = vadd.f32 %v16040_v28, %v4208_v63  ;;  %v4331_v2 = vadd.f32 %v16041_v5, %v4218_v24  ;;  %v16043_v4 = vld [vmem:[#allocation29_spill] sm:$0xff]  ;;  %v16045_v63 = vld [vmem:[#allocation36_spill] sm:$0xff]  ;;  %v16049_v50 = vld [vmem:[#allocation38_spill] sm:$0xff] }
 0x270   :  { %v13972_v23 = vpop.f32.mrf.mxu0  ;;  %9108 = vmatpush1.bf16.msra.mxu1 %v12076_v43  ;;  %v4414_v40 = vadd.f32 %v13716_v37, %v4301_v49  ;;  %v4341_v62 = vadd.f32 %v16042_v17, %v4228_v45  ;;  %v4351_v48 = vadd.f32 %v16043_v4, %v4238_v47  ;;  %v4424_v22 = vadd.f32 %v13733_v61, %v4311_v6  ;;  %v12081_v21 = vld [vmem:[#allocation12 + $0x354] ss:$8 sps:$4 sm:$0xff]   ;;  %v16046_v37 = vld [vmem:[#allocation34_spill] sm:$0xff]  ;;  %v4576_v55 = vpop.f32.mrf.mxu1  ;;  %v12079_v24 = vld [vmem:[#allocation12 + $0x350] ss:$8 sps:$4 sm:$0xff]  }
 0x271   :  { %v14011_v43 = vadd.f32 %v16044_v31, %v4248_v7  ;;  %v14015_v34 = vadd.f32 %v13685_v0, %v13688_v16  ;;  %v14019_v33 = vadd.f32 %v16046_v37, %v16045_v63  ;;  %v4434_v9 = vadd.f32 %v13748_v52, %v4321_v30  ;;  %v16047_v56 = vld [vmem:[#allocation37_spill] sm:$0xff]  ;;  %v16048_v45 = vld [vmem:[#allocation39_spill] sm:$0xff]  ;;  %v16050_v19 = vld [vmem:[#allocation40_spill] sm:$0xff]  ;;  %9220 = vmatprep.subr.bf16.mxu0 %v12081_v21 }
 0x272   :  { %v13984_v46 = vpop.f32.mrf.mxu0  ;;  %v14023_v61 = vadd.f32 %v16047_v56, %v4258_v11  ;;  %v4521_v47 = vadd.f32 %v16049_v50, %v16048_v45  ;;  %v4523_v49 = vadd.f32 %v16050_v19, %v13709_v13  ;;  %v16051_v0 = vld [vmem:[#allocation41_spill] sm:$0xff]  ;;  %v12084_v6 = vld [vmem:[#allocation12 + $0x244] ss:$8 sps:$4 sm:$0xff]   ;;  %v4527_v52 = vadd.f32 %v13718_v12, %v4414_v40  ;;  %v16054_v5 = vld [vmem:[#allocation44_spill] sm:$0xff] }
 0x273   :  { %v4525_v16 = vadd.f32 %v16051_v0, %v13714_v29  ;;  %v12082_v44 = vld [vmem:[#allocation12 + $0x240] ss:$8 sps:$4 sm:$0xff]   ;;  %v16052_v28 = vld [vmem:[#allocation43_spill] sm:$0xff]  ;;  %v4533_v17 = vadd.f32 %v16054_v5, %v13726_v20  ;;  %v4444_v4 = vadd.f32 %v13763_v14, %v4331_v2  ;;  %9221 = vmatpush1.bf16.msra.mxu0 %v12079_v24  ;;  %v12090_v63 = vld [vmem:[#allocation12 + $0x234] ss:$8 sps:$4 sm:$0xff]   ;;  %v4537_v21 = vadd.f32 %v13740_v41, %v4424_v22  ;;  %v4580_v41 = vpop.f32.mrf.mxu1 }
 0x274   :  { %v13992_v38 = vpop.f32.mrf.mxu0  ;;  %v16053_v30 = vld [vmem:[#allocation42_spill] sm:$0xff]  ;;  %v16055_v29 = vld [vmem:[#allocation45_spill] sm:$0xff]  ;;  %v16057_v40 = vld [vmem:[#allocation47_spill] sm:$0xff]  ;;  %9109 = vmatprep.subr.bf16.mxu1 %v12084_v6  ;;  %v14055_v2 = vadd.f32 %v13770_v32, %v4434_v9 }
 0x275   :  { %v4531_v11 = vadd.f32 %v16053_v30, %v16052_v28  ;;  %v12085_v13 = vld [vmem:[#allocation12 + $0x340] ss:$8 sps:$4 sm:$0xff]   ;;  %v12087_v31 = vld [vmem:[#allocation12 + $0x344] ss:$8 sps:$4 sm:$0xff]   ;;  %v4535_v37 = vadd.f32 %v16055_v29, %v13731_v42  ;;  %v14046_v45 = vadd.f32 %v13755_v1, %v16057_v40  ;;  %v16058_v20 = vld [vmem:[#allocation48_spill] sm:$0xff]  ;;  %v4454_v42 = vadd.f32 %v13778_v15, %v4341_v62  ;;  %9110 = vmatpush1.bf16.msra.mxu1 %v12082_v44 }
 0x276   :  { %v14000_v39 = vpop.f32.mrf.mxu0  ;;  %v16056_v56 = vld [vmem:[#allocation46_spill] sm:$0xff]  ;;  %v14052_v14 = vadd.f32 %v13765_v27, %v16058_v20  ;;  %v14059_v22 = vadd.f32 %v13948_v60, %v4525_v16  ;;  %v16059_v1 = vld [vmem:[#allocation49_spill] sm:$0xff]  ;;  %v16060_v24 = vld [vmem:[#allocation55_spill] sm:$0xff]  ;;  %9222 = vmatprep.subr.bf16.mxu0 %v12087_v31  ;;  %9111 = vmatprep.subr.bf16.mxu1 %v12090_v63  ;;  %v14080_v44 = vadd.f32 %v13941_v25, %v4521_v47 }
 0x277   :  { %v4541_v12 = vadd.f32 %v13750_v36, %v16056_v56  ;;  %v12088_v36 = vld [vmem:[#allocation12 + $0x230] ss:$8 sps:$4 sm:$0xff]   ;;  %v14063_v19 = vadd.f32 %v16060_v24, %v16059_v1  ;;  %v16061_v0 = vld [vmem:[#allocation50_spill] sm:$0xff]  ;;  %v14083_v30 = vadd.f32 %v13954_v54, %v4527_v52  ;;  %9223 = vmatpush1.bf16.msra.mxu0 %v12085_v13  ;;  %v16068_v56 = vld [vmem:[#allocation53_spill] sm:$0xff]  ;;  %v14103_v54 = vadd.f32 %v13946_v8, %v4454_v42  ;;  %v4582_v13 = vpop.f32.mrf.mxu1 }
 0x278   :  { %v14008_v26 = vpop.f32.mrf.mxu0  ;;  %v14067_v6 = vadd.f32 %v13785_v57, %v16061_v0  ;;  %v16062_v27 = vld [vmem:[#allocation51_spill] sm:$0xff]  ;;  %v16063_v28 = vld [vmem:[#allocation60_spill] sm:$0xff]  ;;  %v16064_v15 = vld [vmem:[#allocation62_spill] sm:$0xff]  ;;  %v14110_v20 = vadd.f32 %v13944_v51, %v4523_v49  ;;  %v14126_v51 = vadd.f32 %v13984_v46, %v4535_v37 }
 0x279   :  { %v14071_v32 = vadd.f32 %v16063_v28, %v16062_v27  ;;  %v14076_v60 = vadd.f32 %v16064_v15, %v4444_v4  ;;  %v16065_v62 = vld [vmem:[#allocation59_spill] sm:$0xff]  ;;  %v16066_v57 = vld [vmem:[#allocation52_spill] sm:$0xff]  ;;  %v16067_v5 = vld [vmem:[#allocation66_spill] sm:$0xff]  ;;  %9112 = vmatpush1.bf16.msra.mxu1 %v12088_v36 }
 0x27a   :  { %v14031_v7 = vpop.f32.mrf.mxu0  ;;  %v4464_v16 = vadd.f32 %v16065_v62, %v4351_v48  ;;  %v14087_v29 = vadd.f32 %v16067_v5, %v16066_v57  ;;  %v16069_v40 = vld [vmem:[#allocation75_spill] sm:$0xff]  ;;  %v16070_v63 = vld [vmem:[#allocation54_spill] sm:$0xff]  ;;  %v14098_v48 = vadd.f32 %v13964_v3, %v4531_v11  ;;  %v16071_v47 = vld [vmem:[#allocation56_spill] sm:$0xff]  ;;  %v4757_v57 = vmul.f32 %v14110_v20, %v14110_v20 }
 0x27b   :  { %v14091_v31 = vadd.f32 %v16069_v40, %v16068_v56  ;;  %v14095_v4 = vadd.f32 %v13938_v35, %v16070_v63  ;;  %v14107_v52 = vadd.f32 %v13958_v18, %v16071_v47  ;;  %v4758_v35 = vmul.f32 %v14059_v22, %v14059_v22  ;;  %v12091_v1 = vld [vmem:[#allocation12 + $0x330] ss:$8 sps:$4 sm:$0xff]   ;;  %v12093_v3 = vld [vmem:[#allocation12 + $0x334] ss:$8 sps:$4 sm:$0xff]   ;;  %v16073_v8 = vld [vmem:[#allocation58_spill] sm:$0xff]  ;;  %v4584_v47 = vpop.f32.mrf.mxu1 }
 0x27c   :  { %v14048_v50 = vpop.f32.mrf.mxu0  ;;  %v16072_v11 = vld [vmem:[#allocation57_spill] sm:$0xff]  ;;  %v14120_v42 = vadd.f32 %v13996_v58, %v16073_v8  ;;  %v14123_v18 = vadd.f32 %v13972_v23, %v4533_v17  ;;  %v12096_v27 = vld [vmem:[#allocation12 + $0x224] ss:$8 sps:$4 sm:$0xff]   ;;  %v14128_v36 = vadd.f32 %v4576_v55, %v4464_v16  ;;  %v4759_v58 = vmul.f32 %v14083_v30, %v14083_v30  ;;  %9224 = vmatprep.subr.bf16.mxu0 %v12093_v3  ;;  %v12100_v63 = vld [vmem:[#allocation12 + $0x210] ss:$8 sps:$4 sm:$0xff]  }
 0x27d   :  { %v14116_v24 = vadd.f32 %v13977_v10, %v16072_v11  ;;  %v12094_v0 = vld [vmem:[#allocation12 + $0x220] ss:$8 sps:$4 sm:$0xff]   ;;  %v4756_v10 = vmul.f32 %v14080_v44, %v14080_v44  ;;  %v12099_v23 = vld [vmem:[#allocation12 + $0x324] ss:$8 sps:$4 sm:$0xff]   ;;  %v12102_v17 = vld [vmem:[#allocation12 + $0x214] ss:$8 sps:$4 sm:$0xff]   ;;  %v4760_v37 = vmul.f32 %v14098_v48, %v14098_v48  ;;  %v14143_v55 = vadd.f32 %v13992_v38, %v4537_v21  ;;  %9113 = vmatprep.subr.bf16.mxu1 %v12096_v27 }
 0x27e   :  { %v14073_v9 = vpop.f32.mrf.mxu0  ;;  %v16074_v28 = vld [vmem:[#allocation61_spill] sm:$0xff]  ;;  %v16075_v62 = vld [vmem:[#allocation63_spill] sm:$0xff]  ;;  %9225 = vmatpush1.bf16.msra.mxu0 %v12091_v1  ;;  %v4714_v5 = vadd.f32 %v14059_v22, %v14080_v44  ;;  %v14150_v40 = vadd.f32 %v14000_v39, %v4541_v12  ;;  %9114 = vmatpush1.bf16.msra.mxu1 %v12094_v0  ;;  %v4761_v38 = vmul.f32 %v14123_v18, %v14123_v18 }
 0x27f   :  { %v14131_v15 = vadd.f32 %v4580_v41, %v16074_v28  ;;  %v14138_v46 = vadd.f32 %v4582_v13, %v16075_v62  ;;  %v12097_v16 = vld [vmem:[#allocation12 + $0x320] ss:$8 sps:$4 sm:$0xff]   ;;  %v4788_v56 = vadd.f32 %v4758_v35, %v4756_v10  ;;  %v4762_v21 = vmul.f32 %v14126_v51, %v14126_v51  ;;  %9226 = vmatprep.subr.bf16.mxu0 %v12099_v23  ;;  %v12105_v23 = vld [vmem:[#allocation12 + $0x314] ss:$8 sps:$4 sm:$0xff]  }
 0x280   :  { %v14100_v25 = vpop.f32.mrf.mxu0  ;;  %v14158_v13 = vadd.f32 %v14008_v26, %v14046_v45  ;;  %9115 = vmatprep.subr.bf16.mxu1 %v12102_v17  ;;  %v16076_v35 = vld [vmem:[#allocation65_spill] sm:$0xff]  ;;  %v4735_v12 = vadd.f32 %v14083_v30, %v14110_v20  ;;  %v4809_v3 = vadd.f32 %v4759_v58, %v4757_v57  ;;  %v14166_v11 = vadd.f32 %v14031_v7, %v14052_v14  ;;  %v12103_v58 = vld [vmem:[#allocation12 + $0x310] ss:$8 sps:$4 sm:$0xff]   ;;  %v12108_v57 = vld [vmem:[#allocation12 + $0x204] ss:$8 sps:$4 sm:$0xff]  }
 0x281   :  { %v4474_v39 = vadd.f32 %v16076_v35, %v14011_v43  ;;  %v4715_v8 = vadd.f32 %v4714_v5, %v14098_v48  ;;  %v4789_v0 = vadd.f32 %v4788_v56, %v4760_v37  ;;  %v4763_v26 = vmul.f32 %v14143_v55, %v14143_v55  ;;  %v16077_v43 = vld [vmem:[#allocation64_spill] sm:$0xff] }
 0x282   :  { %v4667_v49 = vpop.f32.mrf.mxu0  ;;  %v14173_v45 = vadd.f32 %v14048_v50, %v14055_v2  ;;  %9227 = vmatpush1.bf16.msra.mxu0 %v12097_v16  ;;  %v14176_v28 = vadd.f32 %v4584_v47, %v16077_v43  ;;  %v4736_v10 = vadd.f32 %v4735_v12, %v14123_v18  ;;  %v4764_v7 = vmul.f32 %v14150_v40, %v14150_v40  ;;  %v12106_v16 = vld [vmem:[#allocation12 + $0x200] ss:$8 sps:$4 sm:$0xff]   ;;  %v12114_v47 = vld [vmem:[#allocation12 + $0x2f4] ss:$8 sps:$4 sm:$0xff]  }
 0x283   :  { %v14183_v14 = vadd.f32 %v14073_v9, %v14063_v19  ;;  %9116 = vmatpush1.bf16.msra.mxu1 %v12100_v63  ;;  %v4810_v17 = vadd.f32 %v4809_v3, %v4761_v38  ;;  %v4716_v50 = vadd.f32 %v4715_v8, %v14126_v51  ;;  %v4790_v2 = vadd.f32 %v4789_v0, %v4762_v21  ;;  %v12111_v63 = vld [vmem:[#allocation12 + $0x304] ss:$8 sps:$4 sm:$0xff]   ;;  %v12109_v3 = vld [vmem:[#allocation12 + $0x300] ss:$8 sps:$4 sm:$0xff]   ;;  %v4586_v8 = vpop.f32.mrf.mxu1 }
 0x284   :  { %v4669_v41 = vpop.f32.mrf.mxu0  ;;  %v4765_v62 = vmul.f32 %v14158_v13, %v14158_v13  ;;  %v4737_v5 = vadd.f32 %v4736_v10, %v14143_v55  ;;  %v4766_v56 = vmul.f32 %v14166_v11, %v14166_v11  ;;  %v14193_v19 = vadd.f32 %v14100_v25, %v14067_v6  ;;  %9228 = vmatprep.subr.bf16.mxu0 %v12105_v23 }
 0x285   :  { %v14196_v9 = vadd.f32 %v4667_v49, %v14071_v32  ;;  %v4811_v38 = vadd.f32 %v4810_v17, %v4763_v26  ;;  %v4717_v21 = vadd.f32 %v4716_v50, %v14150_v40  ;;  %v4767_v35 = vmul.f32 %v14173_v45, %v14173_v45  ;;  %9117 = vmatprep.subr.bf16.mxu1 %v12108_v57  ;;  %v12112_v49 = vld [vmem:[#allocation12 + $0x2f0] ss:$8 sps:$4 sm:$0xff]  }
 0x286   :  { %v4673_v1 = vpop.f32.mrf.mxu0  ;;  %9229 = vmatpush1.bf16.msra.mxu0 %v12103_v58  ;;  %v4791_v0 = vadd.f32 %v4790_v2, %v4764_v7  ;;  %v4768_v6 = vmul.f32 %v14183_v14, %v14183_v14  ;;  %v14204_v32 = vadd.f32 %v4669_v41, %v14076_v60  ;;  %v4738_v26 = vadd.f32 %v4737_v5, %v14158_v13  ;;  %v16078_v5 = vld [vmem:[#allocation72_spill] sm:$0xff] }
 0x287   :  { %v14207_v25 = vadd.f32 %v4673_v1, %v14087_v29  ;;  %9118 = vmatpush1.bf16.msra.mxu1 %v12106_v16  ;;  %v4812_v43 = vadd.f32 %v4811_v38, %v4765_v62  ;;  %v4718_v10 = vadd.f32 %v4717_v21, %v14166_v11  ;;  %9230 = vmatprep.subr.bf16.mxu0 %v12111_v63  ;;  %v12118_v38 = vld [vmem:[#allocation12 + $0x2e0] ss:$8 sps:$4 sm:$0xff]   ;;  %v12120_v21 = vld [vmem:[#allocation12 + $0x2e4] ss:$8 sps:$4 sm:$0xff]  }
 0x288   :  { %v4675_v27 = vpop.f32.mrf.mxu0  ;;  %9119 = vmatprep.subr.bf16.mxu1 %v12114_v47  ;;  %v4792_v7 = vadd.f32 %v4791_v0, %v4766_v56  ;;  %v4769_v23 = vmul.f32 %v14193_v19, %v14193_v19  ;;  %v4770_v60 = vmul.f32 %v14196_v9, %v14196_v9  ;;  %v14218_v41 = vadd.f32 %v4586_v8, %v4474_v39  ;;  %v12115_v39 = vld [vmem:[#allocation12 + $0x3f0] ss:$8 sps:$4 sm:$0xff]  }
 0x289   :  { %v14216_v29 = vadd.f32 %v4675_v27, %v14091_v31  ;;  %v4739_v1 = vadd.f32 %v4738_v26, %v14173_v45  ;;  %v4813_v17 = vadd.f32 %v4812_v43, %v4767_v35  ;;  %v4719_v62 = vadd.f32 %v4718_v10, %v14183_v14  ;;  %v12117_v27 = vld [vmem:[#allocation12 + $0x3f4] ss:$8 sps:$4 sm:$0xff]   ;;  %v4590_v35 = vpop.f32.mrf.mxu1  ;;  %v12121_v43 = vld [vmem:[#allocation12 + $0x3e0] ss:$8 sps:$4 sm:$0xff]  }
 0x28a   :  { %v4677_v37 = vpop.f32.mrf.mxu0  ;;  %9231 = vmatpush1.bf16.msra.mxu0 %v12109_v3  ;;  %v4793_v16 = vadd.f32 %v4792_v7, %v4768_v6  ;;  %v4771_v57 = vmul.f32 %v14204_v32, %v14204_v32  ;;  %v4772_v31 = vmul.f32 %v14207_v25, %v14207_v25  ;;  %v4480_v56 = vadd.f32 %v16078_v5, %v14015_v34  ;;  %v12123_v34 = vld [vmem:[#allocation12 + $0x3e4] ss:$8 sps:$4 sm:$0xff]  }
 0x28b   :  { %v14222_v50 = vadd.f32 %v4677_v37, %v14095_v4  ;;  %9120 = vmatpush2.bf16.msra.mxu1 %v12112_v49  ;;  %v4740_v4 = vadd.f32 %v4739_v1, %v14193_v19  ;;  %v4814_v3 = vadd.f32 %v4813_v17, %v4769_v23  ;;  %v4720_v8 = vadd.f32 %v4719_v62, %v14196_v9  ;;  %v12126_v49 = vld [vmem:[#allocation12 + $0x2d4] ss:$8 sps:$4 sm:$0xff]  }
 0x28c   :  { %v4679_v12 = vpop.f32.mrf.mxu0  ;;  %v4794_v0 = vadd.f32 %v4793_v16, %v4770_v60  ;;  %v4773_v6 = vmul.f32 %v14216_v29, %v14216_v29  ;;  %9232 = vmatprep.subr.bf16.mxu0 %v12117_v27  ;;  %9121 = vmatprep.subr.bf16.mxu1 %v12120_v21  ;;  %v12124_v60 = vld [vmem:[#allocation12 + $0x2d0] ss:$8 sps:$4 sm:$0xff]   ;;  %v4592_v16 = vpop.f32.mrf.mxu1 }
 0x28d   :  { %v14233_v37 = vadd.f32 %v4679_v12, %v14103_v54  ;;  %v4774_v54 = vmul.f32 %v14222_v50, %v14222_v50  ;;  %v4741_v10 = vadd.f32 %v4740_v4, %v14204_v32  ;;  %v4721_v7 = vadd.f32 %v4720_v8, %v14207_v25  ;;  %v12127_v8 = vld [vmem:[#allocation12 + $0x3d0] ss:$8 sps:$4 sm:$0xff]  }
 0x28e   :  { %v4683_v58 = vpop.f32.mrf.mxu0  ;;  %9233 = vmatpush2.bf16.msra.mxu0 %v12115_v39  ;;  %v4795_v23 = vadd.f32 %v4794_v0, %v4772_v31  ;;  %v12129_v0 = vld [vmem:[#allocation12 + $0x3d4] ss:$8 sps:$4 sm:$0xff]  }
 0x28f   :  { %v14236_v63 = vadd.f32 %v4683_v58, %v14107_v52  ;;  %v4815_v58 = vadd.f32 %v4814_v3, %v4771_v57  ;;  %9122 = vmatpush2.bf16.msra.mxu1 %v12118_v38  ;;  %v4775_v1 = vmul.f32 %v14233_v37, %v14233_v37  ;;  %9234 = vmatprep.subr.bf16.mxu0 %v12123_v34  ;;  %v16080_v38 = vld [vmem:[#allocation77_spill] sm:$0xff] }
 0x290   :  { %v4685_v2 = vpop.f32.mrf.mxu0  ;;  %9123 = vmatprep.subr.bf16.mxu1 %v12126_v49  ;;  %v4742_v57 = vadd.f32 %v4741_v10, %v14216_v29  ;;  %v4722_v31 = vadd.f32 %v4721_v7, %v14222_v50  ;;  %v4796_v5 = vadd.f32 %v4795_v23, %v4774_v54  ;;  %v4482_v21 = vadd.f32 %v16080_v38, %v14019_v33  ;;  %v12130_v33 = vld [vmem:[#allocation12 + $0x2c0] ss:$8 sps:$4 sm:$0xff]  }
 0x291   :  { %v14244_v52 = vadd.f32 %v4685_v2, %v14116_v24  ;;  %v4776_v24 = vmul.f32 %v14236_v63, %v14236_v63  ;;  %v16079_v2 = vld [vmem:[#allocation70_spill] sm:$0xff]  ;;  %v4816_v27 = vadd.f32 %v4815_v58, %v4773_v6  ;;  %v4593_v10 = vadd.f32 %v4592_v16, %v4480_v56  ;;  %v4594_v58 = vpop.f32.mrf.mxu1 }
 0x292   :  { %v4687_v47 = vpop.f32.mrf.mxu0  ;;  %v4591_v62 = vadd.f32 %v4590_v35, %v16079_v2  ;;  %9235 = vmatpush2.bf16.msra.mxu0 %v12121_v43  ;;  %v4743_v35 = vadd.f32 %v4742_v57, %v14233_v37  ;;  %v4723_v3 = vadd.f32 %v4722_v31, %v14236_v63  ;;  %v12132_v43 = vld [vmem:[#allocation12 + $0x2c4] ss:$8 sps:$4 sm:$0xff]   ;;  %v12133_v56 = vld [vmem:[#allocation12 + $0x3c0] ss:$8 sps:$4 sm:$0xff]  }
 0x293   :  { %v14247_v12 = vadd.f32 %v4687_v47, %v14120_v42  ;;  %v4777_v4 = vmul.f32 %v14244_v52, %v14244_v52  ;;  %9124 = vmatpush2.bf16.msra.mxu1 %v12124_v60  ;;  %v4817_v6 = vadd.f32 %v4816_v27, %v4775_v1  ;;  %v4797_v34 = vadd.f32 %v4796_v5, %v4776_v24  ;;  %v12135_v60 = vld [vmem:[#allocation12 + $0x3c4] ss:$8 sps:$4 sm:$0xff]   ;;  %v12138_v1 = vld [vmem:[#allocation12 + $0x2b4] ss:$8 sps:$4 sm:$0xff]   ;;  %v12136_v5 = vld [vmem:[#allocation12 + $0x2b0] ss:$8 sps:$4 sm:$0xff]  }
 0x294   :  { %v4689_v26 = vpop.f32.mrf.mxu0  ;;  %v4744_v7 = vadd.f32 %v4743_v35, %v14244_v52  ;;  %9236 = vmatprep.subr.bf16.mxu0 %v12129_v0  ;;  %9125 = vmatprep.subr.bf16.mxu1 %v12132_v43  ;;  %v4596_v35 = vpop.f32.mrf.mxu1  ;;  %v12139_v43 = vld [vmem:[#allocation12 + $0x3b0] ss:$8 sps:$4 sm:$0xff]  }
 0x295   :  { %v14256_v42 = vadd.f32 %v4689_v26, %v14128_v36  ;;  %v4778_v36 = vmul.f32 %v14247_v12, %v14247_v12  ;;  %v4818_v24 = vadd.f32 %v4817_v6, %v4777_v4  ;;  %v4484_v4 = vadd.f32 %v13935_v59, %v14023_v61 }
 0x296   :  { %v4693_v17 = vpop.f32.mrf.mxu0  ;;  %9237 = vmatpush2.bf16.msra.mxu0 %v12127_v8  ;;  %v4595_v6 = vadd.f32 %v4594_v58, %v4482_v21  ;;  %v12142_v21 = vld [vmem:[#allocation12 + $0x2a0] ss:$8 sps:$4 sm:$0xff]   ;;  %v12144_v58 = vld [vmem:[#allocation12 + $0x2a4] ss:$8 sps:$4 sm:$0xff]  }
 0x297   :  { %v14262_v39 = vadd.f32 %v4693_v17, %v14131_v15  ;;  %v4779_v49 = vmul.f32 %v14256_v42, %v14256_v42  ;;  %v4798_v17 = vadd.f32 %v4797_v34, %v4778_v36  ;;  %v4745_v16 = vadd.f32 %v4744_v7, %v14256_v42  ;;  %9126 = vmatpush2.bf16.msra.mxu1 %v12130_v33  ;;  %v12141_v7 = vld [vmem:[#allocation12 + $0x3b4] ss:$8 sps:$4 sm:$0xff]  }
 0x298   :  { %v4695_v47 = vpop.f32.mrf.mxu0  ;;  %9238 = vmatprep.subr.bf16.mxu0 %v12135_v60  ;;  %9127 = vmatprep.subr.bf16.mxu1 %v12138_v1 }
 0x299   :  { %v14273_v15 = vadd.f32 %v4695_v47, %v14138_v46  ;;  %v4780_v54 = vmul.f32 %v14262_v39, %v14262_v39  ;;  %v4724_v46 = vadd.f32 %v4723_v3, %v14247_v12  ;;  %v4819_v36 = vadd.f32 %v4818_v24, %v4779_v49 }
 0x29a   :  { %v4697_v26 = vpop.f32.mrf.mxu0  ;;  %9239 = vmatpush2.bf16.msra.mxu0 %v12133_v56 }
 0x29b   :  { %v14282_v23 = vadd.f32 %v4697_v26, %v14176_v28  ;;  %v4781_v2 = vmul.f32 %v14273_v15, %v14273_v15  ;;  %v4725_v31 = vadd.f32 %v4724_v46, %v14262_v39  ;;  %v4799_v47 = vadd.f32 %v4798_v17, %v4780_v54  ;;  %9128 = vmatpush2.bf16.msra.mxu1 %v12136_v5 }
 0x29c   :  { %v4699_v57 = vpop.f32.mrf.mxu0  ;;  %v4746_v3 = vadd.f32 %v4745_v16, %v14273_v15  ;;  %v4597_v46 = vadd.f32 %v4596_v35, %v4484_v4  ;;  %9240 = vmatprep.subr.bf16.mxu0 %v12141_v7  ;;  %9129 = vmatprep.subr.bf16.mxu1 %v12144_v58  ;;  %v12145_v16 = vld [vmem:[#allocation12 + $0x3a0] ss:$8 sps:$4 sm:$0xff]  }
 0x29d   :  { %v4782_v28 = vmul.f32 %v14282_v23, %v14282_v23  ;;  %v14291_v27 = vadd.f32 %v4699_v57, %v14218_v41  ;;  %v4726_v8 = vadd.f32 %v4725_v31, %v14282_v23  ;;  %v4820_v34 = vadd.f32 %v4819_v36, %v4781_v2  ;;  %v12147_v57 = vld [vmem:[#allocation12 + $0x3a4] ss:$8 sps:$4 sm:$0xff]   ;;  %v12148_v36 = vld [vmem:[#allocation12 + $0x290] ss:$8 sps:$4 sm:$0xff]   ;;  %v16084_v58 = vld [vmem:[#allocation69_spill] sm:$0xff] }
 0x29e   :  { %v4703_v38 = vpop.f32.mrf.mxu0  ;;  %9241 = vmatpush2.bf16.msra.mxu0 %v12139_v43 }
 0x29f   :  { %v4783_v0 = vmul.f32 %v14291_v27, %v14291_v27  ;;  %v14299_v41 = vadd.f32 %v4703_v38, %v4591_v62  ;;  %v4800_v26 = vadd.f32 %v4799_v47, %v4782_v28  ;;  %v4747_v59 = vadd.f32 %v4746_v3, %v14291_v27  ;;  %9130 = vmatpush2.bf16.msra.mxu1 %v12142_v21  ;;  %v12156_v21 = vld [vmem:[#allocation12 + $0x284] ss:$8 sps:$4 sm:$0xff]  }
 0x2a0   :  { %v4705_v33 = vpop.f32.mrf.mxu0  ;;  %9242 = vmatprep.subr.bf16.mxu0 %v12147_v57 }
 0x2a1   :  { %v4727_v61 = vadd.f32 %v4726_v8, %v14299_v41  ;;  %v4784_v49 = vmul.f32 %v14299_v41, %v14299_v41  ;;  %v14305_v54 = vadd.f32 %v4705_v33, %v4593_v10  ;;  %v4821_v62 = vadd.f32 %v4820_v34, %v4783_v0  ;;  %v12150_v10 = vld [vmem:[#allocation12 + $0x294] ss:$8 sps:$4 sm:$0xff]   ;;  %v16081_v8 = vld [vmem:[#allocation67_spill] sm:$0xff] }
 0x2a2   :  { %v4707_v60 = vpop.f32.mrf.mxu0  ;;  %9131 = vmatprep.subr.bf16.mxu1 %v12150_v10  ;;  %v5960_v0 = vrot.slane %v16081_v8, 2  ;;  %v16083_v33 = vld [vmem:[#allocation73_spill] sm:$0xff]  ;;  %9243 = vmatpush2.bf16.msra.mxu0 %v12145_v16 }
 0x2a3   :  { %v4801_v1 = vadd.f32 %v4800_v26, %v4784_v49  ;;  %v4748_v24 = vadd.f32 %v4747_v59, %v14305_v54  ;;  %v4785_v17 = vmul.f32 %v14305_v54, %v14305_v54  ;;  %v14310_v2 = vadd.f32 %v4707_v60, %v4595_v6  ;;  %v16082_v6 = vld [vmem:[#allocation68_spill] sm:$0xff]  ;;  %9132 = vmatpush2.bf16.msra.mxu1 %v12148_v36  ;;  %v12154_v60 = vld [vmem:[#allocation12 + $0x280] ss:$8 sps:$4 sm:$0xff]  }
 0x2a4   :  { %v4709_v56 = vpop.f32.mrf.mxu0  ;;  %v5966_v34 = vrot.slane %v16082_v6, 2  ;;  %v5957_v26 = vrot.slane %v13914_v53, 2  ;;  %v5963_v59 = vrot.slane %v16083_v33, 2  ;;  %9133 = vmatprep.subr.bf16.mxu1 %v12156_v21  ;;  %v16086_v36 = vld [vmem:[#allocation74_spill] sm:$0xff]  ;;  %v12162_v6 = vld [vmem:[#allocation12 + $0x474] ss:$8 sps:$4 sm:$0xff]  }
 0x2a5   :  { %v4822_v31 = vadd.f32 %v4821_v62, %v4785_v17  ;;  %v4728_v28 = vadd.f32 %v4727_v61, %v14310_v2  ;;  %v4786_v5 = vmul.f32 %v14310_v2, %v14310_v2  ;;  %v14315_v4 = vadd.f32 %v4709_v56, %v4597_v46  ;;  %v12151_v46 = vld [vmem:[#allocation12 + $0x390] ss:$8 sps:$4 sm:$0xff]   ;;  %v12153_v62 = vld [vmem:[#allocation12 + $0x394] ss:$8 sps:$4 sm:$0xff]  }
 0x2a6   :  { %9244 = vmatprep.subr.bf16.mxu0 %v12153_v62 }
 0x2a7   :  { %v4729_v47 = vrot.slane %v4728_v28, 4  ;;  %v4802_v38 = vadd.f32 %v4801_v1, %v4786_v5  ;;  %v4749_v35 = vadd.f32 %v4748_v24, %v14315_v4  ;;  %v4787_v3 = vmul.f32 %v14315_v4, %v14315_v4  ;;  %v16085_v24 = vld [vmem:[#allocation71_spill] sm:$0xff]  ;;  %9245 = vmatpush2.bf16.msra.mxu0 %v12151_v46  ;;  %9134 = vmatpush2.bf16.msra.mxu1 %v12154_v60 }
 0x2a8   :  { %v5961_v1 = vrot.slane %v16084_v58, 2  ;;  %v5967_v17 = vrot.slane %v16085_v24, 2  ;;  %v12159_v5 = vld [vmem:[#allocation12 + $0x384] ss:$8 sps:$4 sm:$0xff]   ;;  %9329 = vmatprep.subr.bf16.mxu1 %v12162_v6 }
 0x2a9   :  { %v4730_v61 = vadd.f32 %v4729_v47, %v4728_v28  ;;  %v4803_v49 = vrot.slane %v4802_v38, 4  ;;  %v4750_v43 = vrot.slane %v4749_v35, 4  ;;  %v4823_v7 = vadd.f32 %v4822_v31, %v4787_v3  ;;  %v12157_v28 = vld [vmem:[#allocation12 + $0x380] ss:$8 sps:$4 sm:$0xff]   ;;  %v16087_v3 = vld [vmem:[#allocation76_spill] sm:$0xff]  ;;  %9246 = vmatprep.subr.bf16.mxu0 %v12159_v5 }
 0x2aa   :  { %v14327_v16 = vsel %vm774_vm1, %v5960_v0, %v5961_v1  ;;  %v14330_v31 = vsel %vm774_vm1, %v5966_v34, %v5967_v17  ;;  %v5958_v47 = vrot.slane %v16086_v36, 2  ;;  %v5964_v8 = vrot.slane %v16087_v3, 2  ;;  %v12165_v17 = vld [vmem:[#allocation12 + $0x574] ss:$8 sps:$4 sm:$0xff]  }
 0x2ab   :  { %v4731_v57 = vrot.slane %v4730_v61, 2  ;;  %v4804_v10 = vadd.f32 %v4803_v49, %v4802_v38  ;;  %v4751_v56 = vadd.f32 %v4750_v43, %v4749_v35  ;;  %v4824_v53 = vrot.slane %v4823_v7, 4  ;;  %9247 = vmatpush2.bf16.msra.mxu0 %v12157_v28 }
 0x2ac   :  { %v14337_v0 = vsel %vm774_vm1, %v5957_v26, %v5958_v47  ;;  %v14340_v34 = vsel %vm774_vm1, %v5963_v59, %v5964_v8  ;;  %9442 = vmatprep.subr.bf16.mxu0 %v12165_v17 }
 0x2ad   :  { %v4732_v33 = vadd.f32 %v4731_v57, %v4730_v61  ;;  %v4805_v38 = vrot.slane %v4804_v10, 2  ;;  %v4752_v35 = vrot.slane %v4751_v56, 2  ;;  %v4825_v49 = vadd.f32 %v4824_v53, %v4823_v7 }
 0x2af   :  { %v4733_v46 = vrot.slane %v4732_v33, 1  ;;  %v4806_v62 = vadd.f32 %v4805_v38, %v4804_v10  ;;  %v4753_v21 = vadd.f32 %v4752_v35, %v4751_v56  ;;  %v4826_v58 = vrot.slane %v4825_v49, 2 }
 0x2b1   :  { %v4734_v7 = vadd.f32 %v4733_v46, %v4732_v33  ;;  %v4807_v60 = vrot.slane %v4806_v62, 1  ;;  %v4754_v1 = vrot.slane %v4753_v21, 1  ;;  %v4827_v24 = vadd.f32 %v4826_v58, %v4825_v49 }
 0x2b2   :  { %v12590_v33 = vmov 1966171168   ;;  %v16088_v46 = vlaneseq }
 0x2b3   :  { %v4808_v57 = vadd.f32 %v4807_v60, %v4806_v62  ;;  %v4830_v26 = vmul.f32 0.0078125, %v4734_v7  ;;  %v4755_v53 = vadd.f32 %v4754_v1, %v4753_v21  ;;  %v4828_v5 = vrot.slane %v4827_v24, 1 }
 0x2b4   :  { %v4846_v35 = vunpack.c.l.s4 %v12590_v33  ;;  %v4849_v62 = vshrl.u32 %v16088_v46, 7 }
 0x2b5   :  { %v4832_v59 = vmul.f32 0.0078125, %v4808_v57  ;;  %v4834_v36 = vmul.f32 %v4830_v26, %v4830_v26  ;;  %v4829_v47 = vadd.f32 %v4828_v5, %v4827_v24  ;;  %v4831_v10 = vmul.f32 0.0078125, %v4755_v53  ;;  %v4712_v24 = vld [vmem:[#allocation9] sm:$0x3] }
 0x2b6   :  { %v4847_v49 = vunpack.c.0.s8 %v4846_v35  ;;  %v14349_v57 = vsub.s32 0, %v4849_v62  ;;  %v14351_v53 = vsub.s32 1, %v4849_v62 }
 0x2b7   :  { %v4836_v56 = vsub.f32 %v4832_v59, %v4834_v36  ;;  %v4833_v3 = vmul.f32 0.0078125, %v4829_v47  ;;  %v4835_v8 = vmul.f32 %v4831_v10, %v4831_v10 }
 0x2b8   :  { %v14345_v58 = vsub.s32 %v4847_v49, %v4849_v62  ;;  %16090 = vst [vmem:[#allocation26_spill] sm:$0xff] %v14349_v57  ;;  %16091 = vst [vmem:[#allocation23_spill] sm:$0xff] %v14351_v53 }
 0x2b9   :  { %v4838_v6 = vadd.f32 1e-05, %v4836_v56  ;;  %v4837_v38 = vsub.f32 %v4833_v3, %v4835_v8 }
 0x2ba   :  { %16089 = vst [vmem:[#allocation22_spill] sm:$0xff] %v14345_v58 }
 0x2bb   :  { %v4839_v28 = vadd.f32 1e-05, %v4837_v38  ;;  %12400 = vrsqrt.f32 %v4838_v6  ;;  %v4713_v38 = vld [vmem:[#allocation10] sm:$0x3] }
 0x2bd   :  { %12402 = vrsqrt.f32 %v4839_v28 }
 0x2c8   :  { %v12401_v21 = vpop.eup %12400 }
 0x2ca   :  { %v12403_v7 = vpop.eup %12402 }
 0x2cb   :  { %v4844_v60 = vcombine.low %v12401_v21, %v12403_v7 }
 0x2cd   :  { %v4851_v1 = vrot.slane %v4844_v60, %v14345_v58 }
 0x2cf   :  { %v4858_v17 = vrot.slane %v4851_v1, %v14345_v58 }
 0x2d1   :  { %v4860_v5 = vmul.f32 %v4858_v17, %v4712_v24 }
 0x2d3   :  { %v14354_v59 = vrot.slane %v4860_v5, %v14349_v57  ;;  %v14357_v36 = vrot.slane %v4860_v5, %v14351_v53 }
 0x2d5   :  { %v4872_v47 = vmul.f32 %v14354_v59, %v4830_v26  ;;  %v4873_v56 = vmul.f32 %v14357_v36, %v4831_v10  ;;  %v4924_v3 = vmul.f32 %v14357_v36, %v14315_v4  ;;  %v4894_v28 = vmul.f32 %v14357_v36, %v14110_v20 }
 0x2d6   :  { %v4896_v33 = vmul.f32 %v14357_v36, %v14083_v30  ;;  %v4893_v35 = vmul.f32 %v14354_v59, %v14080_v44  ;;  %v4895_v10 = vmul.f32 %v14354_v59, %v14059_v22  ;;  %v4898_v4 = vmul.f32 %v14357_v36, %v14123_v18 }
 0x2d7   :  { %v4876_v8 = vcombine.low %v4872_v47, %v4873_v56  ;;  %v4900_v49 = vmul.f32 %v14357_v36, %v14143_v55  ;;  %v4897_v20 = vmul.f32 %v14354_v59, %v14098_v48  ;;  %v4899_v30 = vmul.f32 %v14354_v59, %v14126_v51 }
 0x2d8   :  { %v4902_v44 = vmul.f32 %v14357_v36, %v14158_v13  ;;  %v14385_v46 = vmul.f32 %v14357_v36, %v14291_v27  ;;  %v4904_v18 = vmul.f32 %v14357_v36, %v14173_v45  ;;  %v14391_v55 = vmul.f32 %v14354_v59, %v14282_v23 }
 0x2d9   :  { %v4883_v6 = vrot.slane %v4876_v8, %v14345_v58  ;;  %v14395_v48 = vmul.f32 %v14357_v36, %v14305_v54  ;;  %v4901_v51 = vmul.f32 %v14354_v59, %v14150_v40  ;;  %v4903_v13 = vmul.f32 %v14354_v59, %v14166_v11 }
 0x2da   :  { %v14403_v27 = vmul.f32 %v14354_v59, %v14299_v41  ;;  %v14407_v45 = vmul.f32 %v14354_v59, %v14310_v2  ;;  %v4906_v40 = vmul.f32 %v14357_v36, %v14193_v19  ;;  %v4908_v11 = vmul.f32 %v14357_v36, %v14204_v32 }
 0x2db   :  { %v4890_v26 = vrot.slane %v4883_v6, %v14345_v58  ;;  %v4905_v41 = vmul.f32 %v14354_v59, %v14183_v14  ;;  %v14423_v62 = vmul.f32 %v14357_v36, %v14216_v29  ;;  %v14427_v2 = vmul.f32 %v14357_v36, %v14233_v37 }
 0x2dc   :  { %v14431_v21 = vmul.f32 %v14357_v36, %v14244_v52 }
 0x2dd   :  { %v4892_v22 = vsub.f32 %v4713_v38, %v4890_v26 }
 0x2df   :  { %v14410_v23 = vrot.slane %v4892_v22, %v14349_v57  ;;  %v14413_v54 = vrot.slane %v4892_v22, %v14351_v53 }
 0x2e1   :  { %v4967_v19 = vadd.f32 %v14413_v54, %v4924_v3  ;;  %v4937_v7 = vadd.f32 %v14413_v54, %v4894_v28  ;;  %v4939_v32 = vadd.f32 %v14413_v54, %v4896_v33  ;;  %v4936_v14 = vadd.f32 %v14410_v23, %v4893_v35 }
 0x2e2   :  { %v4938_v60 = vadd.f32 %v14410_v23, %v4895_v10  ;;  %v4941_v29 = vadd.f32 %v14413_v54, %v4898_v4  ;;  %v4943_v1 = vadd.f32 %v14413_v54, %v4900_v49  ;;  %v4940_v37 = vadd.f32 %v14410_v23, %v4897_v20 }
 0x2e3   :  { %v4999_v24 = vmax.f32 %v4967_v19, 0.0  ;;  %v4969_v17 = vmax.f32 %v4937_v7, 0.0  ;;  %v4971_v52 = vmax.f32 %v4939_v32, 0.0  ;;  %v4968_v5 = vmax.f32 %v4936_v14, 0.0 }
 0x2e4   :  { %v4970_v47 = vmax.f32 %v4938_v60, 0.0  ;;  %v4973_v56 = vmax.f32 %v4941_v29, 0.0  ;;  %v4975_v3 = vmax.f32 %v4943_v1, 0.0  ;;  %v4942_v8 = vadd.f32 %v14410_v23, %v4899_v30 }
 0x2e5   :  { %v5203_v6 = vrot.slane %v4999_v24, 7  ;;  %v5173_v38 = vrot.slane %v4969_v17, 7  ;;  %v5175_v28 = vrot.slane %v4971_v52, 7  ;;  %v5172_v33 = vrot.slane %v4968_v5, 7 }
 0x2e6   :  { %v5174_v35 = vrot.slane %v4970_v47, 7  ;;  %v5177_v26 = vrot.slane %v4973_v56, 7  ;;  %v5179_v10 = vrot.slane %v4975_v3, 7  ;;  %v4972_v4 = vmax.f32 %v4940_v37, 0.0 }
 0x2e7   :  { %5298 = vst [vmem:[#allocation3 + $0x228] sm:$0xfe] %v5203_v6  ;;  %5300 = vst [vmem:[#allocation3 + $0x238] sm:$0x1] %v5203_v6  ;;  %v4974_v49 = vmax.f32 %v4942_v8, 0.0  ;;  %v4945_v20 = vadd.f32 %v14413_v54, %v4902_v44  ;;  %v4947_v30 = vadd.f32 %v14413_v54, %v4904_v18  ;;  %v4944_v22 = vadd.f32 %v14410_v23, %v4901_v51 }
 0x2e8   :  { %5238 = vst [vmem:[#allocation3 + $0x48] sm:$0xfe] %v5173_v38  ;;  %5240 = vst [vmem:[#allocation3 + $0x58] sm:$0x1] %v5173_v38  ;;  %v5176_v19 = vrot.slane %v4972_v4, 7  ;;  %v4946_v7 = vadd.f32 %v14410_v23, %v4903_v13  ;;  %v4949_v32 = vadd.f32 %v14413_v54, %v4906_v40  ;;  %v4951_v14 = vadd.f32 %v14413_v54, %v4908_v11 }
 0x2e9   :  { %5242 = vst [vmem:[#allocation3 + $0x68] sm:$0xfe] %v5175_v28  ;;  %5244 = vst [vmem:[#allocation3 + $0x78] sm:$0x1] %v5175_v28  ;;  %v5178_v60 = vrot.slane %v4974_v49, 7  ;;  %v4977_v29 = vmax.f32 %v4945_v20, 0.0  ;;  %v4948_v24 = vadd.f32 %v14410_v23, %v4905_v41  ;;  %v4916_v40 = vmul.f32 %v14357_v36, %v14256_v42 }
 0x2ea   :  { %5237 = vst [vmem:[#allocation3 + $0x40] sm:$0xfe] %v5172_v33  ;;  %5239 = vst [vmem:[#allocation3 + $0x50] sm:$0x1] %v5172_v33  ;;  %v4979_v44 = vmax.f32 %v4947_v30, 0.0  ;;  %v4976_v1 = vmax.f32 %v4944_v22, 0.0  ;;  %v14453_v41 = vadd.f32 %v14413_v54, %v14423_v62  ;;  %v14457_v3 = vadd.f32 %v14413_v54, %v14427_v2 }
 0x2eb   :  { %5241 = vst [vmem:[#allocation3 + $0x60] sm:$0xfe] %v5174_v35  ;;  %5243 = vst [vmem:[#allocation3 + $0x70] sm:$0x1] %v5174_v35  ;;  %v4978_v18 = vmax.f32 %v4946_v7, 0.0  ;;  %v4981_v51 = vmax.f32 %v4949_v32, 0.0  ;;  %v14467_v62 = vadd.f32 %v14413_v54, %v14431_v21  ;;  %v14470_v2 = vadd.f32 %v14413_v54, %v4916_v40 }
 0x2ec   :  { %5246 = vst [vmem:[#allocation3 + $0x88] sm:$0xfe] %v5177_v26  ;;  %5248 = vst [vmem:[#allocation3 + $0x98] sm:$0x1] %v5177_v26  ;;  %v4983_v37 = vmax.f32 %v4951_v14, 0.0  ;;  %v5181_v17 = vrot.slane %v4977_v29, 7 }
 0x2ed   :  { %5250 = vst [vmem:[#allocation3 + $0xa8] sm:$0xfe] %v5179_v10  ;;  %5252 = vst [vmem:[#allocation3 + $0xb8] sm:$0x1] %v5179_v10  ;;  %v5183_v52 = vrot.slane %v4979_v44, 7  ;;  %v5180_v13 = vrot.slane %v4976_v1, 7 }
 0x2ee   :  { %5245 = vst [vmem:[#allocation3 + $0x80] sm:$0xfe] %v5176_v19  ;;  %5247 = vst [vmem:[#allocation3 + $0x90] sm:$0x1] %v5176_v19  ;;  %v5182_v11 = vrot.slane %v4978_v18, 7  ;;  %v5185_v5 = vrot.slane %v4981_v51, 7  ;;  %v4907_v51 = vmul.f32 %v14354_v59, %v14196_v9 }
 0x2ef   :  { %5249 = vst [vmem:[#allocation3 + $0xa0] sm:$0xfe] %v5178_v60  ;;  %5251 = vst [vmem:[#allocation3 + $0xb0] sm:$0x1] %v5178_v60  ;;  %v5187_v47 = vrot.slane %v4983_v37, 7  ;;  %v4980_v56 = vmax.f32 %v4948_v24, 0.0 }
 0x2f0   :  { %5254 = vst [vmem:[#allocation3 + $0xc8] sm:$0xfe] %v5181_v17  ;;  %5256 = vst [vmem:[#allocation3 + $0xd8] sm:$0x1] %v5181_v17  ;;  %v14459_v8 = vld [vmem:[#allocation3 + $0x48] sm:$0xff] }
 0x2f1   :  { %5258 = vst [vmem:[#allocation3 + $0xe8] sm:$0xfe] %v5183_v52  ;;  %5260 = vst [vmem:[#allocation3 + $0xf8] sm:$0x1] %v5183_v52  ;;  %v14461_v42 = vld [vmem:[#allocation3 + $0x68] sm:$0xff]  ;;  %v14463_v6 = vld [vmem:[#allocation3 + $0x40] sm:$0xff] }
 0x2f2   :  { %5253 = vst [vmem:[#allocation3 + $0xc0] sm:$0xfe] %v5180_v13  ;;  %5255 = vst [vmem:[#allocation3 + $0xd0] sm:$0x1] %v5180_v13  ;;  %v5184_v38 = vrot.slane %v4980_v56, 7  ;;  %v14472_v28 = vld [vmem:[#allocation3 + $0x60] sm:$0xff]  ;;  %v14479_v26 = vpack.c.bf16 %v14461_v42, %v14459_v8 }
 0x2f3   :  { %5257 = vst [vmem:[#allocation3 + $0xe0] sm:$0xfe] %v5182_v11  ;;  %5259 = vst [vmem:[#allocation3 + $0xf0] sm:$0x1] %v5182_v11  ;;  %v14474_v33 = vld [vmem:[#allocation3 + $0x88] sm:$0xff]  ;;  %v5644_v35 = vrot.slane %v14459_v8, 1  ;;  %v14490_v30 = vpack.c.bf16 %v14472_v28, %v14463_v6  ;;  %v4909_v11 = vmul.f32 %v14354_v59, %v14207_v25 }
 0x2f4   :  { %5262 = vst [vmem:[#allocation3 + $0x108] sm:$0xfe] %v5185_v5  ;;  %5264 = vst [vmem:[#allocation3 + $0x118] sm:$0x1] %v5185_v5  ;;  %v14481_v10 = vld [vmem:[#allocation3 + $0xa8] sm:$0xff]  ;;  %v5650_v21 = vrot.slane %v14461_v42, 1  ;;  %8919 = vmatprep.mubr.bf16.mxu1 %v14479_v26 }
 0x2f5   :  { %5266 = vst [vmem:[#allocation3 + $0x128] sm:$0xfe] %v5187_v47  ;;  %5268 = vst [vmem:[#allocation3 + $0x138] sm:$0x1] %v5187_v47  ;;  %v14483_v4 = vld [vmem:[#allocation3 + $0x58] sm:$0x3]  ;;  %v14499_v32 = vpack.c.bf16 %v14481_v10, %v14474_v33  ;;  %8920 = vmatmul.mubr.bf16.gmra.mxu1 %v14490_v30 }
 0x2f6   :  { %5261 = vst [vmem:[#allocation3 + $0x100] sm:$0xfe] %v5184_v38  ;;  %5263 = vst [vmem:[#allocation3 + $0x110] sm:$0x1] %v5184_v38  ;;  %v5641_v49 = vrot.slane %v14463_v6, 1  ;;  %v5647_v20 = vrot.slane %v14472_v28, 1 }
 0x2f7   :  { %v14492_v22 = vld [vmem:[#allocation3 + $0x78] sm:$0x3]  ;;  %v5656_v19 = vrot.slane %v14474_v33, 1  ;;  %v5662_v7 = vrot.slane %v14481_v10, 1  ;;  %16092 = vst [vmem:[#allocation28_spill] sm:$0xff] %v14499_v32  ;;  %v5645_v14 = vrot.slane %v14483_v4, 1  ;;  %8929 = vmatprep.mubr.bf16.mxu1 %v14499_v32 }
 0x2f8   :  { %v14502_v60 = vld [vmem:[#allocation3 + $0x50] sm:$0x3]  ;;  %v5651_v29 = vrot.slane %v14492_v22, 1  ;;  %v14509_v18 = vld [vmem:[#allocation3 + $0x98] sm:$0x3]  ;;  %v14519_v13 = vld [vmem:[#allocation3 + $0x80] sm:$0xff] }
 0x2f9   :  { %v14506_v44 = vld [vmem:[#allocation3 + $0x70] sm:$0x3]  ;;  %v5642_v1 = vrot.slane %v14502_v60, 1  ;;  %v5646_v37 = vsel %vm445_vm0, %v5644_v35, %v5645_v14  ;;  %v14516_v17 = vld [vmem:[#allocation3 + $0xb8] sm:$0x3]  ;;  %v5657_v52 = vrot.slane %v14509_v18, 1  ;;  %v4911_v35 = vmul.f32 %v14354_v59, %v14222_v50 }
 0x2fa   :  { %v5648_v24 = vrot.slane %v14506_v44, 1  ;;  %v14521_v40 = vld [vmem:[#allocation3 + $0xa0] sm:$0xff]  ;;  %v5652_v5 = vsel %vm445_vm0, %v5650_v21, %v5651_v29  ;;  %v5663_v47 = vrot.slane %v14516_v17, 1  ;;  %v14528_v56 = vld [vmem:[#allocation3 + $0xc8] sm:$0xff]  ;;  %v14538_v25 = vld [vmem:[#allocation3 + $0x90] sm:$0x3]  ;;  %v4950_v29 = vadd.f32 %v14410_v23, %v4907_v51 }
 0x2fb   :  { %16093 = vst [vmem:[#allocation31_spill] sm:$0xff] %v14521_v40  ;;  %v5643_v9 = vsel %vm445_vm0, %v5641_v49, %v5642_v1  ;;  %16094 = vst [vmem:[#allocation35_spill] sm:$0xff] %v14528_v56  ;;  %v14530_v38 = vld [vmem:[#allocation3 + $0xe8] sm:$0xff]  ;;  %v14534_v14 = vpack.c.bf16 %v5652_v5, %v5646_v37  ;;  %v5658_v43 = vsel %vm445_vm0, %v5656_v19, %v5657_v52  ;;  %v14540_v21 = vld [vmem:[#allocation3 + $0xb0] sm:$0x3]  ;;  %v5653_v50 = vrot.slane %v14519_v13, 1 }
 0x2fc   :  { %16095 = vst [vmem:[#allocation24_spill] sm:$0xff] %v14530_v38  ;;  %v5649_v61 = vsel %vm445_vm0, %v5647_v20, %v5648_v24  ;;  %16097 = vst [vmem:[#allocation27_spill] sm:$0xff] %v14538_v25  ;;  %v14542_v49 = vld [vmem:[#allocation3 + $0xd8] sm:$0x3]  ;;  %v5664_v53 = vsel %vm445_vm0, %v5662_v7, %v5663_v47  ;;  %v5659_v37 = vrot.slane %v14521_v40, 1  ;;  %v14557_v19 = vpack.c.bf16 %v14521_v40, %v14519_v13  ;;  %v14577_v57 = vld [vmem:[#allocation3 + $0x108] sm:$0xff] }
 0x2fd   :  { %16096 = vst [vmem:[#allocation25_spill] sm:$0xff] %v14534_v14  ;;  %16098 = vst [vmem:[#allocation30_spill] sm:$0xff] %v14540_v21  ;;  %v14545_v1 = vpack.c.bf16 %v5649_v61, %v5643_v9  ;;  %v14550_v5 = vld [vmem:[#allocation3 + $0xf8] sm:$0x3]  ;;  %9032 = vmatprep.mubr.bf16.mxu0 %v14534_v14  ;;  %v14553_v20 = vpack.c.bf16 %v5664_v53, %v5658_v43  ;;  %v5668_v51 = vrot.slane %v14528_v56, 1  ;;  %v5674_v7 = vrot.slane %v14530_v38, 1 }
 0x2fe   :  { %16099 = vst [vmem:[#allocation33_spill] sm:$0xff] %v14542_v49  ;;  %16101 = vst [vmem:[#allocation32_spill] sm:$0xff] %v14550_v5  ;;  %v4913_v61 = vmul.f32 %v14354_v59, %v14236_v63  ;;  %v5654_v24 = vrot.slane %v14538_v25, 1  ;;  %v5660_v52 = vrot.slane %v14540_v21, 1  ;;  %v5669_v43 = vrot.slane %v14542_v49, 1  ;;  %v14567_v53 = vld [vmem:[#allocation3 + $0xc0] sm:$0xff]  ;;  %8930 = vmatmul.mubr.bf16.gmra.mxu1 %v14557_v19 }
 0x2ff   :  { %16100 = vst [vmem:[#allocation29_spill] sm:$0xff] %v14545_v1  ;;  %16102 = vst [vmem:[#allocation36_spill] sm:$0xff] %v14553_v20  ;;  %9033 = vmatmul.mubr.bf16.gmra.mxu0 %v14545_v1  ;;  %v14569_v9 = vld [vmem:[#allocation3 + $0xe0] sm:$0xff]  ;;  %v14574_v47 = vpack.c.bf16 %v14530_v38, %v14528_v56  ;;  %v5675_v63 = vrot.slane %v14550_v5, 1  ;;  %v4982_v58 = vmax.f32 %v4950_v29, 0.0  ;;  %v4915_v1 = vmul.f32 %v14354_v59, %v14247_v12 }
 0x300   :  { %16103 = vst [vmem:[#allocation34_spill] sm:$0xff] %v14557_v19  ;;  %9042 = vmatprep.mubr.bf16.mxu0 %v14553_v20  ;;  %v5655_v14 = vsel %vm445_vm0, %v5653_v50, %v5654_v24  ;;  %v5661_v49 = vsel %vm445_vm0, %v5659_v37, %v5660_v52  ;;  %v14584_v21 = vld [vmem:[#allocation3 + $0xd0] sm:$0x3]  ;;  %v14588_v38 = vld [vmem:[#allocation3 + $0x118] sm:$0x3]  ;;  %v4918_v5 = vmul.f32 %v14357_v36, %v14273_v15  ;;  %v5665_v12 = vrot.slane %v14567_v53, 1 }
 0x301   :  { %16104 = vst [vmem:[#allocation37_spill] sm:$0xff] %v14574_v47  ;;  %v14586_v20 = vld [vmem:[#allocation3 + $0xf0] sm:$0x3]  ;;  %16105 = vst [vmem:[#allocation39_spill] sm:$0xff] %v14588_v38  ;;  %v4917_v29 = vmul.f32 %v14354_v59, %v14262_v39  ;;  %8939 = vmatprep.mubr.bf16.mxu1 %v14574_v47  ;;  %v5671_v50 = vrot.slane %v14569_v9, 1  ;;  %v14597_v24 = vld [vmem:[#allocation3 + $0x128] sm:$0xff]  ;;  %v4952_v52 = vadd.f32 %v14410_v23, %v4909_v11 }
 0x302   :  { %v14599_v37 = vld [vmem:[#allocation3 + $0x138] sm:$0x3]  ;;  %v4954_v19 = vadd.f32 %v14410_v23, %v4911_v35  ;;  %v5670_v56 = vsel %vm445_vm0, %v5668_v51, %v5669_v43  ;;  %v5676_v15 = vsel %vm445_vm0, %v5674_v7, %v5675_v63  ;;  %v5680_v39 = vrot.slane %v14577_v57, 1  ;;  %v14612_v40 = vld [vmem:[#allocation3 + $0x100] sm:$0xff] }
 0x303   :  { %v4956_v59 = vadd.f32 %v14410_v23, %v4913_v61  ;;  %v14607_v36 = vpack.c.bf16 %v5661_v49, %v5655_v14  ;;  %v5666_v47 = vrot.slane %v14584_v21, 1  ;;  %v5672_v25 = vrot.slane %v14586_v20, 1 }
 0x304   :  { %v5681_v32 = vrot.slane %v14588_v38, 1  ;;  %v14616_v11 = vpack.c.bf16 %v14569_v9, %v14567_v53  ;;  %v5686_v35 = vrot.slane %v14597_v24, 1  ;;  %v5687_v51 = vrot.slane %v14599_v37, 1 }
 0x305   :  { %16106 = vst [vmem:[#allocation38_spill] sm:$0xff] %v14607_v36  ;;  %v5186_v7 = vrot.slane %v4982_v58, 7  ;;  %v14620_v61 = vpack.c.bf16 %v5676_v15, %v5670_v56  ;;  %v5667_v14 = vsel %vm445_vm0, %v5665_v12, %v5666_v47  ;;  %v5673_v49 = vsel %vm445_vm0, %v5671_v50, %v5672_v25 }
 0x306   :  { %v4985_v43 = vmax.f32 %v14453_v41, 0.0  ;;  %v14628_v63 = vpack.c.bf16 %v14597_v24, %v14577_v57  ;;  %v5682_v38 = vsel %vm445_vm0, %v5680_v39, %v5681_v32  ;;  %v5677_v58 = vrot.slane %v14612_v40, 1  ;;  %8940 = vmatmul.mubr.bf16.gmra.mxu1 %v14616_v11 }
 0x307   :  { %16107 = vst [vmem:[#allocation40_spill] sm:$0xff] %v14620_v61  ;;  %9043 = vmatmul.mubr.bf16.gmra.mxu0 %v14607_v36  ;;  %5265 = vst [vmem:[#allocation3 + $0x120] sm:$0xfe] %v5186_v7  ;;  %v4987_v56 = vmax.f32 %v14457_v3, 0.0  ;;  %v14634_v47 = vpack.c.bf16 %v5673_v49, %v5667_v14  ;;  %v4984_v41 = vmax.f32 %v4952_v52, 0.0  ;;  %v4986_v12 = vmax.f32 %v4954_v19, 0.0 }
 0x308   :  { %5267 = vst [vmem:[#allocation3 + $0x130] sm:$0x1] %v5186_v7  ;;  %9052 = vmatprep.mubr.bf16.mxu0 %v14620_v61  ;;  %v5189_v25 = vrot.slane %v4985_v43, 7  ;;  %v5688_v50 = vsel %vm445_vm0, %v5686_v35, %v5687_v51  ;;  %v4989_v32 = vmax.f32 %v14467_v62, 0.0  ;;  %v4991_v39 = vmax.f32 %v14470_v2, 0.0  ;;  %8949 = vmatprep.mubr.bf16.mxu1 %v14628_v63 }
 0x309   :  { %16108 = vst [vmem:[#allocation41_spill] sm:$0xff] %v14634_v47  ;;  %v5191_v15 = vrot.slane %v4987_v56, 7  ;;  %v14641_v3 = vld [vmem:[#allocation3 + $0x110] sm:$0x3]  ;;  %v5188_v7 = vrot.slane %v4984_v41, 7  ;;  %v5190_v14 = vrot.slane %v4986_v12, 7  ;;  %v4958_v52 = vadd.f32 %v14410_v23, %v4915_v1 }
 0x30a   :  { %5270 = vst [vmem:[#allocation3 + $0x148] sm:$0xfe] %v5189_v25  ;;  %5272 = vst [vmem:[#allocation3 + $0x158] sm:$0x1] %v5189_v25  ;;  %v4988_v19 = vmax.f32 %v4956_v59, 0.0  ;;  %v5193_v49 = vrot.slane %v4989_v32, 7  ;;  %v4961_v51 = vadd.f32 %v14413_v54, %v4918_v5  ;;  %v4963_v62 = vadd.f32 %v14413_v54, %v14385_v46 }
 0x30b   :  { %5274 = vst [vmem:[#allocation3 + $0x168] sm:$0xfe] %v5191_v15  ;;  %5276 = vst [vmem:[#allocation3 + $0x178] sm:$0x1] %v5191_v15  ;;  %v5195_v35 = vrot.slane %v4991_v39, 7  ;;  %v4990_v2 = vmax.f32 %v4958_v52, 0.0  ;;  %v4960_v56 = vadd.f32 %v14410_v23, %v4917_v29  ;;  %v4962_v1 = vadd.f32 %v14410_v23, %v14391_v55 }
 0x30c   :  { %5269 = vst [vmem:[#allocation3 + $0x140] sm:$0xfe] %v5188_v7  ;;  %5271 = vst [vmem:[#allocation3 + $0x150] sm:$0x1] %v5188_v7  ;;  %v5192_v43 = vrot.slane %v4988_v19, 7  ;;  %v14650_v59 = vpack.c.bf16 %v5688_v50, %v5682_v38  ;;  %v5678_v25 = vrot.slane %v14641_v3, 1  ;;  %v14659_v55 = vadd.f32 %v14413_v54, %v14395_v48 }
 0x30d   :  { %5273 = vst [vmem:[#allocation3 + $0x160] sm:$0xfe] %v5190_v14  ;;  %5275 = vst [vmem:[#allocation3 + $0x170] sm:$0x1] %v5190_v14  ;;  %v4993_v46 = vmax.f32 %v4961_v51, 0.0  ;;  %v4995_v5 = vmax.f32 %v4963_v62, 0.0 }
 0x30e   :  { %16109 = vst [vmem:[#allocation43_spill] sm:$0xff] %v14650_v59  ;;  %5278 = vst [vmem:[#allocation3 + $0x188] sm:$0xfe] %v5193_v49  ;;  %v14653_v41 = vld [vmem:[#allocation3 + $0x120] sm:$0xff]  ;;  %v5194_v15 = vrot.slane %v4990_v2, 7  ;;  %v4992_v29 = vmax.f32 %v4960_v56, 0.0  ;;  %v5679_v51 = vsel %vm445_vm0, %v5677_v58, %v5678_v25 }
 0x30f   :  { %5280 = vst [vmem:[#allocation3 + $0x198] sm:$0x1] %v5193_v49  ;;  %5282 = vst [vmem:[#allocation3 + $0x1a8] sm:$0xfe] %v5195_v35  ;;  %v14655_v12 = vld [vmem:[#allocation3 + $0x130] sm:$0x3]  ;;  %9053 = vmatmul.mubr.bf16.gmra.mxu0 %v14634_v47  ;;  %v14665_v50 = vpack.c.bf16 %v14653_v41, %v14612_v40 }
 0x310   :  { %5284 = vst [vmem:[#allocation3 + $0x1b8] sm:$0x1] %v5195_v35  ;;  %5277 = vst [vmem:[#allocation3 + $0x180] sm:$0xfe] %v5192_v43  ;;  %v4994_v32 = vmax.f32 %v4962_v1, 0.0  ;;  %v5683_v38 = vrot.slane %v14653_v41, 1  ;;  %9062 = vmatprep.mubr.bf16.mxu0 %v14650_v59 }
 0x311   :  { %5279 = vst [vmem:[#allocation3 + $0x190] sm:$0x1] %v5192_v43  ;;  %v5684_v39 = vrot.slane %v14655_v12, 1  ;;  %5281 = vst [vmem:[#allocation3 + $0x1a0] sm:$0xfe] %v5194_v15  ;;  %v5197_v7 = vrot.slane %v4993_v46, 7  ;;  %8950 = vmatmul.mubr.bf16.gmra.mxu1 %v14665_v50 }
 0x312   :  { %5283 = vst [vmem:[#allocation3 + $0x1b0] sm:$0x1] %v5194_v15  ;;  %v5199_v14 = vrot.slane %v4995_v5, 7  ;;  %v5196_v52 = vrot.slane %v4992_v29, 7  ;;  %v5198_v19 = vrot.slane %v4994_v32, 7  ;;  %v14670_v48 = vld [vmem:[#allocation3 + $0x148] sm:$0xff] }
 0x313   :  { %v14672_v54 = vld [vmem:[#allocation3 + $0x158] sm:$0x3]  ;;  %v14674_v49 = vld [vmem:[#allocation3 + $0x168] sm:$0xff]  ;;  %v5692_v35 = vrot.slane %v14670_v48, 1  ;;  %v5685_v62 = vsel %vm445_vm0, %v5683_v38, %v5684_v39  ;;  %5286 = vst [vmem:[#allocation3 + $0x1c8] sm:$0xfe] %v5197_v7 }
 0x314   :  { %v14681_v2 = vld [vmem:[#allocation3 + $0x178] sm:$0x3]  ;;  %v5693_v43 = vrot.slane %v14672_v54, 1  ;;  %5288 = vst [vmem:[#allocation3 + $0x1d8] sm:$0x1] %v5197_v7  ;;  %v5698_v56 = vrot.slane %v14674_v49, 1  ;;  %v14687_v1 = vpack.c.bf16 %v14674_v49, %v14670_v48  ;;  %v14700_v32 = vpack.c.bf16 %v5685_v62, %v5679_v51 }
 0x315   :  { %5290 = vst [vmem:[#allocation3 + $0x1e8] sm:$0xfe] %v5199_v14  ;;  %5292 = vst [vmem:[#allocation3 + $0x1f8] sm:$0x1] %v5199_v14  ;;  %v5699_v58 = vrot.slane %v14681_v2, 1  ;;  %v14690_v25 = vld [vmem:[#allocation3 + $0x140] sm:$0xff] }
 0x316   :  { %5285 = vst [vmem:[#allocation3 + $0x1c0] sm:$0xfe] %v5196_v52  ;;  %5287 = vst [vmem:[#allocation3 + $0x1d0] sm:$0x1] %v5196_v52  ;;  %v14692_v46 = vld [vmem:[#allocation3 + $0x160] sm:$0xff]  ;;  %v5694_v5 = vsel %vm445_vm0, %v5692_v35, %v5693_v43  ;;  %v14695_v15 = vld [vmem:[#allocation3 + $0x188] sm:$0xff]  ;;  %8959 = vmatprep.mubr.bf16.mxu1 %v14687_v1 }
 0x317   :  { %5289 = vst [vmem:[#allocation3 + $0x1e0] sm:$0xfe] %v5198_v19  ;;  %5291 = vst [vmem:[#allocation3 + $0x1f0] sm:$0x1] %v5198_v19  ;;  %v14697_v29 = vld [vmem:[#allocation3 + $0x1a8] sm:$0xff]  ;;  %v5700_v38 = vsel %vm445_vm0, %v5698_v56, %v5699_v58  ;;  %v5689_v39 = vrot.slane %v14690_v25, 1  ;;  %v14713_v35 = vpack.c.bf16 %v14692_v46, %v14690_v25  ;;  %9063 = vmatmul.mubr.bf16.gmra.mxu0 %v14700_v32 }
 0x318   :  { %16110 = vst [vmem:[#allocation42_spill] sm:$0xff] %v14687_v1  ;;  %16111 = vst [vmem:[#allocation44_spill] sm:$0xff] %v14695_v15  ;;  %v14704_v7 = vld [vmem:[#allocation3 + $0x150] sm:$0x3]  ;;  %v14708_v52 = vpack.c.bf16 %v5700_v38, %v5694_v5  ;;  %v5695_v19 = vrot.slane %v14692_v46, 1  ;;  %v5704_v43 = vrot.slane %v14695_v15, 1  ;;  %v14728_v59 = vpack.c.bf16 %v14697_v29, %v14695_v15 }
 0x319   :  { %16112 = vst [vmem:[#allocation45_spill] sm:$0xff] %v14697_v29  ;;  %16113 = vst [vmem:[#allocation46_spill] sm:$0xff] %v14700_v32  ;;  %v14706_v14 = vld [vmem:[#allocation3 + $0x170] sm:$0x3]  ;;  %v14716_v51 = vld [vmem:[#allocation3 + $0x198] sm:$0x3]  ;;  %8960 = vmatmul.mubr.bf16.gmra.mxu1 %v14713_v35 }
 0x31a   :  { %16114 = vst [vmem:[#allocation47_spill] sm:$0xff] %v14704_v7  ;;  %16115 = vst [vmem:[#allocation48_spill] sm:$0xff] %v14706_v14  ;;  %v5710_v62 = vrot.slane %v14697_v29, 1  ;;  %v5690_v56 = vrot.slane %v14704_v7, 1  ;;  %v5696_v58 = vrot.slane %v14706_v14, 1  ;;  %v5705_v38 = vrot.slane %v14716_v51, 1  ;;  %9072 = vmatprep.mubr.bf16.mxu0 %v14708_v52  ;;  %8969 = vmatprep.mubr.bf16.mxu1 %v14728_v59 }
 0x31b   :  { %16116 = vst [vmem:[#allocation49_spill] sm:$0xff] %v14708_v52  ;;  %16117 = vst [vmem:[#allocation55_spill] sm:$0xff] %v14713_v35  ;;  %v14722_v5 = vld [vmem:[#allocation3 + $0x1b8] sm:$0x3]  ;;  %v14735_v36 = vld [vmem:[#allocation3 + $0x180] sm:$0xff] }
 0x31c   :  { %16118 = vst [vmem:[#allocation50_spill] sm:$0xff] %v14716_v51  ;;  %16119 = vst [vmem:[#allocation51_spill] sm:$0xff] %v14722_v5  ;;  %v5711_v47 = vrot.slane %v14722_v5, 1  ;;  %v5691_v32 = vsel %vm445_vm0, %v5689_v39, %v5690_v56  ;;  %v5697_v61 = vsel %vm445_vm0, %v5695_v19, %v5696_v58  ;;  %v14737_v14 = vld [vmem:[#allocation3 + $0x1a0] sm:$0xff]  ;;  %v5706_v52 = vsel %vm445_vm0, %v5704_v43, %v5705_v38  ;;  %v14741_v29 = vld [vmem:[#allocation3 + $0x1c8] sm:$0xff] }
 0x31d   :  { %16120 = vst [vmem:[#allocation60_spill] sm:$0xff] %v14728_v59  ;;  %16121 = vst [vmem:[#allocation62_spill] sm:$0xff] %v14741_v29  ;;  %v14743_v15 = vld [vmem:[#allocation3 + $0x190] sm:$0x3]  ;;  %v14747_v35 = vld [vmem:[#allocation3 + $0x1e8] sm:$0xff]  ;;  %v14753_v19 = vpack.c.bf16 %v5697_v61, %v5691_v32  ;;  %v5701_v56 = vrot.slane %v14735_v36, 1 }
 0x31e   :  { %v5712_v51 = vsel %vm445_vm0, %v5710_v62, %v5711_v47  ;;  %16122 = vst [vmem:[#allocation59_spill] sm:$0xff] %v14743_v15  ;;  %v14745_v5 = vld [vmem:[#allocation3 + $0x1b0] sm:$0x3]  ;;  %16124 = vst [vmem:[#allocation66_spill] sm:$0xff] %v14747_v35  ;;  %v14749_v59 = vld [vmem:[#allocation3 + $0x1d8] sm:$0x3]  ;;  %v14761_v47 = vpack.c.bf16 %v14737_v14, %v14735_v36 }
 0x31f   :  { %16123 = vst [vmem:[#allocation52_spill] sm:$0xff] %v14745_v5  ;;  %16125 = vst [vmem:[#allocation53_spill] sm:$0xff] %v14749_v59  ;;  %v14751_v39 = vld [vmem:[#allocation3 + $0x1f8] sm:$0x3]  ;;  %v5707_v43 = vrot.slane %v14737_v14, 1  ;;  %v14757_v58 = vpack.c.bf16 %v5712_v51, %v5706_v52  ;;  %v5702_v62 = vrot.slane %v14743_v15, 1  ;;  %9073 = vmatmul.mubr.bf16.gmra.mxu0 %v14753_v19  ;;  %v14773_v52 = vpack.c.bf16 %v14747_v35, %v14741_v29 }
 0x320   :  { %16126 = vst [vmem:[#allocation75_spill] sm:$0xff] %v14751_v39  ;;  %16127 = vst [vmem:[#allocation54_spill] sm:$0xff] %v14753_v19  ;;  %v5708_v38 = vrot.slane %v14745_v5, 1  ;;  %v5716_v7 = vrot.slane %v14741_v29, 1  ;;  %v5722_v61 = vrot.slane %v14747_v35, 1  ;;  %v5717_v32 = vrot.slane %v14749_v59, 1 }
 0x321   :  { %16128 = vst [vmem:[#allocation56_spill] sm:$0xff] %v14757_v58  ;;  %16129 = vst [vmem:[#allocation57_spill] sm:$0xff] %v14761_v47  ;;  %v5723_v1 = vrot.slane %v14751_v39, 1  ;;  %9082 = vmatprep.mubr.bf16.mxu0 %v14757_v58  ;;  %8970 = vmatmul.mubr.bf16.gmra.mxu1 %v14761_v47  ;;  %v5703_v51 = vsel %vm445_vm0, %v5701_v56, %v5702_v62  ;;  %v14779_v5 = vld [vmem:[#allocation3 + $0x1c0] sm:$0xff]  ;;  %v14785_v58 = vld [vmem:[#allocation3 + $0x1d0] sm:$0x3] }
 0x322   :  { %16130 = vst [vmem:[#allocation58_spill] sm:$0xff] %v14773_v52  ;;  %8979 = vmatprep.mubr.bf16.mxu1 %v14773_v52  ;;  %v5709_v19 = vsel %vm445_vm0, %v5707_v43, %v5708_v38  ;;  %v5718_v59 = vsel %vm445_vm0, %v5716_v7, %v5717_v32  ;;  %v14783_v15 = vld [vmem:[#allocation3 + $0x1e0] sm:$0xff]  ;;  %v14787_v35 = vld [vmem:[#allocation3 + $0x1f0] sm:$0x3]  ;;  %v5713_v52 = vrot.slane %v14779_v5, 1  ;;  %v5714_v43 = vrot.slane %v14785_v58, 1 }
 0x323   :  { %v5724_v39 = vsel %vm445_vm0, %v5722_v61, %v5723_v1  ;;  %v14789_v29 = vpack.c.bf16 %v5709_v19, %v5703_v51  ;;  %v5719_v56 = vrot.slane %v14783_v15, 1  ;;  %v5720_v7 = vrot.slane %v14787_v35, 1 }
 0x324   :  { %v14792_v47 = vpack.c.bf16 %v5724_v39, %v5718_v59  ;;  %v14800_v1 = vpack.c.bf16 %v14783_v15, %v14779_v5  ;;  %v5972_v19 = vrot.slane %v14459_v8, 2  ;;  %v5978_v62 = vrot.slane %v14461_v42, 2 }
 0x325   :  { %16131 = vst [vmem:[#allocation61_spill] sm:$0xff] %v14789_v29  ;;  %v5973_v59 = vrot.slane %v14483_v4, 2  ;;  %v5979_v39 = vrot.slane %v14492_v22, 2  ;;  %v5715_v38 = vsel %vm445_vm0, %v5713_v52, %v5714_v43  ;;  %v5721_v61 = vsel %vm445_vm0, %v5719_v56, %v5720_v7  ;;  %v12160_v4 = vld [vmem:[#allocation12 + $0x470] ss:$8 sps:$4 sm:$0xff]  }
 0x326   :  { %16132 = vst [vmem:[#allocation63_spill] sm:$0xff] %v14792_v47  ;;  %v16133_v32 = vpack.c.bf16 %v14330_v31, %v14327_v16  ;;  %v5975_v22 = vrot.slane %v14472_v28, 2  ;;  %v5984_v52 = vrot.slane %v14474_v33, 2  ;;  %v12168_v56 = vld [vmem:[#allocation12 + $0x464] ss:$8 sps:$4 sm:$0xff]   ;;  %v5970_v16 = vrot.slane %v14502_v60, 2 }
 0x327   :  { %9083 = vmatmul.mubr.bf16.gmra.mxu0 %v14789_v29  ;;  %v8911_v51 = vpop.f32.mrf.mxu1  ;;  %v5974_v8 = vsel %vm774_vm1, %v5972_v19, %v5973_v59  ;;  %v5980_v42 = vsel %vm774_vm1, %v5978_v62, %v5979_v39  ;;  %v5969_v29 = vrot.slane %v14463_v6, 2  ;;  %v4997_v31 = vmax.f32 %v14659_v55, 0.0  ;;  %v12174_v39 = vld [vmem:[#allocation12 + $0x454] ss:$8 sps:$4 sm:$0xff]  }
 0x328   :  { %9092 = vmatprep.mubr.bf16.mxu0 %v14792_v47  ;;  %v14813_v47 = vpack.c.bf16 %v5721_v61, %v5715_v38  ;;  %v5990_v43 = vrot.slane %v14481_v10, 2  ;;  %v14825_v7 = vpack.c.bf16 %v5980_v42, %v5974_v8  ;;  %v5976_v6 = vrot.slane %v14506_v44, 2  ;;  %v12166_v44 = vld [vmem:[#allocation12 + $0x460] ss:$8 sps:$4 sm:$0xff]   ;;  %v12171_v8 = vld [vmem:[#allocation12 + $0x564] ss:$8 sps:$4 sm:$0xff]  }
 0x329   :  { %8980 = vmatmul.mubr.bf16.gmra.mxu1 %v14800_v1  ;;  %v5985_v19 = vrot.slane %v14509_v18, 2  ;;  %v8913_v62 = vpop.f32.mrf.mxu1  ;;  %v16134_v33 = vpack.c.bf16 %v14340_v34, %v14337_v0  ;;  %v5991_v60 = vrot.slane %v14516_v17, 2  ;;  %v5201_v59 = vrot.slane %v4997_v31, 7  ;;  %v12163_v17 = vld [vmem:[#allocation12 + $0x570] ss:$8 sps:$4 sm:$0xff]  }
 0x32a   :  { %9135 = vmatprep.mubr.bf16.mxu1 %v16133_v32  ;;  %v9024_v28 = vpop.f32.mrf.mxu0  ;;  %v4964_v10 = vadd.f32 %v14410_v23, %v14403_v27  ;;  %v5971_v55 = vsel %vm774_vm1, %v5969_v29, %v5970_v16  ;;  %v5977_v38 = vsel %vm774_vm1, %v5975_v22, %v5976_v6  ;;  %v12172_v16 = vld [vmem:[#allocation12 + $0x450] ss:$8 sps:$4 sm:$0xff]   ;;  %v5981_v31 = vrot.slane %v14519_v13, 2 }
 0x32b   :  { %5294 = vst [vmem:[#allocation3 + $0x208] sm:$0xfe] %v5201_v59  ;;  %5296 = vst [vmem:[#allocation3 + $0x218] sm:$0x1] %v5201_v59  ;;  %v5986_v27 = vsel %vm774_vm1, %v5984_v52, %v5985_v19  ;;  %v14841_v61 = vadd.f32 %v9024_v28, %v8911_v51  ;;  %v5992_v42 = vsel %vm774_vm1, %v5990_v43, %v5991_v60  ;;  %v12180_v51 = vld [vmem:[#allocation12 + $0x444] ss:$8 sps:$4 sm:$0xff]  }
 0x32c   :  { %v9026_v18 = vpop.f32.mrf.mxu0  ;;  %v4996_v0 = vmax.f32 %v4964_v10, 0.0  ;;  %v14850_v22 = vpack.c.bf16 %v5977_v38, %v5971_v55  ;;  %v16135_v52 = vld [vmem:[#allocation31_spill] sm:$0xff]  ;;  %v16136_v6 = vld [vmem:[#allocation28_spill] sm:$0xff]  ;;  %v12169_v19 = vld [vmem:[#allocation12 + $0x560] ss:$8 sps:$4 sm:$0xff]   ;;  %v14854_v28 = vpack.c.bf16 %v5992_v42, %v5986_v27 }
 0x32d   :  { %v5987_v43 = vrot.slane %v16135_v52, 2  ;;  %v16139_v60 = vld [vmem:[#allocation35_spill] sm:$0xff]  ;;  %v16140_v10 = vld [vmem:[#allocation24_spill] sm:$0xff] }
 0x32e   :  { %v9028_v32 = vpop.f32.mrf.mxu0  ;;  %v5200_v29 = vrot.slane %v4996_v0, 7  ;;  %v5996_v59 = vrot.slane %v16139_v60, 2  ;;  %v12175_v38 = vld [vmem:[#allocation12 + $0x550] ss:$8 sps:$4 sm:$0xff]   ;;  %v12192_v52 = vld [vmem:[#allocation12 + $0x424] ss:$8 sps:$4 sm:$0xff]  }
 0x32f   :  { %9093 = vmatmul.mubr.bf16.gmra.mxu0 %v14813_v47  ;;  %v12189_v60 = vld [vmem:[#allocation12 + $0x534] ss:$8 sps:$4 sm:$0xff]  }
 0x330   :  { %9248 = vmatprep.mubr.bf16.mxu0 %v14479_v26  ;;  %v4966_v26 = vadd.f32 %v14410_v23, %v14407_v45  ;;  %v14843_v45 = vadd.f32 %v9026_v18, %v8913_v62  ;;  %v8915_v23 = vpop.f32.mrf.mxu1  ;;  %5293 = vst [vmem:[#allocation3 + $0x200] sm:$0xfe] %v5200_v29  ;;  %5295 = vst [vmem:[#allocation3 + $0x210] sm:$0x1] %v5200_v29  ;;  %v16137_v62 = vld [vmem:[#allocation27_spill] sm:$0xff]  ;;  %v16141_v18 = vld [vmem:[#allocation33_spill] sm:$0xff] }
 0x331   :  { %9136 = vmatmul.mubr.bf16.vlgmr.msra.gmra.mxu1 %v16134_v33  ;;  %v5982_v13 = vrot.slane %v16137_v62, 2  ;;  %v16138_v33 = vld [vmem:[#allocation30_spill] sm:$0xff]  ;;  %v5997_v55 = vrot.slane %v16141_v18, 2  ;;  %v12184_v29 = vld [vmem:[#allocation12 + $0x430] ss:$8 sps:$4 sm:$0xff]  }
 0x332   :  { %9145 = vmatprep.mubr.bf16.mxu1 %v14825_v7  ;;  %9330 = vmatpush1.bf16.msra.mxu1 %v12160_v4  ;;  %v4998_v34 = vmax.f32 %v4966_v26, 0.0  ;;  %v6002_v26 = vrot.slane %v16140_v10, 2  ;;  %v6015_v10 = vrot.slane %v14599_v37, 2  ;;  %v12196_v37 = vld [vmem:[#allocation12 + $0x410] ss:$8 sps:$4 sm:$0xff]  }
 0x333   :  { %9331 = vmatprep.subr.bf16.mxu1 %v12168_v56  ;;  %v14846_v56 = vadd.f32 %v9028_v32, %v8915_v23  ;;  %v5983_v27 = vsel %vm774_vm1, %v5981_v31, %v5982_v13  ;;  %v12183_v32 = vld [vmem:[#allocation12 + $0x544] ss:$8 sps:$4 sm:$0xff]   ;;  %v5999_v31 = vrot.slane %v14569_v9, 2  ;;  %v5994_v13 = vrot.slane %v14584_v21, 2  ;;  %v12198_v21 = vld [vmem:[#allocation12 + $0x414] ss:$8 sps:$4 sm:$0xff]  }
 0x334   :  { %v5202_v4 = vrot.slane %v4998_v34, 7  ;;  %v12178_v34 = vld [vmem:[#allocation12 + $0x440] ss:$8 sps:$4 sm:$0xff]  }
 0x336   :  { %9332 = vmatpush1.bf16.msra.mxu1 %v12166_v44  ;;  %5297 = vst [vmem:[#allocation3 + $0x220] sm:$0xfe] %v5202_v4  ;;  %5299 = vst [vmem:[#allocation3 + $0x230] sm:$0x1] %v5202_v4  ;;  %v12177_v44 = vld [vmem:[#allocation12 + $0x554] ss:$8 sps:$4 sm:$0xff]  }
 0x337   :  { %9249 = vmatmul.mubr.bf16.vlgmr.msra.gmra.mxu0 %v14490_v30  ;;  %9333 = vmatprep.subr.bf16.mxu1 %v12174_v39  ;;  %v5988_v30 = vrot.slane %v16138_v33, 2  ;;  %v16142_v39 = vld [vmem:[#allocation32_spill] sm:$0xff]  ;;  %v5993_v4 = vrot.slane %v14567_v53, 2  ;;  %v6000_v33 = vrot.slane %v14586_v20, 2  ;;  %v6008_v53 = vrot.slane %v14577_v57, 2 }
 0x338   :  { %9258 = vmatprep.mubr.bf16.mxu0 %v16136_v6  ;;  %9443 = vmatpush1.bf16.msra.mxu0 %v12163_v17  ;;  %v6003_v0 = vrot.slane %v16142_v39, 2  ;;  %v12186_v17 = vld [vmem:[#allocation12 + $0x434] ss:$8 sps:$4 sm:$0xff]   ;;  %v12187_v20 = vld [vmem:[#allocation12 + $0x530] ss:$8 sps:$4 sm:$0xff]   ;;  %v6005_v39 = vrot.slane %v14612_v40, 2 }
 0x339   :  { %9444 = vmatprep.subr.bf16.mxu0 %v12171_v8  ;;  %9146 = vmatmul.mubr.bf16.gmra.mxu1 %v14850_v22  ;;  %v5989_v23 = vsel %vm774_vm1, %v5987_v43, %v5988_v30  ;;  %v5998_v8 = vsel %vm774_vm1, %v5996_v59, %v5997_v55  ;;  %v12181_v43 = vld [vmem:[#allocation12 + $0x540] ss:$8 sps:$4 sm:$0xff]   ;;  %v6014_v30 = vrot.slane %v14597_v24, 2  ;;  %v16145_v59 = vld [vmem:[#allocation39_spill] sm:$0xff]  ;;  %v5995_v57 = vsel %vm774_vm1, %v5993_v4, %v5994_v13 }
 0x33a   :  { %9155 = vmatprep.mubr.bf16.mxu1 %v14854_v28  ;;  %9334 = vmatpush1.bf16.msra.mxu1 %v12172_v16  ;;  %v6004_v42 = vsel %vm774_vm1, %v6002_v26, %v6003_v0  ;;  %v16143_v16 = vld [vmem:[#allocation34_spill] sm:$0xff]  ;;  %v6009_v9 = vrot.slane %v16145_v59, 2  ;;  %v6001_v24 = vsel %vm774_vm1, %v5999_v31, %v6000_v33  ;;  %v6020_v40 = vrot.slane %v14670_v48, 2 }
 0x33b   :  { %9335 = vmatprep.subr.bf16.mxu1 %v12180_v51  ;;  %v14870_v51 = vpack.c.bf16 %v5989_v23, %v5983_v27  ;;  %v14874_v62 = vpack.c.bf16 %v6004_v42, %v5998_v8  ;;  %v12190_v26 = vld [vmem:[#allocation12 + $0x420] ss:$8 sps:$4 sm:$0xff]   ;;  %v6016_v55 = vsel %vm774_vm1, %v6014_v30, %v6015_v10  ;;  %v14890_v0 = vpack.c.bf16 %v6001_v24, %v5995_v57  ;;  %v12201_v42 = vld [vmem:[#allocation12 + $0x514] ss:$8 sps:$4 sm:$0xff]   ;;  %v12216_v33 = vld [vmem:[#allocation12 + $0x4e4] ss:$8 sps:$4 sm:$0xff]  }
 0x33c   :  { %9445 = vmatpush1.bf16.msra.mxu0 %v12169_v19  ;;  %v16144_v19 = vld [vmem:[#allocation37_spill] sm:$0xff]  ;;  %v6010_v18 = vsel %vm774_vm1, %v6008_v53, %v6009_v9  ;;  %v6006_v23 = vrot.slane %v14641_v3, 2  ;;  %v6026_v8 = vrot.slane %v14674_v49, 2  ;;  %v6023_v53 = vrot.slane %v14692_v46, 2  ;;  %v16146_v30 = vld [vmem:[#allocation42_spill] sm:$0xff]  ;;  %v16147_v9 = vld [vmem:[#allocation47_spill] sm:$0xff] }
 0x33d   :  { %9446 = vmatprep.subr.bf16.mxu0 %v12177_v44  ;;  %v12195_v44 = vld [vmem:[#allocation12 + $0x524] ss:$8 sps:$4 sm:$0xff]   ;;  %v14894_v27 = vpack.c.bf16 %v6016_v55, %v6010_v18  ;;  %v12202_v4 = vld [vmem:[#allocation12 + $0x400] ss:$8 sps:$4 sm:$0xff]   ;;  %v12210_v3 = vld [vmem:[#allocation12 + $0x4f4] ss:$8 sps:$4 sm:$0xff]  }
 0x33e   :  { %9336 = vmatpush1.bf16.msra.mxu1 %v12178_v34  ;;  %v12204_v34 = vld [vmem:[#allocation12 + $0x404] ss:$8 sps:$4 sm:$0xff]   ;;  %v6007_v48 = vsel %vm774_vm1, %v6005_v39, %v6006_v23  ;;  %v6018_v10 = vrot.slane %v16147_v9, 2  ;;  %v16150_v57 = vld [vmem:[#allocation45_spill] sm:$0xff] }
 0x33f   :  { %9259 = vmatmul.mubr.bf16.gmra.mxu0 %v16143_v16  ;;  %9337 = vmatprep.subr.bf16.mxu1 %v12186_v17  ;;  %v6011_v17 = vrot.slane %v14653_v41, 2  ;;  %v6021_v41 = vrot.slane %v14672_v54, 2  ;;  %v6038_v24 = vrot.slane %v16150_v57, 2  ;;  %v16151_v18 = vld [vmem:[#allocation50_spill] sm:$0xff]  ;;  %v16152_v55 = vld [vmem:[#allocation51_spill] sm:$0xff] }
 0x340   :  { %9268 = vmatprep.mubr.bf16.mxu0 %v16144_v19  ;;  %9447 = vmatpush1.bf16.msra.mxu0 %v12175_v38  ;;  %v12193_v38 = vld [vmem:[#allocation12 + $0x520] ss:$8 sps:$4 sm:$0xff]   ;;  %v6033_v46 = vrot.slane %v16151_v18, 2  ;;  %v12225_v9 = vld [vmem:[#allocation12 + $0x5d4] ss:$8 sps:$4 sm:$0xff]  }
 0x341   :  { %9448 = vmatprep.subr.bf16.mxu0 %v12183_v32  ;;  %9156 = vmatmul.mubr.bf16.gmra.mxu1 %v14870_v51  ;;  %v6012_v32 = vrot.slane %v14655_v12, 2  ;;  %v12199_v12 = vld [vmem:[#allocation12 + $0x510] ss:$8 sps:$4 sm:$0xff]   ;;  %v6022_v31 = vsel %vm774_vm1, %v6020_v40, %v6021_v41  ;;  %v12214_v39 = vld [vmem:[#allocation12 + $0x4e0] ss:$8 sps:$4 sm:$0xff]   ;;  %v6029_v41 = vrot.slane %v14735_v36, 2 }
 0x342   :  { %9165 = vmatprep.mubr.bf16.mxu1 %v14874_v62  ;;  %9338 = vmatpush1.bf16.msra.mxu1 %v12184_v29  ;;  %v6027_v29 = vrot.slane %v14681_v2, 2  ;;  %v12208_v2 = vld [vmem:[#allocation12 + $0x4f0] ss:$8 sps:$4 sm:$0xff]   ;;  %v12231_v18 = vld [vmem:[#allocation12 + $0x5c4] ss:$8 sps:$4 sm:$0xff]  }
 0x343   :  { %9339 = vmatprep.subr.bf16.mxu1 %v12192_v52  ;;  %v6013_v49 = vsel %vm774_vm1, %v6011_v17, %v6012_v32  ;;  %v12207_v52 = vld [vmem:[#allocation12 + $0x504] ss:$8 sps:$4 sm:$0xff]   ;;  %v12211_v17 = vld [vmem:[#allocation12 + $0x5f0] ss:$8 sps:$4 sm:$0xff]  }
 0x344   :  { %9449 = vmatpush1.bf16.msra.mxu0 %v12181_v43  ;;  %v6028_v54 = vsel %vm774_vm1, %v6026_v8, %v6027_v29  ;;  %v6017_v43 = vrot.slane %v14690_v25, 2  ;;  %v14910_v13 = vpack.c.bf16 %v6013_v49, %v6007_v48  ;;  %v12219_v32 = vld [vmem:[#allocation12 + $0x5e4] ss:$8 sps:$4 sm:$0xff]   ;;  %v16155_v48 = vld [vmem:[#allocation60_spill] sm:$0xff]  ;;  %v12217_v49 = vld [vmem:[#allocation12 + $0x5e0] ss:$8 sps:$4 sm:$0xff]  }
 0x345   :  { %9450 = vmatprep.subr.bf16.mxu0 %v12189_v60  ;;  %v12205_v60 = vld [vmem:[#allocation12 + $0x500] ss:$8 sps:$4 sm:$0xff]   ;;  %v14914_v59 = vpack.c.bf16 %v6028_v54, %v6022_v31  ;;  %v16153_v29 = vld [vmem:[#allocation55_spill] sm:$0xff] }
 0x346   :  { %9340 = vmatpush1.bf16.msra.mxu1 %v12190_v26  ;;  %v16148_v26 = vld [vmem:[#allocation48_spill] sm:$0xff]  ;;  %v16157_v31 = vld [vmem:[#allocation59_spill] sm:$0xff] }
 0x347   :  { %9269 = vmatmul.mubr.bf16.gmra.mxu0 %v14616_v11  ;;  %9341 = vmatprep.subr.bf16.mxu1 %v12198_v21  ;;  %v6024_v21 = vrot.slane %v16148_v26, 2  ;;  %v6030_v54 = vrot.slane %v16157_v31, 2  ;;  %v16162_v26 = vld [vmem:[#allocation75_spill] sm:$0xff] }
 0x348   :  { %9278 = vmatprep.mubr.bf16.mxu0 %v14628_v63  ;;  %9451 = vmatpush1.bf16.msra.mxu0 %v12187_v20  ;;  %v16149_v20 = vld [vmem:[#allocation44_spill] sm:$0xff] }
 0x349   :  { %9452 = vmatprep.subr.bf16.mxu0 %v12195_v44  ;;  %9166 = vmatmul.mubr.bf16.gmra.mxu1 %v14890_v0  ;;  %v6032_v25 = vrot.slane %v16149_v20, 2  ;;  %v12213_v44 = vld [vmem:[#allocation12 + $0x5f4] ss:$8 sps:$4 sm:$0xff]   ;;  %v6025_v23 = vsel %vm774_vm1, %v6023_v53, %v6024_v21  ;;  %v16160_v53 = vld [vmem:[#allocation66_spill] sm:$0xff]  ;;  %v6051_v21 = vrot.slane %v16162_v26, 2 }
 0x34a   :  { %9175 = vmatprep.mubr.bf16.mxu1 %v14894_v27  ;;  %9342 = vmatpush1.bf16.msra.mxu1 %v12196_v37  ;;  %v6039_v37 = vrot.slane %v16152_v55, 2  ;;  %v12226_v20 = vld [vmem:[#allocation12 + $0x4c0] ss:$8 sps:$4 sm:$0xff]   ;;  %v12223_v57 = vld [vmem:[#allocation12 + $0x5d0] ss:$8 sps:$4 sm:$0xff]  }
 0x34b   :  { %9343 = vmatprep.subr.bf16.mxu1 %v12204_v34  ;;  %v12222_v34 = vld [vmem:[#allocation12 + $0x4d4] ss:$8 sps:$4 sm:$0xff]   ;;  %v6034_v40 = vsel %vm774_vm1, %v6032_v25, %v6033_v46  ;;  %v12235_v31 = vld [vmem:[#allocation12 + $0x5b0] ss:$8 sps:$4 sm:$0xff]   ;;  %v12250_v26 = vld [vmem:[#allocation12 + $0x480] ss:$8 sps:$4 sm:$0xff]  }
 0x34c   :  { %9453 = vmatpush1.bf16.msra.mxu0 %v12193_v38  ;;  %v6019_v38 = vsel %vm774_vm1, %v6017_v43, %v6018_v10  ;;  %v6040_v8 = vsel %vm774_vm1, %v6038_v24, %v6039_v37  ;;  %v16161_v10 = vld [vmem:[#allocation53_spill] sm:$0xff]  ;;  %v6031_v24 = vsel %vm774_vm1, %v6029_v41, %v6030_v54  ;;  %v12232_v37 = vld [vmem:[#allocation12 + $0x4b0] ss:$8 sps:$4 sm:$0xff]   ;;  %v6048_v41 = vrot.slane %v14787_v35, 2  ;;  %v12243_v54 = vld [vmem:[#allocation12 + $0x5a4] ss:$8 sps:$4 sm:$0xff]  }
 0x34d   :  { %9454 = vmatprep.subr.bf16.mxu0 %v12201_v42  ;;  %v12220_v42 = vld [vmem:[#allocation12 + $0x4d0] ss:$8 sps:$4 sm:$0xff]   ;;  %v12234_v25 = vld [vmem:[#allocation12 + $0x4b4] ss:$8 sps:$4 sm:$0xff]  }
 0x34e   :  { %9344 = vmatpush1.bf16.msra.mxu1 %v12202_v4  ;;  %v14930_v4 = vpack.c.bf16 %v6025_v23, %v6019_v38  ;;  %v12240_v38 = vld [vmem:[#allocation12 + $0x4a4] ss:$8 sps:$4 sm:$0xff]   ;;  %v6047_v23 = vrot.slane %v14783_v15, 2 }
 0x34f   :  { %9279 = vmatmul.mubr.bf16.gmra.mxu0 %v14665_v50  ;;  %9345 = vmatprep.subr.bf16.mxu1 %v12210_v3  ;;  %v12228_v3 = vld [vmem:[#allocation12 + $0x4c4] ss:$8 sps:$4 sm:$0xff]  }
 0x350   :  { %9288 = vmatprep.mubr.bf16.mxu0 %v16146_v30  ;;  %9455 = vmatpush1.bf16.msra.mxu0 %v12199_v12  ;;  %16154 = vst [vmem:[#allocation65_spill] sm:$0xff] %v14930_v4  ;;  %v6035_v12 = vrot.slane %v14737_v14, 2  ;;  %v6045_v14 = vrot.slane %v16161_v10, 2  ;;  %v14962_v15 = vld [vmem:[#allocation3 + $0x228] sm:$0xff]  ;;  %v6049_v35 = vsel %vm774_vm1, %v6047_v23, %v6048_v41  ;;  %v14976_v10 = vld [vmem:[#allocation3 + $0x200] sm:$0xff] }
 0x351   :  { %9456 = vmatprep.subr.bf16.mxu0 %v12207_v52  ;;  %9176 = vmatmul.mubr.bf16.gmra.mxu1 %v14910_v13  ;;  %v14934_v52 = vpack.c.bf16 %v6040_v8, %v6034_v40  ;;  %v12229_v40 = vld [vmem:[#allocation12 + $0x5c0] ss:$8 sps:$4 sm:$0xff]   ;;  %v12259_v23 = vld [vmem:[#allocation12 + $0x770] ss:$8 sps:$4 sm:$0xff]  }
 0x352   :  { %9185 = vmatprep.mubr.bf16.mxu1 %v14914_v59  ;;  %9346 = vmatpush2.bf16.msra.mxu1 %v12208_v2  ;;  %v16158_v2 = vld [vmem:[#allocation52_spill] sm:$0xff]  ;;  %v12265_v41 = vld [vmem:[#allocation12 + $0x760] ss:$8 sps:$4 sm:$0xff]  }
 0x353   :  { %9347 = vmatprep.subr.bf16.mxu1 %v12216_v33  ;;  %16156 = vst [vmem:[#allocation64_spill] sm:$0xff] %v14934_v52  ;;  %v6036_v43 = vrot.slane %v16158_v2, 2  ;;  %v16159_v33 = vld [vmem:[#allocation62_spill] sm:$0xff] }
 0x354   :  { %9457 = vmatpush1.bf16.msra.mxu0 %v12205_v60  ;;  %v6044_v36 = vrot.slane %v16159_v33, 2  ;;  %v6050_v60 = vrot.slane %v16160_v53, 2  ;;  %v12241_v53 = vld [vmem:[#allocation12 + $0x5a0] ss:$8 sps:$4 sm:$0xff]  }
 0x355   :  { %9458 = vmatprep.subr.bf16.mxu0 %v12213_v44  ;;  %v6037_v44 = vsel %vm774_vm1, %v6035_v12, %v6036_v43  ;;  %v14960_v12 = vld [vmem:[#allocation3 + $0x208] sm:$0xff]  ;;  %v12244_v43 = vld [vmem:[#allocation12 + $0x490] ss:$8 sps:$4 sm:$0xff]  }
 0x356   :  { %9348 = vmatpush2.bf16.msra.mxu1 %v12214_v39  ;;  %v6046_v46 = vsel %vm774_vm1, %v6044_v36, %v6045_v14  ;;  %v6052_v55 = vsel %vm774_vm1, %v6050_v60, %v6051_v21  ;;  %v6041_v39 = vrot.slane %v14779_v5, 2  ;;  %v12237_v5 = vld [vmem:[#allocation12 + $0x5b4] ss:$8 sps:$4 sm:$0xff]   ;;  %v14968_v2 = vpack.c.bf16 %v14962_v15, %v14960_v12  ;;  %v12252_v36 = vld [vmem:[#allocation12 + $0x484] ss:$8 sps:$4 sm:$0xff]  }
 0x357   :  { %9289 = vmatmul.mubr.bf16.gmra.mxu0 %v16153_v29  ;;  %9349 = vmatprep.subr.bf16.mxu1 %v12222_v34  ;;  %v16163_v34 = vld [vmem:[#allocation57_spill] sm:$0xff]  ;;  %v14954_v8 = vpack.c.bf16 %v6052_v55, %v6046_v46 }
 0x358   :  { %9298 = vmatprep.mubr.bf16.mxu0 %v16155_v48  ;;  %9459 = vmatpush2.bf16.msra.mxu0 %v12211_v17  ;;  %v14950_v17 = vpack.c.bf16 %v6037_v44, %v6031_v24  ;;  %v12249_v60 = vld [vmem:[#allocation12 + $0x594] ss:$8 sps:$4 sm:$0xff]   ;;  %v12256_v24 = vld [vmem:[#allocation12 + $0x670] ss:$8 sps:$4 sm:$0xff]   ;;  %v12264_v44 = vld [vmem:[#allocation12 + $0x664] ss:$8 sps:$4 sm:$0xff]  }
 0x359   :  { %9460 = vmatprep.subr.bf16.mxu0 %v12219_v32  ;;  %9186 = vmatmul.mubr.bf16.gmra.mxu1 %v14930_v4  ;;  %v16165_v32 = vld [vmem:[#allocation58_spill] sm:$0xff]  ;;  %16166 = vst [vmem:[#allocation70_spill] sm:$0xff] %v14954_v8  ;;  %v14978_v14 = vld [vmem:[#allocation3 + $0x220] sm:$0xff] }
 0x35a   :  { %9195 = vmatprep.mubr.bf16.mxu1 %v14934_v52  ;;  %9350 = vmatpush2.bf16.msra.mxu1 %v12220_v42  ;;  %16164 = vst [vmem:[#allocation72_spill] sm:$0xff] %v14950_v17  ;;  %v6042_v42 = vrot.slane %v14785_v58, 2  ;;  %v12258_v21 = vld [vmem:[#allocation12 + $0x674] ss:$8 sps:$4 sm:$0xff]  }
 0x35b   :  { %9351 = vmatprep.subr.bf16.mxu1 %v12228_v3  ;;  %v12238_v3 = vld [vmem:[#allocation12 + $0x4a0] ss:$8 sps:$4 sm:$0xff]   ;;  %v12261_v55 = vld [vmem:[#allocation12 + $0x774] ss:$8 sps:$4 sm:$0xff]  }
 0x35c   :  { %9461 = vmatpush2.bf16.msra.mxu0 %v12217_v49  ;;  %v12246_v49 = vld [vmem:[#allocation12 + $0x494] ss:$8 sps:$4 sm:$0xff]   ;;  %v6043_v58 = vsel %vm774_vm1, %v6041_v39, %v6042_v42  ;;  %v12262_v39 = vld [vmem:[#allocation12 + $0x660] ss:$8 sps:$4 sm:$0xff]   ;;  %v12268_v42 = vld [vmem:[#allocation12 + $0x650] ss:$8 sps:$4 sm:$0xff]  }
 0x35d   :  { %9462 = vmatprep.subr.bf16.mxu0 %v12225_v9  ;;  %v14971_v33 = vpack.c.bf16 %v6049_v35, %v6043_v58  ;;  %v16167_v9 = vld [vmem:[#allocation25_spill] sm:$0xff]  ;;  %v12271_v35 = vld [vmem:[#allocation12 + $0x750] ss:$8 sps:$4 sm:$0xff]  }
 0x35e   :  { %9352 = vmatpush2.bf16.msra.mxu1 %v12226_v20  ;;  %v12247_v20 = vld [vmem:[#allocation12 + $0x590] ss:$8 sps:$4 sm:$0xff]   ;;  %v16168_v46 = vld [vmem:[#allocation29_spill] sm:$0xff] }
 0x35f   :  { %9299 = vmatmul.mubr.bf16.gmra.mxu0 %v16163_v34  ;;  %9353 = vmatprep.subr.bf16.mxu1 %v12234_v25  ;;  %v14982_v25 = vpack.c.bf16 %v14978_v14, %v14976_v10  ;;  %v12282_v58 = vld [vmem:[#allocation12 + $0x634] ss:$8 sps:$4 sm:$0xff]  }
 0x360   :  { %9308 = vmatprep.mubr.bf16.mxu0 %v16165_v32  ;;  %9463 = vmatpush2.bf16.msra.mxu0 %v12223_v57  ;;  %v12255_v57 = vld [vmem:[#allocation12 + $0x584] ss:$8 sps:$4 sm:$0xff]  }
 0x361   :  { %9464 = vmatprep.subr.bf16.mxu0 %v12231_v18  ;;  %9196 = vmatmul.mubr.bf16.gmra.mxu1 %v14950_v17  ;;  %v12253_v18 = vld [vmem:[#allocation12 + $0x580] ss:$8 sps:$4 sm:$0xff]  }
 0x362   :  { %9205 = vmatprep.mubr.bf16.mxu1 %v14954_v8  ;;  %9354 = vmatpush2.bf16.msra.mxu1 %v12232_v37  ;;  %v16169_v37 = vld [vmem:[#allocation36_spill] sm:$0xff] }
 0x363   :  { %9355 = vmatprep.subr.bf16.mxu1 %v12240_v38  ;;  %v12270_v38 = vld [vmem:[#allocation12 + $0x654] ss:$8 sps:$4 sm:$0xff]  }
 0x364   :  { %9465 = vmatpush2.bf16.msra.mxu0 %v12229_v40  ;;  %v12267_v40 = vld [vmem:[#allocation12 + $0x764] ss:$8 sps:$4 sm:$0xff]  }
 0x365   :  { %9466 = vmatprep.subr.bf16.mxu0 %v12237_v5  ;;  %v16170_v5 = vld [vmem:[#allocation38_spill] sm:$0xff] }
 0x366   :  { %9356 = vmatpush2.bf16.msra.mxu1 %v12238_v3  ;;  %v12273_v3 = vld [vmem:[#allocation12 + $0x754] ss:$8 sps:$4 sm:$0xff]  }
 0x367   :  { %9309 = vmatmul.mubr.bf16.gmra.mxu0 %v14800_v1  ;;  %9357 = vmatprep.subr.bf16.mxu1 %v12246_v49  ;;  %v16171_v49 = vld [vmem:[#allocation40_spill] sm:$0xff] }
 0x368   :  { %9318 = vmatprep.mubr.bf16.mxu0 %v14968_v2  ;;  %9467 = vmatpush2.bf16.msra.mxu0 %v12235_v31  ;;  %v12274_v31 = vld [vmem:[#allocation12 + $0x640] ss:$8 sps:$4 sm:$0xff]  }
 0x369   :  { %9468 = vmatprep.subr.bf16.mxu0 %v12243_v54  ;;  %9206 = vmatmul.mubr.bf16.gmra.mxu1 %v14971_v33  ;;  %v12280_v54 = vld [vmem:[#allocation12 + $0x630] ss:$8 sps:$4 sm:$0xff]  }
 0x36a   :  { %9358 = vmatpush2.bf16.msra.mxu1 %v12244_v43  ;;  %9361 = vmatprep.mubr.bf16.mxu1 %v16167_v9  ;;  %v12288_v43 = vld [vmem:[#allocation12 + $0x624] ss:$8 sps:$4 sm:$0xff]  }
 0x36b   :  { %9359 = vmatprep.subr.bf16.mxu1 %v12252_v36  ;;  %v12277_v36 = vld [vmem:[#allocation12 + $0x740] ss:$8 sps:$4 sm:$0xff]   ;;  %v16173_v9 = vld [vmem:[#allocation43_spill] sm:$0xff] }
 0x36c   :  { %9469 = vmatpush2.bf16.msra.mxu0 %v12241_v53  ;;  %v16172_v53 = vld [vmem:[#allocation41_spill] sm:$0xff] }
 0x36d   :  { %9470 = vmatprep.subr.bf16.mxu0 %v12249_v60  ;;  %v12285_v60 = vld [vmem:[#allocation12 + $0x734] ss:$8 sps:$4 sm:$0xff]  }
 0x36e   :  { %9360 = vmatpush2.bf16.msra.mxu1 %v12250_v26  ;;  %v12286_v26 = vld [vmem:[#allocation12 + $0x620] ss:$8 sps:$4 sm:$0xff]  }
 0x36f   :  { %9319 = vmatmul.mubr.bf16.gmra.mxu0 %v14982_v25  ;;  %9555 = vmatprep.subr.bf16.mxu1 %v12258_v21  ;;  %v12294_v21 = vld [vmem:[#allocation12 + $0x614] ss:$8 sps:$4 sm:$0xff]  }
 0x370   :  { %9471 = vmatpush2.bf16.msra.mxu0 %v12247_v20  ;;  %9474 = vmatprep.mubr.bf16.mxu0 %v14825_v7  ;;  %v12276_v7 = vld [vmem:[#allocation12 + $0x644] ss:$8 sps:$4 sm:$0xff]   ;;  %v12283_v20 = vld [vmem:[#allocation12 + $0x730] ss:$8 sps:$4 sm:$0xff]  }
 0x371   :  { %9472 = vmatprep.subr.bf16.mxu0 %v12255_v57  ;;  %9362 = vmatmul.mubr.bf16.vlgmr.msra.gmra.mxu1 %v16168_v46  ;;  %v12291_v57 = vld [vmem:[#allocation12 + $0x724] ss:$8 sps:$4 sm:$0xff]  }
 0x372   :  { %9371 = vmatprep.mubr.bf16.mxu1 %v16169_v37  ;;  %9556 = vmatpush1.bf16.msra.mxu1 %v12256_v24  ;;  %v12292_v24 = vld [vmem:[#allocation12 + $0x610] ss:$8 sps:$4 sm:$0xff]   ;;  %v16174_v46 = vld [vmem:[#allocation46_spill] sm:$0xff] }
 0x373   :  { %9557 = vmatprep.subr.bf16.mxu1 %v12264_v44  ;;  %v12300_v44 = vld [vmem:[#allocation12 + $0x604] ss:$8 sps:$4 sm:$0xff]  }
 0x374   :  { %9473 = vmatpush2.bf16.msra.mxu0 %v12253_v18  ;;  %v12289_v18 = vld [vmem:[#allocation12 + $0x720] ss:$8 sps:$4 sm:$0xff]  }
 0x375   :  { %9668 = vmatprep.subr.bf16.mxu0 %v12261_v55  ;;  %v12297_v55 = vld [vmem:[#allocation12 + $0x714] ss:$8 sps:$4 sm:$0xff]  }
 0x376   :  { %9558 = vmatpush1.bf16.msra.mxu1 %v12262_v39  ;;  %v16175_v39 = vld [vmem:[#allocation49_spill] sm:$0xff] }
 0x377   :  { %9475 = vmatmul.mubr.bf16.vlgmr.msra.gmra.mxu0 %v14850_v22  ;;  %9559 = vmatprep.subr.bf16.mxu1 %v12270_v38  ;;  %v12279_v22 = vld [vmem:[#allocation12 + $0x744] ss:$8 sps:$4 sm:$0xff]   ;;  %v12298_v38 = vld [vmem:[#allocation12 + $0x600] ss:$8 sps:$4 sm:$0xff]  }
 0x378   :  { %9484 = vmatprep.mubr.bf16.mxu0 %v14854_v28  ;;  %9669 = vmatpush1.bf16.msra.mxu0 %v12259_v23  ;;  %v12306_v23 = vld [vmem:[#allocation12 + $0x6f4] ss:$8 sps:$4 sm:$0xff]  }
 0x379   :  { %9670 = vmatprep.subr.bf16.mxu0 %v12267_v40  ;;  %9372 = vmatmul.mubr.bf16.gmra.mxu1 %v16170_v5  ;;  %v12295_v40 = vld [vmem:[#allocation12 + $0x710] ss:$8 sps:$4 sm:$0xff]  }
 0x37a   :  { %9381 = vmatprep.mubr.bf16.mxu1 %v16171_v49  ;;  %9560 = vmatpush1.bf16.msra.mxu1 %v12268_v42  ;;  %v12303_v42 = vld [vmem:[#allocation12 + $0x704] ss:$8 sps:$4 sm:$0xff]  }
 0x37b   :  { %9561 = vmatprep.subr.bf16.mxu1 %v12276_v7  ;;  %v12304_v7 = vld [vmem:[#allocation12 + $0x6f0] ss:$8 sps:$4 sm:$0xff]  }
 0x37c   :  { %9671 = vmatpush1.bf16.msra.mxu0 %v12265_v41  ;;  %v12312_v41 = vld [vmem:[#allocation12 + $0x6e4] ss:$8 sps:$4 sm:$0xff]  }
 0x37d   :  { %9672 = vmatprep.subr.bf16.mxu0 %v12273_v3  ;;  %v12301_v3 = vld [vmem:[#allocation12 + $0x700] ss:$8 sps:$4 sm:$0xff]  }
 0x37e   :  { %9562 = vmatpush1.bf16.msra.mxu1 %v12274_v31  ;;  %v16176_v31 = vld [vmem:[#allocation54_spill] sm:$0xff] }
 0x37f   :  { %9485 = vmatmul.mubr.bf16.gmra.mxu0 %v14870_v51  ;;  %9563 = vmatprep.subr.bf16.mxu1 %v12282_v58  ;;  %v12309_v58 = vld [vmem:[#allocation12 + $0x7f4] ss:$8 sps:$4 sm:$0xff]  }
 0x380   :  { %9494 = vmatprep.mubr.bf16.mxu0 %v14874_v62  ;;  %9673 = vmatpush1.bf16.msra.mxu0 %v12271_v35  ;;  %v16177_v35 = vld [vmem:[#allocation56_spill] sm:$0xff] }
 0x381   :  { %9674 = vmatprep.subr.bf16.mxu0 %v12279_v22  ;;  %9382 = vmatmul.mubr.bf16.gmra.mxu1 %v16172_v53  ;;  %v12310_v22 = vld [vmem:[#allocation12 + $0x6e0] ss:$8 sps:$4 sm:$0xff]  }
 0x382   :  { %9391 = vmatprep.mubr.bf16.mxu1 %v16173_v9  ;;  %9564 = vmatpush1.bf16.msra.mxu1 %v12280_v54  ;;  %v12318_v54 = vld [vmem:[#allocation12 + $0x6d4] ss:$8 sps:$4 sm:$0xff]  }
 0x383   :  { %9565 = vmatprep.subr.bf16.mxu1 %v12288_v43  ;;  %v12307_v43 = vld [vmem:[#allocation12 + $0x7f0] ss:$8 sps:$4 sm:$0xff]  }
 0x384   :  { %9675 = vmatpush1.bf16.msra.mxu0 %v12277_v36  ;;  %v12315_v36 = vld [vmem:[#allocation12 + $0x7e4] ss:$8 sps:$4 sm:$0xff]  }
 0x385   :  { %9676 = vmatprep.subr.bf16.mxu0 %v12285_v60  ;;  %v5368_v60 = vld [vmem:[#allocation3 + $0x218] sm:$0x3] }
 0x386   :  { %9566 = vmatpush1.bf16.msra.mxu1 %v12286_v26  ;;  %v5372_v26 = vld [vmem:[#allocation3 + $0x238] sm:$0x3] }
 0x387   :  { %9495 = vmatmul.mubr.bf16.gmra.mxu0 %v14890_v0  ;;  %9567 = vmatprep.subr.bf16.mxu1 %v12294_v21  ;;  %v12316_v21 = vld [vmem:[#allocation12 + $0x6d0] ss:$8 sps:$4 sm:$0xff]  }
 0x388   :  { %9504 = vmatprep.mubr.bf16.mxu0 %v14894_v27  ;;  %9677 = vmatpush1.bf16.msra.mxu0 %v12283_v20  ;;  %v12324_v20 = vld [vmem:[#allocation12 + $0x6c4] ss:$8 sps:$4 sm:$0xff]  }
 0x389   :  { %9678 = vmatprep.subr.bf16.mxu0 %v12291_v57  ;;  %9392 = vmatmul.mubr.bf16.gmra.mxu1 %v16174_v46  ;;  %v5728_v57 = vrot.slane %v14960_v12, 1 }
 0x38a   :  { %9401 = vmatprep.mubr.bf16.mxu1 %v16175_v39  ;;  %9568 = vmatpush1.bf16.msra.mxu1 %v12292_v24  ;;  %v5734_v24 = vrot.slane %v14962_v15, 1 }
 0x38b   :  { %9569 = vmatprep.subr.bf16.mxu1 %v12300_v44  ;;  %v12313_v44 = vld [vmem:[#allocation12 + $0x7e0] ss:$8 sps:$4 sm:$0xff]  }
 0x38c   :  { %9679 = vmatpush1.bf16.msra.mxu0 %v12289_v18  ;;  %v5729_v18 = vrot.slane %v5368_v60, 1 }
 0x38d   :  { %9680 = vmatprep.subr.bf16.mxu0 %v12297_v55  ;;  %v5735_v55 = vrot.slane %v5372_v26, 1 }
 0x38e   :  { %9570 = vmatpush1.bf16.msra.mxu1 %v12298_v38  ;;  %v16178_v38 = vld [vmem:[#allocation61_spill] sm:$0xff] }
 0x38f   :  { %9505 = vmatmul.mubr.bf16.gmra.mxu0 %v14910_v13  ;;  %9571 = vmatprep.subr.bf16.mxu1 %v12306_v23  ;;  %v12321_v23 = vld [vmem:[#allocation12 + $0x7d4] ss:$8 sps:$4 sm:$0xff]  }
 0x390   :  { %9514 = vmatprep.mubr.bf16.mxu0 %v14914_v59  ;;  %9681 = vmatpush1.bf16.msra.mxu0 %v12295_v40  ;;  %v16179_v40 = vld [vmem:[#allocation63_spill] sm:$0xff] }
 0x391   :  { %9682 = vmatprep.subr.bf16.mxu0 %v12303_v42  ;;  %9402 = vmatmul.mubr.bf16.gmra.mxu1 %v16176_v31  ;;  %v12322_v42 = vld [vmem:[#allocation12 + $0x6c0] ss:$8 sps:$4 sm:$0xff]  }
 0x392   :  { %9411 = vmatprep.mubr.bf16.mxu1 %v16177_v35  ;;  %9572 = vmatpush2.bf16.msra.mxu1 %v12304_v7  ;;  %v12330_v7 = vld [vmem:[#allocation12 + $0x6b4] ss:$8 sps:$4 sm:$0xff]  }
 0x393   :  { %9573 = vmatprep.subr.bf16.mxu1 %v12312_v41  ;;  %v12319_v41 = vld [vmem:[#allocation12 + $0x7d0] ss:$8 sps:$4 sm:$0xff]  }
 0x394   :  { %9683 = vmatpush1.bf16.msra.mxu0 %v12301_v3  ;;  %v5730_v3 = vsel %vm445_vm0, %v5728_v57, %v5729_v18  ;;  %v12336_v57 = vld [vmem:[#allocation12 + $0x6a4] ss:$8 sps:$4 sm:$0xff]   ;;  %v5731_v18 = vrot.slane %v14978_v14, 1 }
 0x395   :  { %9684 = vmatprep.subr.bf16.mxu0 %v12309_v58  ;;  %v5736_v58 = vsel %vm445_vm0, %v5734_v24, %v5735_v55  ;;  %v5725_v24 = vrot.slane %v14976_v10, 1 }
 0x396   :  { %9574 = vmatpush2.bf16.msra.mxu1 %v12310_v22  ;;  %v12327_v22 = vld [vmem:[#allocation12 + $0x7c4] ss:$8 sps:$4 sm:$0xff]  }
 0x397   :  { %9515 = vmatmul.mubr.bf16.gmra.mxu0 %v14930_v4  ;;  %9575 = vmatprep.subr.bf16.mxu1 %v12318_v54  ;;  %v5367_v54 = vld [vmem:[#allocation3 + $0x210] sm:$0x3]  ;;  %v6056_v4 = vrot.slane %v14960_v12, 2  ;;  %v12333_v12 = vld [vmem:[#allocation12 + $0x7b4] ss:$8 sps:$4 sm:$0xff]  }
 0x398   :  { %9524 = vmatprep.mubr.bf16.mxu0 %v14934_v52  ;;  %9685 = vmatpush2.bf16.msra.mxu0 %v12307_v43  ;;  %v5371_v43 = vld [vmem:[#allocation3 + $0x230] sm:$0x3]  ;;  %v12328_v52 = vld [vmem:[#allocation12 + $0x6b0] ss:$8 sps:$4 sm:$0xff]   ;;  %v5726_v55 = vrot.slane %v5367_v54, 1 }
 0x399   :  { %9686 = vmatprep.subr.bf16.mxu0 %v12315_v36  ;;  %9412 = vmatmul.mubr.bf16.gmra.mxu1 %v16178_v38  ;;  %v6062_v36 = vrot.slane %v14962_v15, 2  ;;  %v12325_v15 = vld [vmem:[#allocation12 + $0x7c0] ss:$8 sps:$4 sm:$0xff]  }
 0x39a   :  { %9421 = vmatprep.mubr.bf16.mxu1 %v16179_v40  ;;  %9576 = vmatpush2.bf16.msra.mxu1 %v12316_v21  ;;  %v15015_v21 = vpack.c.bf16 %v5736_v58, %v5730_v3  ;;  %v12331_v3 = vld [vmem:[#allocation12 + $0x7b0] ss:$8 sps:$4 sm:$0xff]  }
 0x39b   :  { %9577 = vmatprep.subr.bf16.mxu1 %v12324_v20  ;;  %v6057_v20 = vrot.slane %v5368_v60, 2  ;;  %v12334_v60 = vld [vmem:[#allocation12 + $0x6a0] ss:$8 sps:$4 sm:$0xff]  }
 0x39c   :  { %9687 = vmatpush2.bf16.msra.mxu0 %v12313_v44  ;;  %v6063_v44 = vrot.slane %v5372_v26, 2 }
 0x39d   :  { %9688 = vmatprep.subr.bf16.mxu0 %v12321_v23  ;;  %v5732_v23 = vrot.slane %v5371_v43, 1  ;;  %v6058_v26 = vsel %vm774_vm1, %v6056_v4, %v6057_v20  ;;  %v12340_v4 = vld [vmem:[#allocation12 + $0x690] ss:$8 sps:$4 sm:$0xff]   ;;  %v6054_v20 = vrot.slane %v5367_v54, 2 }
 0x39e   :  { %9578 = vmatpush2.bf16.msra.mxu1 %v12322_v42  ;;  %v6064_v42 = vsel %vm774_vm1, %v6062_v36, %v6063_v44  ;;  %v6060_v36 = vrot.slane %v5371_v43, 2 }
 0x39f   :  { %9525 = vmatmul.mubr.bf16.gmra.mxu0 %v14950_v17  ;;  %9579 = vmatprep.subr.bf16.mxu1 %v12330_v7  ;;  %v12342_v7 = vld [vmem:[#allocation12 + $0x694] ss:$8 sps:$4 sm:$0xff]   ;;  %v5733_v58 = vsel %vm445_vm0, %v5731_v18, %v5732_v23  ;;  %v6059_v17 = vrot.slane %v14978_v14, 2  ;;  %v12351_v23 = vld [vmem:[#allocation12 + $0x784] ss:$8 sps:$4 sm:$0xff]  }
 0x3a0   :  { %9534 = vmatprep.mubr.bf16.mxu0 %v14954_v8  ;;  %9689 = vmatpush2.bf16.msra.mxu0 %v12319_v41  ;;  %v5727_v41 = vsel %vm445_vm0, %v5725_v24, %v5726_v55  ;;  %v12339_v8 = vld [vmem:[#allocation12 + $0x7a4] ss:$8 sps:$4 sm:$0xff]   ;;  %v12345_v14 = vld [vmem:[#allocation12 + $0x794] ss:$8 sps:$4 sm:$0xff]   ;;  %v12346_v24 = vld [vmem:[#allocation12 + $0x680] ss:$8 sps:$4 sm:$0xff]  }
 0x3a1   :  { %9690 = vmatprep.subr.bf16.mxu0 %v12327_v22  ;;  %9422 = vmatmul.mubr.bf16.gmra.mxu1 %v14813_v47  ;;  %v6053_v22 = vrot.slane %v14976_v10, 2  ;;  %v15031_v44 = vpack.c.bf16 %v5733_v58, %v5727_v41  ;;  %v12337_v10 = vld [vmem:[#allocation12 + $0x7a0] ss:$8 sps:$4 sm:$0xff]   ;;  %v6061_v43 = vsel %vm774_vm1, %v6059_v17, %v6060_v36  ;;  %v12354_v18 = vld [vmem:[#allocation12 + $0x874] ss:$8 sps:$4 sm:$0xff]   ;;  %v15050_v41 = vpop.f32.mrf.mxu0 }
 0x3a2   :  { %9431 = vmatprep.mubr.bf16.mxu1 %v15015_v21  ;;  %9580 = vmatpush2.bf16.msra.mxu1 %v12328_v52  ;;  %v15028_v52 = vpack.c.bf16 %v6064_v42, %v6058_v26  ;;  %v12355_v17 = vld [vmem:[#allocation12 + $0x860] ss:$8 sps:$4 sm:$0xff]   ;;  %v12358_v26 = vld [vmem:[#allocation12 + $0x850] ss:$8 sps:$4 sm:$0xff]   ;;  %v15044_v42 = vpop.f32.mrf.mxu1 }
 0x3a3   :  { %9581 = vmatprep.subr.bf16.mxu1 %v12336_v57  ;;  %v12348_v57 = vld [vmem:[#allocation12 + $0x684] ss:$8 sps:$4 sm:$0xff]   ;;  %v6055_v54 = vsel %vm774_vm1, %v6053_v22, %v6054_v20  ;;  %v12364_v22 = vld [vmem:[#allocation12 + $0x830] ss:$8 sps:$4 sm:$0xff]  }
 0x3a4   :  { %9691 = vmatpush2.bf16.msra.mxu0 %v12325_v15  ;;  %v12343_v15 = vld [vmem:[#allocation12 + $0x790] ss:$8 sps:$4 sm:$0xff]   ;;  %v15038_v55 = vpack.c.bf16 %v6061_v43, %v6055_v54 }
 0x3a5   :  { %9692 = vmatprep.subr.bf16.mxu0 %v12333_v12  ;;  %v12357_v12 = vld [vmem:[#allocation12 + $0x864] ss:$8 sps:$4 sm:$0xff]  }
 0x3a6   :  { %9582 = vmatpush2.bf16.msra.mxu1 %v12334_v60  ;;  %16180 = vst [vmem:[#allocation77_spill] sm:$0xff] %v15038_v55  ;;  %v12360_v60 = vld [vmem:[#allocation12 + $0x854] ss:$8 sps:$4 sm:$0xff]  }
 0x3a7   :  { %9535 = vmatmul.mubr.bf16.gmra.mxu0 %v14971_v33  ;;  %9583 = vmatprep.subr.bf16.mxu1 %v12342_v7  ;;  %v12363_v7 = vld [vmem:[#allocation12 + $0x844] ss:$8 sps:$4 sm:$0xff]  }
 0x3a8   :  { %9544 = vmatprep.mubr.bf16.mxu0 %v15028_v52  ;;  %9693 = vmatpush2.bf16.msra.mxu0 %v12331_v3  ;;  %v12366_v3 = vld [vmem:[#allocation12 + $0x834] ss:$8 sps:$4 sm:$0xff]  }
 0x3a9   :  { %9694 = vmatprep.subr.bf16.mxu0 %v12339_v8  ;;  %9432 = vmatmul.mubr.bf16.gmra.mxu1 %v15031_v44  ;;  %v12352_v8 = vld [vmem:[#allocation12 + $0x870] ss:$8 sps:$4 sm:$0xff]  }
 0x3aa   :  { %9584 = vmatpush2.bf16.msra.mxu1 %v12340_v4  ;;  %9587 = vmatprep.mubr.bf16.mxu1 %v16136_v6  ;;  %v12349_v6 = vld [vmem:[#allocation12 + $0x780] ss:$8 sps:$4 sm:$0xff]  }
 0x3ab   :  { %9585 = vmatprep.subr.bf16.mxu1 %v12348_v57  ;;  %v12367_v57 = vld [vmem:[#allocation12 + $0x820] ss:$8 sps:$4 sm:$0xff]  }
 0x3ac   :  { %9695 = vmatpush2.bf16.msra.mxu0 %v12337_v10 }
 0x3ad   :  { %9696 = vmatprep.subr.bf16.mxu0 %v12345_v14 }
 0x3ae   :  { %9586 = vmatpush2.bf16.msra.mxu1 %v12346_v24 }
 0x3af   :  { %9545 = vmatmul.mubr.bf16.gmra.mxu0 %v15038_v55  ;;  %9781 = vmatprep.subr.bf16.mxu1 %v12354_v18 }
 0x3b0   :  { %9697 = vmatpush2.bf16.msra.mxu0 %v12343_v15  ;;  %9700 = vmatprep.mubr.bf16.mxu0 %v16169_v37 }
 0x3b1   :  { %9698 = vmatprep.subr.bf16.mxu0 %v12351_v23  ;;  %9588 = vmatmul.mubr.bf16.vlgmr.msra.gmra.mxu1 %v16143_v16  ;;  %v12361_v16 = vld [vmem:[#allocation12 + $0x840] ss:$8 sps:$4 sm:$0xff]  }
 0x3b2   :  { %9597 = vmatprep.mubr.bf16.mxu1 %v16144_v19  ;;  %9782 = vmatpush1.bf16.msra.mxu1 %v12352_v8 }
 0x3b3   :  { %9783 = vmatprep.subr.bf16.mxu1 %v12357_v12 }
 0x3b4   :  { %9699 = vmatpush2.bf16.msra.mxu0 %v12349_v6 }
 0x3b5   :  { %v8921_v37 = vpop.f32.mrf.mxu1 }
 0x3b6   :  { %9784 = vmatpush1.bf16.msra.mxu1 %v12355_v17  ;;  %v12373_v17 = vld [vmem:[#allocation12 + $0x800] ss:$8 sps:$4 sm:$0xff]  }
 0x3b7   :  { %9701 = vmatmul.mubr.bf16.vlgmr.msra.gmra.mxu0 %v16170_v5  ;;  %9785 = vmatprep.subr.bf16.mxu1 %v12360_v60  ;;  %v8923_v19 = vpop.f32.mrf.mxu1 }
 0x3b8   :  { %9710 = vmatprep.mubr.bf16.mxu0 %v16171_v49  ;;  %v12369_v49 = vld [vmem:[#allocation12 + $0x824] ss:$8 sps:$4 sm:$0xff]  }
 0x3b9   :  { %9598 = vmatmul.mubr.bf16.gmra.mxu1 %v14616_v11  ;;  %v8925_v58 = vpop.f32.mrf.mxu1 }
 0x3ba   :  { %9607 = vmatprep.mubr.bf16.mxu1 %v14628_v63  ;;  %9786 = vmatpush1.bf16.msra.mxu1 %v12358_v26 }
 0x3bb   :  { %9787 = vmatprep.subr.bf16.mxu1 %v12363_v7  ;;  %v8927_v4 = vpop.f32.mrf.mxu1 }
 0x3be   :  { %9788 = vmatpush1.bf16.msra.mxu1 %v12361_v16  ;;  %v8931_v63 = vpop.f32.mrf.mxu1 }
 0x3bf   :  { %v9034_v5 = vpop.f32.mrf.mxu0  ;;  %9711 = vmatmul.mubr.bf16.gmra.mxu0 %v16172_v53  ;;  %9789 = vmatprep.subr.bf16.mxu1 %v12366_v3  ;;  %v12372_v53 = vld [vmem:[#allocation12 + $0x814] ss:$8 sps:$4 sm:$0xff]  }
 0x3c0   :  { %v15053_v20 = vadd.f32 %v9034_v5, %v8921_v37  ;;  %9720 = vmatprep.mubr.bf16.mxu0 %v16173_v9  ;;  %v8933_v14 = vpop.f32.mrf.mxu1  ;;  %v12370_v9 = vld [vmem:[#allocation12 + $0x810] ss:$8 sps:$4 sm:$0xff]  }
 0x3c1   :  { %v9036_v11 = vpop.f32.mrf.mxu0  ;;  %9608 = vmatmul.mubr.bf16.gmra.mxu1 %v14665_v50 }
 0x3c2   :  { %v15057_v36 = vadd.f32 %v9036_v11, %v8923_v19  ;;  %9617 = vmatprep.mubr.bf16.mxu1 %v16146_v30  ;;  %9790 = vmatpush1.bf16.msra.mxu1 %v12364_v22  ;;  %v8935_v24 = vpop.f32.mrf.mxu1  ;;  %v12375_v30 = vld [vmem:[#allocation12 + $0x804] ss:$8 sps:$4 sm:$0xff]  }
 0x3c3   :  { %v9038_v10 = vpop.f32.mrf.mxu0  ;;  %9791 = vmatprep.subr.bf16.mxu1 %v12369_v49  ;;  %v12379_v49 = vld [vmem:[#allocation12 + $0x8e0] ss:$8 sps:$4 sm:$0xff]  }
 0x3c4   :  { %v15060_v54 = vadd.f32 %v9038_v10, %v8925_v58  ;;  %v8937_v50 = vpop.f32.mrf.mxu1 }
 0x3c5   :  { %v9040_v43 = vpop.f32.mrf.mxu0 }
 0x3c6   :  { %v15062_v18 = vadd.f32 %v9040_v43, %v8927_v4  ;;  %9792 = vmatpush1.bf16.msra.mxu1 %v12367_v57  ;;  %v8941_v12 = vpop.f32.mrf.mxu1 }
 0x3c7   :  { %v9044_v15 = vpop.f32.mrf.mxu0  ;;  %9721 = vmatmul.mubr.bf16.gmra.mxu0 %v16174_v46  ;;  %9793 = vmatprep.subr.bf16.mxu1 %v12372_v53  ;;  %v12378_v46 = vld [vmem:[#allocation12 + $0x8f4] ss:$8 sps:$4 sm:$0xff]  }
 0x3c8   :  { %v15065_v23 = vadd.f32 %v9044_v15, %v8931_v63  ;;  %9730 = vmatprep.mubr.bf16.mxu0 %v16175_v39  ;;  %v8943_v26 = vpop.f32.mrf.mxu1  ;;  %v12376_v39 = vld [vmem:[#allocation12 + $0x8f0] ss:$8 sps:$4 sm:$0xff]  }
 0x3c9   :  { %v9046_v8 = vpop.f32.mrf.mxu0  ;;  %9618 = vmatmul.mubr.bf16.gmra.mxu1 %v16153_v29 }
 0x3ca   :  { %v15069_v6 = vadd.f32 %v9046_v8, %v8933_v14  ;;  %9627 = vmatprep.mubr.bf16.mxu1 %v16155_v48  ;;  %9794 = vmatpush1.bf16.msra.mxu1 %v12370_v9  ;;  %v8945_v16 = vpop.f32.mrf.mxu1  ;;  %v12381_v48 = vld [vmem:[#allocation12 + $0x8e4] ss:$8 sps:$4 sm:$0xff]  }
 0x3cb   :  { %v9048_v60 = vpop.f32.mrf.mxu0  ;;  %9795 = vmatprep.subr.bf16.mxu1 %v12375_v30  ;;  %v15093_v30 = vld [vmem:[#allocation3 + $0x248] sm:$0xff] }
 0x3cc   :  { %v15072_v7 = vadd.f32 %v9048_v60, %v8935_v24  ;;  %v8947_v29 = vpop.f32.mrf.mxu1 }
 0x3cd   :  { %v9050_v37 = vpop.f32.mrf.mxu0 }
 0x3ce   :  { %v15074_v19 = vadd.f32 %v9050_v37, %v8937_v50  ;;  %9796 = vmatpush1.bf16.msra.mxu1 %v12373_v17  ;;  %v12385_v50 = vld [vmem:[#allocation12 + $0x8c0] ss:$8 sps:$4 sm:$0xff]   ;;  %v15102_v17 = vld [vmem:[#allocation3 + $0x278] sm:$0x3] }
 0x3cf   :  { %v9054_v3 = vpop.f32.mrf.mxu0  ;;  %9731 = vmatmul.mubr.bf16.gmra.mxu0 %v16176_v31  ;;  %9797 = vmatprep.subr.bf16.mxu1 %v12378_v46  ;;  %v12384_v31 = vld [vmem:[#allocation12 + $0x8d4] ss:$8 sps:$4 sm:$0xff]  }
 0x3d0   :  { %v15077_v58 = vadd.f32 %v9054_v3, %v8941_v12  ;;  %9740 = vmatprep.mubr.bf16.mxu0 %v16177_v35  ;;  %v12382_v35 = vld [vmem:[#allocation12 + $0x8d0] ss:$8 sps:$4 sm:$0xff]   ;;  %v15100_v12 = vld [vmem:[#allocation3 + $0x258] sm:$0x3]  ;;  %v5747_v3 = vrot.slane %v15102_v17, 1 }
 0x3d1   :  { %v9056_v22 = vpop.f32.mrf.mxu0  ;;  %v8951_v5 = vpop.f32.mrf.mxu1  ;;  %9628 = vmatmul.mubr.bf16.gmra.mxu1 %v16163_v34 }
 0x3d2   :  { %v15081_v4 = vadd.f32 %v9056_v22, %v8943_v26  ;;  %9637 = vmatprep.mubr.bf16.mxu1 %v16165_v32  ;;  %9798 = vmatpush2.bf16.msra.mxu1 %v12376_v39  ;;  %v12387_v32 = vld [vmem:[#allocation12 + $0x8c4] ss:$8 sps:$4 sm:$0xff]   ;;  %v12390_v26 = vld [vmem:[#allocation12 + $0x8b4] ss:$8 sps:$4 sm:$0xff]  }
 0x3d3   :  { %v9058_v11 = vpop.f32.mrf.mxu0  ;;  %v8953_v63 = vpop.f32.mrf.mxu1  ;;  %9799 = vmatprep.subr.bf16.mxu1 %v12381_v48  ;;  %v12388_v48 = vld [vmem:[#allocation12 + $0x8b0] ss:$8 sps:$4 sm:$0xff]  }
 0x3d4   :  { %v15084_v57 = vadd.f32 %v9058_v11, %v8945_v16  ;;  %v5740_v16 = vrot.slane %v15093_v30, 1  ;;  %v12393_v11 = vld [vmem:[#allocation12 + $0x8a4] ss:$8 sps:$4 sm:$0xff]  }
 0x3d5   :  { %v9060_v10 = vpop.f32.mrf.mxu0  ;;  %v8955_v14 = vpop.f32.mrf.mxu1 }
 0x3d6   :  { %v15086_v53 = vadd.f32 %v9060_v10, %v8947_v29  ;;  %9800 = vmatpush2.bf16.msra.mxu1 %v12379_v49  ;;  %v15120_v10 = vld [vmem:[#allocation3 + $0x260] sm:$0xff] }
 0x3d7   :  { %v9064_v43 = vpop.f32.mrf.mxu0  ;;  %9741 = vmatmul.mubr.bf16.gmra.mxu0 %v16178_v38  ;;  %v8957_v34 = vpop.f32.mrf.mxu1  ;;  %9801 = vmatprep.subr.bf16.mxu1 %v12384_v31  ;;  %v15098_v38 = vld [vmem:[#allocation3 + $0x268] sm:$0xff]  ;;  %v15118_v31 = vld [vmem:[#allocation3 + $0x240] sm:$0xff] }
 0x3d8   :  { %v15089_v24 = vadd.f32 %v9064_v43, %v8951_v5  ;;  %9750 = vmatprep.mubr.bf16.mxu0 %v16179_v40  ;;  %v5746_v39 = vrot.slane %v15098_v38, 1  ;;  %v11517_v22 = vpack.c.bf16 %v15098_v38, %v15093_v30 }
 0x3d9   :  { %v9066_v9 = vpop.f32.mrf.mxu0  ;;  %v8961_v15 = vpop.f32.mrf.mxu1  ;;  %9638 = vmatmul.mubr.bf16.gmra.mxu1 %v14800_v1 }
 0x3da   :  { %v15095_v8 = vadd.f32 %v9066_v9, %v8953_v63  ;;  %9647 = vmatprep.mubr.bf16.mxu1 %v14968_v2  ;;  %9802 = vmatpush2.bf16.msra.mxu1 %v12382_v35  ;;  %v5741_v2 = vrot.slane %v15100_v12, 1 }
 0x3db   :  { %v9068_v60 = vpop.f32.mrf.mxu0  ;;  %v8963_v40 = vpop.f32.mrf.mxu1  ;;  %9803 = vmatprep.subr.bf16.mxu1 %v12387_v32  ;;  %v15127_v32 = vld [vmem:[#allocation3 + $0x270] sm:$0x3] }
 0x3dc   :  { %v15104_v46 = vadd.f32 %v9068_v60, %v8955_v14  ;;  %v5742_v43 = vsel %vm445_vm0, %v5740_v16, %v5741_v2  ;;  %16181 = vst [vmem:[#allocation67_spill] sm:$0xff] %v15127_v32  ;;  %v5737_v60 = vrot.slane %v15118_v31, 1  ;;  %v5744_v2 = vrot.slane %v15127_v32, 1 }
 0x3dd   :  { %v9070_v1 = vpop.f32.mrf.mxu0  ;;  %v8965_v37 = vpop.f32.mrf.mxu1 }
 0x3de   :  { %v15110_v29 = vadd.f32 %v9070_v1, %v8957_v34  ;;  %9804 = vmatpush2.bf16.msra.mxu1 %v12385_v50  ;;  %v5748_v34 = vsel %vm445_vm0, %v5746_v39, %v5747_v3 }
 0x3df   :  { %v9074_v5 = vpop.f32.mrf.mxu0  ;;  %9751 = vmatmul.mubr.bf16.gmra.mxu0 %v14813_v47  ;;  %v8967_v49 = vpop.f32.mrf.mxu1  ;;  %9805 = vmatprep.subr.bf16.mxu1 %v12390_v26  ;;  %v15125_v47 = vld [vmem:[#allocation3 + $0x250] sm:$0x3]  ;;  %v12396_v26 = vld [vmem:[#allocation12 + $0x894] ss:$8 sps:$4 sm:$0xff]   ;;  %v11519_v16 = vpack.c.bf16 %v5748_v34, %v5742_v43 }
 0x3e0   :  { %v15115_v63 = vadd.f32 %v9074_v5, %v8961_v15  ;;  %9760 = vmatprep.mubr.bf16.mxu0 %v15015_v21  ;;  %v12391_v21 = vld [vmem:[#allocation12 + $0x8a0] ss:$8 sps:$4 sm:$0xff]   ;;  %v5738_v39 = vrot.slane %v15125_v47, 1  ;;  %v12394_v5 = vld [vmem:[#allocation12 + $0x890] ss:$8 sps:$4 sm:$0xff]  }
 0x3e1   :  { %v9076_v14 = vpop.f32.mrf.mxu0  ;;  %v8971_v35 = vpop.f32.mrf.mxu1  ;;  %9648 = vmatmul.mubr.bf16.gmra.mxu1 %v14982_v25  ;;  %v5743_v25 = vrot.slane %v15120_v10, 1 }
 0x3e2   :  { %v15129_v9 = vadd.f32 %v9076_v14, %v8963_v40  ;;  %9806 = vmatpush2.bf16.msra.mxu1 %v12388_v48  ;;  %9657 = vmatprep.mubr.bf16.mxu1 %v11517_v22  ;;  %v11516_v48 = vpack.c.bf16 %v15120_v10, %v15118_v31  ;;  %v5739_v34 = vsel %vm445_vm0, %v5737_v60, %v5738_v39 }
 0x3e3   :  { %v9078_v15 = vpop.f32.mrf.mxu0  ;;  %v8973_v50 = vpop.f32.mrf.mxu1  ;;  %9807 = vmatprep.subr.bf16.mxu1 %v12393_v11 }
 0x3e4   :  { %v15133_v1 = vadd.f32 %v9078_v15, %v8965_v37  ;;  %v12399_v37 = vld [vmem:[#allocation12 + $0x884] ss:$8 sps:$4 sm:$0xff]   ;;  %v5745_v15 = vsel %vm445_vm0, %v5743_v25, %v5744_v2 }
 0x3e5   :  { %v9080_v40 = vpop.f32.mrf.mxu0  ;;  %v8975_v3 = vpop.f32.mrf.mxu1 }
 0x3e6   :  { %v15139_v22 = vadd.f32 %v9080_v40, %v8967_v49  ;;  %9808 = vmatpush2.bf16.msra.mxu1 %v12391_v21  ;;  %v12397_v21 = vld [vmem:[#allocation12 + $0x880] ss:$8 sps:$4 sm:$0xff]  }
 0x3e7   :  { %v9084_v11 = vpop.f32.mrf.mxu0  ;;  %9761 = vmatmul.mubr.bf16.gmra.mxu0 %v15031_v44  ;;  %v8977_v14 = vpop.f32.mrf.mxu1  ;;  %9809 = vmatprep.subr.bf16.mxu1 %v12396_v26  ;;  %v11518_v26 = vpack.c.bf16 %v5745_v15, %v5739_v34 }
 0x3e8   :  { %v15142_v43 = vadd.f32 %v9084_v11, %v8971_v35  ;;  %9770 = vmatprep.mubr.bf16.mxu0 %v11519_v16 }
 0x3e9   :  { %v9086_v55 = vpop.f32.mrf.mxu0  ;;  %v8981_v32 = vpop.f32.mrf.mxu1  ;;  %9658 = vmatmul.mubr.bf16.gmra.mxu1 %v11516_v48 }
 0x3ea   :  { %v15146_v49 = vadd.f32 %v9086_v55, %v8973_v50  ;;  %9810 = vmatpush2.bf16.msra.mxu1 %v12394_v5  ;;  %9813 = vmatprep.mubr.bf16.mxu1 %v14854_v28 }
 0x3eb   :  { %v9088_v44 = vpop.f32.mrf.mxu0  ;;  %v8983_v40 = vpop.f32.mrf.mxu1  ;;  %9811 = vmatprep.subr.bf16.mxu1 %v12399_v37 }
 0x3ec   :  { %v15149_v35 = vadd.f32 %v9088_v44, %v8975_v3 }
 0x3ed   :  { %v9090_v16 = vpop.f32.mrf.mxu0  ;;  %v8985_v11 = vpop.f32.mrf.mxu1 }
 0x3ee   :  { %v15151_v60 = vadd.f32 %v9090_v16, %v8977_v14  ;;  %9812 = vmatpush2.bf16.msra.mxu1 %v12397_v21 }
 0x3ef   :  { %v9094_v25 = vpop.f32.mrf.mxu0  ;;  %9771 = vmatmul.mubr.bf16.gmra.mxu0 %v11518_v26  ;;  %v8987_v39 = vpop.f32.mrf.mxu1 }
 0x3f0   :  { %v15153_v55 = vadd.f32 %v9094_v25, %v8981_v32 }
 0x3f1   :  { %v9096_v50 = vpop.f32.mrf.mxu0  ;;  %v9137_v2 = vpop.f32.mrf.mxu1  ;;  %9814 = vmatmul.mubr.bf16.vlgmr.msra.gmra.mxu1 %v14870_v51 }
 0x3f2   :  { %v15156_v28 = vadd.f32 %v9096_v50, %v8983_v40  ;;  %v9138_v48 = vadd.f32 %v9137_v2, %v14841_v61  ;;  %9823 = vmatprep.mubr.bf16.mxu1 %v14874_v62  ;;  %v9031_v40 = vadd.f32 %v15050_v41, %v15044_v42 }
 0x3f3   :  { %v9098_v3 = vpop.f32.mrf.mxu0  ;;  %v9139_v5 = vpop.f32.mrf.mxu1 }
 0x3f4   :  { %v15160_v14 = vadd.f32 %v9098_v3, %v8985_v11  ;;  %v9140_v37 = vadd.f32 %v9139_v5, %v14843_v45 }
 0x3f5   :  { %v9100_v34 = vpop.f32.mrf.mxu0  ;;  %v9141_v15 = vpop.f32.mrf.mxu1 }
 0x3f6   :  { %v15163_v32 = vadd.f32 %v9100_v34, %v8987_v39  ;;  %v9142_v21 = vadd.f32 %v9141_v15, %v14846_v56 }
 0x3f7   :  { %v9250_v44 = vpop.f32.mrf.mxu0  ;;  %v9143_v51 = vpop.f32.mrf.mxu1 }
 0x3f8   :  { %v15168_v61 = vadd.f32 %v9250_v44, %v9138_v48  ;;  %v9144_v45 = vadd.f32 %v9143_v51, %v9031_v40 }
 0x3f9   :  { %v9252_v62 = vpop.f32.mrf.mxu0  ;;  %v9147_v26 = vpop.f32.mrf.mxu1  ;;  %9824 = vmatmul.mubr.bf16.gmra.mxu1 %v14890_v0 }
 0x3fa   :  { %v15171_v16 = vadd.f32 %v9252_v62, %v9140_v37  ;;  %v9148_v11 = vadd.f32 %v9147_v26, %v15053_v20  ;;  %9833 = vmatprep.mubr.bf16.mxu1 %v14894_v27 }
 0x3fb   :  { %v9254_v25 = vpop.f32.mrf.mxu0  ;;  %v9149_v56 = vpop.f32.mrf.mxu1 }
 0x3fc   :  { %v15175_v39 = vadd.f32 %v9254_v25, %v9142_v21  ;;  %v9150_v50 = vadd.f32 %v9149_v56, %v15057_v36  ;;  %v16182_v25 = vld [vmem:[#allocation65_spill] sm:$0xff] }
 0x3fd   :  { %v9256_v42 = vpop.f32.mrf.mxu0  ;;  %v9151_v41 = vpop.f32.mrf.mxu1 }
 0x3fe   :  { %v15178_v2 = vadd.f32 %v9256_v42, %v9144_v45  ;;  %v9152_v48 = vadd.f32 %v9151_v41, %v15060_v54 }
 0x3ff   :  { %v9260_v0 = vpop.f32.mrf.mxu0  ;;  %v9153_v3 = vpop.f32.mrf.mxu1 }
 0x400   :  { %v15181_v5 = vadd.f32 %v9260_v0, %v9148_v11  ;;  %v9154_v20 = vadd.f32 %v9153_v3, %v15062_v18 }
 0x401   :  { %v9262_v37 = vpop.f32.mrf.mxu0  ;;  %v9157_v27 = vpop.f32.mrf.mxu1  ;;  %9834 = vmatmul.mubr.bf16.gmra.mxu1 %v14910_v13 }
 0x402   :  { %v15185_v34 = vadd.f32 %v9262_v37, %v9150_v50  ;;  %v9158_v36 = vadd.f32 %v9157_v27, %v15065_v23  ;;  %9843 = vmatprep.mubr.bf16.mxu1 %v14914_v59  ;;  %v16183_v50 = vld [vmem:[#allocation64_spill] sm:$0xff] }
 0x403   :  { %v9264_v15 = vpop.f32.mrf.mxu0  ;;  %v9159_v21 = vpop.f32.mrf.mxu1 }
 0x404   :  { %v15189_v44 = vadd.f32 %v9264_v15, %v9152_v48  ;;  %v9160_v54 = vadd.f32 %v9159_v21, %v15069_v6 }
 0x405   :  { %v9266_v51 = vpop.f32.mrf.mxu0  ;;  %v9161_v40 = vpop.f32.mrf.mxu1 }
 0x406   :  { %v15192_v62 = vadd.f32 %v9266_v51, %v9154_v20  ;;  %v9162_v18 = vadd.f32 %v9161_v40, %v15072_v7  ;;  %v16185_v40 = vld [vmem:[#allocation70_spill] sm:$0xff] }
 0x407   :  { %v9270_v26 = vpop.f32.mrf.mxu0  ;;  %v9163_v13 = vpop.f32.mrf.mxu1 }
 0x408   :  { %v15195_v45 = vadd.f32 %v9270_v26, %v9158_v36  ;;  %v9164_v23 = vadd.f32 %v9163_v13, %v15074_v19 }
 0x409   :  { %v9272_v11 = vpop.f32.mrf.mxu0  ;;  %v9167_v59 = vpop.f32.mrf.mxu1  ;;  %9844 = vmatmul.mubr.bf16.gmra.mxu1 %v16182_v25  ;;  %v6068_v25 = vrot.slane %v15093_v30, 2 }
 0x40a   :  { %v15199_v56 = vadd.f32 %v9272_v11, %v9160_v54  ;;  %v9168_v6 = vadd.f32 %v9167_v59, %v15077_v58  ;;  %9853 = vmatprep.mubr.bf16.mxu1 %v16183_v50  ;;  %v16184_v54 = vld [vmem:[#allocation72_spill] sm:$0xff] }
 0x40b   :  { %v9274_v42 = vpop.f32.mrf.mxu0  ;;  %v9169_v41 = vpop.f32.mrf.mxu1 }
 0x40c   :  { %v15203_v48 = vadd.f32 %v9274_v42, %v9162_v18  ;;  %v9170_v7 = vadd.f32 %v9169_v41, %v15081_v4  ;;  %v6069_v42 = vrot.slane %v15100_v12, 2  ;;  %v6075_v41 = vrot.slane %v15102_v17, 2 }
 0x40d   :  { %v9276_v0 = vpop.f32.mrf.mxu0  ;;  %v9171_v3 = vpop.f32.mrf.mxu1 }
 0x40e   :  { %v15206_v20 = vadd.f32 %v9276_v0, %v9164_v23  ;;  %v9172_v19 = vadd.f32 %v9171_v3, %v15084_v57  ;;  %v6070_v12 = vsel %vm774_vm1, %v6068_v25, %v6069_v42 }
 0x40f   :  { %v9280_v37 = vpop.f32.mrf.mxu0  ;;  %v9173_v27 = vpop.f32.mrf.mxu1 }
 0x410   :  { %v15209_v36 = vadd.f32 %v9280_v37, %v9168_v6  ;;  %v9174_v58 = vadd.f32 %v9173_v27, %v15086_v53  ;;  %v6074_v6 = vrot.slane %v15098_v38, 2  ;;  %v6065_v27 = vrot.slane %v15118_v31, 2 }
 0x411   :  { %v9282_v15 = vpop.f32.mrf.mxu0  ;;  %v9177_v21 = vpop.f32.mrf.mxu1  ;;  %9854 = vmatmul.mubr.bf16.gmra.mxu1 %v16184_v54 }
 0x412   :  { %v15213_v51 = vadd.f32 %v9282_v15, %v9170_v7  ;;  %v9178_v4 = vadd.f32 %v9177_v21, %v15089_v24  ;;  %9863 = vmatprep.mubr.bf16.mxu1 %v16185_v40  ;;  %v6076_v17 = vsel %vm774_vm1, %v6074_v6, %v6075_v41 }
 0x413   :  { %v9284_v18 = vpop.f32.mrf.mxu0  ;;  %v9179_v26 = vpop.f32.mrf.mxu1  ;;  %v11521_v54 = vpack.c.bf16 %v6076_v17, %v6070_v12 }
 0x414   :  { %v15217_v13 = vadd.f32 %v9284_v18, %v9172_v19  ;;  %v9180_v57 = vadd.f32 %v9179_v26, %v15095_v8 }
 0x415   :  { %v9286_v23 = vpop.f32.mrf.mxu0  ;;  %v9181_v11 = vpop.f32.mrf.mxu1 }
 0x416   :  { %v15220_v59 = vadd.f32 %v9286_v23, %v9174_v58  ;;  %v9182_v53 = vadd.f32 %v9181_v11, %v15104_v46 }
 0x417   :  { %v9290_v50 = vpop.f32.mrf.mxu0  ;;  %v9183_v24 = vpop.f32.mrf.mxu1 }
 0x418   :  { %v15227_v7 = vadd.f32 %v9290_v50, %v9178_v4  ;;  %v9184_v8 = vadd.f32 %v9183_v24, %v15110_v29  ;;  %v16186_v4 = vld [vmem:[#allocation67_spill] sm:$0xff] }
 0x419   :  { %v9292_v0 = vpop.f32.mrf.mxu0  ;;  %v9187_v3 = vpop.f32.mrf.mxu1  ;;  %9864 = vmatmul.mubr.bf16.gmra.mxu1 %v14971_v33  ;;  %v6071_v33 = vrot.slane %v15120_v10, 2  ;;  %v6072_v40 = vrot.slane %v16186_v4, 2  ;;  %v16187_v10 = vld [vmem:[#allocation77_spill] sm:$0xff] }
 0x41a   :  { %v15231_v19 = vadd.f32 %v9292_v0, %v9180_v57  ;;  %v9188_v30 = vadd.f32 %v9187_v3, %v15115_v63  ;;  %9873 = vmatprep.mubr.bf16.mxu1 %v15028_v52  ;;  %v6066_v63 = vrot.slane %v15125_v47, 2 }
 0x41b   :  { %v9294_v38 = vpop.f32.mrf.mxu0  ;;  %v9189_v46 = vpop.f32.mrf.mxu1 }
 0x41c   :  { %v15237_v37 = vadd.f32 %v9294_v38, %v9182_v53  ;;  %v9190_v29 = vadd.f32 %v9189_v46, %v15129_v9  ;;  %v6073_v53 = vsel %vm774_vm1, %v6071_v33, %v6072_v40 }
 0x41d   :  { %v9296_v58 = vpop.f32.mrf.mxu0  ;;  %v9191_v15 = vpop.f32.mrf.mxu1 }
 0x41e   :  { %v15243_v21 = vadd.f32 %v9296_v58, %v9184_v8  ;;  %v9192_v52 = vadd.f32 %v9191_v15, %v15133_v1  ;;  %v6067_v1 = vsel %vm774_vm1, %v6065_v27, %v6066_v63 }
 0x41f   :  { %v9300_v18 = vpop.f32.mrf.mxu0  ;;  %v9193_v26 = vpop.f32.mrf.mxu1  ;;  %v11520_v41 = vpack.c.bf16 %v6073_v53, %v6067_v1 }
 0x420   :  { %v15247_v57 = vadd.f32 %v9300_v18, %v9188_v30  ;;  %v9194_v9 = vadd.f32 %v9193_v26, %v15139_v22 }
 0x421   :  { %v9302_v31 = vpop.f32.mrf.mxu0  ;;  %v9197_v23 = vpop.f32.mrf.mxu1  ;;  %9874 = vmatmul.mubr.bf16.gmra.mxu1 %v16187_v10 }
 0x422   :  { %v15251_v11 = vadd.f32 %v9302_v31, %v9190_v29  ;;  %v9198_v47 = vadd.f32 %v9197_v23, %v15142_v43  ;;  %9883 = vmatprep.mubr.bf16.mxu1 %v11521_v54 }
 0x423   :  { %v9304_v25 = vpop.f32.mrf.mxu0  ;;  %v9199_v6 = vpop.f32.mrf.mxu1 }
 0x424   :  { %v15256_v50 = vadd.f32 %v9304_v25, %v9192_v52  ;;  %v9200_v24 = vadd.f32 %v9199_v6, %v15146_v49 }
 0x425   :  { %v9306_v22 = vpop.f32.mrf.mxu0  ;;  %v9201_v42 = vpop.f32.mrf.mxu1 }
 0x426   :  { %v15259_v8 = vadd.f32 %v9306_v22, %v9194_v9  ;;  %v9202_v0 = vadd.f32 %v9201_v42, %v15149_v35 }
 0x427   :  { %v9310_v3 = vpop.f32.mrf.mxu0  ;;  %v9203_v43 = vpop.f32.mrf.mxu1 }
 0x428   :  { %v15262_v30 = vadd.f32 %v9310_v3, %v9198_v47  ;;  %v9204_v38 = vadd.f32 %v9203_v43, %v15151_v60 }
 0x429   :  { %v9312_v46 = vpop.f32.mrf.mxu0  ;;  %v9207_v12 = vpop.f32.mrf.mxu1  ;;  %9884 = vmatmul.mubr.bf16.gmra.mxu1 %v11520_v41 }
 0x42a   :  { %v15265_v17 = vadd.f32 %v9312_v46, %v9200_v24  ;;  %v9208_v49 = vadd.f32 %v9207_v12, %v15153_v55 }
 0x42b   :  { %v9314_v29 = vpop.f32.mrf.mxu0  ;;  %v9209_v27 = vpop.f32.mrf.mxu1 }
 0x42c   :  { %v15268_v33 = vadd.f32 %v9314_v29, %v9202_v0  ;;  %v9210_v58 = vadd.f32 %v9209_v27, %v15156_v28 }
 0x42d   :  { %v9316_v35 = vpop.f32.mrf.mxu0  ;;  %v9211_v15 = vpop.f32.mrf.mxu1 }
 0x42e   :  { %v15271_v63 = vadd.f32 %v9316_v35, %v9204_v38  ;;  %v9212_v52 = vadd.f32 %v9211_v15, %v15160_v14 }
 0x42f   :  { %v9320_v60 = vpop.f32.mrf.mxu0  ;;  %v9213_v54 = vpop.f32.mrf.mxu1 }
 0x430   :  { %v15274_v4 = vadd.f32 %v9320_v60, %v9208_v49  ;;  %v9214_v40 = vadd.f32 %v9213_v54, %v15163_v32 }
 0x431   :  { %v9322_v18 = vpop.f32.mrf.mxu0  ;;  %v9363_v55 = vpop.f32.mrf.mxu1 }
 0x432   :  { %v15277_v26 = vadd.f32 %v9322_v18, %v9210_v58  ;;  %v9364_v9 = vadd.f32 %v9363_v55, %v15168_v61 }
 0x433   :  { %v9324_v31 = vpop.f32.mrf.mxu0  ;;  %v9365_v28 = vpop.f32.mrf.mxu1 }
 0x434   :  { %v15280_v23 = vadd.f32 %v9324_v31, %v9212_v52  ;;  %v9366_v10 = vadd.f32 %v9365_v28, %v15171_v16 }
 0x435   :  { %v9326_v47 = vpop.f32.mrf.mxu0  ;;  %v9367_v14 = vpop.f32.mrf.mxu1 }
 0x436   :  { %v15283_v1 = vadd.f32 %v9326_v47, %v9214_v40  ;;  %v9368_v53 = vadd.f32 %v9367_v14, %v15175_v39 }
 0x437   :  { %v9476_v25 = vpop.f32.mrf.mxu0  ;;  %v9369_v32 = vpop.f32.mrf.mxu1 }
 0x438   :  { %v15286_v6 = vadd.f32 %v9476_v25, %v9364_v9  ;;  %v9370_v24 = vadd.f32 %v9369_v32, %v15178_v2 }
 0x439   :  { %v9478_v22 = vpop.f32.mrf.mxu0  ;;  %v9373_v61 = vpop.f32.mrf.mxu1 }
 0x43a   :  { %v15289_v42 = vadd.f32 %v9478_v22, %v9366_v10  ;;  %v9374_v41 = vadd.f32 %v9373_v61, %v15181_v5 }
 0x43b   :  { %v9480_v0 = vpop.f32.mrf.mxu0  ;;  %v9375_v16 = vpop.f32.mrf.mxu1 }
 0x43c   :  { %v15292_v3 = vadd.f32 %v9480_v0, %v9368_v53  ;;  %v9376_v43 = vadd.f32 %v9375_v16, %v15185_v34 }
 0x43d   :  { %v9482_v38 = vpop.f32.mrf.mxu0  ;;  %v9377_v39 = vpop.f32.mrf.mxu1 }
 0x43e   :  { %v15295_v46 = vadd.f32 %v9482_v38, %v9370_v24  ;;  %v9378_v12 = vadd.f32 %v9377_v39, %v15189_v44 }
 0x43f   :  { %v9486_v49 = vpop.f32.mrf.mxu0  ;;  %v9379_v2 = vpop.f32.mrf.mxu1 }
 0x440   :  { %v15298_v29 = vadd.f32 %v9486_v49, %v9374_v41  ;;  %v9380_v27 = vadd.f32 %v9379_v2, %v15192_v62 }
 0x441   :  { %v9488_v58 = vpop.f32.mrf.mxu0  ;;  %v9383_v5 = vpop.f32.mrf.mxu1 }
 0x442   :  { %v15301_v35 = vadd.f32 %v9488_v58, %v9376_v43  ;;  %v9384_v15 = vadd.f32 %v9383_v5, %v15195_v45 }
 0x443   :  { %v9490_v52 = vpop.f32.mrf.mxu0  ;;  %v9385_v34 = vpop.f32.mrf.mxu1 }
 0x444   :  { %v15304_v60 = vadd.f32 %v9490_v52, %v9378_v12  ;;  %v9386_v54 = vadd.f32 %v9385_v34, %v15199_v56 }
 0x445   :  { %v9492_v40 = vpop.f32.mrf.mxu0  ;;  %v9387_v44 = vpop.f32.mrf.mxu1 }
 0x446   :  { %v15307_v18 = vadd.f32 %v9492_v40, %v9380_v27  ;;  %v9388_v55 = vadd.f32 %v9387_v44, %v15203_v48 }
 0x447   :  { %v9496_v9 = vpop.f32.mrf.mxu0  ;;  %v9389_v62 = vpop.f32.mrf.mxu1 }
 0x448   :  { %v15310_v31 = vadd.f32 %v9496_v9, %v9384_v15  ;;  %v9390_v28 = vadd.f32 %v9389_v62, %v15206_v20 }
 0x449   :  { %v9498_v10 = vpop.f32.mrf.mxu0  ;;  %v9393_v45 = vpop.f32.mrf.mxu1 }
 0x44a   :  { %v15313_v47 = vadd.f32 %v9498_v10, %v9386_v54  ;;  %v9394_v14 = vadd.f32 %v9393_v45, %v15209_v36 }
 0x44b   :  { %v9500_v53 = vpop.f32.mrf.mxu0  ;;  %v9395_v56 = vpop.f32.mrf.mxu1 }
 0x44c   :  { %v15316_v25 = vadd.f32 %v9500_v53, %v9388_v55  ;;  %v9396_v32 = vadd.f32 %v9395_v56, %v15213_v51 }
 0x44d   :  { %v9502_v24 = vpop.f32.mrf.mxu0  ;;  %v9397_v48 = vpop.f32.mrf.mxu1 }
 0x44e   :  { %v15319_v22 = vadd.f32 %v9502_v24, %v9390_v28  ;;  %v9398_v61 = vadd.f32 %v9397_v48, %v15217_v13 }
 0x44f   :  { %v9506_v41 = vpop.f32.mrf.mxu0  ;;  %v9399_v20 = vpop.f32.mrf.mxu1 }
 0x450   :  { %v15322_v0 = vadd.f32 %v9506_v41, %v9394_v14  ;;  %v9400_v16 = vadd.f32 %v9399_v20, %v15220_v59 }
 0x451   :  { %v9508_v43 = vpop.f32.mrf.mxu0  ;;  %v9403_v36 = vpop.f32.mrf.mxu1 }
 0x452   :  { %v15325_v38 = vadd.f32 %v9508_v43, %v9396_v32  ;;  %v9404_v39 = vadd.f32 %v9403_v36, %v15227_v7 }
 0x453   :  { %v9510_v12 = vpop.f32.mrf.mxu0  ;;  %v9405_v51 = vpop.f32.mrf.mxu1 }
 0x454   :  { %v15328_v49 = vadd.f32 %v9510_v12, %v9398_v61  ;;  %v9406_v2 = vadd.f32 %v9405_v51, %v15231_v19 }
 0x455   :  { %v9512_v27 = vpop.f32.mrf.mxu0  ;;  %v9407_v13 = vpop.f32.mrf.mxu1 }
 0x456   :  { %v15331_v58 = vadd.f32 %v9512_v27, %v9400_v16  ;;  %v9408_v5 = vadd.f32 %v9407_v13, %v15237_v37 }
 0x457   :  { %v9516_v15 = vpop.f32.mrf.mxu0  ;;  %v9409_v59 = vpop.f32.mrf.mxu1 }
 0x458   :  { %v15334_v52 = vadd.f32 %v9516_v15, %v9404_v39  ;;  %v9410_v34 = vadd.f32 %v9409_v59, %v15243_v21 }
 0x459   :  { %v9518_v54 = vpop.f32.mrf.mxu0  ;;  %v9413_v7 = vpop.f32.mrf.mxu1 }
 0x45a   :  { %v15337_v40 = vadd.f32 %v9518_v54, %v9406_v2  ;;  %v9414_v44 = vadd.f32 %v9413_v7, %v15247_v57 }
 0x45b   :  { %v9520_v55 = vpop.f32.mrf.mxu0  ;;  %v9415_v19 = vpop.f32.mrf.mxu1 }
 0x45c   :  { %v15340_v9 = vadd.f32 %v9520_v55, %v9408_v5  ;;  %v9416_v62 = vadd.f32 %v9415_v19, %v15251_v11 }
 0x45d   :  { %v9522_v28 = vpop.f32.mrf.mxu0  ;;  %v9417_v37 = vpop.f32.mrf.mxu1 }
 0x45e   :  { %v15343_v10 = vadd.f32 %v9522_v28, %v9410_v34  ;;  %v9418_v45 = vadd.f32 %v9417_v37, %v15256_v50 }
 0x45f   :  { %v9526_v14 = vpop.f32.mrf.mxu0  ;;  %v9419_v21 = vpop.f32.mrf.mxu1 }
 0x460   :  { %v15346_v53 = vadd.f32 %v9526_v14, %v9414_v44  ;;  %v9420_v56 = vadd.f32 %v9419_v21, %v15259_v8 }
 0x461   :  { %v9528_v32 = vpop.f32.mrf.mxu0  ;;  %v9423_v57 = vpop.f32.mrf.mxu1 }
 0x462   :  { %v15349_v24 = vadd.f32 %v9528_v32, %v9416_v62  ;;  %v9424_v48 = vadd.f32 %v9423_v57, %v15262_v30 }
 0x463   :  { %v9530_v61 = vpop.f32.mrf.mxu0  ;;  %v9425_v11 = vpop.f32.mrf.mxu1 }
 0x464   :  { %v15352_v41 = vadd.f32 %v9530_v61, %v9418_v45  ;;  %v9426_v20 = vadd.f32 %v9425_v11, %v15265_v17 }
 0x465   :  { %v9532_v16 = vpop.f32.mrf.mxu0  ;;  %v9427_v50 = vpop.f32.mrf.mxu1 }
 0x466   :  { %v15355_v43 = vadd.f32 %v9532_v16, %v9420_v56  ;;  %v9428_v36 = vadd.f32 %v9427_v50, %v15268_v33 }
 0x467   :  { %v9536_v39 = vpop.f32.mrf.mxu0  ;;  %v9429_v8 = vpop.f32.mrf.mxu1 }
 0x468   :  { %v15358_v12 = vadd.f32 %v9536_v39, %v9424_v48  ;;  %v9430_v51 = vadd.f32 %v9429_v8, %v15271_v63 }
 0x469   :  { %v9538_v2 = vpop.f32.mrf.mxu0  ;;  %v9433_v30 = vpop.f32.mrf.mxu1 }
 0x46a   :  { %v15361_v27 = vadd.f32 %v9538_v2, %v9426_v20  ;;  %v9434_v13 = vadd.f32 %v9433_v30, %v15274_v4 }
 0x46b   :  { %v9540_v5 = vpop.f32.mrf.mxu0  ;;  %v9435_v17 = vpop.f32.mrf.mxu1 }
 0x46c   :  { %v15364_v15 = vadd.f32 %v9540_v5, %v9428_v36  ;;  %v15367_v59 = vadd.f32 %v9435_v17, %v15277_v26 }
 0x46d   :  { %v9542_v33 = vpop.f32.mrf.mxu0  ;;  %v9437_v34 = vpop.f32.mrf.mxu1 }
 0x46e   :  { %v15369_v54 = vadd.f32 %v9542_v33, %v9430_v51  ;;  %v15372_v7 = vadd.f32 %v9437_v34, %v15280_v23 }
 0x46f   :  { %v9546_v63 = vpop.f32.mrf.mxu0  ;;  %v9439_v44 = vpop.f32.mrf.mxu1 }
 0x470   :  { %v15374_v55 = vadd.f32 %v9546_v63, %v9434_v13  ;;  %v15377_v4 = vadd.f32 %v9439_v44, %v15283_v1 }
 0x471   :  { %v15379_v19 = vpop.f32.mrf.mxu0  ;;  %v9589_v62 = vpop.f32.mrf.mxu1 }
 0x472   :  { %v15382_v26 = vadd.f32 %v9589_v62, %v15286_v6 }
 0x473   :  { %v15384_v28 = vpop.f32.mrf.mxu0  ;;  %v9591_v37 = vpop.f32.mrf.mxu1 }
 0x474   :  { %v15387_v45 = vadd.f32 %v9591_v37, %v15289_v42 }
 0x475   :  { %v15389_v23 = vpop.f32.mrf.mxu0  ;;  %v9593_v14 = vpop.f32.mrf.mxu1 }
 0x476   :  { %v15392_v21 = vadd.f32 %v9593_v14, %v15292_v3 }
 0x477   :  { %v15394_v1 = vpop.f32.mrf.mxu0  ;;  %v9595_v56 = vpop.f32.mrf.mxu1 }
 0x478   :  { %v15397_v32 = vadd.f32 %v9595_v56, %v15295_v46 }
 0x479   :  { %v15399_v6 = vpop.f32.mrf.mxu0  ;;  %v9599_v57 = vpop.f32.mrf.mxu1 }
 0x47a   :  { %v15402_v48 = vadd.f32 %v9599_v57, %v15298_v29 }
 0x47b   :  { %v15404_v42 = vpop.f32.mrf.mxu0  ;;  %v9601_v61 = vpop.f32.mrf.mxu1 }
 0x47c   :  { %v15407_v11 = vadd.f32 %v9601_v61, %v15301_v35 }
 0x47d   :  { %v15409_v3 = vpop.f32.mrf.mxu0  ;;  %v9603_v20 = vpop.f32.mrf.mxu1 }
 0x47e   :  { %v15412_v16 = vadd.f32 %v9603_v20, %v15304_v60 }
 0x47f   :  { %v15414_v46 = vpop.f32.mrf.mxu0  ;;  %v9605_v50 = vpop.f32.mrf.mxu1 }
 0x480   :  { %v15417_v36 = vadd.f32 %v9605_v50, %v15307_v18 }
 0x481   :  { %v9609_v29 = vpop.f32.mrf.mxu1  ;;  %v15419_v39 = vpop.f32.mrf.mxu0 }
 0x482   :  { %v15422_v8 = vadd.f32 %v9609_v29, %v15310_v31 }
 0x483   :  { %v9611_v35 = vpop.f32.mrf.mxu1  ;;  %v15427_v30 = vpop.f32.mrf.mxu0 }
 0x484   :  { %v15425_v51 = vadd.f32 %v9611_v35, %v15313_v47 }
 0x485   :  { %v9613_v2 = vpop.f32.mrf.mxu1  ;;  %v15435_v17 = vpop.f32.mrf.mxu0 }
 0x486   :  { %v15430_v60 = vadd.f32 %v9613_v2, %v15316_v25 }
 0x487   :  { %v9615_v13 = vpop.f32.mrf.mxu1  ;;  %v15443_v63 = vpop.f32.mrf.mxu0 }
 0x488   :  { %v15433_v18 = vadd.f32 %v9615_v13, %v15319_v22 }
 0x489   :  { %v9619_v5 = vpop.f32.mrf.mxu1  ;;  %v15451_v37 = vpop.f32.mrf.mxu0 }
 0x48a   :  { %v15438_v31 = vadd.f32 %v9619_v5, %v15322_v0 }
 0x48b   :  { %v9621_v33 = vpop.f32.mrf.mxu1  ;;  %v15459_v57 = vpop.f32.mrf.mxu0 }
 0x48c   :  { %v15441_v47 = vadd.f32 %v9621_v33, %v15325_v38 }
 0x48d   :  { %v9623_v34 = vpop.f32.mrf.mxu1  ;;  %v9728_v50 = vpop.f32.mrf.mxu0 }
 0x48e   :  { %v15446_v25 = vadd.f32 %v9623_v34, %v15328_v49 }
 0x48f   :  { %v9625_v44 = vpop.f32.mrf.mxu1  ;;  %v9732_v2 = vpop.f32.mrf.mxu0 }
 0x490   :  { %v15449_v22 = vadd.f32 %v9625_v44, %v15331_v58 }
 0x491   :  { %v9629_v62 = vpop.f32.mrf.mxu1  ;;  %v9734_v33 = vpop.f32.mrf.mxu0 }
 0x492   :  { %v15454_v0 = vadd.f32 %v9629_v62, %v15334_v52 }
 0x493   :  { %v9631_v14 = vpop.f32.mrf.mxu1  ;;  %v9736_v62 = vpop.f32.mrf.mxu0 }
 0x494   :  { %v15457_v38 = vadd.f32 %v9631_v14, %v15337_v40 }
 0x495   :  { %v9633_v56 = vpop.f32.mrf.mxu1 }
 0x496   :  { %v15462_v49 = vadd.f32 %v9633_v56, %v15340_v9 }
 0x497   :  { %v9635_v61 = vpop.f32.mrf.mxu1 }
 0x498   :  { %16188 = vst [vmem:[#allocation68_spill] sm:$0xff] %v15462_v49  ;;  %v15465_v58 = vadd.f32 %v9635_v61, %v15343_v10  ;;  %v9738_v61 = vpop.f32.mrf.mxu0  ;;  %v9707_v49 = vadd.f32 %v15404_v42, %v15392_v21 }
 0x499   :  { %v9639_v20 = vpop.f32.mrf.mxu1 }
 0x49a   :  { %16189 = vst [vmem:[#allocation73_spill] sm:$0xff] %v15465_v58  ;;  %v15468_v29 = vadd.f32 %v9639_v20, %v15346_v53  ;;  %v9703_v58 = vadd.f32 %v15394_v1, %v15382_v26  ;;  %v9719_v26 = vadd.f32 %v15435_v17, %v15417_v36  ;;  %v9725_v1 = vadd.f32 %v15451_v37, %v15425_v51 }
 0x49b   :  { %v9641_v52 = vpop.f32.mrf.mxu1  ;;  %v9737_v36 = vadd.f32 %v9736_v62, %v15446_v25 }
 0x49c   :  { %16190 = vst [vmem:[#allocation69_spill] sm:$0xff] %v15468_v29  ;;  %v15471_v35 = vadd.f32 %v9641_v52, %v15349_v24  ;;  %v15512_v29 = vadd.f32 %v15389_v23, %v15377_v4  ;;  %v9723_v23 = vadd.f32 %v15443_v63, %v15422_v8 }
 0x49d   :  { %v9643_v40 = vpop.f32.mrf.mxu1 }
 0x49e   :  { %16191 = vst [vmem:[#allocation71_spill] sm:$0xff] %v15471_v35  ;;  %v15474_v13 = vadd.f32 %v9643_v40, %v15352_v41  ;;  %v15508_v35 = vadd.f32 %v15384_v28, %v15372_v7  ;;  %v9713_v7 = vadd.f32 %v15414_v46, %v15402_v48  ;;  %v9717_v28 = vadd.f32 %v15427_v30, %v15412_v16 }
 0x49f   :  { %v9645_v9 = vpop.f32.mrf.mxu1  ;;  %v16203_v63 = vld [vmem:[#allocation68_spill] sm:$0xff] }
 0x4a0   :  { %16192 = vst [vmem:[#allocation74_spill] sm:$0xff] %v15474_v13  ;;  %v15477_v5 = vadd.f32 %v9645_v9, %v15355_v43 }
 0x4a1   :  { %v9649_v10 = vpop.f32.mrf.mxu1  ;;  %v16204_v37 = vld [vmem:[#allocation73_spill] sm:$0xff] }
 0x4a2   :  { %16193 = vst [vmem:[#allocation76_spill] sm:$0xff] %v15477_v5  ;;  %v15480_v34 = vadd.f32 %v9649_v10, %v15358_v12 }
 0x4a3   :  { %v9651_v53 = vpop.f32.mrf.mxu1 }
 0x4a4   :  { %16194 = vst [vmem:[#allocation31_spill] sm:$0xff] %v15480_v34  ;;  %v15483_v44 = vadd.f32 %v9651_v53, %v15361_v27  ;;  %v9742_v27 = vpop.f32.mrf.mxu0 }
 0x4a5   :  { %v9653_v24 = vpop.f32.mrf.mxu1 }
 0x4a6   :  { %16195 = vst [vmem:[#allocation28_spill] sm:$0xff] %v15483_v44  ;;  %v15486_v14 = vadd.f32 %v9653_v24, %v15364_v15  ;;  %v9744_v10 = vpop.f32.mrf.mxu0 }
 0x4a7   :  { %v9655_v41 = vpop.f32.mrf.mxu1 }
 0x4a8   :  { %16196 = vst [vmem:[#allocation27_spill] sm:$0xff] %v15486_v14  ;;  %v15489_v56 = vadd.f32 %v9655_v41, %v15369_v54  ;;  %v9746_v24 = vpop.f32.mrf.mxu0 }
 0x4a9   :  { %v9659_v43 = vpop.f32.mrf.mxu1  ;;  %v9747_v25 = vadd.f32 %v9746_v24, %v16203_v63 }
 0x4aa   :  { %16197 = vst [vmem:[#allocation30_spill] sm:$0xff] %v15489_v56  ;;  %v15492_v20 = vadd.f32 %v9659_v43, %v15374_v55  ;;  %v9748_v41 = vpop.f32.mrf.mxu0 }
 0x4ab   :  { %v15494_v12 = vpop.f32.mrf.mxu1 }
 0x4ac   :  { %16198 = vst [vmem:[#allocation35_spill] sm:$0xff] %v15492_v20  ;;  %16199 = vst [vmem:[#allocation24_spill] sm:$0xff] %v15494_v12  ;;  %v9752_v34 = vpop.f32.mrf.mxu0 }
 0x4ad   :  { %v15496_v52 = vpop.f32.mrf.mxu1 }
 0x4ae   :  { %16200 = vst [vmem:[#allocation33_spill] sm:$0xff] %v15496_v52  ;;  %v9754_v20 = vpop.f32.mrf.mxu0 }
 0x4af   :  { %v15498_v40 = vpop.f32.mrf.mxu1 }
 0x4b0   :  { %16201 = vst [vmem:[#allocation32_spill] sm:$0xff] %v15498_v40  ;;  %v15500_v52 = vpop.f32.mrf.mxu0  ;;  %v15504_v40 = vadd.f32 %v15379_v19, %v15367_v59  ;;  %v9709_v59 = vadd.f32 %v15409_v3, %v15397_v32  ;;  %v9715_v19 = vadd.f32 %v15419_v39, %v15407_v11  ;;  %v9727_v32 = vadd.f32 %v15459_v57, %v15430_v60 }
 0x4b1   :  { %v9815_v9 = vpop.f32.mrf.mxu1  ;;  %16202 = vst [vmem:[#allocation34_spill] sm:$0xff] %v15500_v52  ;;  %v9705_v52 = vadd.f32 %v15399_v6, %v15387_v45  ;;  %v9729_v6 = vadd.f32 %v9728_v50, %v15433_v18  ;;  %v9733_v11 = vadd.f32 %v9732_v2, %v15438_v31  ;;  %v9735_v3 = vadd.f32 %v9734_v33, %v15441_v47 }
 0x4b2   :  { %v15532_v45 = vpop.f32.mrf.mxu0  ;;  %v15545_v16 = vadd.f32 %v9815_v9, %v9703_v58  ;;  %v9739_v39 = vadd.f32 %v9738_v61, %v15449_v22  ;;  %v9743_v60 = vadd.f32 %v9742_v27, %v15454_v0  ;;  %v15557_v18 = vadd.f32 %v9744_v10, %v15457_v38  ;;  %v16205_v58 = vld [vmem:[#allocation69_spill] sm:$0xff]  ;;  %v16206_v61 = vld [vmem:[#allocation71_spill] sm:$0xff] }
 0x4b3   :  { %v9817_v15 = vpop.f32.mrf.mxu1  ;;  %v15565_v22 = vadd.f32 %v9748_v41, %v16204_v37  ;;  %v15572_v38 = vadd.f32 %v9752_v34, %v16205_v58 }
 0x4b4   :  { %v15551_v8 = vadd.f32 %v9817_v15, %v9705_v52  ;;  %v9762_v17 = vpop.f32.mrf.mxu0  ;;  %v9938_v50 = vmul.f32 %v15545_v16, %v15545_v16  ;;  %v15589_v52 = vadd.f32 %v9754_v20, %v16206_v61 }
 0x4b5   :  { %v9819_v53 = vpop.f32.mrf.mxu1 }
 0x4b6   :  { %v15534_v21 = vadd.f32 %v9819_v53, %v9707_v49  ;;  %v9764_v27 = vpop.f32.mrf.mxu0 }
 0x4b7   :  { %v9821_v14 = vpop.f32.mrf.mxu1 }
 0x4b8   :  { %v15541_v48 = vadd.f32 %v9821_v14, %v9709_v59  ;;  %v9940_v31 = vmul.f32 %v15534_v21, %v15534_v21  ;;  %v9896_v62 = vadd.f32 %v15534_v21, %v15545_v16 }
 0x4b9   :  { %v9825_v54 = vpop.f32.mrf.mxu1 }
 0x4ba   :  { %v15547_v46 = vadd.f32 %v9825_v54, %v9713_v7  ;;  %v9941_v57 = vmul.f32 %v15541_v48, %v15541_v48  ;;  %v9970_v9 = vadd.f32 %v9940_v31, %v9938_v50  ;;  %v9917_v53 = vadd.f32 %v15541_v48, %v15551_v8 }
 0x4bb   :  { %v9827_v56 = vpop.f32.mrf.mxu1 }
 0x4bc   :  { %v15553_v51 = vadd.f32 %v9827_v56, %v9715_v19  ;;  %v9942_v2 = vmul.f32 %v15547_v46, %v15547_v46  ;;  %v9897_v54 = vadd.f32 %v9896_v62, %v15547_v46 }
 0x4bd   :  { %v9829_v44 = vpop.f32.mrf.mxu1 }
 0x4be   :  { %v15561_v47 = vadd.f32 %v9829_v44, %v9717_v28  ;;  %v9939_v44 = vmul.f32 %v15551_v8, %v15551_v8  ;;  %v9943_v14 = vmul.f32 %v15553_v51, %v15553_v51 }
 0x4bf   :  { %v9831_v55 = vpop.f32.mrf.mxu1 }
 0x4c0   :  { %v15569_v49 = vadd.f32 %v9831_v55, %v9719_v26  ;;  %v9944_v10 = vmul.f32 %v15561_v47, %v15561_v47  ;;  %v9991_v24 = vadd.f32 %v9941_v57, %v9939_v44  ;;  %v9971_v55 = vadd.f32 %v9970_v9, %v9942_v2 }
 0x4c1   :  { %v9835_v43 = vpop.f32.mrf.mxu1  ;;  %v9898_v19 = vadd.f32 %v9897_v54, %v15561_v47 }
 0x4c2   :  { %v15578_v33 = vadd.f32 %v9835_v43, %v9723_v23  ;;  %v9992_v7 = vadd.f32 %v9991_v24, %v9943_v14  ;;  %v9766_v23 = vpop.f32.mrf.mxu0 }
 0x4c3   :  { %v9837_v12 = vpop.f32.mrf.mxu1 }
 0x4c4   :  { %v15586_v56 = vadd.f32 %v9837_v12, %v9725_v1  ;;  %v9945_v12 = vmul.f32 %v15569_v49, %v15569_v49  ;;  %v9946_v20 = vmul.f32 %v15578_v33, %v15578_v33  ;;  %v9972_v1 = vadd.f32 %v9971_v55, %v9944_v10  ;;  %v9768_v9 = vpop.f32.mrf.mxu0 }
 0x4c5   :  { %v9839_v5 = vpop.f32.mrf.mxu1  ;;  %v9899_v57 = vadd.f32 %v9898_v19, %v15578_v33  ;;  %v16211_v19 = vld [vmem:[#allocation28_spill] sm:$0xff] }
 0x4c6   :  { %v15593_v15 = vadd.f32 %v9839_v5, %v9727_v32  ;;  %v9918_v5 = vadd.f32 %v9917_v53, %v15553_v51  ;;  %v9947_v28 = vmul.f32 %v15586_v56, %v15586_v56  ;;  %v9993_v37 = vadd.f32 %v9992_v7, %v9945_v12 }
 0x4c7   :  { %v9841_v13 = vpop.f32.mrf.mxu1  ;;  %v9973_v50 = vadd.f32 %v9972_v1, %v9946_v20 }
 0x4c8   :  { %v15602_v43 = vadd.f32 %v9841_v13, %v9729_v6  ;;  %v9948_v32 = vmul.f32 %v15593_v15, %v15593_v15  ;;  %v16208_v6 = vld [vmem:[#allocation34_spill] sm:$0xff]  ;;  %v9919_v63 = vadd.f32 %v9918_v5, %v15569_v49  ;;  %v9994_v62 = vadd.f32 %v9993_v37, %v9947_v28 }
 0x4c9   :  { %v9845_v4 = vpop.f32.mrf.mxu1  ;;  %v9900_v10 = vadd.f32 %v9899_v57, %v15593_v15  ;;  %v9765_v28 = vadd.f32 %v9764_v27, %v16211_v19  ;;  %v16212_v57 = vld [vmem:[#allocation27_spill] sm:$0xff] }
 0x4ca   :  { %v15604_v59 = vadd.f32 %v9845_v4, %v9733_v11  ;;  %v16207_v4 = vld [vmem:[#allocation74_spill] sm:$0xff]  ;;  %v9949_v2 = vmul.f32 %v15602_v43, %v15602_v43  ;;  %v9974_v53 = vadd.f32 %v9973_v50, %v9948_v32 }
 0x4cb   :  { %v9847_v42 = vpop.f32.mrf.mxu1  ;;  %v9757_v11 = vadd.f32 %v16208_v6, %v16207_v4 }
 0x4cc   :  { %v15612_v31 = vadd.f32 %v9847_v42, %v9735_v3  ;;  %v9950_v44 = vmul.f32 %v15604_v59, %v15604_v59  ;;  %v16209_v3 = vld [vmem:[#allocation76_spill] sm:$0xff]  ;;  %v9995_v55 = vadd.f32 %v9994_v62, %v9949_v2  ;;  %v9901_v20 = vadd.f32 %v9900_v10, %v15604_v59 }
 0x4cd   :  { %v9849_v30 = vpop.f32.mrf.mxu1 }
 0x4ce   :  { %v15614_v13 = vadd.f32 %v9849_v30, %v9737_v36  ;;  %v9759_v36 = vadd.f32 %v15532_v45, %v16209_v3  ;;  %v9920_v30 = vadd.f32 %v9919_v63, %v15586_v56  ;;  %v9951_v24 = vmul.f32 %v15612_v31, %v15612_v31 }
 0x4cf   :  { %v9851_v0 = vpop.f32.mrf.mxu1  ;;  %v9975_v5 = vadd.f32 %v9974_v53, %v9950_v44 }
 0x4d0   :  { %v15624_v42 = vadd.f32 %v9851_v0, %v9739_v39  ;;  %v9952_v39 = vmul.f32 %v15614_v13, %v15614_v13  ;;  %v16210_v0 = vld [vmem:[#allocation31_spill] sm:$0xff]  ;;  %v9921_v45 = vadd.f32 %v9920_v30, %v15602_v43  ;;  %v9996_v32 = vadd.f32 %v9995_v55, %v9951_v24 }
 0x4d1   :  { %v9855_v34 = vpop.f32.mrf.mxu1  ;;  %v9763_v54 = vadd.f32 %v9762_v17, %v16210_v0  ;;  %v9902_v4 = vadd.f32 %v9901_v20, %v15614_v13  ;;  %v16214_v20 = vld [vmem:[#allocation30_spill] sm:$0xff] }
 0x4d2   :  { %v15629_v14 = vadd.f32 %v9855_v34, %v9743_v60  ;;  %v9953_v7 = vmul.f32 %v15624_v42, %v15624_v42  ;;  %v9976_v6 = vadd.f32 %v9975_v5, %v9952_v39  ;;  %v9769_v5 = vadd.f32 %v9768_v9, %v16214_v20 }
 0x4d3   :  { %v9857_v41 = vpop.f32.mrf.mxu1 }
 0x4d4   :  { %v15639_v12 = vadd.f32 %v9857_v41, %v15557_v18  ;;  %v9954_v17 = vmul.f32 %v15629_v14, %v15629_v14  ;;  %v9772_v41 = vpop.f32.mrf.mxu0  ;;  %v9997_v2 = vadd.f32 %v9996_v32, %v9953_v7  ;;  %v9903_v44 = vadd.f32 %v9902_v4, %v15629_v14  ;;  %v16215_v4 = vld [vmem:[#allocation33_spill] sm:$0xff] }
 0x4d5   :  { %v9859_v26 = vpop.f32.mrf.mxu1 }
 0x4d6   :  { %v15641_v60 = vadd.f32 %v9859_v26, %v9747_v25  ;;  %v9922_v26 = vadd.f32 %v9921_v45, %v15612_v31  ;;  %v9955_v27 = vmul.f32 %v15639_v12, %v15639_v12  ;;  %v9977_v3 = vadd.f32 %v9976_v6, %v9954_v17  ;;  %v9774_v53 = vpop.f32.mrf.mxu0 }
 0x4d7   :  { %v9861_v58 = vpop.f32.mrf.mxu1  ;;  %v9664_v6 = vadd.f32 %v16215_v4, %v15508_v35 }
 0x4d8   :  { %v15650_v1 = vadd.f32 %v9861_v58, %v15565_v22  ;;  %v9956_v63 = vmul.f32 %v15641_v60, %v15641_v60  ;;  %v9767_v58 = vadd.f32 %v9766_v23, %v16212_v57  ;;  %v9923_v50 = vadd.f32 %v9922_v26, %v15624_v42 }
 0x4d9   :  { %v9865_v61 = vpop.f32.mrf.mxu1  ;;  %v9904_v24 = vadd.f32 %v9903_v44, %v15641_v60  ;;  %v9998_v0 = vadd.f32 %v9997_v2, %v9955_v27  ;;  %v9776_v27 = vpop.f32.mrf.mxu0 }
 0x4da   :  { %v15653_v18 = vadd.f32 %v9865_v61, %v15572_v38  ;;  %v9957_v30 = vmul.f32 %v15650_v1, %v15650_v1  ;;  %v9924_v23 = vadd.f32 %v9923_v50, %v15639_v12  ;;  %v9978_v45 = vadd.f32 %v9977_v3, %v9956_v63 }
 0x4db   :  { %v9867_v34 = vpop.f32.mrf.mxu1 }
 0x4dc   :  { %v15662_v22 = vadd.f32 %v9867_v34, %v15589_v52  ;;  %v9958_v62 = vmul.f32 %v15653_v18, %v15653_v18  ;;  %v9905_v7 = vadd.f32 %v9904_v24, %v15653_v18  ;;  %v9999_v17 = vadd.f32 %v9998_v0, %v9957_v30 }
 0x4dd   :  { %v9869_v25 = vpop.f32.mrf.mxu1 }
 0x4de   :  { %v15664_v37 = vadd.f32 %v9869_v25, %v9757_v11  ;;  %v16213_v11 = vld [vmem:[#allocation24_spill] sm:$0xff]  ;;  %v9959_v34 = vmul.f32 %v15662_v22, %v15662_v22 }
 0x4df   :  { %v9871_v38 = vpop.f32.mrf.mxu1  ;;  %v9662_v10 = vadd.f32 %v16213_v11, %v15504_v40  ;;  %v9925_v40 = vadd.f32 %v9924_v23, %v15650_v1 }
 0x4e0   :  { %v15673_v61 = vadd.f32 %v9871_v38, %v9759_v36  ;;  %v9960_v36 = vmul.f32 %v15664_v37, %v15664_v37  ;;  %v9906_v63 = vadd.f32 %v9905_v7, %v15664_v37  ;;  %v10000_v50 = vadd.f32 %v9999_v17, %v9959_v34 }
 0x4e1   :  { %v9875_v52 = vpop.f32.mrf.mxu1  ;;  %v9926_v9 = vadd.f32 %v9925_v40, %v15662_v22  ;;  %v9775_v11 = vadd.f32 %v9774_v53, %v9662_v10  ;;  %v9777_v40 = vadd.f32 %v9776_v27, %v9664_v6 }
 0x4e2   :  { %v15679_v39 = vadd.f32 %v9875_v52, %v9763_v54  ;;  %v9979_v54 = vadd.f32 %v9978_v45, %v9958_v62  ;;  %v9961_v25 = vmul.f32 %v15673_v61, %v15673_v61  ;;  %v9778_v45 = vpop.f32.mrf.mxu0 }
 0x4e3   :  { %v9877_v55 = vpop.f32.mrf.mxu1  ;;  %v9927_v30 = vadd.f32 %v9926_v9, %v15673_v61 }
 0x4e4   :  { %v15688_v19 = vadd.f32 %v9877_v55, %v9765_v28  ;;  %v9962_v26 = vmul.f32 %v15679_v39, %v15679_v39  ;;  %v16216_v28 = vld [vmem:[#allocation35_spill] sm:$0xff]  ;;  %v9980_v2 = vadd.f32 %v9979_v54, %v9960_v36  ;;  %v9907_v62 = vadd.f32 %v9906_v63, %v15679_v39 }
 0x4e5   :  { %v9879_v32 = vpop.f32.mrf.mxu1  ;;  %v9773_v57 = vadd.f32 %v9772_v41, %v16216_v28  ;;  %v10001_v41 = vadd.f32 %v10000_v50, %v9961_v25 }
 0x4e6   :  { %v15698_v38 = vadd.f32 %v9879_v32, %v9767_v58  ;;  %v9963_v44 = vmul.f32 %v15688_v19, %v15688_v19  ;;  %v16217_v58 = vld [vmem:[#allocation32_spill] sm:$0xff]  ;;  %v9981_v24 = vadd.f32 %v9980_v2, %v9962_v26  ;;  %v9928_v34 = vadd.f32 %v9927_v30, %v15688_v19 }
 0x4e7   :  { %v9881_v3 = vpop.f32.mrf.mxu1  ;;  %v9666_v23 = vadd.f32 %v16217_v58, %v15512_v29 }
 0x4e8   :  { %v9964_v35 = vmul.f32 %v15698_v38, %v15698_v38  ;;  %v15707_v52 = vadd.f32 %v9881_v3, %v9769_v5  ;;  %v9908_v36 = vadd.f32 %v9907_v62, %v15698_v38  ;;  %v10002_v5 = vadd.f32 %v10001_v41, %v9963_v44 }
 0x4e9   :  { %v9885_v0 = vpop.f32.mrf.mxu1  ;;  %v9779_v25 = vadd.f32 %v9778_v45, %v9666_v23 }
 0x4ea   :  { %v9965_v55 = vmul.f32 %v15707_v52, %v15707_v52  ;;  %v15715_v20 = vadd.f32 %v9885_v0, %v9773_v57  ;;  %v9982_v7 = vadd.f32 %v9981_v24, %v9964_v35  ;;  %v9929_v53 = vadd.f32 %v9928_v34, %v15707_v52 }
 0x4eb   :  { %v9887_v10 = vpop.f32.mrf.mxu1 }
 0x4ec   :  { %v9909_v29 = vadd.f32 %v9908_v36, %v15715_v20  ;;  %v9966_v17 = vmul.f32 %v15715_v20, %v15715_v20  ;;  %v15721_v54 = vadd.f32 %v9887_v10, %v9775_v11  ;;  %v10003_v26 = vadd.f32 %v10002_v5, %v9965_v55 }
 0x4ed   :  { %v9889_v32 = vpop.f32.mrf.mxu1 }
 0x4ee   :  { %v9983_v4 = vadd.f32 %v9982_v7, %v9966_v17  ;;  %v9930_v9 = vadd.f32 %v9929_v53, %v15721_v54  ;;  %v9967_v6 = vmul.f32 %v15721_v54, %v15721_v54  ;;  %v15726_v27 = vadd.f32 %v9889_v32, %v9777_v40 }
 0x4ef   :  { %v9891_v63 = vpop.f32.mrf.mxu1 }
 0x4f0   :  { %v10004_v28 = vadd.f32 %v10003_v26, %v9967_v6  ;;  %v9910_v57 = vadd.f32 %v9909_v29, %v15726_v27  ;;  %v9968_v50 = vmul.f32 %v15726_v27, %v15726_v27  ;;  %v15731_v2 = vadd.f32 %v9891_v63, %v9779_v25 }
 0x4f2   :  { %v9911_v44 = vrot.slane %v9910_v57, 4  ;;  %v9984_v3 = vadd.f32 %v9983_v4, %v9968_v50  ;;  %v9931_v30 = vadd.f32 %v9930_v9, %v15731_v2  ;;  %v9969_v62 = vmul.f32 %v15731_v2, %v15731_v2 }
 0x4f4   :  { %v9912_v35 = vadd.f32 %v9911_v44, %v9910_v57  ;;  %v9985_v11 = vrot.slane %v9984_v3, 4  ;;  %v9932_v58 = vrot.slane %v9931_v30, 4  ;;  %v10005_v23 = vadd.f32 %v10004_v28, %v9969_v62 }
 0x4f6   :  { %v9913_v41 = vrot.slane %v9912_v35, 2  ;;  %v9986_v24 = vadd.f32 %v9985_v11, %v9984_v3  ;;  %v9933_v0 = vadd.f32 %v9932_v58, %v9931_v30  ;;  %v10006_v45 = vrot.slane %v10005_v23, 4 }
 0x4f8   :  { %v9914_v34 = vadd.f32 %v9913_v41, %v9912_v35  ;;  %v9987_v36 = vrot.slane %v9986_v24, 2  ;;  %v9934_v55 = vrot.slane %v9933_v0, 2  ;;  %v10007_v40 = vadd.f32 %v10006_v45, %v10005_v23  ;;  %v9894_v45 = vld [vmem:[#allocation13] sm:$0x3] }
 0x4fa   :  { %v9915_v5 = vrot.slane %v9914_v34, 1  ;;  %v9988_v7 = vadd.f32 %v9987_v36, %v9986_v24  ;;  %v9935_v10 = vadd.f32 %v9934_v55, %v9933_v0  ;;  %v10008_v53 = vrot.slane %v10007_v40, 2  ;;  %v16218_v24 = vld [vmem:[#allocation22_spill] sm:$0xff] }
 0x4fb   :  { %v16219_v55 = vld [vmem:[#allocation26_spill] sm:$0xff] }
 0x4fc   :  { %v9916_v29 = vadd.f32 %v9915_v5, %v9914_v34  ;;  %v9989_v17 = vrot.slane %v9988_v7, 1  ;;  %v9936_v25 = vrot.slane %v9935_v10, 1  ;;  %v10009_v26 = vadd.f32 %v10008_v53, %v10007_v40  ;;  %v16220_v5 = vld [vmem:[#allocation23_spill] sm:$0xff] }
 0x4fe   :  { %v9990_v32 = vadd.f32 %v9989_v17, %v9988_v7  ;;  %v10012_v4 = vmul.f32 0.0078125, %v9916_v29  ;;  %v9937_v9 = vadd.f32 %v9936_v25, %v9935_v10  ;;  %v10010_v6 = vrot.slane %v10009_v26, 1 }
 0x500   :  { %v10014_v63 = vmul.f32 0.0078125, %v9990_v32  ;;  %v10016_v28 = vmul.f32 %v10012_v4, %v10012_v4  ;;  %v10011_v57 = vadd.f32 %v10010_v6, %v10009_v26  ;;  %v10013_v50 = vmul.f32 0.0078125, %v9937_v9 }
 0x502   :  { %v10018_v44 = vsub.f32 %v10014_v63, %v10016_v28  ;;  %v10015_v3 = vmul.f32 0.0078125, %v10011_v57  ;;  %v10017_v30 = vmul.f32 %v10013_v50, %v10013_v50  ;;  %v9895_v57 = vld [vmem:[#allocation15] sm:$0x3] }
 0x504   :  { %v10020_v62 = vadd.f32 1e-05, %v10018_v44  ;;  %v10019_v35 = vsub.f32 %v10015_v3, %v10017_v30 }
 0x506   :  { %v10021_v11 = vadd.f32 1e-05, %v10019_v35  ;;  %12404 = vrsqrt.f32 %v10020_v62 }
 0x508   :  { %12406 = vrsqrt.f32 %v10021_v11 }
 0x513   :  { %v12405_v58 = vpop.eup %12404 }
 0x515   :  { %v12407_v23 = vpop.eup %12406 }
 0x516   :  { %v10026_v41 = vcombine.low %v12405_v58, %v12407_v23 }
 0x518   :  { %v10033_v0 = vrot.slane %v10026_v41, %v16218_v24 }
 0x51a   :  { %v10040_v34 = vrot.slane %v10033_v0, %v16218_v24 }
 0x51c   :  { %v10042_v36 = vmul.f32 %v10040_v34, %v9894_v45 }
 0x51e   :  { %v10047_v40 = vrot.slane %v10042_v36, %v16219_v55  ;;  %v10051_v7 = vrot.slane %v10042_v36, %v16220_v5  ;;  %v10150_v36 = vld [vmem:[#allocation4] sm:$0xff] }
 0x520   :  { %v10054_v10 = vmul.f32 %v10047_v40, %v10012_v4  ;;  %v10055_v53 = vmul.f32 %v10051_v7, %v10013_v50  ;;  %v10075_v17 = vmul.f32 %v10047_v40, %v15545_v16  ;;  %v10076_v25 = vmul.f32 %v10051_v7, %v15551_v8 }
 0x521   :  { %v10077_v26 = vmul.f32 %v10047_v40, %v15534_v21  ;;  %v10078_v32 = vmul.f32 %v10051_v7, %v15541_v48  ;;  %v10079_v9 = vmul.f32 %v10047_v40, %v15547_v46  ;;  %v10080_v63 = vmul.f32 %v10051_v7, %v15553_v51 }
 0x522   :  { %v10058_v29 = vcombine.low %v10054_v10, %v10055_v53  ;;  %v10081_v28 = vmul.f32 %v10047_v40, %v15561_v47  ;;  %v10082_v4 = vmul.f32 %v10051_v7, %v15569_v49  ;;  %v10083_v50 = vmul.f32 %v10047_v40, %v15578_v33  ;;  %v10154_v53 = vld [vmem:[#allocation4 + $0x20] sm:$0xff] }
 0x523   :  { %v10084_v16 = vmul.f32 %v10051_v7, %v15586_v56  ;;  %v10085_v8 = vmul.f32 %v10047_v40, %v15593_v15  ;;  %v10086_v21 = vmul.f32 %v10051_v7, %v15602_v43  ;;  %v10087_v46 = vmul.f32 %v10047_v40, %v15604_v59 }
 0x524   :  { %v10065_v6 = vrot.slane %v10058_v29, %v16218_v24  ;;  %v10088_v44 = vmul.f32 %v10051_v7, %v15612_v31  ;;  %v10089_v51 = vmul.f32 %v10047_v40, %v15614_v13  ;;  %v10090_v47 = vmul.f32 %v10051_v7, %v15624_v42  ;;  %v10155_v29 = vld [vmem:[#allocation4 + $0x28] sm:$0xff] }
 0x525   :  { %v10091_v49 = vmul.f32 %v10047_v40, %v15629_v14  ;;  %v10092_v33 = vmul.f32 %v10051_v7, %v15639_v12  ;;  %v10101_v56 = vmul.f32 %v10047_v40, %v15698_v38  ;;  %v10102_v15 = vmul.f32 %v10051_v7, %v15707_v52 }
 0x526   :  { %v10072_v48 = vrot.slane %v10065_v6, %v16218_v24  ;;  %v10103_v43 = vmul.f32 %v10047_v40, %v15715_v20  ;;  %v10104_v30 = vmul.f32 %v10051_v7, %v15721_v54  ;;  %v10093_v59 = vmul.f32 %v10047_v40, %v15641_v60 }
 0x527   :  { %v10094_v31 = vmul.f32 %v10051_v7, %v15650_v1  ;;  %v10105_v13 = vmul.f32 %v10047_v40, %v15726_v27  ;;  %v10106_v42 = vmul.f32 %v10051_v7, %v15731_v2  ;;  %v10095_v14 = vmul.f32 %v10047_v40, %v15653_v18 }
 0x528   :  { %v10074_v3 = vsub.f32 %v9895_v57, %v10072_v48  ;;  %v10096_v12 = vmul.f32 %v10051_v7, %v15662_v22  ;;  %v10097_v20 = vmul.f32 %v10047_v40, %v15664_v37  ;;  %v10098_v54 = vmul.f32 %v10051_v7, %v15673_v61  ;;  %v10162_v48 = vld [vmem:[#allocation4 + $0x60] sm:$0xff] }
 0x529   :  { %v10099_v60 = vmul.f32 %v10047_v40, %v15679_v39  ;;  %v10100_v1 = vmul.f32 %v10051_v7, %v15688_v19  ;;  %v10151_v39 = vld [vmem:[#allocation4 + $0x8] sm:$0xff]  ;;  %v10153_v19 = vld [vmem:[#allocation4 + $0x18] sm:$0xff] }
 0x52a   :  { %v10111_v38 = vrot.slane %v10074_v3, %v16219_v55  ;;  %v10115_v52 = vrot.slane %v10074_v3, %v16220_v5  ;;  %v10152_v55 = vld [vmem:[#allocation4 + $0x10] sm:$0xff]  ;;  %v10165_v3 = vld [vmem:[#allocation4 + $0x78] sm:$0xff] }
 0x52c   :  { %v10118_v62 = vadd.f32 %v10111_v38, %v10075_v17  ;;  %v10119_v27 = vadd.f32 %v10115_v52, %v10076_v25  ;;  %v10120_v35 = vadd.f32 %v10111_v38, %v10077_v26  ;;  %v10121_v2 = vadd.f32 %v10115_v52, %v10078_v32  ;;  %v10156_v17 = vld [vmem:[#allocation4 + $0x30] sm:$0xff]  ;;  %v10157_v25 = vld [vmem:[#allocation4 + $0x38] sm:$0xff] }
 0x52d   :  { %v10122_v11 = vadd.f32 %v10111_v38, %v10079_v9  ;;  %v10123_v18 = vadd.f32 %v10115_v52, %v10080_v63  ;;  %v10124_v58 = vadd.f32 %v10111_v38, %v10081_v28  ;;  %v10125_v22 = vadd.f32 %v10115_v52, %v10082_v4  ;;  %v10158_v63 = vld [vmem:[#allocation4 + $0x40] sm:$0xff]  ;;  %v10159_v28 = vld [vmem:[#allocation4 + $0x48] sm:$0xff]  ;;  %v10160_v4 = vld [vmem:[#allocation4 + $0x50] sm:$0xff] }
 0x52e   :  { %v10126_v23 = vadd.f32 %v10111_v38, %v10083_v50  ;;  %v10127_v41 = vadd.f32 %v10115_v52, %v10084_v16  ;;  %v10128_v24 = vadd.f32 %v10111_v38, %v10085_v8  ;;  %v10129_v0 = vadd.f32 %v10115_v52, %v10086_v21  ;;  %v10161_v21 = vld [vmem:[#allocation4 + $0x58] sm:$0xff] }
 0x52f   :  { %v10130_v45 = vadd.f32 %v10111_v38, %v10087_v46  ;;  %v10131_v37 = vadd.f32 %v10115_v52, %v10088_v44  ;;  %v10132_v34 = vadd.f32 %v10111_v38, %v10089_v51  ;;  %v10133_v61 = vadd.f32 %v10115_v52, %v10090_v47  ;;  %v10163_v46 = vld [vmem:[#allocation4 + $0x68] sm:$0xff] }
 0x530   :  { %v10134_v40 = vadd.f32 %v10111_v38, %v10091_v49  ;;  %v10135_v5 = vadd.f32 %v10115_v52, %v10092_v33  ;;  %v10136_v7 = vadd.f32 %v10111_v38, %v10093_v59  ;;  %v10137_v10 = vadd.f32 %v10115_v52, %v10094_v31  ;;  %v10164_v33 = vld [vmem:[#allocation4 + $0x70] sm:$0xff]  ;;  %v10166_v59 = vld [vmem:[#allocation4 + $0x80] sm:$0xff]  ;;  %v10167_v31 = vld [vmem:[#allocation4 + $0x88] sm:$0xff] }
 0x531   :  { %v10138_v26 = vadd.f32 %v10111_v38, %v10095_v14  ;;  %v10139_v32 = vadd.f32 %v10115_v52, %v10096_v12  ;;  %v10140_v9 = vadd.f32 %v10111_v38, %v10097_v20  ;;  %v10141_v6 = vadd.f32 %v10115_v52, %v10098_v54  ;;  %v10168_v14 = vld [vmem:[#allocation4 + $0x90] sm:$0xff]  ;;  %v10169_v12 = vld [vmem:[#allocation4 + $0x98] sm:$0xff] }
 0x532   :  { %v10142_v57 = vadd.f32 %v10111_v38, %v10099_v60  ;;  %v10143_v50 = vadd.f32 %v10115_v52, %v10100_v1  ;;  %v10144_v16 = vadd.f32 %v10111_v38, %v10101_v56  ;;  %v10145_v8 = vadd.f32 %v10115_v52, %v10102_v15  ;;  %v10170_v56 = vld [vmem:[#allocation4 + $0xa0] sm:$0xff]  ;;  %v10171_v15 = vld [vmem:[#allocation4 + $0xa8] sm:$0xff] }
 0x533   :  { %v10146_v44 = vadd.f32 %v10111_v38, %v10103_v43  ;;  %v10147_v51 = vadd.f32 %v10115_v52, %v10104_v30  ;;  %v10148_v47 = vadd.f32 %v10111_v38, %v10105_v13  ;;  %v10149_v49 = vadd.f32 %v10115_v52, %v10106_v42  ;;  %v10172_v43 = vld [vmem:[#allocation4 + $0xb0] sm:$0xff]  ;;  %v10173_v52 = vld [vmem:[#allocation4 + $0xb8] sm:$0xff] }
 0x534   :  { %v10182_v20 = vadd.f32 %v10150_v36, %v10118_v62  ;;  %v10183_v54 = vadd.f32 %v10151_v39, %v10119_v27  ;;  %v10184_v60 = vadd.f32 %v10152_v55, %v10120_v35  ;;  %v10185_v1 = vadd.f32 %v10153_v19, %v10121_v2  ;;  %v10174_v36 = vld [vmem:[#allocation4 + $0xc0] sm:$0xff]  ;;  %v10175_v62 = vld [vmem:[#allocation4 + $0xc8] sm:$0xff]  ;;  %v10176_v2 = vld [vmem:[#allocation4 + $0xd0] sm:$0xff] }
 0x535   :  { %v10186_v30 = vadd.f32 %v10154_v53, %v10122_v11  ;;  %v10187_v13 = vadd.f32 %v10155_v29, %v10123_v18  ;;  %v10188_v38 = vadd.f32 %v10156_v17, %v10124_v58  ;;  %v10189_v42 = vadd.f32 %v10157_v25, %v10125_v22  ;;  %v10177_v19 = vld [vmem:[#allocation4 + $0xd8] sm:$0xff]  ;;  %v10178_v11 = vld [vmem:[#allocation4 + $0xe0] sm:$0xff]  ;;  %v10179_v58 = vld [vmem:[#allocation4 + $0xe8] sm:$0xff] }
 0x536   :  { %v10190_v27 = vadd.f32 %v10158_v63, %v10126_v23  ;;  %v10191_v39 = vadd.f32 %v10159_v28, %v10127_v41  ;;  %v10192_v35 = vadd.f32 %v10160_v4, %v10128_v24  ;;  %v10193_v55 = vadd.f32 %v10161_v21, %v10129_v0  ;;  %v10180_v22 = vld [vmem:[#allocation4 + $0xf0] sm:$0xff]  ;;  %v10181_v25 = vld [vmem:[#allocation4 + $0xf8] sm:$0xff] }
 0x537   :  { %v10194_v53 = vadd.f32 %v10162_v48, %v10130_v45  ;;  %v10195_v18 = vadd.f32 %v10163_v46, %v10131_v37  ;;  %v10196_v29 = vadd.f32 %v10164_v33, %v10132_v34  ;;  %v10197_v17 = vadd.f32 %v10165_v3, %v10133_v61 }
 0x538   :  { %v10198_v23 = vadd.f32 %v10166_v59, %v10134_v40  ;;  %v10199_v63 = vadd.f32 %v10167_v31, %v10135_v5  ;;  %v10200_v28 = vadd.f32 %v10168_v14, %v10136_v7  ;;  %v10201_v41 = vadd.f32 %v10169_v12, %v10137_v10 }
 0x539   :  { %v15776_v4 = vadd.f32 %v10170_v56, %v10138_v26  ;;  %v15778_v24 = vadd.f32 %v10171_v15, %v10139_v32  ;;  %v15780_v0 = vadd.f32 %v10172_v43, %v10140_v9  ;;  %v15782_v21 = vadd.f32 %v10173_v52, %v10141_v6 }
 0x53a   :  { %v15784_v45 = vadd.f32 %v10174_v36, %v10142_v57  ;;  %v15786_v37 = vadd.f32 %v10175_v62, %v10143_v50  ;;  %v15788_v34 = vadd.f32 %v10176_v2, %v10144_v16  ;;  %v15790_v61 = vadd.f32 %v10177_v19, %v10145_v8 }
 0x53b   :  { %v15792_v40 = vadd.f32 %v10178_v11, %v10146_v44  ;;  %v15794_v5 = vadd.f32 %v10179_v58, %v10147_v51  ;;  %v15796_v7 = vadd.f32 %v10180_v22, %v10148_v47  ;;  %v15798_v10 = vadd.f32 %v10181_v25, %v10149_v49 }
 0x53c   :  { %v10214_v26 = vmax.f32 %v10182_v20, 0.0  ;;  %v10215_v32 = vmax.f32 %v10183_v54, 0.0  ;;  %v10216_v9 = vmax.f32 %v10184_v60, 0.0  ;;  %v10217_v6 = vmax.f32 %v10185_v1, 0.0 }
 0x53d   :  { %v10218_v57 = vmax.f32 %v10186_v30, 0.0  ;;  %v10219_v48 = vmax.f32 %v10187_v13, 0.0  ;;  %v10220_v50 = vmax.f32 %v10188_v38, 0.0  ;;  %v10221_v46 = vmax.f32 %v10189_v42, 0.0 }
 0x53e   :  { %v10222_v16 = vmax.f32 %v10190_v27, 0.0  ;;  %v10223_v33 = vmax.f32 %v10191_v39, 0.0  ;;  %v10224_v8 = vmax.f32 %v10192_v35, 0.0  ;;  %v10225_v3 = vmax.f32 %v10193_v55, 0.0  ;;  %10246 = vst [vmem:[#allocation16] sm:$0xff] %v10214_v26  ;;  %10247 = vst [vmem:[#allocation16 + $0x8] sm:$0xff] %v10215_v32 }
 0x53f   :  { %10248 = vst [vmem:[#allocation16 + $0x10] sm:$0xff] %v10216_v9  ;;  %10249 = vst [vmem:[#allocation16 + $0x18] sm:$0xff] %v10217_v6  ;;  %v10226_v44 = vmax.f32 %v10194_v53, 0.0  ;;  %v10227_v51 = vmax.f32 %v10195_v18, 0.0  ;;  %v10228_v47 = vmax.f32 %v10196_v29, 0.0  ;;  %v10229_v49 = vmax.f32 %v10197_v17, 0.0 }
 0x540   :  { %10250 = vst [vmem:[#allocation16 + $0x20] sm:$0xff] %v10218_v57  ;;  %10251 = vst [vmem:[#allocation16 + $0x28] sm:$0xff] %v10219_v48  ;;  %v10230_v59 = vmax.f32 %v10198_v23, 0.0  ;;  %v10231_v31 = vmax.f32 %v10199_v63, 0.0  ;;  %v10232_v14 = vmax.f32 %v10200_v28, 0.0  ;;  %v10233_v12 = vmax.f32 %v10201_v41, 0.0 }
 0x541   :  { %10252 = vst [vmem:[#allocation16 + $0x30] sm:$0xff] %v10220_v50  ;;  %10253 = vst [vmem:[#allocation16 + $0x38] sm:$0xff] %v10221_v46  ;;  %v10234_v20 = vmax.f32 %v15776_v4, 0.0  ;;  %v10235_v54 = vmax.f32 %v15778_v24, 0.0  ;;  %v10236_v60 = vmax.f32 %v15780_v0, 0.0  ;;  %v10237_v1 = vmax.f32 %v15782_v21, 0.0 }
 0x542   :  { %10254 = vst [vmem:[#allocation16 + $0x40] sm:$0xff] %v10222_v16  ;;  %10255 = vst [vmem:[#allocation16 + $0x48] sm:$0xff] %v10223_v33  ;;  %v10238_v56 = vmax.f32 %v15784_v45, 0.0  ;;  %v10239_v15 = vmax.f32 %v15786_v37, 0.0  ;;  %v10240_v43 = vmax.f32 %v15788_v34, 0.0  ;;  %v10241_v30 = vmax.f32 %v15790_v61, 0.0 }
 0x543   :  { %10256 = vst [vmem:[#allocation16 + $0x50] sm:$0xff] %v10224_v8  ;;  %10257 = vst [vmem:[#allocation16 + $0x58] sm:$0xff] %v10225_v3  ;;  %v10242_v13 = vmax.f32 %v15792_v40, 0.0  ;;  %v10243_v38 = vmax.f32 %v15794_v5, 0.0  ;;  %v10244_v42 = vmax.f32 %v15796_v7, 0.0  ;;  %v10245_v52 = vmax.f32 %v15798_v10, 0.0 }
 0x544   :  { %10258 = vst [vmem:[#allocation16 + $0x60] sm:$0xff] %v10226_v44  ;;  %10259 = vst [vmem:[#allocation16 + $0x68] sm:$0xff] %v10227_v51 }
 0x545   :  { %10260 = vst [vmem:[#allocation16 + $0x70] sm:$0xff] %v10228_v47  ;;  %10261 = vst [vmem:[#allocation16 + $0x78] sm:$0xff] %v10229_v49 }
 0x546   :  { %10262 = vst [vmem:[#allocation16 + $0x80] sm:$0xff] %v10230_v59  ;;  %10263 = vst [vmem:[#allocation16 + $0x88] sm:$0xff] %v10231_v31 }
 0x547   :  { %10264 = vst [vmem:[#allocation16 + $0x90] sm:$0xff] %v10232_v14  ;;  %10265 = vst [vmem:[#allocation16 + $0x98] sm:$0xff] %v10233_v12 }
 0x548   :  { %10266 = vst [vmem:[#allocation16 + $0xa0] sm:$0xff] %v10234_v20  ;;  %10267 = vst [vmem:[#allocation16 + $0xa8] sm:$0xff] %v10235_v54 }
 0x549   :  { %10268 = vst [vmem:[#allocation16 + $0xb0] sm:$0xff] %v10236_v60  ;;  %10269 = vst [vmem:[#allocation16 + $0xb8] sm:$0xff] %v10237_v1 }
 0x54a   :  { %10270 = vst [vmem:[#allocation16 + $0xc0] sm:$0xff] %v10238_v56  ;;  %10271 = vst [vmem:[#allocation16 + $0xc8] sm:$0xff] %v10239_v15 }
 0x54b   :  { %10272 = vst [vmem:[#allocation16 + $0xd0] sm:$0xff] %v10240_v43  ;;  %10273 = vst [vmem:[#allocation16 + $0xd8] sm:$0xff] %v10241_v30 }
 0x54c   :  { %10274 = vst [vmem:[#allocation16 + $0xe0] sm:$0xff] %v10242_v13  ;;  %10275 = vst [vmem:[#allocation16 + $0xe8] sm:$0xff] %v10243_v38 }
 0x54d   :  { %10276 = vst [vmem:[#allocation16 + $0xf0] sm:$0xff] %v10244_v42  ;;  %10277 = vst [vmem:[#allocation16 + $0xf8] sm:$0xff] %v10245_v52 }
 0x54e   :  { %12559 = shalt.err (!%p12556_p11)
}
 0x54f   :  { %10289 = dma.vmem_to_hbm [thread:$0]  %s10284_s3, 4096, %s15826_s8, [#allocation6], %s12584_s4, %s12584_s4, %s12585_s24  }
 0x550   :  { %12576 = dma.done.wait [#allocation6], 4096  }
 0x551   :  { %12577 = vsyncadd [#allocation6], 4294963200 }
 0x552   :  { %10293 = vsyncpa [#allocation5], 1 }
 0x553   :  { %10294 = vsyncpa [#allocation8], 1 }
 0x554   :  { %10295 = vsyncpa [#allocation11], 1 }
 0x555   :  { %10296 = vsyncpa [#allocation14], 1 }
 0x556   :  { %10297 = vsyncpa [#allocation6], 1 }

</bundles_post_ra>
